<compile_context>
chip_gen: v6e
topology: v6e:2x2x1
jax: 0.10.0
libtpu: 0.0.40
codegen_flags: <defaults>
</compile_context>

<pallas_src>
import functools

import jax
import jax.numpy as jnp
from jax.experimental import pallas as pl
from jax.experimental.pallas import tpu as pltpu

EPS = 1e-5
LANE = 128


def _round_up(n, m):
    return ((n + m - 1) // m) * m


def _pad_lane(a, axis, size):
    pad = size - a.shape[axis]
    if pad == 0:
        return a
    widths = [(0, 0)] * a.ndim
    widths[axis] = (0, pad)
    return jnp.pad(a, widths)


def _tpu_vmem_capacity():
    try:
        return int(pltpu.get_tpu_info().vmem_capacity_bytes)
    except Exception:
        return 128 * 1024 * 1024


def _pick_row_tile(rows, max_tile):
    # TODO(synk): for awkward R (no divisor >= 64) pad rows to a multiple of
    # 512 (zero rows are stat-neutral) instead of falling down this cliff.
    for t in (1024, 512, 256, 128, 64, 32, 16, 8):
        if t <= max_tile and rows % t == 0:
            return t
    return rows


def _bn_affine(stats, gamma, beta, count):
    """stats (2, C) = [sum; sumsq] -> per-channel (scale, shift), each (1, C) f32.

    Note: E[x^2]-E[x]^2 in f32; fine at these counts.  For very large N*H*W a
    Welford-style combination of per-tile partials would be tighter.
    """
    mean = stats[0] / count
    var = jnp.maximum(stats[1] / count - mean * mean, 0.0)
    inv = jax.lax.rsqrt(var + EPS)
    scale = gamma * inv
    shift = beta - mean * scale
    return (scale.reshape(1, -1).astype(jnp.float32),
            shift.reshape(1, -1).astype(jnp.float32))


# ---------------- pass 1: conv1 (1x1) + bn1 statistics -----------------------
def _conv1x1_stats_kernel(x_ref, w_ref, y_ref, st_ref):
    @pl.when(pl.program_id(0) == 0)
    def _():
        st_ref[...] = jnp.zeros_like(st_ref)

    y = jnp.dot(x_ref[...], w_ref[...], preferred_element_type=jnp.float32)
    y_ref[...] = y.astype(y_ref.dtype)            # bf16 intermediate to HBM
    st_ref[...] += jnp.concatenate(
        [jnp.sum(y, axis=0, keepdims=True),
         jnp.sum(y * y, axis=0, keepdims=True)], axis=0)


# --------- pass 2: bn1+relu, conv2 (3x3, per-row tap groups) + bn2 stats -----
def _bn_relu_conv3x3_stats_kernel(H, W, y1_ref, s_ref, t_ref, w2_ref,
                                  y2_ref, st_ref, pad_ref):
    Cp = y1_ref.shape[-1]

    @pl.when(pl.program_id(0) == 0)
    def _():
        st_ref[...] = jnp.zeros_like(st_ref)
        # Zero the padded buffer once; the halo (and the sublane-alignment
        # columns) stay zero across grid steps, only the interior is rewritten.
        pad_ref[...] = jnp.zeros_like(pad_ref)

    z = jnp.maximum(
        y1_ref[0].astype(jnp.float32) * s_ref[...].reshape(1, 1, Cp)
        + t_ref[...].reshape(1, 1, Cp), 0.0)                  # (H, W, Cp) f32
    pad_ref[1:H + 1, 1:W + 1, :] = z

    # conv2 as three K=3*Cp matmuls (one per kernel row) accumulated in f32;
    # avoids materializing the full (H*W, 9*Cp) im2col patch.
    y2 = jnp.zeros((H * W, Cp), jnp.float32)
    for dy in range(3):
        patch = jnp.concatenate(
            [pad_ref[dy:dy + H, dx:dx + W, :].reshape(H * W, Cp)
             for dx in range(3)], axis=-1).astype(jnp.bfloat16)
        y2 = y2 + jnp.dot(patch, w2_ref[dy * 3 * Cp:(dy + 1) * 3 * Cp, :],
                          preferred_element_type=jnp.float32)

    y2_ref[...] = y2.astype(y2_ref.dtype).reshape(1, H, W, Cp)
    st_ref[...] += jnp.concatenate(
        [jnp.sum(y2, axis=0, keepdims=True),
         jnp.sum(y2 * y2, axis=0, keepdims=True)], axis=0)


# ------------ pass 3: bn2 + relu, conv3 (1x1) + bn3 statistics ---------------
def _bn_relu_conv1x1_stats_kernel(y2_ref, s_ref, t_ref, w_ref, y3_ref, st_ref):
    @pl.when(pl.program_id(0) == 0)
    def _():
        st_ref[...] = jnp.zeros_like(st_ref)

    z = jnp.maximum(y2_ref[...].astype(jnp.float32) * s_ref[...] + t_ref[...],
                    0.0)
    y = jnp.dot(z.astype(jnp.bfloat16), w_ref[...],
                preferred_element_type=jnp.float32)           # (rt, Cout)
    y3_ref[...] = y.astype(y3_ref.dtype)
    st_ref[...] += jnp.concatenate(
        [jnp.sum(y, axis=0, keepdims=True),
         jnp.sum(y * y, axis=0, keepdims=True)], axis=0)


# ------------- pass 4: bn3, identity residual, final relu --------------------
def _bn_residual_relu_kernel(y3_ref, s_ref, t_ref, x_ref, out_ref):
    y = y3_ref[...].astype(jnp.float32) * s_ref[...] + t_ref[...]
    out_ref[...] = jnp.maximum(y + x_ref[...].astype(jnp.float32), 0.0)


def bottleneck_forward(x_nchw, params):
    """x_nchw: [N, Cin, H, W] (PyTorch layout). Returns [N, Cout, H, W]."""
    w1, w2, w3, g1, b1, g2, b2, g3, b3 = params
    N, Cin, H, W = x_nchw.shape
    P = w1.shape[1]
    Cout = w3.shape[1]
    assert Cin == Cout, "identity shortcut requires inplanes == planes*4"
    R = N * H * W
    assert R % 8 == 0

    P_p = _round_up(P, LANE)
    vmem_cap = _tpu_vmem_capacity()
    vmem_limit = min((vmem_cap * 3) // 4, 100 * 1024 * 1024)
    rt = _pick_row_tile(R, 512 if vmem_cap <= 64 * 1024 * 1024 else 1024)
    count = float(R)

    # TODO(synk): in a full model keep activations NHWC end-to-end so this
    # boundary transpose (and the final one) disappears from the hot path.
    x2d = jnp.transpose(x_nchw, (0, 2, 3, 1)).reshape(R, Cin).astype(jnp.bfloat16)

    # Weights: 1x1 convs as channel matrices (only the output / contraction
    # dim that feeds the lane-padded y1/y2 is padded); 3x3 conv as a
    # dy-major (9*P_p, P_p) matrix for the per-row tap-group matmuls.
    w1p = _pad_lane(jnp.asarray(w1, jnp.float32), 1, P_p).astype(jnp.bfloat16)
    w2p = _pad_lane(_pad_lane(jnp.asarray(w2, jnp.float32), 2, P_p), 3, P_p)
    w2p = w2p.reshape(9 * P_p, P_p).astype(jnp.bfloat16)
    w3p = _pad_lane(jnp.asarray(w3, jnp.float32), 0, P_p).astype(jnp.bfloat16)

    g1p = _pad_lane(jnp.asarray(g1, jnp.float32), 0, P_p)
    b1p = _pad_lane(jnp.asarray(b1, jnp.float32), 0, P_p)
    g2p = _pad_lane(jnp.asarray(g2, jnp.float32), 0, P_p)
    b2p = _pad_lane(jnp.asarray(b2, jnp.float32), 0, P_p)
    g3f = jnp.asarray(g3, jnp.float32)
    b3f = jnp.asarray(b3, jnp.float32)

    cp_acc = pltpu.CompilerParams(dimension_semantics=("arbitrary",),
                                  vmem_limit_bytes=vmem_limit)
    cp_par = pltpu.CompilerParams(dimension_semantics=("parallel",),
                                  vmem_limit_bytes=vmem_limit)

    # ---- pass 1: conv1 (1x1) + bn1 stats ----
    y1, st1 = pl.pallas_call(
        _conv1x1_stats_kernel,
        grid=(R // rt,),
        in_specs=[pl.BlockSpec((rt, Cin), lambda i: (i, 0)),
                  pl.BlockSpec((Cin, P_p), lambda i: (0, 0))],
        out_specs=[pl.BlockSpec((rt, P_p), lambda i: (i, 0)),
                   pl.BlockSpec((2, P_p), lambda i: (0, 0))],
        out_shape=[jax.ShapeDtypeStruct((R, P_p), jnp.bfloat16),
                   jax.ShapeDtypeStruct((2, P_p), jnp.float32)],
        compiler_params=cp_acc,
    )(x2d, w1p)
    s1, t1 = _bn_affine(st1, g1p, b1p, count)

    # ---- pass 2: bn1+relu, conv2 (3x3) + bn2 stats (tiled per image) ----
    Wp2 = _round_up(W + 2, 8)
    y1_4d = y1.reshape(N, H, W, P_p)
    kern2 = functools.partial(_bn_relu_conv3x3_stats_kernel, H, W)
    y2, st2 = pl.pallas_call(
        kern2,
        grid=(N,),
        in_specs=[pl.BlockSpec((1, H, W, P_p), lambda n: (n, 0, 0, 0)),
                  pl.BlockSpec((1, P_p), lambda n: (0, 0)),
                  pl.BlockSpec((1, P_p), lambda n: (0, 0)),
                  pl.BlockSpec((9 * P_p, P_p), lambda n: (0, 0))],
        out_specs=[pl.BlockSpec((1, H, W, P_p), lambda n: (n, 0, 0, 0)),
                   pl.BlockSpec((2, P_p), lambda n: (0, 0))],
        out_shape=[jax.ShapeDtypeStruct((N, H, W, P_p), jnp.bfloat16),
                   jax.ShapeDtypeStruct((2, P_p), jnp.float32)],
        scratch_shapes=[pltpu.VMEM((H + 2, Wp2, P_p), jnp.float32)],
        compiler_params=cp_acc,
    )(y1_4d, s1, t1, w2p)
    s2, t2 = _bn_affine(st2, g2p, b2p, count)

    # ---- pass 3: bn2+relu, conv3 (1x1) + bn3 stats ----
    y2_2d = y2.reshape(R, P_p)
    y3, st3 = pl.pallas_call(
        _bn_relu_conv1x1_stats_kernel,
        grid=(R // rt,),
        in_specs=[pl.BlockSpec((rt, P_p), lambda i: (i, 0)),
                  pl.BlockSpec((1, P_p), lambda i: (0, 0)),
                  pl.BlockSpec((1, P_p), lambda i: (0, 0)),
                  pl.BlockSpec((P_p, Cout), lambda i: (0, 0))],
        out_specs=[pl.BlockSpec((rt, Cout), lambda i: (i, 0)),
                   pl.BlockSpec((2, Cout), lambda i: (0, 0))],
        out_shape=[jax.ShapeDtypeStruct((R, Cout), jnp.bfloat16),
                   jax.ShapeDtypeStruct((2, Cout), jnp.float32)],
        compiler_params=cp_acc,
    )(y2_2d, s2, t2, w3p)
    s3, t3 = _bn_affine(st3, g3f, b3f, count)

    # ---- pass 4: bn3 + identity residual + relu (no accumulator -> parallel) ----
    out2d = pl.pallas_call(
        _bn_residual_relu_kernel,
        grid=(R // rt,),
        in_specs=[pl.BlockSpec((rt, Cout), lambda i: (i, 0)),
                  pl.BlockSpec((1, Cout), lambda i: (0, 0)),
                  pl.BlockSpec((1, Cout), lambda i: (0, 0)),
                  pl.BlockSpec((rt, Cout), lambda i: (i, 0))],
        out_specs=pl.BlockSpec((rt, Cout), lambda i: (i, 0)),
        out_shape=jax.ShapeDtypeStruct((R, Cout), jnp.float32),
        compiler_params=cp_par,
    )(y3, s3, t3, x2d)

    out = out2d.reshape(N, H, W, Cout)
    return jnp.transpose(out, (0, 3, 1, 2))


def ref_forward(x_nchw, params):
    """Pure-JAX f32 reference (lax.conv) with identical BN semantics."""
    w1, w2, w3, g1, b1, g2, b2, g3, b3 = params
    x = jnp.transpose(x_nchw, (0, 2, 3, 1)).astype(jnp.float32)  # NHWC

    def conv(h, w, pad):
        return jax.lax.conv_general_dilated(
            h, w, window_strides=(1, 1), padding=pad,
            dimension_numbers=("NHWC", "HWIO", "NHWC"))

    def bn(y, g, b):
        mu = jnp.mean(y, axis=(0, 1, 2), keepdims=True)
        var = jnp.mean((y - mu) ** 2, axis=(0, 1, 2), keepdims=True)
        return (y - mu) * jax.lax.rsqrt(var + EPS) * g + b

    h = jax.nn.relu(bn(conv(x, w1[None, None], "VALID"), g1, b1))
    h = jax.nn.relu(bn(conv(h, w2, "SAME"), g2, b2))
    h = bn(conv(h, w3[None, None], "VALID"), g3, b3)
    out = jax.nn.relu(h + x)
    return jnp.transpose(out, (0, 3, 1, 2))


if __name__ == "__main__":
    # Shapes consistent with Bottleneck(inplanes=32, planes=8, stride=1,
    # downsample=None): Cout = planes * 4 = 32 == Cin.
    N, Cin, H, W = 4, 32, 16, 16
    planes = 8
    Cout = planes * 4

    key = jax.random.PRNGKey(0)
    ks = jax.random.split(key, 10)
    w1 = 0.1 * jax.random.normal(ks[0], (Cin, planes), jnp.float32)
    w2 = 0.1 * jax.random.normal(ks[1], (3, 3, planes, planes), jnp.float32)  # HWIO
    w3 = 0.1 * jax.random.normal(ks[2], (planes, Cout), jnp.float32)
    g1 = 1.0 + 0.1 * jax.random.normal(ks[3], (planes,), jnp.float32)
    b1 = 0.1 * jax.random.normal(ks[4], (planes,), jnp.float32)
    g2 = 1.0 + 0.1 * jax.random.normal(ks[5], (planes,), jnp.float32)
    b2 = 0.1 * jax.random.normal(ks[6], (planes,), jnp.float32)
    g3 = 1.0 + 0.1 * jax.random.normal(ks[7], (Cout,), jnp.float32)
    b3 = 0.1 * jax.random.normal(ks[8], (Cout,), jnp.float32)
    x = jax.random.normal(ks[9], (N, Cin, H, W), jnp.float32)
    params = (w1, w2, w3, g1, b1, g2, b2, g3, b3)

    out = jax.jit(bottleneck_forward)(x, params)
    jax.block_until_ready(out)

    ref = ref_forward(x, params)
    assert out.shape == (N, Cout, H, W)
    diff = out - ref
    max_err = float(jnp.max(jnp.abs(diff)))
    rel_err = float(jnp.linalg.norm(diff) / (jnp.linalg.norm(ref) + 1e-12))
    # bf16 MXU operands and bf16 inter-pass intermediates (f32 accumulation
    # and f32 BN math) -> tolerance looser than pure f32.
    assert rel_err < 3e-2 and max_err < 2.5e-1, (
        f"mismatch vs reference: rel={rel_err}, max={max_err}")
    print("KERNEL_OK")
</pallas_src>

<mosaic_0001>
module attributes {stable_mosaic.version = 11 : i64} {
  func.func @_conv1x1_stats_kernel(%arg0: i32, %arg1: memref<1024x32xbf16, #tpu.memory_space<vmem>>, %arg2: memref<32x128xbf16, #tpu.memory_space<vmem>>, %arg3: memref<1024x128xbf16, #tpu.memory_space<vmem>>, %arg4: memref<2x128xf32, #tpu.memory_space<vmem>>) attributes {dimension_semantics = [#tpu.dimension_semantics<arbitrary>], iteration_bounds = array<i64: 1>, scalar_prefetch = 0 : i64, scratch_operands = 0 : i64, tpu.core_type = #tpu.core_type<tc>, window_params = [{transform_indices = @transform_0, window_bounds = array<i64: 1024, 32>}, {pipeline_mode = #tpu.pipeline_mode<synchronous>, transform_indices = @transform_1, window_bounds = array<i64: 32, 128>}, {transform_indices = @transform_2, window_bounds = array<i64: 1024, 128>}, {pipeline_mode = #tpu.pipeline_mode<synchronous>, transform_indices = @transform_3, window_bounds = array<i64: 2, 128>}]} {
    %c0_i32 = arith.constant 0 : i32
    %0 = arith.cmpi eq, %arg0, %c0_i32 : i32
    %1 = arith.extui %0 : i1 to i32
    %c0_i32_0 = arith.constant 0 : i32
    %2 = arith.cmpi ne, %1, %c0_i32_0 : i32
    scf.if %2 {
      %cst_12 = arith.constant 0.000000e+00 : f32
      %17 = vector.broadcast %cst_12 : f32 to vector<2x128xf32>
      %c0_13 = arith.constant 0 : index
      %c0_14 = arith.constant 0 : index
      %18 = vector.load %arg4[%c0_13, %c0_14] : memref<2x128xf32, #tpu.memory_space<vmem>>, vector<2x128xf32>
      tpu.vector_store %arg4[%c0_13, %c0_14], %17 {strides = array<i32>} : memref<2x128xf32, #tpu.memory_space<vmem>>, vector<2x128xf32>,
    } else {
    }
    %c0 = arith.constant 0 : index
    %c0_1 = arith.constant 0 : index
    %3 = vector.load %arg1[%c0, %c0_1] : memref<1024x32xbf16, #tpu.memory_space<vmem>>, vector<1024x32xbf16>
    %c0_2 = arith.constant 0 : index
    %c0_3 = arith.constant 0 : index
    %4 = vector.load %arg2[%c0_2, %c0_3] : memref<32x128xbf16, #tpu.memory_space<vmem>>, vector<32x128xbf16>
    %cst = arith.constant dense<0.000000e+00> : vector<1024x128xf32>
    %5 = tpu.matmul %3, %4, %cst {dimension_numbers = #tpu.dot_dimension_numbers<[1], [0], [0], [1], [0, 0, 1, 1], [], []>} : vector<1024x32xbf16>, vector<32x128xbf16>, vector<1024x128xf32> -> vector<1024x128xf32>
    %6 = arith.truncf %5 : vector<1024x128xf32> to vector<1024x128xbf16>
    %c0_4 = arith.constant 0 : index
    %c0_5 = arith.constant 0 : index
    %7 = vector.load %arg3[%c0_4, %c0_5] : memref<1024x128xbf16, #tpu.memory_space<vmem>>, vector<1024x128xbf16>
    tpu.vector_store %arg3[%c0_4, %c0_5], %6 {strides = array<i32>} : memref<1024x128xbf16, #tpu.memory_space<vmem>>, vector<1024x128xbf16>,
    %c0_6 = arith.constant 0 : index
    %c0_7 = arith.constant 0 : index
    %8 = vector.load %arg4[%c0_6, %c0_7] : memref<2x128xf32, #tpu.memory_space<vmem>>, vector<2x128xf32>
    %cst_8 = arith.constant dense<0.000000e+00> : vector<128xf32>
    %9 = vector.multi_reduction <add>, %5, %cst_8 [0] : vector<1024x128xf32> to vector<128xf32>
    %10 = vector.shape_cast %9 : vector<128xf32> to vector<1x128xf32>
    %11 = arith.mulf %5, %5 : vector<1024x128xf32>
    %cst_9 = arith.constant dense<0.000000e+00> : vector<128xf32>
    %12 = vector.multi_reduction <add>, %11, %cst_9 [0] : vector<1024x128xf32> to vector<128xf32>
    %13 = vector.shape_cast %12 : vector<128xf32> to vector<1x128xf32>
    %14 = tpu.concatenate %10, %13 in 0 : vector<1x128xf32>, vector<1x128xf32> -> vector<2x128xf32>
    %15 = arith.addf %8, %14 : vector<2x128xf32>
    %c0_10 = arith.constant 0 : index
    %c0_11 = arith.constant 0 : index
    %16 = vector.load %arg4[%c0_10, %c0_11] : memref<2x128xf32, #tpu.memory_space<vmem>>, vector<2x128xf32>
    tpu.vector_store %arg4[%c0_10, %c0_11], %15 {strides = array<i32>} : memref<2x128xf32, #tpu.memory_space<vmem>>, vector<2x128xf32>,
    return
  }
  func.func @transform_0(%arg0: i32) -> (i32, i32) {
    %c0_i32 = arith.constant 0 : i32
    %c0_i32_0 = arith.constant 0 : i32
    return %arg0, %c0_i32 : i32, i32
  }
  func.func @transform_1(%arg0: i32) -> (i32, i32) {
    %c0_i32 = arith.constant 0 : i32
    %c0_i32_0 = arith.constant 0 : i32
    %c0_i32_1 = arith.constant 0 : i32
    return %c0_i32, %c0_i32_0 : i32, i32
  }
  func.func @transform_2(%arg0: i32) -> (i32, i32) {
    %c0_i32 = arith.constant 0 : i32
    %c0_i32_0 = arith.constant 0 : i32
    return %arg0, %c0_i32 : i32, i32
  }
  func.func @transform_3(%arg0: i32) -> (i32, i32) {
    %c0_i32 = arith.constant 0 : i32
    %c0_i32_0 = arith.constant 0 : i32
    %c0_i32_1 = arith.constant 0 : i32
    return %c0_i32, %c0_i32_0 : i32, i32
  }
}

module attributes {stable_mosaic.version = 11 : i64} {
  func.func @_bn_relu_conv3x3_stats_kernel(%arg0: i32, %arg1: memref<1x16x16x128xbf16, #tpu.memory_space<vmem>>, %arg2: memref<1x128xf32, #tpu.memory_space<vmem>>, %arg3: memref<1x128xf32, #tpu.memory_space<vmem>>, %arg4: memref<1152x128xbf16, #tpu.memory_space<vmem>>, %arg5: memref<1x16x16x128xbf16, #tpu.memory_space<vmem>>, %arg6: memref<2x128xf32, #tpu.memory_space<vmem>>, %arg7: memref<18x24x128xf32, #tpu.memory_space<vmem>>) attributes {dimension_semantics = [#tpu.dimension_semantics<arbitrary>], iteration_bounds = array<i64: 4>, scalar_prefetch = 0 : i64, scratch_operands = 1 : i64, tpu.core_type = #tpu.core_type<tc>, window_params = [{transform_indices = @transform_0, window_bounds = array<i64: 1, 16, 16, 128>}, {pipeline_mode = #tpu.pipeline_mode<synchronous>, transform_indices = @transform_1, window_bounds = array<i64: 1, 128>}, {pipeline_mode = #tpu.pipeline_mode<synchronous>, transform_indices = @transform_2, window_bounds = array<i64: 1, 128>}, {pipeline_mode = #tpu.pipeline_mode<synchronous>, transform_indices = @transform_3, window_bounds = array<i64: 1152, 128>}, {transform_indices = @transform_4, window_bounds = array<i64: 1, 16, 16, 128>}, {pipeline_mode = #tpu.pipeline_mode<synchronous>, transform_indices = @transform_5, window_bounds = array<i64: 2, 128>}]} {
    %c0_i32 = arith.constant 0 : i32
    %0 = arith.cmpi eq, %arg0, %c0_i32 : i32
    %1 = arith.extui %0 : i1 to i32
    %c0_i32_0 = arith.constant 0 : i32
    %2 = arith.cmpi ne, %1, %c0_i32_0 : i32
    scf.if %2 {
      %cst_54 = arith.constant 0.000000e+00 : f32
      %63 = vector.broadcast %cst_54 : f32 to vector<2x128xf32>
      %c0_55 = arith.constant 0 : index
      %c0_56 = arith.constant 0 : index
      %64 = vector.load %arg6[%c0_55, %c0_56] : memref<2x128xf32, #tpu.memory_space<vmem>>, vector<2x128xf32>
      tpu.vector_store %arg6[%c0_55, %c0_56], %63 {strides = array<i32>} : memref<2x128xf32, #tpu.memory_space<vmem>>, vector<2x128xf32>,
      %cst_57 = arith.constant 0.000000e+00 : f32
      %65 = vector.broadcast %cst_57 : f32 to vector<18x24x128xf32>
      %c0_58 = arith.constant 0 : index
      %c0_59 = arith.constant 0 : index
      %c0_60 = arith.constant 0 : index
      %66 = vector.load %arg7[%c0_58, %c0_59, %c0_60] : memref<18x24x128xf32, #tpu.memory_space<vmem>>, vector<18x24x128xf32>
      tpu.vector_store %arg7[%c0_58, %c0_59, %c0_60], %65 {strides = array<i32>} : memref<18x24x128xf32, #tpu.memory_space<vmem>>, vector<18x24x128xf32>,
    } else {
    }
    %c0 = arith.constant 0 : index
    %c0_1 = arith.constant 0 : index
    %c0_2 = arith.constant 0 : index
    %c0_3 = arith.constant 0 : index
    %3 = vector.load %arg1[%c0, %c0_1, %c0_2, %c0_3] : memref<1x16x16x128xbf16, #tpu.memory_space<vmem>>, vector<1x16x16x128xbf16>
    %4 = vector.shape_cast %3 : vector<1x16x16x128xbf16> to vector<16x16x128xbf16>
    %5 = arith.extf %4 : vector<16x16x128xbf16> to vector<16x16x128xf32>
    %c0_4 = arith.constant 0 : index
    %c0_5 = arith.constant 0 : index
    %6 = vector.load %arg2[%c0_4, %c0_5] : memref<1x128xf32, #tpu.memory_space<vmem>>, vector<1x128xf32>
    %7 = vector.shape_cast %6 : vector<1x128xf32> to vector<1x1x128xf32>
    %8 = vector.broadcast %7 : vector<1x1x128xf32> to vector<16x16x128xf32>
    %9 = arith.mulf %5, %8 : vector<16x16x128xf32>
    %c0_6 = arith.constant 0 : index
    %c0_7 = arith.constant 0 : index
    %10 = vector.load %arg3[%c0_6, %c0_7] : memref<1x128xf32, #tpu.memory_space<vmem>>, vector<1x128xf32>
    %11 = vector.shape_cast %10 : vector<1x128xf32> to vector<1x1x128xf32>
    %12 = vector.broadcast %11 : vector<1x1x128xf32> to vector<16x16x128xf32>
    %13 = arith.addf %9, %12 : vector<16x16x128xf32>
    %cst = arith.constant 0.000000e+00 : f32
    %14 = vector.broadcast %cst : f32 to vector<16x16x128xf32>
    %15 = arith.maximumf %13, %14 : vector<16x16x128xf32>
    %c1 = arith.constant 1 : index
    %c1_8 = arith.constant 1 : index
    %c0_9 = arith.constant 0 : index
    %16 = vector.load %arg7[%c1, %c1_8, %c0_9] : memref<18x24x128xf32, #tpu.memory_space<vmem>>, vector<16x16x128xf32>
    tpu.vector_store %arg7[%c1, %c1_8, %c0_9], %15 {strides = array<i32>} : memref<18x24x128xf32, #tpu.memory_space<vmem>>, vector<16x16x128xf32>,
    %cst_10 = arith.constant 0.000000e+00 : f32
    %17 = vector.broadcast %cst_10 : f32 to vector<256x128xf32>
    %c0_11 = arith.constant 0 : index
    %c0_12 = arith.constant 0 : index
    %c0_13 = arith.constant 0 : index
    %18 = vector.load %arg7[%c0_11, %c0_12, %c0_13] : memref<18x24x128xf32, #tpu.memory_space<vmem>>, vector<16x16x128xf32>
    %19 = vector.shape_cast %18 : vector<16x16x128xf32> to vector<256x128xf32>
    %c0_14 = arith.constant 0 : index
    %c1_15 = arith.constant 1 : index
    %c0_16 = arith.constant 0 : index
    %20 = vector.load %arg7[%c0_14, %c1_15, %c0_16] : memref<18x24x128xf32, #tpu.memory_space<vmem>>, vector<16x16x128xf32>
    %21 = vector.shape_cast %20 : vector<16x16x128xf32> to vector<256x128xf32>
    %c0_17 = arith.constant 0 : index
    %c2 = arith.constant 2 : index
    %c0_18 = arith.constant 0 : index
    %22 = vector.load %arg7[%c0_17, %c2, %c0_18] : memref<18x24x128xf32, #tpu.memory_space<vmem>>, vector<16x16x128xf32>
    %23 = vector.shape_cast %22 : vector<16x16x128xf32> to vector<256x128xf32>
    %24 = tpu.concatenate %19, %21, %23 in 1 : vector<256x128xf32>, vector<256x128xf32>, vector<256x128xf32> -> vector<256x384xf32>
    %25 = arith.truncf %24 : vector<256x384xf32> to vector<256x384xbf16>
    %c0_19 = arith.constant 0 : index
    %c0_20 = arith.constant 0 : index
    %26 = vector.load %arg4[%c0_19, %c0_20] : memref<1152x128xbf16, #tpu.memory_space<vmem>>, vector<384x128xbf16>
    %cst_21 = arith.constant dense<0.000000e+00> : vector<256x128xf32>
    %27 = tpu.matmul %25, %26, %cst_21 {dimension_numbers = #tpu.dot_dimension_numbers<[1], [0], [0], [1], [0, 0, 1, 1], [], []>} : vector<256x384xbf16>, vector<384x128xbf16>, vector<256x128xf32> -> vector<256x128xf32>
    %28 = arith.addf %17, %27 : vector<256x128xf32>
    %c1_22 = arith.constant 1 : index
    %c0_23 = arith.constant 0 : index
    %c0_24 = arith.constant 0 : index
    %29 = vector.load %arg7[%c1_22, %c0_23, %c0_24] : memref<18x24x128xf32, #tpu.memory_space<vmem>>, vector<16x16x128xf32>
    %30 = vector.shape_cast %29 : vector<16x16x128xf32> to vector<256x128xf32>
    %c1_25 = arith.constant 1 : index
    %c1_26 = arith.constant 1 : index
    %c0_27 = arith.constant 0 : index
    %31 = vector.load %arg7[%c1_25, %c1_26, %c0_27] : memref<18x24x128xf32, #tpu.memory_space<vmem>>, vector<16x16x128xf32>
    %32 = vector.shape_cast %31 : vector<16x16x128xf32> to vector<256x128xf32>
    %c1_28 = arith.constant 1 : index
    %c2_29 = arith.constant 2 : index
    %c0_30 = arith.constant 0 : index
    %33 = vector.load %arg7[%c1_28, %c2_29, %c0_30] : memref<18x24x128xf32, #tpu.memory_space<vmem>>, vector<16x16x128xf32>
    %34 = vector.shape_cast %33 : vector<16x16x128xf32> to vector<256x128xf32>
    %35 = tpu.concatenate %30, %32, %34 in 1 : vector<256x128xf32>, vector<256x128xf32>, vector<256x128xf32> -> vector<256x384xf32>
    %36 = arith.truncf %35 : vector<256x384xf32> to vector<256x384xbf16>
    %c384 = arith.constant 384 : index
    %c0_31 = arith.constant 0 : index
    %37 = vector.load %arg4[%c384, %c0_31] : memref<1152x128xbf16, #tpu.memory_space<vmem>>, vector<384x128xbf16>
    %cst_32 = arith.constant dense<0.000000e+00> : vector<256x128xf32>
    %38 = tpu.matmul %36, %37, %cst_32 {dimension_numbers = #tpu.dot_dimension_numbers<[1], [0], [0], [1], [0, 0, 1, 1], [], []>} : vector<256x384xbf16>, vector<384x128xbf16>, vector<256x128xf32> -> vector<256x128xf32>
    %39 = arith.addf %28, %38 : vector<256x128xf32>
    %c2_33 = arith.constant 2 : index
    %c0_34 = arith.constant 0 : index
    %c0_35 = arith.constant 0 : index
    %40 = vector.load %arg7[%c2_33, %c0_34, %c0_35] : memref<18x24x128xf32, #tpu.memory_space<vmem>>, vector<16x16x128xf32>
    %41 = vector.shape_cast %40 : vector<16x16x128xf32> to vector<256x128xf32>
    %c2_36 = arith.constant 2 : index
    %c1_37 = arith.constant 1 : index
    %c0_38 = arith.constant 0 : index
    %42 = vector.load %arg7[%c2_36, %c1_37, %c0_38] : memref<18x24x128xf32, #tpu.memory_space<vmem>>, vector<16x16x128xf32>
    %43 = vector.shape_cast %42 : vector<16x16x128xf32> to vector<256x128xf32>
    %c2_39 = arith.constant 2 : index
    %c2_40 = arith.constant 2 : index
    %c0_41 = arith.constant 0 : index
    %44 = vector.load %arg7[%c2_39, %c2_40, %c0_41] : memref<18x24x128xf32, #tpu.memory_space<vmem>>, vector<16x16x128xf32>
    %45 = vector.shape_cast %44 : vector<16x16x128xf32> to vector<256x128xf32>
    %46 = tpu.concatenate %41, %43, %45 in 1 : vector<256x128xf32>, vector<256x128xf32>, vector<256x128xf32> -> vector<256x384xf32>
    %47 = arith.truncf %46 : vector<256x384xf32> to vector<256x384xbf16>
    %c768 = arith.constant 768 : index
    %c0_42 = arith.constant 0 : index
    %48 = vector.load %arg4[%c768, %c0_42] : memref<1152x128xbf16, #tpu.memory_space<vmem>>, vector<384x128xbf16>
    %cst_43 = arith.constant dense<0.000000e+00> : vector<256x128xf32>
    %49 = tpu.matmul %47, %48, %cst_43 {dimension_numbers = #tpu.dot_dimension_numbers<[1], [0], [0], [1], [0, 0, 1, 1], [], []>} : vector<256x384xbf16>, vector<384x128xbf16>, vector<256x128xf32> -> vector<256x128xf32>
    %50 = arith.addf %39, %49 : vector<256x128xf32>
    %51 = arith.truncf %50 : vector<256x128xf32> to vector<256x128xbf16>
    %52 = vector.shape_cast %51 : vector<256x128xbf16> to vector<1x16x16x128xbf16>
    %c0_44 = arith.constant 0 : index
    %c0_45 = arith.constant 0 : index
    %c0_46 = arith.constant 0 : index
    %c0_47 = arith.constant 0 : index
    %53 = vector.load %arg5[%c0_44, %c0_45, %c0_46, %c0_47] : memref<1x16x16x128xbf16, #tpu.memory_space<vmem>>, vector<1x16x16x128xbf16>
    tpu.vector_store %arg5[%c0_44, %c0_45, %c0_46, %c0_47], %52 {strides = array<i32>} : memref<1x16x16x128xbf16, #tpu.memory_space<vmem>>, vector<1x16x16x128xbf16>,
    %c0_48 = arith.constant 0 : index
    %c0_49 = arith.constant 0 : index
    %54 = vector.load %arg6[%c0_48, %c0_49] : memref<2x128xf32, #tpu.memory_space<vmem>>, vector<2x128xf32>
    %cst_50 = arith.constant dense<0.000000e+00> : vector<128xf32>
    %55 = vector.multi_reduction <add>, %50, %cst_50 [0] : vector<256x128xf32> to vector<128xf32>
    %56 = vector.shape_cast %55 : vector<128xf32> to vector<1x128xf32>
    %57 = arith.mulf %50, %50 : vector<256x128xf32>
    %cst_51 = arith.constant dense<0.000000e+00> : vector<128xf32>
    %58 = vector.multi_reduction <add>, %57, %cst_51 [0] : vector<256x128xf32> to vector<128xf32>
    %59 = vector.shape_cast %58 : vector<128xf32> to vector<1x128xf32>
    %60 = tpu.concatenate %56, %59 in 0 : vector<1x128xf32>, vector<1x128xf32> -> vector<2x128xf32>
    %61 = arith.addf %54, %60 : vector<2x128xf32>
    %c0_52 = arith.constant 0 : index
    %c0_53 = arith.constant 0 : index
    %62 = vector.load %arg6[%c0_52, %c0_53] : memref<2x128xf32, #tpu.memory_space<vmem>>, vector<2x128xf32>
    tpu.vector_store %arg6[%c0_52, %c0_53], %61 {strides = array<i32>} : memref<2x128xf32, #tpu.memory_space<vmem>>, vector<2x128xf32>,
    return
  }
  func.func @transform_0(%arg0: i32) -> (i32, i32, i32, i32) {
    %c0_i32 = arith.constant 0 : i32
    %c0_i32_0 = arith.constant 0 : i32
    %c0_i32_1 = arith.constant 0 : i32
    %c0_i32_2 = arith.constant 0 : i32
    return %arg0, %c0_i32, %c0_i32_0, %c0_i32_1 : i32, i32, i32, i32
  }
  func.func @transform_1(%arg0: i32) -> (i32, i32) {
    %c0_i32 = arith.constant 0 : i32
    %c0_i32_0 = arith.constant 0 : i32
    %c0_i32_1 = arith.constant 0 : i32
    return %c0_i32, %c0_i32_0 : i32, i32
  }
  func.func @transform_2(%arg0: i32) -> (i32, i32) {
    %c0_i32 = arith.constant 0 : i32
    %c0_i32_0 = arith.constant 0 : i32
    %c0_i32_1 = arith.constant 0 : i32
    return %c0_i32, %c0_i32_0 : i32, i32
  }
  func.func @transform_3(%arg0: i32) -> (i32, i32) {
    %c0_i32 = arith.constant 0 : i32
    %c0_i32_0 = arith.constant 0 : i32
    %c0_i32_1 = arith.constant 0 : i32
    return %c0_i32, %c0_i32_0 : i32, i32
  }
  func.func @transform_4(%arg0: i32) -> (i32, i32, i32, i32) {
    %c0_i32 = arith.constant 0 : i32
    %c0_i32_0 = arith.constant 0 : i32
    %c0_i32_1 = arith.constant 0 : i32
    %c0_i32_2 = arith.constant 0 : i32
    return %arg0, %c0_i32, %c0_i32_0, %c0_i32_1 : i32, i32, i32, i32
  }
  func.func @transform_5(%arg0: i32) -> (i32, i32) {
    %c0_i32 = arith.constant 0 : i32
    %c0_i32_0 = arith.constant 0 : i32
    %c0_i32_1 = arith.constant 0 : i32
    return %c0_i32, %c0_i32_0 : i32, i32
  }
}

module attributes {stable_mosaic.version = 11 : i64} {
  func.func @_bn_relu_conv1x1_stats_kernel(%arg0: i32, %arg1: memref<1024x128xbf16, #tpu.memory_space<vmem>>, %arg2: memref<1x128xf32, #tpu.memory_space<vmem>>, %arg3: memref<1x128xf32, #tpu.memory_space<vmem>>, %arg4: memref<128x32xbf16, #tpu.memory_space<vmem>>, %arg5: memref<1024x32xbf16, #tpu.memory_space<vmem>>, %arg6: memref<2x32xf32, #tpu.memory_space<vmem>>) attributes {dimension_semantics = [#tpu.dimension_semantics<arbitrary>], iteration_bounds = array<i64: 1>, scalar_prefetch = 0 : i64, scratch_operands = 0 : i64, tpu.core_type = #tpu.core_type<tc>, window_params = [{transform_indices = @transform_0, window_bounds = array<i64: 1024, 128>}, {pipeline_mode = #tpu.pipeline_mode<synchronous>, transform_indices = @transform_1, window_bounds = array<i64: 1, 128>}, {pipeline_mode = #tpu.pipeline_mode<synchronous>, transform_indices = @transform_2, window_bounds = array<i64: 1, 128>}, {pipeline_mode = #tpu.pipeline_mode<synchronous>, transform_indices = @transform_3, window_bounds = array<i64: 128, 32>}, {transform_indices = @transform_4, window_bounds = array<i64: 1024, 32>}, {pipeline_mode = #tpu.pipeline_mode<synchronous>, transform_indices = @transform_5, window_bounds = array<i64: 2, 32>}]} {
    %c0_i32 = arith.constant 0 : i32
    %0 = arith.cmpi eq, %arg0, %c0_i32 : i32
    %1 = arith.extui %0 : i1 to i32
    %c0_i32_0 = arith.constant 0 : i32
    %2 = arith.cmpi ne, %1, %c0_i32_0 : i32
    scf.if %2 {
      %cst_17 = arith.constant 0.000000e+00 : f32
      %27 = vector.broadcast %cst_17 : f32 to vector<2x32xf32>
      %c0_18 = arith.constant 0 : index
      %c0_19 = arith.constant 0 : index
      %28 = vector.load %arg6[%c0_18, %c0_19] : memref<2x32xf32, #tpu.memory_space<vmem>>, vector<2x32xf32>
      tpu.vector_store %arg6[%c0_18, %c0_19], %27 {strides = array<i32>} : memref<2x32xf32, #tpu.memory_space<vmem>>, vector<2x32xf32>,
    } else {
    }
    %c0 = arith.constant 0 : index
    %c0_1 = arith.constant 0 : index
    %3 = vector.load %arg1[%c0, %c0_1] : memref<1024x128xbf16, #tpu.memory_space<vmem>>, vector<1024x128xbf16>
    %4 = arith.extf %3 : vector<1024x128xbf16> to vector<1024x128xf32>
    %c0_2 = arith.constant 0 : index
    %c0_3 = arith.constant 0 : index
    %5 = vector.load %arg2[%c0_2, %c0_3] : memref<1x128xf32, #tpu.memory_space<vmem>>, vector<1x128xf32>
    %6 = vector.broadcast %5 : vector<1x128xf32> to vector<1024x128xf32>
    %7 = arith.mulf %4, %6 : vector<1024x128xf32>
    %c0_4 = arith.constant 0 : index
    %c0_5 = arith.constant 0 : index
    %8 = vector.load %arg3[%c0_4, %c0_5] : memref<1x128xf32, #tpu.memory_space<vmem>>, vector<1x128xf32>
    %9 = vector.broadcast %8 : vector<1x128xf32> to vector<1024x128xf32>
    %10 = arith.addf %7, %9 : vector<1024x128xf32>
    %cst = arith.constant 0.000000e+00 : f32
    %11 = vector.broadcast %cst : f32 to vector<1024x128xf32>
    %12 = arith.maximumf %10, %11 : vector<1024x128xf32>
    %13 = arith.truncf %12 : vector<1024x128xf32> to vector<1024x128xbf16>
    %c0_6 = arith.constant 0 : index
    %c0_7 = arith.constant 0 : index
    %14 = vector.load %arg4[%c0_6, %c0_7] : memref<128x32xbf16, #tpu.memory_space<vmem>>, vector<128x32xbf16>
    %cst_8 = arith.constant dense<0.000000e+00> : vector<1024x32xf32>
    %15 = tpu.matmul %13, %14, %cst_8 {dimension_numbers = #tpu.dot_dimension_numbers<[1], [0], [0], [1], [0, 0, 1, 1], [], []>} : vector<1024x128xbf16>, vector<128x32xbf16>, vector<1024x32xf32> -> vector<1024x32xf32>
    %16 = arith.truncf %15 : vector<1024x32xf32> to vector<1024x32xbf16>
    %c0_9 = arith.constant 0 : index
    %c0_10 = arith.constant 0 : index
    %17 = vector.load %arg5[%c0_9, %c0_10] : memref<1024x32xbf16, #tpu.memory_space<vmem>>, vector<1024x32xbf16>
    tpu.vector_store %arg5[%c0_9, %c0_10], %16 {strides = array<i32>} : memref<1024x32xbf16, #tpu.memory_space<vmem>>, vector<1024x32xbf16>,
    %c0_11 = arith.constant 0 : index
    %c0_12 = arith.constant 0 : index
    %18 = vector.load %arg6[%c0_11, %c0_12] : memref<2x32xf32, #tpu.memory_space<vmem>>, vector<2x32xf32>
    %cst_13 = arith.constant dense<0.000000e+00> : vector<32xf32>
    %19 = vector.multi_reduction <add>, %15, %cst_13 [0] : vector<1024x32xf32> to vector<32xf32>
    %20 = vector.shape_cast %19 : vector<32xf32> to vector<1x32xf32>
    %21 = arith.mulf %15, %15 : vector<1024x32xf32>
    %cst_14 = arith.constant dense<0.000000e+00> : vector<32xf32>
    %22 = vector.multi_reduction <add>, %21, %cst_14 [0] : vector<1024x32xf32> to vector<32xf32>
    %23 = vector.shape_cast %22 : vector<32xf32> to vector<1x32xf32>
    %24 = tpu.concatenate %20, %23 in 0 : vector<1x32xf32>, vector<1x32xf32> -> vector<2x32xf32>
    %25 = arith.addf %18, %24 : vector<2x32xf32>
    %c0_15 = arith.constant 0 : index
    %c0_16 = arith.constant 0 : index
    %26 = vector.load %arg6[%c0_15, %c0_16] : memref<2x32xf32, #tpu.memory_space<vmem>>, vector<2x32xf32>
    tpu.vector_store %arg6[%c0_15, %c0_16], %25 {strides = array<i32>} : memref<2x32xf32, #tpu.memory_space<vmem>>, vector<2x32xf32>,
    return
  }
  func.func @transform_0(%arg0: i32) -> (i32, i32) {
    %c0_i32 = arith.constant 0 : i32
    %c0_i32_0 = arith.constant 0 : i32
    return %arg0, %c0_i32 : i32, i32
  }
  func.func @transform_1(%arg0: i32) -> (i32, i32) {
    %c0_i32 = arith.constant 0 : i32
    %c0_i32_0 = arith.constant 0 : i32
    %c0_i32_1 = arith.constant 0 : i32
    return %c0_i32, %c0_i32_0 : i32, i32
  }
  func.func @transform_2(%arg0: i32) -> (i32, i32) {
    %c0_i32 = arith.constant 0 : i32
    %c0_i32_0 = arith.constant 0 : i32
    %c0_i32_1 = arith.constant 0 : i32
    return %c0_i32, %c0_i32_0 : i32, i32
  }
  func.func @transform_3(%arg0: i32) -> (i32, i32) {
    %c0_i32 = arith.constant 0 : i32
    %c0_i32_0 = arith.constant 0 : i32
    %c0_i32_1 = arith.constant 0 : i32
    return %c0_i32, %c0_i32_0 : i32, i32
  }
  func.func @transform_4(%arg0: i32) -> (i32, i32) {
    %c0_i32 = arith.constant 0 : i32
    %c0_i32_0 = arith.constant 0 : i32
    return %arg0, %c0_i32 : i32, i32
  }
  func.func @transform_5(%arg0: i32) -> (i32, i32) {
    %c0_i32 = arith.constant 0 : i32
    %c0_i32_0 = arith.constant 0 : i32
    %c0_i32_1 = arith.constant 0 : i32
    return %c0_i32, %c0_i32_0 : i32, i32
  }
}

module attributes {stable_mosaic.version = 11 : i64} {
  func.func @_bn_residual_relu_kernel(%arg0: i32, %arg1: memref<1024x32xbf16, #tpu.memory_space<vmem>>, %arg2: memref<1x32xf32, #tpu.memory_space<vmem>>, %arg3: memref<1x32xf32, #tpu.memory_space<vmem>>, %arg4: memref<1024x32xbf16, #tpu.memory_space<vmem>>, %arg5: memref<1024x32xf32, #tpu.memory_space<vmem>>) attributes {dimension_semantics = [#tpu.dimension_semantics<parallel>], iteration_bounds = array<i64: 1>, scalar_prefetch = 0 : i64, scratch_operands = 0 : i64, tpu.core_type = #tpu.core_type<tc>, window_params = [{transform_indices = @transform_0, window_bounds = array<i64: 1024, 32>}, {pipeline_mode = #tpu.pipeline_mode<synchronous>, transform_indices = @transform_1, window_bounds = array<i64: 1, 32>}, {pipeline_mode = #tpu.pipeline_mode<synchronous>, transform_indices = @transform_2, window_bounds = array<i64: 1, 32>}, {transform_indices = @transform_3, window_bounds = array<i64: 1024, 32>}, {transform_indices = @transform_4, window_bounds = array<i64: 1024, 32>}]} {
    %c0 = arith.constant 0 : index
    %c0_0 = arith.constant 0 : index
    %0 = vector.load %arg1[%c0, %c0_0] : memref<1024x32xbf16, #tpu.memory_space<vmem>>, vector<1024x32xbf16>
    %1 = arith.extf %0 : vector<1024x32xbf16> to vector<1024x32xf32>
    %c0_1 = arith.constant 0 : index
    %c0_2 = arith.constant 0 : index
    %2 = vector.load %arg2[%c0_1, %c0_2] : memref<1x32xf32, #tpu.memory_space<vmem>>, vector<1x32xf32>
    %3 = vector.broadcast %2 : vector<1x32xf32> to vector<1024x32xf32>
    %4 = arith.mulf %1, %3 : vector<1024x32xf32>
    %c0_3 = arith.constant 0 : index
    %c0_4 = arith.constant 0 : index
    %5 = vector.load %arg3[%c0_3, %c0_4] : memref<1x32xf32, #tpu.memory_space<vmem>>, vector<1x32xf32>
    %6 = vector.broadcast %5 : vector<1x32xf32> to vector<1024x32xf32>
    %7 = arith.addf %4, %6 : vector<1024x32xf32>
    %c0_5 = arith.constant 0 : index
    %c0_6 = arith.constant 0 : index
    %8 = vector.load %arg4[%c0_5, %c0_6] : memref<1024x32xbf16, #tpu.memory_space<vmem>>, vector<1024x32xbf16>
    %9 = arith.extf %8 : vector<1024x32xbf16> to vector<1024x32xf32>
    %10 = arith.addf %7, %9 : vector<1024x32xf32>
    %cst = arith.constant 0.000000e+00 : f32
    %11 = vector.broadcast %cst : f32 to vector<1024x32xf32>
    %12 = arith.maximumf %10, %11 : vector<1024x32xf32>
    %c0_7 = arith.constant 0 : index
    %c0_8 = arith.constant 0 : index
    %13 = vector.load %arg5[%c0_7, %c0_8] : memref<1024x32xf32, #tpu.memory_space<vmem>>, vector<1024x32xf32>
    tpu.vector_store %arg5[%c0_7, %c0_8], %12 {strides = array<i32>} : memref<1024x32xf32, #tpu.memory_space<vmem>>, vector<1024x32xf32>,
    return
  }
  func.func @transform_0(%arg0: i32) -> (i32, i32) {
    %c0_i32 = arith.constant 0 : i32
    %c0_i32_0 = arith.constant 0 : i32
    return %arg0, %c0_i32 : i32, i32
  }
  func.func @transform_1(%arg0: i32) -> (i32, i32) {
    %c0_i32 = arith.constant 0 : i32
    %c0_i32_0 = arith.constant 0 : i32
    %c0_i32_1 = arith.constant 0 : i32
    return %c0_i32, %c0_i32_0 : i32, i32
  }
  func.func @transform_2(%arg0: i32) -> (i32, i32) {
    %c0_i32 = arith.constant 0 : i32
    %c0_i32_0 = arith.constant 0 : i32
    %c0_i32_1 = arith.constant 0 : i32
    return %c0_i32, %c0_i32_0 : i32, i32
  }
  func.func @transform_3(%arg0: i32) -> (i32, i32) {
    %c0_i32 = arith.constant 0 : i32
    %c0_i32_0 = arith.constant 0 : i32
    return %arg0, %c0_i32 : i32, i32
  }
  func.func @transform_4(%arg0: i32) -> (i32, i32) {
    %c0_i32 = arith.constant 0 : i32
    %c0_i32_0 = arith.constant 0 : i32
    return %arg0, %c0_i32 : i32, i32
  }
}

</mosaic_0001>

<bundles_post_ra>
// kernel: bottleneck_forward.7
= control target key start
LH: loop header
LB: loop body
LE: loop exit
PB: predicated region body
PF: predicated region fallthrough
CT: control target
= control target key end

     0   :  { %vm1056_vm0 = vcmask 261120   ;;  %s2687_s0 = inlined_call_operand.vmem [shape: bf16[1024,32], index: 0, kind: input, shape index: {}]   ;;  %s2688_s1 = inlined_call_operand.vmem [shape: f32[1,32], index: 1, kind: input, shape index: {}]   ;;  %s2689_s2 = inlined_call_operand.vmem [shape: f32[1,32], index: 2, kind: input, shape index: {}]   ;;  %s2690_s3 = inlined_call_operand.vmem [shape: bf16[1024,32], index: 3, kind: input, shape index: {}]   ;;  %s2691_s4 = inlined_call_operand.hbm [shape: f32[1024,32], index: 4, kind: output, shape index: {}]  }
   0x1   :  { %v1204_v0 = vld [vmem:[%s2687_s0] sm:$0xff]   ;;  %v1715_v5 = vld [vmem:[%s2687_s0 + $0x8] sm:$0xff]   ;;  %v1716_v12 = vld [vmem:[%s2687_s0 + $0x10] sm:$0xff]  }
   0x2   :  { %v1902_v1 = vld [vmem:[%s2688_s1] ss:$0 sm:$0xff]  ;;  %v1205_v2 = vunpack.c.l.bf16 %v1204_v0  ;;  %v1206_v4 = vunpack.c.h.bf16 %v1204_v0  ;;  %v1778_v6 = vld [vmem:[%s2690_s3 + $0x8] sm:$0xff]   ;;  %v1209_v10 = vunpack.c.l.bf16 %v1715_v5  ;;  %v1779_v13 = vld [vmem:[%s2690_s3 + $0x10] sm:$0xff]   ;;  %v1210_v16 = vunpack.c.h.bf16 %v1715_v5 }
   0x3   :  { %v1460_v3 = vld [vmem:[%s2690_s3] sm:$0xff]   ;;  %v1465_v11 = vunpack.c.l.bf16 %v1778_v6  ;;  %v1466_v17 = vunpack.c.h.bf16 %v1778_v6  ;;  %v1717_v18 = vld [vmem:[%s2687_s0 + $0x18] sm:$0xff]   ;;  %v1213_v20 = vunpack.c.l.bf16 %v1716_v12  ;;  %v1469_v21 = vunpack.c.l.bf16 %v1779_v13  ;;  %v1719_v54 = vld [vmem:[%s2687_s0 + $0x28] sm:$0xff]  }
   0x4   :  { %v1916_v7 = vld [vmem:[%s2689_s2] ss:$0 sm:$0xff]  ;;  %v1461_v8 = vunpack.c.l.bf16 %v1460_v3  ;;  %v1462_v9 = vunpack.c.h.bf16 %v1460_v3  ;;  %v281_v14 = vmul.f32 %v1205_v2, %v1902_v1  ;;  %v282_v15 = vmul.f32 %v1206_v4, %v1902_v1  ;;  %v1780_v23 = vld [vmem:[%s2690_s3 + $0x18] sm:$0xff]   ;;  %v1782_v55 = vld [vmem:[%s2690_s3 + $0x28] sm:$0xff]  }
   0x5   :  { %v283_v19 = vmul.f32 %v1209_v10, %v1902_v1  ;;  %v1214_v22 = vunpack.c.h.bf16 %v1716_v12  ;;  %v284_v26 = vmul.f32 %v1210_v16, %v1902_v1  ;;  %v1470_v27 = vunpack.c.h.bf16 %v1779_v13  ;;  %v1718_v40 = vld [vmem:[%s2687_s0 + $0x20] sm:$0xff]   ;;  %v1720_v0 = vld [vmem:[%s2687_s0 + $0x30] sm:$0xff]   ;;  %v1721_v16 = vld [vmem:[%s2687_s0 + $0x38] sm:$0xff]  }
   0x6   :  { %v416_v24 = vadd.f32 %v1916_v7, %v281_v14  ;;  %v417_v25 = vadd.f32 %v1916_v7, %v282_v15  ;;  %v285_v29 = vmul.f32 %v1213_v20, %v1902_v1  ;;  %v1217_v31 = vunpack.c.l.bf16 %v1717_v18  ;;  %v1781_v45 = vld [vmem:[%s2690_s3 + $0x20] sm:$0xff]   ;;  %v1783_v2 = vld [vmem:[%s2690_s3 + $0x30] sm:$0xff]  }
   0x7   :  { %v418_v28 = vadd.f32 %v1916_v7, %v283_v19  ;;  %v286_v30 = vmul.f32 %v1214_v22, %v1902_v1  ;;  %v419_v34 = vadd.f32 %v1916_v7, %v284_v26  ;;  %v1473_v35 = vunpack.c.l.bf16 %v1780_v23 }
   0x8   :  { %v800_v32 = vadd.f32 %v1461_v8, %v416_v24  ;;  %v801_v33 = vadd.f32 %v1462_v9, %v417_v25  ;;  %v420_v37 = vadd.f32 %v1916_v7, %v285_v29  ;;  %v287_v39 = vmul.f32 %v1217_v31, %v1902_v1 }
   0x9   :  { %v802_v36 = vadd.f32 %v1465_v11, %v418_v28  ;;  %v421_v38 = vadd.f32 %v1916_v7, %v286_v30  ;;  %v803_v43 = vadd.f32 %v1466_v17, %v419_v34  ;;  %v1218_v44 = vunpack.c.h.bf16 %v1717_v18  ;;  %v1722_v34 = vld [vmem:[%s2687_s0 + $0x40] sm:$0xff]  }
   0xa   :  { %v928_v41 = vmax.f32 %v800_v32, 0.0  ;;  %v929_v42 = vmax.f32 %v801_v33, 0.0  ;;  %v804_v47 = vadd.f32 %v1469_v21, %v420_v37  ;;  %v422_v49 = vadd.f32 %v1916_v7, %v287_v39  ;;  %v1784_v21 = vld [vmem:[%s2690_s3 + $0x38] sm:$0xff]   ;;  %v1785_v39 = vld [vmem:[%s2690_s3 + $0x40] sm:$0xff]  }
   0xb   :  { %v930_v46 = vmax.f32 %v802_v36, 0.0  ;;  %v805_v48 = vadd.f32 %v1470_v27, %v421_v38  ;;  %v931_v50 = vmax.f32 %v803_v43, 0.0  ;;  %v288_v51 = vmul.f32 %v1218_v44, %v1902_v1 }
   0xc   :  { %1057 = vst.msk [vmem:[#allocation2] sm:$0xff] %vm1056_vm0, %v928_v41  ;;  %1058 = vst.msk [vmem:[#allocation2 + $0x8] sm:$0xff] %vm1056_vm0, %v929_v42  ;;  %v1474_v52 = vunpack.c.h.bf16 %v1780_v23  ;;  %v1221_v53 = vunpack.c.l.bf16 %v1718_v40  ;;  %v932_v56 = vmax.f32 %v804_v47, 0.0  ;;  %v806_v58 = vadd.f32 %v1473_v35, %v422_v49  ;;  %v1786_v49 = vld [vmem:[%s2690_s3 + $0x48] sm:$0xff]  }
   0xd   :  { %1059 = vst.msk [vmem:[#allocation2 + $0x10] sm:$0xff] %vm1056_vm0, %v930_v46  ;;  %v933_v57 = vmax.f32 %v805_v48, 0.0  ;;  %v1477_v59 = vunpack.c.l.bf16 %v1781_v45  ;;  %1060 = vst.msk [vmem:[#allocation2 + $0x18] sm:$0xff] %vm1056_vm0, %v931_v50  ;;  %v423_v60 = vadd.f32 %v1916_v7, %v288_v51  ;;  %v1222_v62 = vunpack.c.h.bf16 %v1718_v40  ;;  %v1723_v48 = vld [vmem:[%s2687_s0 + $0x48] sm:$0xff]  }
   0xe   :  { %v289_v61 = vmul.f32 %v1221_v53, %v1902_v1  ;;  %v1478_v63 = vunpack.c.h.bf16 %v1781_v45  ;;  %1061 = vst.msk [vmem:[#allocation2 + $0x20] sm:$0xff] %vm1056_vm0, %v932_v56  ;;  %v934_v3 = vmax.f32 %v806_v58, 0.0  ;;  %v1225_v4 = vunpack.c.l.bf16 %v1719_v54  ;;  %v1724_v58 = vld [vmem:[%s2687_s0 + $0x50] sm:$0xff]  }
   0xf   :  { %1062 = vst.msk [vmem:[#allocation2 + $0x28] sm:$0xff] %vm1056_vm0, %v933_v57  ;;  %v1481_v5 = vunpack.c.l.bf16 %v1782_v55  ;;  %v1226_v6 = vunpack.c.h.bf16 %v1719_v54  ;;  %v807_v8 = vadd.f32 %v1474_v52, %v423_v60  ;;  %v290_v10 = vmul.f32 %v1222_v62, %v1902_v1 }
  0x10   :  { %v424_v9 = vadd.f32 %v1916_v7, %v289_v61  ;;  %v1482_v11 = vunpack.c.h.bf16 %v1782_v55  ;;  %1063 = vst.msk [vmem:[#allocation2 + $0x30] sm:$0xff] %vm1056_vm0, %v934_v3  ;;  %v291_v12 = vmul.f32 %v1225_v4, %v1902_v1  ;;  %v1229_v14 = vunpack.c.l.bf16 %v1720_v0 }
  0x11   :  { %v292_v13 = vmul.f32 %v1226_v6, %v1902_v1  ;;  %v1485_v15 = vunpack.c.l.bf16 %v1783_v2  ;;  %v935_v17 = vmax.f32 %v807_v8, 0.0  ;;  %v425_v19 = vadd.f32 %v1916_v7, %v290_v10  ;;  %v1725_v10 = vld [vmem:[%s2687_s0 + $0x58] sm:$0xff]  }
  0x12   :  { %v808_v18 = vadd.f32 %v1477_v59, %v424_v9  ;;  %v1230_v20 = vunpack.c.h.bf16 %v1720_v0  ;;  %v426_v22 = vadd.f32 %v1916_v7, %v291_v12  ;;  %v293_v24 = vmul.f32 %v1229_v14, %v1902_v1 }
  0x13   :  { %v427_v23 = vadd.f32 %v1916_v7, %v292_v13  ;;  %v1486_v25 = vunpack.c.h.bf16 %v1783_v2  ;;  %1064 = vst.msk [vmem:[#allocation2 + $0x38] sm:$0xff] %vm1056_vm0, %v935_v17  ;;  %v809_v27 = vadd.f32 %v1478_v63, %v425_v19  ;;  %v1233_v29 = vunpack.c.l.bf16 %v1721_v16  ;;  %v1787_v63 = vld [vmem:[%s2690_s3 + $0x50] sm:$0xff]   ;;  %v1788_v19 = vld [vmem:[%s2690_s3 + $0x58] sm:$0xff]  }
  0x14   :  { %v936_v26 = vmax.f32 %v808_v18, 0.0  ;;  %v294_v28 = vmul.f32 %v1230_v20, %v1902_v1  ;;  %v810_v30 = vadd.f32 %v1481_v5, %v426_v22  ;;  %v428_v32 = vadd.f32 %v1916_v7, %v293_v24 }
  0x15   :  { %v811_v31 = vadd.f32 %v1482_v11, %v427_v23  ;;  %v1489_v33 = vunpack.c.l.bf16 %v1784_v21  ;;  %v937_v35 = vmax.f32 %v809_v27, 0.0  ;;  %v295_v37 = vmul.f32 %v1233_v29, %v1902_v1 }
  0x16   :  { %1065 = vst.msk [vmem:[#allocation2 + $0x40] sm:$0xff] %vm1056_vm0, %v936_v26  ;;  %v429_v36 = vadd.f32 %v1916_v7, %v294_v28  ;;  %v1234_v38 = vunpack.c.h.bf16 %v1721_v16  ;;  %v938_v40 = vmax.f32 %v810_v30, 0.0  ;;  %v812_v42 = vadd.f32 %v1485_v15, %v428_v32  ;;  %v1726_v28 = vld [vmem:[%s2687_s0 + $0x60] sm:$0xff]  }
  0x17   :  { %v939_v41 = vmax.f32 %v811_v31, 0.0  ;;  %v1490_v43 = vunpack.c.h.bf16 %v1784_v21  ;;  %1066 = vst.msk [vmem:[#allocation2 + $0x48] sm:$0xff] %vm1056_vm0, %v937_v35  ;;  %v430_v45 = vadd.f32 %v1916_v7, %v295_v37  ;;  %v1237_v47 = vunpack.c.l.bf16 %v1722_v34 }
  0x18   :  { %v813_v44 = vadd.f32 %v1486_v25, %v429_v36  ;;  %v296_v46 = vmul.f32 %v1234_v38, %v1902_v1  ;;  %1067 = vst.msk [vmem:[#allocation2 + $0x50] sm:$0xff] %vm1056_vm0, %v938_v40  ;;  %v940_v50 = vmax.f32 %v812_v42, 0.0  ;;  %v1493_v51 = vunpack.c.l.bf16 %v1785_v39  ;;  %v1727_v42 = vld [vmem:[%s2687_s0 + $0x68] sm:$0xff]  }
  0x19   :  { %1068 = vst.msk [vmem:[#allocation2 + $0x58] sm:$0xff] %vm1056_vm0, %v939_v41  ;;  %v1238_v52 = vunpack.c.h.bf16 %v1722_v34  ;;  %v1494_v53 = vunpack.c.h.bf16 %v1785_v39  ;;  %v814_v55 = vadd.f32 %v1489_v33, %v430_v45  ;;  %v297_v57 = vmul.f32 %v1237_v47, %v1902_v1  ;;  %v1789_v33 = vld [vmem:[%s2690_s3 + $0x60] sm:$0xff]  }
  0x1a   :  { %v941_v54 = vmax.f32 %v813_v44, 0.0  ;;  %v431_v56 = vadd.f32 %v1916_v7, %v296_v46  ;;  %1069 = vst.msk [vmem:[#allocation2 + $0x60] sm:$0xff] %vm1056_vm0, %v940_v50  ;;  %v1241_v60 = vunpack.c.l.bf16 %v1723_v48  ;;  %v1497_v61 = vunpack.c.l.bf16 %v1786_v49 }
  0x1b   :  { %v298_v59 = vmul.f32 %v1238_v52, %v1902_v1  ;;  %v1242_v62 = vunpack.c.h.bf16 %v1723_v48  ;;  %v942_v0 = vmax.f32 %v814_v55, 0.0  ;;  %v432_v3 = vadd.f32 %v1916_v7, %v297_v57  ;;  %v1728_v52 = vld [vmem:[%s2687_s0 + $0x70] sm:$0xff]  }
  0x1c   :  { %1070 = vst.msk [vmem:[#allocation2 + $0x68] sm:$0xff] %vm1056_vm0, %v941_v54  ;;  %v815_v2 = vadd.f32 %v1490_v43, %v431_v56  ;;  %v1498_v4 = vunpack.c.h.bf16 %v1786_v49  ;;  %v299_v6 = vmul.f32 %v1241_v60, %v1902_v1  ;;  %v1245_v9 = vunpack.c.l.bf16 %v1724_v58  ;;  %v1790_v43 = vld [vmem:[%s2690_s3 + $0x68] sm:$0xff]   ;;  %v1791_v57 = vld [vmem:[%s2690_s3 + $0x70] sm:$0xff]  }
  0x1d   :  { %v433_v5 = vadd.f32 %v1916_v7, %v298_v59  ;;  %v300_v8 = vmul.f32 %v1242_v62, %v1902_v1  ;;  %1071 = vst.msk [vmem:[#allocation2 + $0x70] sm:$0xff] %vm1056_vm0, %v942_v0  ;;  %v816_v12 = vadd.f32 %v1493_v51, %v432_v3  ;;  %v1501_v13 = vunpack.c.l.bf16 %v1787_v63 }
  0x1e   :  { %v943_v11 = vmax.f32 %v815_v2, 0.0  ;;  %v1246_v14 = vunpack.c.h.bf16 %v1724_v58  ;;  %v434_v16 = vadd.f32 %v1916_v7, %v299_v6  ;;  %v301_v18 = vmul.f32 %v1245_v9, %v1902_v1 }
  0x1f   :  { %v817_v15 = vadd.f32 %v1494_v53, %v433_v5  ;;  %v435_v17 = vadd.f32 %v1916_v7, %v300_v8  ;;  %v944_v20 = vmax.f32 %v816_v12, 0.0  ;;  %v1502_v22 = vunpack.c.h.bf16 %v1787_v63 }
  0x20   :  { %1072 = vst.msk [vmem:[#allocation2 + $0x78] sm:$0xff] %vm1056_vm0, %v943_v11  ;;  %v302_v21 = vmul.f32 %v1246_v14, %v1902_v1  ;;  %v1249_v23 = vunpack.c.l.bf16 %v1725_v10  ;;  %v818_v25 = vadd.f32 %v1497_v61, %v434_v16  ;;  %v436_v27 = vadd.f32 %v1916_v7, %v301_v18 }
  0x21   :  { %v945_v24 = vmax.f32 %v817_v15, 0.0  ;;  %v819_v26 = vadd.f32 %v1498_v4, %v435_v17  ;;  %1073 = vst.msk [vmem:[#allocation2 + $0x80] sm:$0xff] %vm1056_vm0, %v944_v20  ;;  %v1505_v31 = vunpack.c.l.bf16 %v1788_v19  ;;  %v1250_v32 = vunpack.c.h.bf16 %v1725_v10 }
  0x22   :  { %v437_v29 = vadd.f32 %v1916_v7, %v302_v21  ;;  %v303_v30 = vmul.f32 %v1249_v23, %v1902_v1  ;;  %v946_v34 = vmax.f32 %v818_v25, 0.0  ;;  %v820_v36 = vadd.f32 %v1501_v13, %v436_v27 }
  0x23   :  { %1074 = vst.msk [vmem:[#allocation2 + $0x88] sm:$0xff] %vm1056_vm0, %v945_v24  ;;  %v947_v35 = vmax.f32 %v819_v26, 0.0  ;;  %v1506_v37 = vunpack.c.h.bf16 %v1788_v19  ;;  %v304_v40 = vmul.f32 %v1250_v32, %v1902_v1  ;;  %v1253_v41 = vunpack.c.l.bf16 %v1726_v28 }
  0x24   :  { %v821_v38 = vadd.f32 %v1502_v22, %v437_v29  ;;  %v438_v39 = vadd.f32 %v1916_v7, %v303_v30  ;;  %1075 = vst.msk [vmem:[#allocation2 + $0x90] sm:$0xff] %vm1056_vm0, %v946_v34  ;;  %v948_v44 = vmax.f32 %v820_v36, 0.0  ;;  %v1509_v45 = vunpack.c.l.bf16 %v1789_v33 }
  0x25   :  { %1076 = vst.msk [vmem:[#allocation2 + $0x98] sm:$0xff] %vm1056_vm0, %v947_v35  ;;  %v1254_v46 = vunpack.c.h.bf16 %v1726_v28  ;;  %v1510_v47 = vunpack.c.h.bf16 %v1789_v33  ;;  %v439_v50 = vadd.f32 %v1916_v7, %v304_v40  ;;  %v305_v51 = vmul.f32 %v1253_v41, %v1902_v1 }
  0x26   :  { %v949_v48 = vmax.f32 %v821_v38, 0.0  ;;  %v822_v49 = vadd.f32 %v1505_v31, %v438_v39  ;;  %1077 = vst.msk [vmem:[#allocation2 + $0xa0] sm:$0xff] %vm1056_vm0, %v948_v44  ;;  %v1257_v54 = vunpack.c.l.bf16 %v1727_v42  ;;  %v1513_v55 = vunpack.c.l.bf16 %v1790_v43 }
  0x27   :  { %v306_v53 = vmul.f32 %v1254_v46, %v1902_v1  ;;  %v1258_v56 = vunpack.c.h.bf16 %v1727_v42 }
  0x28   :  { %9 = vsyncpa [#allocation3], 0  ;;  %1078 = vst.msk [vmem:[#allocation2 + $0xa8] sm:$0xff] %vm1056_vm0, %v949_v48  ;;  %v950_v58 = vmax.f32 %v822_v49, 0.0  ;;  %v823_v59 = vadd.f32 %v1506_v37, %v439_v50  ;;  %v440_v60 = vadd.f32 %v1916_v7, %v305_v51  ;;  %v1514_v61 = vunpack.c.h.bf16 %v1790_v43  ;;  %v1729_v3 = vld [vmem:[%s2687_s0 + $0x78] sm:$0xff]   ;;  %v1730_v22 = vld [vmem:[%s2687_s0 + $0x80] sm:$0xff]  }
  0x29   :  { %v441_v62 = vadd.f32 %v1916_v7, %v306_v53  ;;  %v307_v63 = vmul.f32 %v1257_v54, %v1902_v1  ;;  %v308_v0 = vmul.f32 %v1258_v56, %v1902_v1  ;;  %v1261_v2 = vunpack.c.l.bf16 %v1728_v52  ;;  %v1792_v13 = vld [vmem:[%s2690_s3 + $0x78] sm:$0xff]   ;;  %v1793_v27 = vld [vmem:[%s2690_s3 + $0x80] sm:$0xff]   ;;  %v1731_v36 = vld [vmem:[%s2687_s0 + $0x88] sm:$0xff]  }
  0x2a   :  { %1079 = vst.msk [vmem:[#allocation2 + $0xb0] sm:$0xff] %vm1056_vm0, %v950_v58  ;;  %v951_v4 = vmax.f32 %v823_v59, 0.0  ;;  %v824_v5 = vadd.f32 %v1509_v45, %v440_v60  ;;  %v1517_v6 = vunpack.c.l.bf16 %v1791_v57  ;;  %v1262_v8 = vunpack.c.h.bf16 %v1728_v52  ;;  %v1794_v37 = vld [vmem:[%s2690_s3 + $0x88] sm:$0xff]   ;;  %v1732_v46 = vld [vmem:[%s2687_s0 + $0x90] sm:$0xff]   ;;  %v1733_v60 = vld [vmem:[%s2687_s0 + $0x98] sm:$0xff]  }
  0x2b   :  { %v825_v9 = vadd.f32 %v1510_v47, %v441_v62  ;;  %v442_v10 = vadd.f32 %v1916_v7, %v307_v63  ;;  %v443_v11 = vadd.f32 %v1916_v7, %v308_v0  ;;  %v309_v12 = vmul.f32 %v1261_v2, %v1902_v1  ;;  %v1795_v51 = vld [vmem:[%s2690_s3 + $0x90] sm:$0xff]  }
  0x2c   :  { %1080 = vst.msk [vmem:[#allocation2 + $0xb8] sm:$0xff] %vm1056_vm0, %v951_v4  ;;  %v952_v14 = vmax.f32 %v824_v5, 0.0  ;;  %v310_v15 = vmul.f32 %v1262_v8, %v1902_v1  ;;  %v1518_v16 = vunpack.c.h.bf16 %v1791_v57  ;;  %v1265_v17 = vunpack.c.l.bf16 %v1729_v3 }
  0x2d   :  { %v953_v18 = vmax.f32 %v825_v9, 0.0  ;;  %v826_v19 = vadd.f32 %v1513_v55, %v442_v10  ;;  %v827_v20 = vadd.f32 %v1514_v61, %v443_v11  ;;  %v444_v21 = vadd.f32 %v1916_v7, %v309_v12 }
  0x2e   :  { %1081 = vst.msk [vmem:[#allocation2 + $0xc0] sm:$0xff] %vm1056_vm0, %v952_v14  ;;  %v445_v23 = vadd.f32 %v1916_v7, %v310_v15  ;;  %v311_v24 = vmul.f32 %v1265_v17, %v1902_v1  ;;  %v1521_v25 = vunpack.c.l.bf16 %v1792_v13  ;;  %v1266_v26 = vunpack.c.h.bf16 %v1729_v3 }
  0x2f   :  { %1082 = vst.msk [vmem:[#allocation2 + $0xc8] sm:$0xff] %vm1056_vm0, %v953_v18  ;;  %v954_v28 = vmax.f32 %v826_v19, 0.0  ;;  %v955_v29 = vmax.f32 %v827_v20, 0.0  ;;  %v828_v30 = vadd.f32 %v1517_v6, %v444_v21  ;;  %v1522_v31 = vunpack.c.h.bf16 %v1792_v13  ;;  %v1796_v6 = vld [vmem:[%s2690_s3 + $0x98] sm:$0xff]   ;;  %v1797_v21 = vld [vmem:[%s2690_s3 + $0xa0] sm:$0xff]  }
  0x30   :  { %v829_v32 = vadd.f32 %v1518_v16, %v445_v23  ;;  %v446_v33 = vadd.f32 %v1916_v7, %v311_v24  ;;  %v312_v34 = vmul.f32 %v1266_v26, %v1902_v1  ;;  %v1269_v35 = vunpack.c.l.bf16 %v1730_v22  ;;  %v1734_v16 = vld [vmem:[%s2687_s0 + $0xa0] sm:$0xff]  }
  0x31   :  { %1083 = vst.msk [vmem:[#allocation2 + $0xd0] sm:$0xff] %vm1056_vm0, %v954_v28  ;;  %1084 = vst.msk [vmem:[#allocation2 + $0xd8] sm:$0xff] %vm1056_vm0, %v955_v29  ;;  %v956_v38 = vmax.f32 %v828_v30, 0.0  ;;  %v1525_v39 = vunpack.c.l.bf16 %v1793_v27  ;;  %v1270_v40 = vunpack.c.h.bf16 %v1730_v22  ;;  %v1526_v41 = vunpack.c.h.bf16 %v1793_v27  ;;  %v1735_v30 = vld [vmem:[%s2687_s0 + $0xa8] sm:$0xff]  }
  0x32   :  { %v957_v42 = vmax.f32 %v829_v32, 0.0  ;;  %v830_v43 = vadd.f32 %v1521_v25, %v446_v33  ;;  %v447_v44 = vadd.f32 %v1916_v7, %v312_v34  ;;  %v313_v45 = vmul.f32 %v1269_v35, %v1902_v1 }
  0x33   :  { %1085 = vst.msk [vmem:[#allocation2 + $0xe0] sm:$0xff] %vm1056_vm0, %v956_v38  ;;  %v314_v47 = vmul.f32 %v1270_v40, %v1902_v1  ;;  %v1273_v48 = vunpack.c.l.bf16 %v1731_v36  ;;  %v1529_v49 = vunpack.c.l.bf16 %v1794_v37  ;;  %v1274_v50 = vunpack.c.h.bf16 %v1731_v36  ;;  %v1736_v40 = vld [vmem:[%s2687_s0 + $0xb0] sm:$0xff]  }
  0x34   :  { %1086 = vst.msk [vmem:[#allocation2 + $0xe8] sm:$0xff] %vm1056_vm0, %v957_v42  ;;  %v958_v52 = vmax.f32 %v830_v43, 0.0  ;;  %v831_v53 = vadd.f32 %v1522_v31, %v447_v44  ;;  %v448_v54 = vadd.f32 %v1916_v7, %v313_v45  ;;  %v1530_v55 = vunpack.c.h.bf16 %v1794_v37  ;;  %v1798_v31 = vld [vmem:[%s2690_s3 + $0xa8] sm:$0xff]   ;;  %v1799_v45 = vld [vmem:[%s2690_s3 + $0xb0] sm:$0xff]  }
  0x35   :  { %v449_v56 = vadd.f32 %v1916_v7, %v314_v47  ;;  %v315_v57 = vmul.f32 %v1273_v48, %v1902_v1  ;;  %v316_v58 = vmul.f32 %v1274_v50, %v1902_v1  ;;  %v1277_v59 = vunpack.c.l.bf16 %v1732_v46 }
  0x36   :  { %1087 = vst.msk [vmem:[#allocation2 + $0xf0] sm:$0xff] %vm1056_vm0, %v958_v52  ;;  %v959_v61 = vmax.f32 %v831_v53, 0.0  ;;  %v832_v62 = vadd.f32 %v1525_v39, %v448_v54  ;;  %v1533_v63 = vunpack.c.l.bf16 %v1795_v51  ;;  %v1278_v0 = vunpack.c.h.bf16 %v1732_v46  ;;  %v1737_v54 = vld [vmem:[%s2687_s0 + $0xb8] sm:$0xff]  }
  0x37   :  { %v833_v2 = vadd.f32 %v1526_v41, %v449_v56  ;;  %v450_v3 = vadd.f32 %v1916_v7, %v315_v57  ;;  %v451_v4 = vadd.f32 %v1916_v7, %v316_v58  ;;  %v317_v5 = vmul.f32 %v1277_v59, %v1902_v1 }
  0x38   :  { %1088 = vst.msk [vmem:[#allocation2 + $0xf8] sm:$0xff] %vm1056_vm0, %v959_v61  ;;  %v960_v8 = vmax.f32 %v832_v62, 0.0  ;;  %v318_v9 = vmul.f32 %v1278_v0, %v1902_v1  ;;  %v1534_v10 = vunpack.c.h.bf16 %v1795_v51  ;;  %v1281_v11 = vunpack.c.l.bf16 %v1733_v60 }
  0x39   :  { %v961_v12 = vmax.f32 %v833_v2, 0.0  ;;  %v834_v13 = vadd.f32 %v1529_v49, %v450_v3  ;;  %v835_v14 = vadd.f32 %v1530_v55, %v451_v4  ;;  %v452_v15 = vadd.f32 %v1916_v7, %v317_v5 }
  0x3a   :  { %1089 = vst.msk [vmem:[#allocation2 + $0x100] sm:$0xff] %vm1056_vm0, %v960_v8  ;;  %v453_v17 = vadd.f32 %v1916_v7, %v318_v9  ;;  %v319_v18 = vmul.f32 %v1281_v11, %v1902_v1  ;;  %v1537_v19 = vunpack.c.l.bf16 %v1796_v6  ;;  %v1282_v20 = vunpack.c.h.bf16 %v1733_v60 }
  0x3b   :  { %1090 = vst.msk [vmem:[#allocation2 + $0x108] sm:$0xff] %vm1056_vm0, %v961_v12  ;;  %v962_v22 = vmax.f32 %v834_v13, 0.0  ;;  %v963_v23 = vmax.f32 %v835_v14, 0.0  ;;  %v836_v24 = vadd.f32 %v1533_v63, %v452_v15  ;;  %v1538_v25 = vunpack.c.h.bf16 %v1796_v6  ;;  %v1800_v63 = vld [vmem:[%s2690_s3 + $0xb8] sm:$0xff]   ;;  %v1801_v15 = vld [vmem:[%s2690_s3 + $0xc0] sm:$0xff]  }
  0x3c   :  { %v837_v26 = vadd.f32 %v1534_v10, %v453_v17  ;;  %v454_v27 = vadd.f32 %v1916_v7, %v319_v18  ;;  %v320_v28 = vmul.f32 %v1282_v20, %v1902_v1  ;;  %v1285_v29 = vunpack.c.l.bf16 %v1734_v16  ;;  %v1738_v10 = vld [vmem:[%s2687_s0 + $0xc0] sm:$0xff]  }
  0x3d   :  { %1091 = vst.msk [vmem:[#allocation2 + $0x110] sm:$0xff] %vm1056_vm0, %v962_v22  ;;  %1092 = vst.msk [vmem:[#allocation2 + $0x118] sm:$0xff] %vm1056_vm0, %v963_v23  ;;  %v964_v32 = vmax.f32 %v836_v24, 0.0  ;;  %v1541_v33 = vunpack.c.l.bf16 %v1797_v21  ;;  %v1286_v34 = vunpack.c.h.bf16 %v1734_v16  ;;  %v1542_v35 = vunpack.c.h.bf16 %v1797_v21  ;;  %v1739_v24 = vld [vmem:[%s2687_s0 + $0xc8] sm:$0xff]  }
  0x3e   :  { %v965_v36 = vmax.f32 %v837_v26, 0.0  ;;  %v838_v37 = vadd.f32 %v1537_v19, %v454_v27  ;;  %v455_v38 = vadd.f32 %v1916_v7, %v320_v28  ;;  %v321_v39 = vmul.f32 %v1285_v29, %v1902_v1 }
  0x3f   :  { %1093 = vst.msk [vmem:[#allocation2 + $0x120] sm:$0xff] %vm1056_vm0, %v964_v32  ;;  %v322_v41 = vmul.f32 %v1286_v34, %v1902_v1  ;;  %v1289_v42 = vunpack.c.l.bf16 %v1735_v30  ;;  %v1545_v43 = vunpack.c.l.bf16 %v1798_v31  ;;  %v1290_v44 = vunpack.c.h.bf16 %v1735_v30  ;;  %v1740_v34 = vld [vmem:[%s2687_s0 + $0xd0] sm:$0xff]  }
  0x40   :  { %1094 = vst.msk [vmem:[#allocation2 + $0x128] sm:$0xff] %vm1056_vm0, %v965_v36  ;;  %v966_v46 = vmax.f32 %v838_v37, 0.0  ;;  %v839_v47 = vadd.f32 %v1538_v25, %v455_v38  ;;  %v456_v48 = vadd.f32 %v1916_v7, %v321_v39  ;;  %v1546_v49 = vunpack.c.h.bf16 %v1798_v31  ;;  %v1802_v25 = vld [vmem:[%s2690_s3 + $0xc8] sm:$0xff]   ;;  %v1803_v39 = vld [vmem:[%s2690_s3 + $0xd0] sm:$0xff]  }
  0x41   :  { %v457_v50 = vadd.f32 %v1916_v7, %v322_v41  ;;  %v323_v51 = vmul.f32 %v1289_v42, %v1902_v1  ;;  %v324_v52 = vmul.f32 %v1290_v44, %v1902_v1  ;;  %v1293_v53 = vunpack.c.l.bf16 %v1736_v40 }
  0x42   :  { %1095 = vst.msk [vmem:[#allocation2 + $0x130] sm:$0xff] %vm1056_vm0, %v966_v46  ;;  %v967_v55 = vmax.f32 %v839_v47, 0.0  ;;  %v840_v56 = vadd.f32 %v1541_v33, %v456_v48  ;;  %v1549_v57 = vunpack.c.l.bf16 %v1799_v45  ;;  %v1294_v58 = vunpack.c.h.bf16 %v1736_v40  ;;  %v1741_v48 = vld [vmem:[%s2687_s0 + $0xd8] sm:$0xff]  }
  0x43   :  { %v841_v59 = vadd.f32 %v1542_v35, %v457_v50  ;;  %v458_v60 = vadd.f32 %v1916_v7, %v323_v51  ;;  %v459_v61 = vadd.f32 %v1916_v7, %v324_v52  ;;  %v325_v62 = vmul.f32 %v1293_v53, %v1902_v1 }
  0x44   :  { %1096 = vst.msk [vmem:[#allocation2 + $0x138] sm:$0xff] %vm1056_vm0, %v967_v55  ;;  %v968_v0 = vmax.f32 %v840_v56, 0.0  ;;  %v326_v2 = vmul.f32 %v1294_v58, %v1902_v1  ;;  %v1550_v3 = vunpack.c.h.bf16 %v1799_v45  ;;  %v1297_v4 = vunpack.c.l.bf16 %v1737_v54 }
  0x45   :  { %v969_v5 = vmax.f32 %v841_v59, 0.0  ;;  %v842_v6 = vadd.f32 %v1545_v43, %v458_v60  ;;  %v843_v8 = vadd.f32 %v1546_v49, %v459_v61  ;;  %v460_v9 = vadd.f32 %v1916_v7, %v325_v62 }
  0x46   :  { %1097 = vst.msk [vmem:[#allocation2 + $0x140] sm:$0xff] %vm1056_vm0, %v968_v0  ;;  %v461_v11 = vadd.f32 %v1916_v7, %v326_v2  ;;  %v327_v12 = vmul.f32 %v1297_v4, %v1902_v1  ;;  %v1553_v13 = vunpack.c.l.bf16 %v1800_v63  ;;  %v1298_v14 = vunpack.c.h.bf16 %v1737_v54 }
  0x47   :  { %1098 = vst.msk [vmem:[#allocation2 + $0x148] sm:$0xff] %vm1056_vm0, %v969_v5  ;;  %v970_v16 = vmax.f32 %v842_v6, 0.0  ;;  %v971_v17 = vmax.f32 %v843_v8, 0.0  ;;  %v844_v18 = vadd.f32 %v1549_v57, %v460_v9  ;;  %v1554_v19 = vunpack.c.h.bf16 %v1800_v63  ;;  %v1804_v57 = vld [vmem:[%s2690_s3 + $0xd8] sm:$0xff]   ;;  %v1805_v9 = vld [vmem:[%s2690_s3 + $0xe0] sm:$0xff]  }
  0x48   :  { %v845_v20 = vadd.f32 %v1550_v3, %v461_v11  ;;  %v462_v21 = vadd.f32 %v1916_v7, %v327_v12  ;;  %v328_v22 = vmul.f32 %v1298_v14, %v1902_v1  ;;  %v1301_v23 = vunpack.c.l.bf16 %v1738_v10  ;;  %v1742_v3 = vld [vmem:[%s2687_s0 + $0xe0] sm:$0xff]  }
  0x49   :  { %1099 = vst.msk [vmem:[#allocation2 + $0x150] sm:$0xff] %vm1056_vm0, %v970_v16  ;;  %1100 = vst.msk [vmem:[#allocation2 + $0x158] sm:$0xff] %vm1056_vm0, %v971_v17  ;;  %v972_v26 = vmax.f32 %v844_v18, 0.0  ;;  %v1557_v27 = vunpack.c.l.bf16 %v1801_v15  ;;  %v1302_v28 = vunpack.c.h.bf16 %v1738_v10  ;;  %v1558_v29 = vunpack.c.h.bf16 %v1801_v15  ;;  %v1743_v18 = vld [vmem:[%s2687_s0 + $0xe8] sm:$0xff]  }
  0x4a   :  { %v973_v30 = vmax.f32 %v845_v20, 0.0  ;;  %v846_v31 = vadd.f32 %v1553_v13, %v462_v21  ;;  %v463_v32 = vadd.f32 %v1916_v7, %v328_v22  ;;  %v329_v33 = vmul.f32 %v1301_v23, %v1902_v1 }
  0x4b   :  { %1101 = vst.msk [vmem:[#allocation2 + $0x160] sm:$0xff] %vm1056_vm0, %v972_v26  ;;  %v330_v35 = vmul.f32 %v1302_v28, %v1902_v1  ;;  %v1305_v36 = vunpack.c.l.bf16 %v1739_v24  ;;  %v1561_v37 = vunpack.c.l.bf16 %v1802_v25  ;;  %v1306_v38 = vunpack.c.h.bf16 %v1739_v24  ;;  %v1744_v28 = vld [vmem:[%s2687_s0 + $0xf0] sm:$0xff]  }
  0x4c   :  { %1102 = vst.msk [vmem:[#allocation2 + $0x168] sm:$0xff] %vm1056_vm0, %v973_v30  ;;  %v974_v40 = vmax.f32 %v846_v31, 0.0  ;;  %v847_v41 = vadd.f32 %v1554_v19, %v463_v32  ;;  %v464_v42 = vadd.f32 %v1916_v7, %v329_v33  ;;  %v1562_v43 = vunpack.c.h.bf16 %v1802_v25  ;;  %v1806_v19 = vld [vmem:[%s2690_s3 + $0xe8] sm:$0xff]   ;;  %v1807_v33 = vld [vmem:[%s2690_s3 + $0xf0] sm:$0xff]  }
  0x4d   :  { %v465_v44 = vadd.f32 %v1916_v7, %v330_v35  ;;  %v331_v45 = vmul.f32 %v1305_v36, %v1902_v1  ;;  %v332_v46 = vmul.f32 %v1306_v38, %v1902_v1  ;;  %v1309_v47 = vunpack.c.l.bf16 %v1740_v34 }
  0x4e   :  { %1103 = vst.msk [vmem:[#allocation2 + $0x170] sm:$0xff] %vm1056_vm0, %v974_v40  ;;  %v975_v49 = vmax.f32 %v847_v41, 0.0  ;;  %v848_v50 = vadd.f32 %v1557_v27, %v464_v42  ;;  %v1565_v51 = vunpack.c.l.bf16 %v1803_v39  ;;  %v1310_v52 = vunpack.c.h.bf16 %v1740_v34  ;;  %v1745_v42 = vld [vmem:[%s2687_s0 + $0xf8] sm:$0xff]  }
  0x4f   :  { %v849_v53 = vadd.f32 %v1558_v29, %v465_v44  ;;  %v466_v54 = vadd.f32 %v1916_v7, %v331_v45  ;;  %v467_v55 = vadd.f32 %v1916_v7, %v332_v46  ;;  %v333_v56 = vmul.f32 %v1309_v47, %v1902_v1 }
  0x50   :  { %1104 = vst.msk [vmem:[#allocation2 + $0x178] sm:$0xff] %vm1056_vm0, %v975_v49  ;;  %v976_v58 = vmax.f32 %v848_v50, 0.0  ;;  %v334_v59 = vmul.f32 %v1310_v52, %v1902_v1  ;;  %v1566_v60 = vunpack.c.h.bf16 %v1803_v39  ;;  %v1313_v61 = vunpack.c.l.bf16 %v1741_v48 }
  0x51   :  { %v977_v62 = vmax.f32 %v849_v53, 0.0  ;;  %v850_v63 = vadd.f32 %v1561_v37, %v466_v54  ;;  %v851_v0 = vadd.f32 %v1562_v43, %v467_v55  ;;  %v468_v2 = vadd.f32 %v1916_v7, %v333_v56 }
  0x52   :  { %1105 = vst.msk [vmem:[#allocation2 + $0x180] sm:$0xff] %vm1056_vm0, %v976_v58  ;;  %v469_v4 = vadd.f32 %v1916_v7, %v334_v59  ;;  %v335_v5 = vmul.f32 %v1313_v61, %v1902_v1  ;;  %v1569_v6 = vunpack.c.l.bf16 %v1804_v57  ;;  %v1314_v8 = vunpack.c.h.bf16 %v1741_v48 }
  0x53   :  { %1106 = vst.msk [vmem:[#allocation2 + $0x188] sm:$0xff] %vm1056_vm0, %v977_v62  ;;  %v978_v10 = vmax.f32 %v850_v63, 0.0  ;;  %v979_v11 = vmax.f32 %v851_v0, 0.0  ;;  %v852_v12 = vadd.f32 %v1565_v51, %v468_v2  ;;  %v1570_v13 = vunpack.c.h.bf16 %v1804_v57  ;;  %v1808_v51 = vld [vmem:[%s2690_s3 + $0xf8] sm:$0xff]   ;;  %v1809_v2 = vld [vmem:[%s2690_s3 + $0x100] sm:$0xff]  }
  0x54   :  { %v853_v14 = vadd.f32 %v1566_v60, %v469_v4  ;;  %v470_v15 = vadd.f32 %v1916_v7, %v335_v5  ;;  %v336_v16 = vmul.f32 %v1314_v8, %v1902_v1  ;;  %v1317_v17 = vunpack.c.l.bf16 %v1742_v3  ;;  %v1746_v60 = vld [vmem:[%s2687_s0 + $0x100] sm:$0xff]  }
  0x55   :  { %1107 = vst.msk [vmem:[#allocation2 + $0x190] sm:$0xff] %vm1056_vm0, %v978_v10  ;;  %1108 = vst.msk [vmem:[#allocation2 + $0x198] sm:$0xff] %vm1056_vm0, %v979_v11  ;;  %v980_v20 = vmax.f32 %v852_v12, 0.0  ;;  %v1573_v21 = vunpack.c.l.bf16 %v1805_v9  ;;  %v1318_v22 = vunpack.c.h.bf16 %v1742_v3  ;;  %v1574_v23 = vunpack.c.h.bf16 %v1805_v9  ;;  %v1747_v12 = vld [vmem:[%s2687_s0 + $0x108] sm:$0xff]  }
  0x56   :  { %v981_v24 = vmax.f32 %v853_v14, 0.0  ;;  %v854_v25 = vadd.f32 %v1569_v6, %v470_v15  ;;  %v471_v26 = vadd.f32 %v1916_v7, %v336_v16  ;;  %v337_v27 = vmul.f32 %v1317_v17, %v1902_v1 }
  0x57   :  { %1109 = vst.msk [vmem:[#allocation2 + $0x1a0] sm:$0xff] %vm1056_vm0, %v980_v20  ;;  %v338_v29 = vmul.f32 %v1318_v22, %v1902_v1  ;;  %v1321_v30 = vunpack.c.l.bf16 %v1743_v18  ;;  %v1577_v31 = vunpack.c.l.bf16 %v1806_v19  ;;  %v1322_v32 = vunpack.c.h.bf16 %v1743_v18  ;;  %v2301_v20 = vld [vmem:[%s2688_s1] ss:$0 sm:$0xff]  ;;  %v1748_v22 = vld [vmem:[%s2687_s0 + $0x110] sm:$0xff]  }
  0x58   :  { %1110 = vst.msk [vmem:[#allocation2 + $0x1a8] sm:$0xff] %vm1056_vm0, %v981_v24  ;;  %v982_v34 = vmax.f32 %v854_v25, 0.0  ;;  %v855_v35 = vadd.f32 %v1570_v13, %v471_v26  ;;  %v472_v36 = vadd.f32 %v1916_v7, %v337_v27  ;;  %v1578_v37 = vunpack.c.h.bf16 %v1806_v19  ;;  %v1810_v13 = vld [vmem:[%s2690_s3 + $0x108] sm:$0xff]  }
  0x59   :  { %v473_v38 = vadd.f32 %v1916_v7, %v338_v29  ;;  %v339_v39 = vmul.f32 %v1321_v30, %v1902_v1  ;;  %v340_v40 = vmul.f32 %v1322_v32, %v1902_v1  ;;  %v1325_v41 = vunpack.c.l.bf16 %v1744_v28  ;;  %v2316_v29 = vld [vmem:[%s2689_s2] ss:$0 sm:$0xff] }
  0x5a   :  { %1111 = vst.msk [vmem:[#allocation2 + $0x1b0] sm:$0xff] %vm1056_vm0, %v982_v34  ;;  %v983_v43 = vmax.f32 %v855_v35, 0.0  ;;  %v856_v44 = vadd.f32 %v1573_v21, %v472_v36  ;;  %v1581_v45 = vunpack.c.l.bf16 %v1807_v33  ;;  %v1326_v46 = vunpack.c.h.bf16 %v1744_v28  ;;  %v1749_v36 = vld [vmem:[%s2687_s0 + $0x118] sm:$0xff]  }
  0x5b   :  { %v857_v47 = vadd.f32 %v1574_v23, %v473_v38  ;;  %v474_v48 = vadd.f32 %v1916_v7, %v339_v39  ;;  %v475_v49 = vadd.f32 %v1916_v7, %v340_v40  ;;  %v341_v50 = vmul.f32 %v1325_v41, %v1902_v1 }
  0x5c   :  { %1112 = vst.msk [vmem:[#allocation2 + $0x1b8] sm:$0xff] %vm1056_vm0, %v983_v43  ;;  %v984_v52 = vmax.f32 %v856_v44, 0.0  ;;  %v342_v53 = vmul.f32 %v1326_v46, %v1902_v1  ;;  %v1582_v54 = vunpack.c.h.bf16 %v1807_v33  ;;  %v1329_v55 = vunpack.c.l.bf16 %v1745_v42 }
  0x5d   :  { %v985_v56 = vmax.f32 %v857_v47, 0.0  ;;  %v858_v57 = vadd.f32 %v1577_v31, %v474_v48  ;;  %v859_v58 = vadd.f32 %v1578_v37, %v475_v49  ;;  %v476_v59 = vadd.f32 %v1916_v7, %v341_v50 }
  0x5e   :  { %1113 = vst.msk [vmem:[#allocation2 + $0x1c0] sm:$0xff] %vm1056_vm0, %v984_v52  ;;  %v477_v61 = vadd.f32 %v1916_v7, %v342_v53  ;;  %v343_v62 = vmul.f32 %v1329_v55, %v1902_v1  ;;  %v1585_v63 = vunpack.c.l.bf16 %v1808_v51  ;;  %v1330_v0 = vunpack.c.h.bf16 %v1745_v42 }
  0x5f   :  { %1114 = vst.msk [vmem:[#allocation2 + $0x1c8] sm:$0xff] %vm1056_vm0, %v985_v56  ;;  %v986_v3 = vmax.f32 %v858_v57, 0.0  ;;  %v987_v4 = vmax.f32 %v859_v58, 0.0  ;;  %v860_v5 = vadd.f32 %v1581_v45, %v476_v59  ;;  %v1586_v6 = vunpack.c.h.bf16 %v1808_v51  ;;  %v1812_v45 = vld [vmem:[%s2690_s3 + $0x118] sm:$0xff]   ;;  %v1813_v59 = vld [vmem:[%s2690_s3 + $0x120] sm:$0xff]  }
  0x60   :  { %v861_v8 = vadd.f32 %v1582_v54, %v477_v61  ;;  %v478_v9 = vadd.f32 %v1916_v7, %v343_v62  ;;  %v344_v10 = vmul.f32 %v1330_v0, %v1902_v1  ;;  %v1333_v11 = vunpack.c.l.bf16 %v1746_v60  ;;  %v1750_v54 = vld [vmem:[%s2687_s0 + $0x120] sm:$0xff]  }
  0x61   :  { %1115 = vst.msk [vmem:[#allocation2 + $0x1d0] sm:$0xff] %vm1056_vm0, %v986_v3  ;;  %1116 = vst.msk [vmem:[#allocation2 + $0x1d8] sm:$0xff] %vm1056_vm0, %v987_v4  ;;  %v988_v14 = vmax.f32 %v860_v5, 0.0  ;;  %v1589_v15 = vunpack.c.l.bf16 %v1809_v2  ;;  %v1334_v16 = vunpack.c.h.bf16 %v1746_v60  ;;  %v1590_v17 = vunpack.c.h.bf16 %v1809_v2  ;;  %v1751_v5 = vld [vmem:[%s2687_s0 + $0x128] sm:$0xff]  }
  0x62   :  { %v989_v18 = vmax.f32 %v861_v8, 0.0  ;;  %v862_v19 = vadd.f32 %v1585_v63, %v478_v9  ;;  %v479_v1 = vadd.f32 %v1916_v7, %v344_v10  ;;  %v345_v21 = vmul.f32 %v2301_v20, %v1333_v11  ;;  %v1811_v7 = vld [vmem:[%s2690_s3 + $0x110] sm:$0xff]  }
  0x63   :  { %1117 = vst.msk [vmem:[#allocation2 + $0x1e0] sm:$0xff] %vm1056_vm0, %v988_v14  ;;  %v346_v23 = vmul.f32 %v2301_v20, %v1334_v16  ;;  %v1337_v24 = vunpack.c.l.bf16 %v1747_v12  ;;  %v1593_v25 = vunpack.c.l.bf16 %v1810_v13  ;;  %v1338_v26 = vunpack.c.h.bf16 %v1747_v12  ;;  %v1752_v16 = vld [vmem:[%s2687_s0 + $0x130] sm:$0xff]  }
  0x64   :  { %1118 = vst.msk [vmem:[#allocation2 + $0x1e8] sm:$0xff] %vm1056_vm0, %v989_v18  ;;  %v990_v27 = vmax.f32 %v862_v19, 0.0  ;;  %v863_v28 = vadd.f32 %v1586_v6, %v479_v1  ;;  %v480_v30 = vadd.f32 %v2316_v29, %v345_v21  ;;  %v1594_v31 = vunpack.c.h.bf16 %v1810_v13  ;;  %v1814_v6 = vld [vmem:[%s2690_s3 + $0x128] sm:$0xff]   ;;  %v1815_v21 = vld [vmem:[%s2690_s3 + $0x130] sm:$0xff]  }
  0x65   :  { %v481_v32 = vadd.f32 %v2316_v29, %v346_v23  ;;  %v347_v33 = vmul.f32 %v2301_v20, %v1337_v24  ;;  %v348_v34 = vmul.f32 %v2301_v20, %v1338_v26  ;;  %v1341_v35 = vunpack.c.l.bf16 %v1748_v22 }
  0x66   :  { %1119 = vst.msk [vmem:[#allocation2 + $0x1f0] sm:$0xff] %vm1056_vm0, %v990_v27  ;;  %v991_v37 = vmax.f32 %v863_v28, 0.0  ;;  %v864_v38 = vadd.f32 %v1589_v15, %v480_v30  ;;  %v1597_v39 = vunpack.c.l.bf16 %v1811_v7  ;;  %v1342_v40 = vunpack.c.h.bf16 %v1748_v22  ;;  %v1753_v30 = vld [vmem:[%s2687_s0 + $0x138] sm:$0xff]  }
  0x67   :  { %v865_v41 = vadd.f32 %v1590_v17, %v481_v32  ;;  %v482_v42 = vadd.f32 %v2316_v29, %v347_v33  ;;  %v483_v43 = vadd.f32 %v2316_v29, %v348_v34  ;;  %v349_v44 = vmul.f32 %v2301_v20, %v1341_v35 }
  0x68   :  { %1120 = vst.msk [vmem:[#allocation2 + $0x1f8] sm:$0xff] %vm1056_vm0, %v991_v37  ;;  %v992_v46 = vmax.f32 %v864_v38, 0.0  ;;  %v350_v47 = vmul.f32 %v2301_v20, %v1342_v40  ;;  %v1598_v48 = vunpack.c.h.bf16 %v1811_v7  ;;  %v1345_v49 = vunpack.c.l.bf16 %v1749_v36 }
  0x69   :  { %v993_v50 = vmax.f32 %v865_v41, 0.0  ;;  %v866_v51 = vadd.f32 %v1593_v25, %v482_v42  ;;  %v867_v52 = vadd.f32 %v1594_v31, %v483_v43  ;;  %v484_v53 = vadd.f32 %v2316_v29, %v349_v44 }
  0x6a   :  { %1121 = vst.msk [vmem:[#allocation2 + $0x200] sm:$0xff] %vm1056_vm0, %v992_v46  ;;  %v485_v55 = vadd.f32 %v2316_v29, %v350_v47  ;;  %v351_v56 = vmul.f32 %v2301_v20, %v1345_v49  ;;  %v1601_v57 = vunpack.c.l.bf16 %v1812_v45  ;;  %v1346_v58 = vunpack.c.h.bf16 %v1749_v36 }
  0x6b   :  { %1122 = vst.msk [vmem:[#allocation2 + $0x208] sm:$0xff] %vm1056_vm0, %v993_v50  ;;  %v994_v60 = vmax.f32 %v866_v51, 0.0  ;;  %v995_v61 = vmax.f32 %v867_v52, 0.0  ;;  %v868_v62 = vadd.f32 %v1597_v39, %v484_v53  ;;  %v1602_v63 = vunpack.c.h.bf16 %v1812_v45  ;;  %v1816_v39 = vld [vmem:[%s2690_s3 + $0x138] sm:$0xff]   ;;  %v1817_v53 = vld [vmem:[%s2690_s3 + $0x140] sm:$0xff]  }
  0x6c   :  { %v869_v0 = vadd.f32 %v1598_v48, %v485_v55  ;;  %v486_v2 = vadd.f32 %v2316_v29, %v351_v56  ;;  %v352_v3 = vmul.f32 %v2301_v20, %v1346_v58  ;;  %v1349_v4 = vunpack.c.l.bf16 %v1750_v54  ;;  %v1754_v48 = vld [vmem:[%s2687_s0 + $0x140] sm:$0xff]  }
  0x6d   :  { %1123 = vst.msk [vmem:[#allocation2 + $0x210] sm:$0xff] %vm1056_vm0, %v994_v60  ;;  %1124 = vst.msk [vmem:[#allocation2 + $0x218] sm:$0xff] %vm1056_vm0, %v995_v61  ;;  %v996_v8 = vmax.f32 %v868_v62, 0.0  ;;  %v1605_v9 = vunpack.c.l.bf16 %v1813_v59  ;;  %v1350_v10 = vunpack.c.h.bf16 %v1750_v54  ;;  %v1606_v11 = vunpack.c.h.bf16 %v1813_v59  ;;  %v1755_v62 = vld [vmem:[%s2687_s0 + $0x148] sm:$0xff]  }
  0x6e   :  { %v997_v12 = vmax.f32 %v869_v0, 0.0  ;;  %v870_v13 = vadd.f32 %v1601_v57, %v486_v2  ;;  %v487_v14 = vadd.f32 %v2316_v29, %v352_v3  ;;  %v353_v15 = vmul.f32 %v2301_v20, %v1349_v4 }
  0x6f   :  { %1125 = vst.msk [vmem:[#allocation2 + $0x220] sm:$0xff] %vm1056_vm0, %v996_v8  ;;  %v354_v17 = vmul.f32 %v2301_v20, %v1350_v10  ;;  %v1353_v18 = vunpack.c.l.bf16 %v1751_v5  ;;  %v1609_v19 = vunpack.c.l.bf16 %v1814_v6  ;;  %v1354_v1 = vunpack.c.h.bf16 %v1751_v5  ;;  %v1756_v10 = vld [vmem:[%s2687_s0 + $0x150] sm:$0xff]  }
  0x70   :  { %1126 = vst.msk [vmem:[#allocation2 + $0x228] sm:$0xff] %vm1056_vm0, %v997_v12  ;;  %v998_v22 = vmax.f32 %v870_v13, 0.0  ;;  %v871_v23 = vadd.f32 %v1602_v63, %v487_v14  ;;  %v488_v24 = vadd.f32 %v2316_v29, %v353_v15  ;;  %v1610_v25 = vunpack.c.h.bf16 %v1814_v6  ;;  %v1818_v63 = vld [vmem:[%s2690_s3 + $0x148] sm:$0xff]   ;;  %v1819_v15 = vld [vmem:[%s2690_s3 + $0x150] sm:$0xff]  }
  0x71   :  { %v489_v26 = vadd.f32 %v2316_v29, %v354_v17  ;;  %v355_v7 = vmul.f32 %v2301_v20, %v1353_v18  ;;  %v356_v27 = vmul.f32 %v2301_v20, %v1354_v1  ;;  %v1357_v28 = vunpack.c.l.bf16 %v1752_v16 }
  0x72   :  { %1127 = vst.msk [vmem:[#allocation2 + $0x230] sm:$0xff] %vm1056_vm0, %v998_v22  ;;  %v999_v31 = vmax.f32 %v871_v23, 0.0  ;;  %v872_v32 = vadd.f32 %v1605_v9, %v488_v24  ;;  %v1613_v33 = vunpack.c.l.bf16 %v1815_v21  ;;  %v1358_v34 = vunpack.c.h.bf16 %v1752_v16  ;;  %v1757_v24 = vld [vmem:[%s2687_s0 + $0x158] sm:$0xff]  }
  0x73   :  { %v873_v35 = vadd.f32 %v1606_v11, %v489_v26  ;;  %v490_v36 = vadd.f32 %v2316_v29, %v355_v7  ;;  %v491_v37 = vadd.f32 %v2316_v29, %v356_v27  ;;  %v357_v38 = vmul.f32 %v2301_v20, %v1357_v28 }
  0x74   :  { %1128 = vst.msk [vmem:[#allocation2 + $0x238] sm:$0xff] %vm1056_vm0, %v999_v31  ;;  %v1000_v40 = vmax.f32 %v872_v32, 0.0  ;;  %v358_v41 = vmul.f32 %v2301_v20, %v1358_v34  ;;  %v1614_v42 = vunpack.c.h.bf16 %v1815_v21  ;;  %v1361_v43 = vunpack.c.l.bf16 %v1753_v30 }
  0x75   :  { %v1001_v44 = vmax.f32 %v873_v35, 0.0  ;;  %v874_v45 = vadd.f32 %v1609_v19, %v490_v36  ;;  %v875_v46 = vadd.f32 %v1610_v25, %v491_v37  ;;  %v492_v47 = vadd.f32 %v2316_v29, %v357_v38 }
  0x76   :  { %1129 = vst.msk [vmem:[#allocation2 + $0x240] sm:$0xff] %vm1056_vm0, %v1000_v40  ;;  %v493_v49 = vadd.f32 %v2316_v29, %v358_v41  ;;  %v359_v50 = vmul.f32 %v2301_v20, %v1361_v43  ;;  %v1617_v51 = vunpack.c.l.bf16 %v1816_v39  ;;  %v1362_v52 = vunpack.c.h.bf16 %v1753_v30 }
  0x77   :  { %1130 = vst.msk [vmem:[#allocation2 + $0x248] sm:$0xff] %vm1056_vm0, %v1001_v44  ;;  %v1002_v54 = vmax.f32 %v874_v45, 0.0  ;;  %v1003_v55 = vmax.f32 %v875_v46, 0.0  ;;  %v876_v56 = vadd.f32 %v1613_v33, %v492_v47  ;;  %v1618_v57 = vunpack.c.h.bf16 %v1816_v39  ;;  %v1820_v33 = vld [vmem:[%s2690_s3 + $0x158] sm:$0xff]   ;;  %v1821_v47 = vld [vmem:[%s2690_s3 + $0x160] sm:$0xff]  }
  0x78   :  { %v877_v58 = vadd.f32 %v1614_v42, %v493_v49  ;;  %v494_v59 = vadd.f32 %v2316_v29, %v359_v50  ;;  %v360_v60 = vmul.f32 %v2301_v20, %v1362_v52  ;;  %v1365_v61 = vunpack.c.l.bf16 %v1754_v48  ;;  %v1758_v42 = vld [vmem:[%s2687_s0 + $0x160] sm:$0xff]  }
  0x79   :  { %1131 = vst.msk [vmem:[#allocation2 + $0x250] sm:$0xff] %vm1056_vm0, %v1002_v54  ;;  %1132 = vst.msk [vmem:[#allocation2 + $0x258] sm:$0xff] %vm1056_vm0, %v1003_v55  ;;  %v1004_v0 = vmax.f32 %v876_v56, 0.0  ;;  %v1621_v2 = vunpack.c.l.bf16 %v1817_v53  ;;  %v1366_v3 = vunpack.c.h.bf16 %v1754_v48  ;;  %v1622_v4 = vunpack.c.h.bf16 %v1817_v53  ;;  %v1759_v56 = vld [vmem:[%s2687_s0 + $0x168] sm:$0xff]  }
  0x7a   :  { %v1005_v5 = vmax.f32 %v877_v58, 0.0  ;;  %v878_v6 = vadd.f32 %v1617_v51, %v494_v59  ;;  %v495_v8 = vadd.f32 %v2316_v29, %v360_v60  ;;  %v361_v9 = vmul.f32 %v2301_v20, %v1365_v61 }
  0x7b   :  { %1133 = vst.msk [vmem:[#allocation2 + $0x260] sm:$0xff] %vm1056_vm0, %v1004_v0  ;;  %v362_v11 = vmul.f32 %v2301_v20, %v1366_v3  ;;  %v1369_v12 = vunpack.c.l.bf16 %v1755_v62  ;;  %v1625_v13 = vunpack.c.l.bf16 %v1818_v63  ;;  %v1370_v14 = vunpack.c.h.bf16 %v1755_v62  ;;  %v1760_v3 = vld [vmem:[%s2687_s0 + $0x170] sm:$0xff]  }
  0x7c   :  { %1134 = vst.msk [vmem:[#allocation2 + $0x268] sm:$0xff] %vm1056_vm0, %v1005_v5  ;;  %v1006_v16 = vmax.f32 %v878_v6, 0.0  ;;  %v879_v17 = vadd.f32 %v1618_v57, %v495_v8  ;;  %v496_v18 = vadd.f32 %v2316_v29, %v361_v9  ;;  %v1626_v19 = vunpack.c.h.bf16 %v1818_v63  ;;  %v1822_v57 = vld [vmem:[%s2690_s3 + $0x168] sm:$0xff]   ;;  %v1823_v9 = vld [vmem:[%s2690_s3 + $0x170] sm:$0xff]  }
  0x7d   :  { %v497_v1 = vadd.f32 %v2316_v29, %v362_v11  ;;  %v363_v21 = vmul.f32 %v2301_v20, %v1369_v12  ;;  %v364_v22 = vmul.f32 %v2301_v20, %v1370_v14  ;;  %v1373_v23 = vunpack.c.l.bf16 %v1756_v10 }
  0x7e   :  { %1135 = vst.msk [vmem:[#allocation2 + $0x270] sm:$0xff] %vm1056_vm0, %v1006_v16  ;;  %v1007_v25 = vmax.f32 %v879_v17, 0.0  ;;  %v880_v26 = vadd.f32 %v1621_v2, %v496_v18  ;;  %v1629_v7 = vunpack.c.l.bf16 %v1819_v15  ;;  %v1374_v27 = vunpack.c.h.bf16 %v1756_v10  ;;  %v1761_v18 = vld [vmem:[%s2687_s0 + $0x178] sm:$0xff]  }
  0x7f   :  { %v881_v28 = vadd.f32 %v1622_v4, %v497_v1  ;;  %v498_v30 = vadd.f32 %v2316_v29, %v363_v21  ;;  %v499_v31 = vadd.f32 %v2316_v29, %v364_v22  ;;  %v365_v32 = vmul.f32 %v2301_v20, %v1373_v23 }
  0x80   :  { %1136 = vst.msk [vmem:[#allocation2 + $0x278] sm:$0xff] %vm1056_vm0, %v1007_v25  ;;  %v1008_v34 = vmax.f32 %v880_v26, 0.0  ;;  %v366_v35 = vmul.f32 %v2301_v20, %v1374_v27  ;;  %v1630_v36 = vunpack.c.h.bf16 %v1819_v15  ;;  %v1377_v37 = vunpack.c.l.bf16 %v1757_v24 }
  0x81   :  { %v1009_v38 = vmax.f32 %v881_v28, 0.0  ;;  %v882_v39 = vadd.f32 %v1625_v13, %v498_v30  ;;  %v883_v40 = vadd.f32 %v1626_v19, %v499_v31  ;;  %v500_v41 = vadd.f32 %v2316_v29, %v365_v32 }
  0x82   :  { %1137 = vst.msk [vmem:[#allocation2 + $0x280] sm:$0xff] %vm1056_vm0, %v1008_v34  ;;  %v501_v43 = vadd.f32 %v2316_v29, %v366_v35  ;;  %v367_v44 = vmul.f32 %v2301_v20, %v1377_v37  ;;  %v1633_v45 = vunpack.c.l.bf16 %v1820_v33  ;;  %v1378_v46 = vunpack.c.h.bf16 %v1757_v24 }
  0x83   :  { %1138 = vst.msk [vmem:[#allocation2 + $0x288] sm:$0xff] %vm1056_vm0, %v1009_v38  ;;  %v1010_v48 = vmax.f32 %v882_v39, 0.0  ;;  %v1011_v49 = vmax.f32 %v883_v40, 0.0  ;;  %v884_v50 = vadd.f32 %v1629_v7, %v500_v41  ;;  %v1634_v51 = vunpack.c.h.bf16 %v1820_v33  ;;  %v1824_v7 = vld [vmem:[%s2690_s3 + $0x178] sm:$0xff]   ;;  %v1825_v41 = vld [vmem:[%s2690_s3 + $0x180] sm:$0xff]  }
  0x84   :  { %v885_v52 = vadd.f32 %v1630_v36, %v501_v43  ;;  %v502_v53 = vadd.f32 %v2316_v29, %v367_v44  ;;  %v368_v54 = vmul.f32 %v2301_v20, %v1378_v46  ;;  %v1381_v55 = vunpack.c.l.bf16 %v1758_v42  ;;  %v1762_v36 = vld [vmem:[%s2687_s0 + $0x180] sm:$0xff]  }
  0x85   :  { %1139 = vst.msk [vmem:[#allocation2 + $0x290] sm:$0xff] %vm1056_vm0, %v1010_v48  ;;  %1140 = vst.msk [vmem:[#allocation2 + $0x298] sm:$0xff] %vm1056_vm0, %v1011_v49  ;;  %v1012_v58 = vmax.f32 %v884_v50, 0.0  ;;  %v1637_v59 = vunpack.c.l.bf16 %v1821_v47  ;;  %v1382_v60 = vunpack.c.h.bf16 %v1758_v42  ;;  %v1638_v61 = vunpack.c.h.bf16 %v1821_v47  ;;  %v1763_v50 = vld [vmem:[%s2687_s0 + $0x188] sm:$0xff]  }
  0x86   :  { %v1013_v62 = vmax.f32 %v885_v52, 0.0  ;;  %v886_v63 = vadd.f32 %v1633_v45, %v502_v53  ;;  %v503_v0 = vadd.f32 %v2316_v29, %v368_v54  ;;  %v369_v2 = vmul.f32 %v2301_v20, %v1381_v55 }
  0x87   :  { %1141 = vst.msk [vmem:[#allocation2 + $0x2a0] sm:$0xff] %vm1056_vm0, %v1012_v58  ;;  %v370_v4 = vmul.f32 %v2301_v20, %v1382_v60  ;;  %v1385_v5 = vunpack.c.l.bf16 %v1759_v56  ;;  %v1641_v6 = vunpack.c.l.bf16 %v1822_v57  ;;  %v1386_v8 = vunpack.c.h.bf16 %v1759_v56  ;;  %v1764_v60 = vld [vmem:[%s2687_s0 + $0x190] sm:$0xff]  }
  0x88   :  { %1142 = vst.msk [vmem:[#allocation2 + $0x2a8] sm:$0xff] %vm1056_vm0, %v1013_v62  ;;  %v1014_v10 = vmax.f32 %v886_v63, 0.0  ;;  %v887_v11 = vadd.f32 %v1634_v51, %v503_v0  ;;  %v504_v12 = vadd.f32 %v2316_v29, %v369_v2  ;;  %v1642_v13 = vunpack.c.h.bf16 %v1822_v57  ;;  %v1826_v51 = vld [vmem:[%s2690_s3 + $0x188] sm:$0xff]   ;;  %v1827_v2 = vld [vmem:[%s2690_s3 + $0x190] sm:$0xff]  }
  0x89   :  { %v505_v14 = vadd.f32 %v2316_v29, %v370_v4  ;;  %v371_v15 = vmul.f32 %v2301_v20, %v1385_v5  ;;  %v372_v16 = vmul.f32 %v2301_v20, %v1386_v8  ;;  %v1389_v17 = vunpack.c.l.bf16 %v1760_v3 }
  0x8a   :  { %1143 = vst.msk [vmem:[#allocation2 + $0x2b0] sm:$0xff] %vm1056_vm0, %v1014_v10  ;;  %v1015_v19 = vmax.f32 %v887_v11, 0.0  ;;  %v888_v1 = vadd.f32 %v1637_v59, %v504_v12  ;;  %v1645_v21 = vunpack.c.l.bf16 %v1823_v9  ;;  %v1390_v22 = vunpack.c.h.bf16 %v1760_v3  ;;  %v1765_v12 = vld [vmem:[%s2687_s0 + $0x198] sm:$0xff]  }
  0x8b   :  { %v889_v23 = vadd.f32 %v1638_v61, %v505_v14  ;;  %v506_v24 = vadd.f32 %v2316_v29, %v371_v15  ;;  %v507_v25 = vadd.f32 %v2316_v29, %v372_v16  ;;  %v373_v26 = vmul.f32 %v2301_v20, %v1389_v17 }
  0x8c   :  { %1144 = vst.msk [vmem:[#allocation2 + $0x2b8] sm:$0xff] %vm1056_vm0, %v1015_v19  ;;  %v1016_v27 = vmax.f32 %v888_v1, 0.0  ;;  %v374_v28 = vmul.f32 %v2301_v20, %v1390_v22  ;;  %v1646_v30 = vunpack.c.h.bf16 %v1823_v9  ;;  %v1393_v31 = vunpack.c.l.bf16 %v1761_v18 }
  0x8d   :  { %v1017_v32 = vmax.f32 %v889_v23, 0.0  ;;  %v890_v33 = vadd.f32 %v1641_v6, %v506_v24  ;;  %v891_v34 = vadd.f32 %v1642_v13, %v507_v25  ;;  %v508_v35 = vadd.f32 %v2316_v29, %v373_v26 }
  0x8e   :  { %1145 = vst.msk [vmem:[#allocation2 + $0x2c0] sm:$0xff] %vm1056_vm0, %v1016_v27  ;;  %v509_v37 = vadd.f32 %v2316_v29, %v374_v28  ;;  %v375_v38 = vmul.f32 %v2301_v20, %v1393_v31  ;;  %v1649_v39 = vunpack.c.l.bf16 %v1824_v7  ;;  %v1394_v40 = vunpack.c.h.bf16 %v1761_v18 }
  0x8f   :  { %1146 = vst.msk [vmem:[#allocation2 + $0x2c8] sm:$0xff] %vm1056_vm0, %v1017_v32  ;;  %v1018_v42 = vmax.f32 %v890_v33, 0.0  ;;  %v1019_v43 = vmax.f32 %v891_v34, 0.0  ;;  %v892_v44 = vadd.f32 %v1645_v21, %v508_v35  ;;  %v1650_v45 = vunpack.c.h.bf16 %v1824_v7  ;;  %v1828_v21 = vld [vmem:[%s2690_s3 + $0x198] sm:$0xff]   ;;  %v1829_v35 = vld [vmem:[%s2690_s3 + $0x1a0] sm:$0xff]  }
  0x90   :  { %v893_v46 = vadd.f32 %v1646_v30, %v509_v37  ;;  %v510_v47 = vadd.f32 %v2316_v29, %v375_v38  ;;  %v376_v48 = vmul.f32 %v2301_v20, %v1394_v40  ;;  %v1397_v49 = vunpack.c.l.bf16 %v1762_v36  ;;  %v1766_v30 = vld [vmem:[%s2687_s0 + $0x1a0] sm:$0xff]  }
  0x91   :  { %1147 = vst.msk [vmem:[#allocation2 + $0x2d0] sm:$0xff] %vm1056_vm0, %v1018_v42  ;;  %1148 = vst.msk [vmem:[#allocation2 + $0x2d8] sm:$0xff] %vm1056_vm0, %v1019_v43  ;;  %v1020_v52 = vmax.f32 %v892_v44, 0.0  ;;  %v1653_v53 = vunpack.c.l.bf16 %v1825_v41  ;;  %v1398_v54 = vunpack.c.h.bf16 %v1762_v36  ;;  %v1654_v55 = vunpack.c.h.bf16 %v1825_v41  ;;  %v1767_v44 = vld [vmem:[%s2687_s0 + $0x1a8] sm:$0xff]  }
  0x92   :  { %v1021_v56 = vmax.f32 %v893_v46, 0.0  ;;  %v894_v57 = vadd.f32 %v1649_v39, %v510_v47  ;;  %v511_v58 = vadd.f32 %v2316_v29, %v376_v48  ;;  %v377_v59 = vmul.f32 %v2301_v20, %v1397_v49 }
  0x93   :  { %1149 = vst.msk [vmem:[#allocation2 + $0x2e0] sm:$0xff] %vm1056_vm0, %v1020_v52  ;;  %v378_v61 = vmul.f32 %v2301_v20, %v1398_v54  ;;  %v1401_v62 = vunpack.c.l.bf16 %v1763_v50  ;;  %v1657_v63 = vunpack.c.l.bf16 %v1826_v51  ;;  %v1402_v0 = vunpack.c.h.bf16 %v1763_v50  ;;  %v1768_v54 = vld [vmem:[%s2687_s0 + $0x1b0] sm:$0xff]  }
  0x94   :  { %1150 = vst.msk [vmem:[#allocation2 + $0x2e8] sm:$0xff] %vm1056_vm0, %v1021_v56  ;;  %v1022_v3 = vmax.f32 %v894_v57, 0.0  ;;  %v895_v4 = vadd.f32 %v1650_v45, %v511_v58  ;;  %v512_v5 = vadd.f32 %v2316_v29, %v377_v59  ;;  %v1658_v6 = vunpack.c.h.bf16 %v1826_v51  ;;  %v1830_v45 = vld [vmem:[%s2690_s3 + $0x1a8] sm:$0xff]   ;;  %v1831_v59 = vld [vmem:[%s2690_s3 + $0x1b0] sm:$0xff]  }
  0x95   :  { %v513_v8 = vadd.f32 %v2316_v29, %v378_v61  ;;  %v379_v9 = vmul.f32 %v2301_v20, %v1401_v62  ;;  %v380_v10 = vmul.f32 %v2301_v20, %v1402_v0  ;;  %v1405_v11 = vunpack.c.l.bf16 %v1764_v60 }
  0x96   :  { %1151 = vst.msk [vmem:[#allocation2 + $0x2f0] sm:$0xff] %vm1056_vm0, %v1022_v3  ;;  %v1023_v13 = vmax.f32 %v895_v4, 0.0  ;;  %v896_v14 = vadd.f32 %v1653_v53, %v512_v5  ;;  %v1661_v15 = vunpack.c.l.bf16 %v1827_v2  ;;  %v1406_v16 = vunpack.c.h.bf16 %v1764_v60  ;;  %v1769_v5 = vld [vmem:[%s2687_s0 + $0x1b8] sm:$0xff]  }
  0x97   :  { %v897_v17 = vadd.f32 %v1654_v55, %v513_v8  ;;  %v514_v18 = vadd.f32 %v2316_v29, %v379_v9  ;;  %v515_v19 = vadd.f32 %v2316_v29, %v380_v10  ;;  %v381_v1 = vmul.f32 %v2301_v20, %v1405_v11 }
  0x98   :  { %1152 = vst.msk [vmem:[#allocation2 + $0x2f8] sm:$0xff] %vm1056_vm0, %v1023_v13  ;;  %v1024_v22 = vmax.f32 %v896_v14, 0.0  ;;  %v382_v23 = vmul.f32 %v2301_v20, %v1406_v16  ;;  %v1662_v24 = vunpack.c.h.bf16 %v1827_v2  ;;  %v1409_v25 = vunpack.c.l.bf16 %v1765_v12 }
  0x99   :  { %v1025_v26 = vmax.f32 %v897_v17, 0.0  ;;  %v898_v7 = vadd.f32 %v1657_v63, %v514_v18  ;;  %v899_v27 = vadd.f32 %v1658_v6, %v515_v19  ;;  %v516_v28 = vadd.f32 %v2316_v29, %v381_v1 }
  0x9a   :  { %1153 = vst.msk [vmem:[#allocation2 + $0x300] sm:$0xff] %vm1056_vm0, %v1024_v22  ;;  %v517_v31 = vadd.f32 %v2316_v29, %v382_v23  ;;  %v383_v32 = vmul.f32 %v2301_v20, %v1409_v25  ;;  %v1665_v33 = vunpack.c.l.bf16 %v1828_v21  ;;  %v1410_v34 = vunpack.c.h.bf16 %v1765_v12 }
  0x9b   :  { %1154 = vst.msk [vmem:[#allocation2 + $0x308] sm:$0xff] %vm1056_vm0, %v1025_v26  ;;  %v1026_v36 = vmax.f32 %v898_v7, 0.0  ;;  %v1027_v37 = vmax.f32 %v899_v27, 0.0  ;;  %v900_v38 = vadd.f32 %v1661_v15, %v516_v28  ;;  %v1666_v39 = vunpack.c.h.bf16 %v1828_v21  ;;  %v1832_v15 = vld [vmem:[%s2690_s3 + $0x1b8] sm:$0xff]   ;;  %v1833_v28 = vld [vmem:[%s2690_s3 + $0x1c0] sm:$0xff]  }
  0x9c   :  { %v901_v40 = vadd.f32 %v1662_v24, %v517_v31  ;;  %v518_v41 = vadd.f32 %v2316_v29, %v383_v32  ;;  %v384_v42 = vmul.f32 %v2301_v20, %v1410_v34  ;;  %v1413_v43 = vunpack.c.l.bf16 %v1766_v30  ;;  %v1770_v24 = vld [vmem:[%s2687_s0 + $0x1c0] sm:$0xff]  }
  0x9d   :  { %1155 = vst.msk [vmem:[#allocation2 + $0x310] sm:$0xff] %vm1056_vm0, %v1026_v36  ;;  %1156 = vst.msk [vmem:[#allocation2 + $0x318] sm:$0xff] %vm1056_vm0, %v1027_v37  ;;  %v1028_v46 = vmax.f32 %v900_v38, 0.0  ;;  %v1669_v47 = vunpack.c.l.bf16 %v1829_v35  ;;  %v1414_v48 = vunpack.c.h.bf16 %v1766_v30  ;;  %v1670_v49 = vunpack.c.h.bf16 %v1829_v35  ;;  %v1771_v38 = vld [vmem:[%s2687_s0 + $0x1c8] sm:$0xff]  }
  0x9e   :  { %v1029_v50 = vmax.f32 %v901_v40, 0.0  ;;  %v902_v51 = vadd.f32 %v1665_v33, %v518_v41  ;;  %v519_v52 = vadd.f32 %v2316_v29, %v384_v42  ;;  %v385_v53 = vmul.f32 %v2301_v20, %v1413_v43 }
  0x9f   :  { %1157 = vst.msk [vmem:[#allocation2 + $0x320] sm:$0xff] %vm1056_vm0, %v1028_v46  ;;  %v386_v55 = vmul.f32 %v2301_v20, %v1414_v48  ;;  %v1417_v56 = vunpack.c.l.bf16 %v1767_v44  ;;  %v1673_v57 = vunpack.c.l.bf16 %v1830_v45  ;;  %v1418_v58 = vunpack.c.h.bf16 %v1767_v44  ;;  %v1772_v48 = vld [vmem:[%s2687_s0 + $0x1d0] sm:$0xff]  }
  0xa0   :  { %1158 = vst.msk [vmem:[#allocation2 + $0x328] sm:$0xff] %vm1056_vm0, %v1029_v50  ;;  %v1030_v60 = vmax.f32 %v902_v51, 0.0  ;;  %v903_v61 = vadd.f32 %v1666_v39, %v519_v52  ;;  %v520_v62 = vadd.f32 %v2316_v29, %v385_v53  ;;  %v1674_v63 = vunpack.c.h.bf16 %v1830_v45  ;;  %v1834_v39 = vld [vmem:[%s2690_s3 + $0x1c8] sm:$0xff]   ;;  %v1835_v53 = vld [vmem:[%s2690_s3 + $0x1d0] sm:$0xff]  }
  0xa1   :  { %v521_v0 = vadd.f32 %v2316_v29, %v386_v55  ;;  %v387_v2 = vmul.f32 %v2301_v20, %v1417_v56  ;;  %v388_v3 = vmul.f32 %v2301_v20, %v1418_v58  ;;  %v1421_v4 = vunpack.c.l.bf16 %v1768_v54 }
  0xa2   :  { %1159 = vst.msk [vmem:[#allocation2 + $0x330] sm:$0xff] %vm1056_vm0, %v1030_v60  ;;  %v1031_v6 = vmax.f32 %v903_v61, 0.0  ;;  %v904_v8 = vadd.f32 %v1669_v47, %v520_v62  ;;  %v1677_v9 = vunpack.c.l.bf16 %v1831_v59  ;;  %v1422_v10 = vunpack.c.h.bf16 %v1768_v54  ;;  %v1773_v62 = vld [vmem:[%s2687_s0 + $0x1d8] sm:$0xff]  }
  0xa3   :  { %v905_v11 = vadd.f32 %v1670_v49, %v521_v0  ;;  %v522_v12 = vadd.f32 %v2316_v29, %v387_v2  ;;  %v523_v13 = vadd.f32 %v2316_v29, %v388_v3  ;;  %v389_v14 = vmul.f32 %v2301_v20, %v1421_v4 }
  0xa4   :  { %1160 = vst.msk [vmem:[#allocation2 + $0x338] sm:$0xff] %vm1056_vm0, %v1031_v6  ;;  %v1032_v16 = vmax.f32 %v904_v8, 0.0  ;;  %v390_v17 = vmul.f32 %v2301_v20, %v1422_v10  ;;  %v1678_v18 = vunpack.c.h.bf16 %v1831_v59  ;;  %v1425_v19 = vunpack.c.l.bf16 %v1769_v5 }
  0xa5   :  { %v1033_v1 = vmax.f32 %v905_v11, 0.0  ;;  %v906_v21 = vadd.f32 %v1673_v57, %v522_v12  ;;  %v907_v22 = vadd.f32 %v1674_v63, %v523_v13  ;;  %v524_v23 = vadd.f32 %v2316_v29, %v389_v14 }
  0xa6   :  { %1161 = vst.msk [vmem:[#allocation2 + $0x340] sm:$0xff] %vm1056_vm0, %v1032_v16  ;;  %v525_v25 = vadd.f32 %v2316_v29, %v390_v17  ;;  %v391_v26 = vmul.f32 %v2301_v20, %v1425_v19  ;;  %v1681_v7 = vunpack.c.l.bf16 %v1832_v15  ;;  %v1426_v27 = vunpack.c.h.bf16 %v1769_v5 }
  0xa7   :  { %1162 = vst.msk [vmem:[#allocation2 + $0x348] sm:$0xff] %vm1056_vm0, %v1033_v1  ;;  %v1034_v30 = vmax.f32 %v906_v21, 0.0  ;;  %v1035_v31 = vmax.f32 %v907_v22, 0.0  ;;  %v908_v32 = vadd.f32 %v1677_v9, %v524_v23  ;;  %v1682_v33 = vunpack.c.h.bf16 %v1832_v15  ;;  %v1836_v9 = vld [vmem:[%s2690_s3 + $0x1d8] sm:$0xff]   ;;  %v1837_v23 = vld [vmem:[%s2690_s3 + $0x1e0] sm:$0xff]  }
  0xa8   :  { %v909_v34 = vadd.f32 %v1678_v18, %v525_v25  ;;  %v526_v35 = vadd.f32 %v2316_v29, %v391_v26  ;;  %v392_v36 = vmul.f32 %v2301_v20, %v1426_v27  ;;  %v1429_v37 = vunpack.c.l.bf16 %v1770_v24  ;;  %v1774_v18 = vld [vmem:[%s2687_s0 + $0x1e0] sm:$0xff]  }
  0xa9   :  { %1163 = vst.msk [vmem:[#allocation2 + $0x350] sm:$0xff] %vm1056_vm0, %v1034_v30  ;;  %1164 = vst.msk [vmem:[#allocation2 + $0x358] sm:$0xff] %vm1056_vm0, %v1035_v31  ;;  %v1036_v40 = vmax.f32 %v908_v32, 0.0  ;;  %v1685_v41 = vunpack.c.l.bf16 %v1833_v28  ;;  %v1430_v42 = vunpack.c.h.bf16 %v1770_v24  ;;  %v1686_v43 = vunpack.c.h.bf16 %v1833_v28  ;;  %v1775_v32 = vld [vmem:[%s2687_s0 + $0x1e8] sm:$0xff]  }
  0xaa   :  { %v1037_v44 = vmax.f32 %v909_v34, 0.0  ;;  %v910_v45 = vadd.f32 %v1681_v7, %v526_v35  ;;  %v527_v46 = vadd.f32 %v2316_v29, %v392_v36  ;;  %v393_v47 = vmul.f32 %v2301_v20, %v1429_v37 }
  0xab   :  { %1165 = vst.msk [vmem:[#allocation2 + $0x360] sm:$0xff] %vm1056_vm0, %v1036_v40  ;;  %v394_v49 = vmul.f32 %v2301_v20, %v1430_v42  ;;  %v1433_v50 = vunpack.c.l.bf16 %v1771_v38  ;;  %v1689_v51 = vunpack.c.l.bf16 %v1834_v39  ;;  %v1434_v52 = vunpack.c.h.bf16 %v1771_v38  ;;  %v1776_v42 = vld [vmem:[%s2687_s0 + $0x1f0] sm:$0xff]  }
  0xac   :  { %1166 = vst.msk [vmem:[#allocation2 + $0x368] sm:$0xff] %vm1056_vm0, %v1037_v44  ;;  %v1038_v54 = vmax.f32 %v910_v45, 0.0  ;;  %v911_v55 = vadd.f32 %v1682_v33, %v527_v46  ;;  %v528_v56 = vadd.f32 %v2316_v29, %v393_v47  ;;  %v1690_v57 = vunpack.c.h.bf16 %v1834_v39  ;;  %v1838_v33 = vld [vmem:[%s2690_s3 + $0x1e8] sm:$0xff]   ;;  %v1839_v47 = vld [vmem:[%s2690_s3 + $0x1f0] sm:$0xff]  }
  0xad   :  { %v529_v58 = vadd.f32 %v2316_v29, %v394_v49  ;;  %v395_v59 = vmul.f32 %v2301_v20, %v1433_v50  ;;  %v396_v60 = vmul.f32 %v2301_v20, %v1434_v52  ;;  %v1437_v61 = vunpack.c.l.bf16 %v1772_v48 }
  0xae   :  { %1167 = vst.msk [vmem:[#allocation2 + $0x370] sm:$0xff] %vm1056_vm0, %v1038_v54  ;;  %v1039_v63 = vmax.f32 %v911_v55, 0.0  ;;  %v912_v0 = vadd.f32 %v1685_v41, %v528_v56  ;;  %v1693_v2 = vunpack.c.l.bf16 %v1835_v53  ;;  %v1438_v3 = vunpack.c.h.bf16 %v1772_v48  ;;  %v1777_v56 = vld [vmem:[%s2687_s0 + $0x1f8] sm:$0xff]   ;;  %s1868_s0 = smov [#allocation2]  }
  0xaf   :  { %v913_v4 = vadd.f32 %v1686_v43, %v529_v58  ;;  %v530_v5 = vadd.f32 %v2316_v29, %v395_v59  ;;  %v531_v6 = vadd.f32 %v2316_v29, %v396_v60  ;;  %v397_v8 = vmul.f32 %v2301_v20, %v1437_v61 }
  0xb0   :  { %1168 = vst.msk [vmem:[#allocation2 + $0x378] sm:$0xff] %vm1056_vm0, %v1039_v63  ;;  %v1040_v10 = vmax.f32 %v912_v0, 0.0  ;;  %v398_v11 = vmul.f32 %v2301_v20, %v1438_v3  ;;  %v1694_v12 = vunpack.c.h.bf16 %v1835_v53  ;;  %v1441_v13 = vunpack.c.l.bf16 %v1773_v62 }
  0xb1   :  { %v1041_v14 = vmax.f32 %v913_v4, 0.0  ;;  %v914_v15 = vadd.f32 %v1689_v51, %v530_v5  ;;  %v915_v16 = vadd.f32 %v1690_v57, %v531_v6  ;;  %v532_v17 = vadd.f32 %v2316_v29, %v397_v8 }
  0xb2   :  { %1169 = vst.msk [vmem:[#allocation2 + $0x380] sm:$0xff] %vm1056_vm0, %v1040_v10  ;;  %v533_v19 = vadd.f32 %v2316_v29, %v398_v11  ;;  %v399_v1 = vmul.f32 %v2301_v20, %v1441_v13  ;;  %v1697_v21 = vunpack.c.l.bf16 %v1836_v9  ;;  %v1442_v22 = vunpack.c.h.bf16 %v1773_v62 }
  0xb3   :  { %1170 = vst.msk [vmem:[#allocation2 + $0x388] sm:$0xff] %vm1056_vm0, %v1041_v14  ;;  %v1042_v24 = vmax.f32 %v914_v15, 0.0  ;;  %v1043_v25 = vmax.f32 %v915_v16, 0.0  ;;  %v916_v26 = vadd.f32 %v1693_v2, %v532_v17  ;;  %v1698_v7 = vunpack.c.h.bf16 %v1836_v9  ;;  %v1840_v2 = vld [vmem:[%s2690_s3 + $0x1f8] sm:$0xff]   ;;  %s1190_s3 = sshll.u32 %s1868_s0, 4  ;;  %s1191_s3 = int_to_ptr.vmem [resolvable:$true] %s1190_s3 }
  0xb4   :  { %v917_v27 = vadd.f32 %v1694_v12, %v533_v19  ;;  %v534_v28 = vadd.f32 %v2316_v29, %v399_v1  ;;  %v400_v30 = vmul.f32 %v2301_v20, %v1442_v22  ;;  %v1445_v31 = vunpack.c.l.bf16 %v1774_v18  ;;  %s1846_s9 = scalar_lea.vmem %s1191_s3, 16384  ;;  %p1851_p1 = scmp.lt.s32.totalorder %s1191_s3, %s1191_s3 }
  0xb5   :  { %1171 = vst.msk [vmem:[#allocation2 + $0x390] sm:$0xff] %vm1056_vm0, %v1042_v24  ;;  %1172 = vst.msk [vmem:[#allocation2 + $0x398] sm:$0xff] %vm1056_vm0, %v1043_v25  ;;  %v1044_v34 = vmax.f32 %v916_v26, 0.0  ;;  %v1701_v35 = vunpack.c.l.bf16 %v1837_v23  ;;  %v1446_v36 = vunpack.c.h.bf16 %v1774_v18  ;;  %v1702_v37 = vunpack.c.h.bf16 %v1837_v23  ;;  %p1847_p0 = scmp.ne.s32.totalorder %s1191_s3, %s1846_s9  ;;  %p1852_p2 = scmp.lt.s32.totalorder %s1846_s9, %s1846_s9 }
  0xb6   :  { %v1045_v38 = vmax.f32 %v917_v27, 0.0  ;;  %v918_v39 = vadd.f32 %v1697_v21, %v534_v28  ;;  %v535_v40 = vadd.f32 %v2316_v29, %v400_v30  ;;  %v401_v41 = vmul.f32 %v2301_v20, %v1445_v31 }
  0xb7   :  { %1173 = vst.msk [vmem:[#allocation2 + $0x3a0] sm:$0xff] %vm1056_vm0, %v1044_v34  ;;  %v402_v43 = vmul.f32 %v2301_v20, %v1446_v36  ;;  %v1449_v44 = vunpack.c.l.bf16 %v1775_v32  ;;  %v1705_v45 = vunpack.c.l.bf16 %v1838_v33  ;;  %v1450_v46 = vunpack.c.h.bf16 %v1775_v32  ;;  %p1853_p3 = por %p1852_p2, %p1851_p1 }
  0xb8   :  { %1174 = vst.msk [vmem:[#allocation2 + $0x3a8] sm:$0xff] %vm1056_vm0, %v1045_v38  ;;  %v1046_v48 = vmax.f32 %v918_v39, 0.0  ;;  %v919_v49 = vadd.f32 %v1698_v7, %v535_v40  ;;  %v536_v50 = vadd.f32 %v2316_v29, %v401_v41  ;;  %v1706_v51 = vunpack.c.h.bf16 %v1838_v33 }
  0xb9   :  { %v537_v52 = vadd.f32 %v2316_v29, %v402_v43  ;;  %v403_v53 = vmul.f32 %v2301_v20, %v1449_v44  ;;  %v404_v54 = vmul.f32 %v2301_v20, %v1450_v46  ;;  %v1453_v55 = vunpack.c.l.bf16 %v1776_v42  ;;  %p1854_p4 = pnand %p1853_p3, %p1847_p0 }
  0xba   :  { %1175 = vst.msk [vmem:[#allocation2 + $0x3b0] sm:$0xff] %vm1056_vm0, %v1046_v48  ;;  %v1047_v57 = vmax.f32 %v919_v49, 0.0  ;;  %v920_v58 = vadd.f32 %v1701_v35, %v536_v50  ;;  %v1709_v59 = vunpack.c.l.bf16 %v1839_v47  ;;  %v1454_v60 = vunpack.c.h.bf16 %v1776_v42 }
  0xbb   :  { %v921_v61 = vadd.f32 %v1702_v37, %v537_v52  ;;  %v538_v62 = vadd.f32 %v2316_v29, %v403_v53  ;;  %v539_v63 = vadd.f32 %v2316_v29, %v404_v54  ;;  %v405_v0 = vmul.f32 %v2301_v20, %v1453_v55 }
  0xbc   :  { %1176 = vst.msk [vmem:[#allocation2 + $0x3b8] sm:$0xff] %vm1056_vm0, %v1047_v57  ;;  %v1048_v3 = vmax.f32 %v920_v58, 0.0  ;;  %v406_v4 = vmul.f32 %v2301_v20, %v1454_v60  ;;  %v1710_v5 = vunpack.c.h.bf16 %v1839_v47  ;;  %v1457_v6 = vunpack.c.l.bf16 %v1777_v56 }
  0xbd   :  { %v1049_v8 = vmax.f32 %v921_v61, 0.0  ;;  %v922_v9 = vadd.f32 %v1705_v45, %v538_v62  ;;  %v923_v10 = vadd.f32 %v1706_v51, %v539_v63  ;;  %v540_v11 = vadd.f32 %v2316_v29, %v405_v0 }
  0xbe   :  { %1177 = vst.msk [vmem:[#allocation2 + $0x3c0] sm:$0xff] %vm1056_vm0, %v1048_v3  ;;  %v541_v12 = vadd.f32 %v2316_v29, %v406_v4  ;;  %v407_v13 = vmul.f32 %v2301_v20, %v1457_v6  ;;  %v1713_v14 = vunpack.c.l.bf16 %v1840_v2  ;;  %v1458_v15 = vunpack.c.h.bf16 %v1777_v56 }
  0xbf   :  { %1178 = vst.msk [vmem:[#allocation2 + $0x3c8] sm:$0xff] %vm1056_vm0, %v1049_v8  ;;  %v1050_v16 = vmax.f32 %v922_v9, 0.0  ;;  %v1051_v17 = vmax.f32 %v923_v10, 0.0  ;;  %v924_v18 = vadd.f32 %v1709_v59, %v540_v11  ;;  %v1714_v22 = vunpack.c.h.bf16 %v1840_v2 }
  0xc0   :  { %v925_v19 = vadd.f32 %v1710_v5, %v541_v12  ;;  %v542_v1 = vadd.f32 %v2316_v29, %v407_v13  ;;  %v408_v21 = vmul.f32 %v2301_v20, %v1458_v15 }
  0xc1   :  { %1179 = vst.msk [vmem:[#allocation2 + $0x3d0] sm:$0xff] %vm1056_vm0, %v1050_v16  ;;  %1180 = vst.msk [vmem:[#allocation2 + $0x3d8] sm:$0xff] %vm1056_vm0, %v1051_v17  ;;  %v1052_v23 = vmax.f32 %v924_v18, 0.0 }
  0xc2   :  { %v1053_v24 = vmax.f32 %v925_v19, 0.0  ;;  %v926_v25 = vadd.f32 %v1713_v14, %v542_v1  ;;  %v543_v26 = vadd.f32 %v2316_v29, %v408_v21 }
  0xc3   :  { %1181 = vst.msk [vmem:[#allocation2 + $0x3e0] sm:$0xff] %vm1056_vm0, %v1052_v23 }
  0xc4   :  { %1182 = vst.msk [vmem:[#allocation2 + $0x3e8] sm:$0xff] %vm1056_vm0, %v1053_v24  ;;  %v1054_v7 = vmax.f32 %v926_v25, 0.0  ;;  %v927_v27 = vadd.f32 %v1714_v22, %v543_v26 }
  0xc6   :  { %1183 = vst.msk [vmem:[#allocation2 + $0x3f0] sm:$0xff] %vm1056_vm0, %v1054_v7  ;;  %v1055_v20 = vmax.f32 %v927_v27, 0.0 }
  0xc8   :  { %1184 = vst.msk [vmem:[#allocation2 + $0x3f8] sm:$0xff] %vm1056_vm0, %v1055_v20 }
  0xc9   :  { %1857 = shalt.err (!%p1854_p4)
}
  0xca   :  { %s1869_s10 = smov 128   ;;  %s1870_s11 = smov 8  }
  0xcb   :  { %1196 = dma.vmem_to_hbm [thread:$0]  %s1191_s3, 16384, %s2691_s4, [#allocation3], %s1869_s10, %s1869_s10, %s1870_s11  }
  0xcc   :  { %1866 = dma.done.wait [#allocation3], 16384  }
  0xcd   :  { %1867 = vsyncadd [#allocation3], 4294950912 }
  0xce   :  { %1200 = vsyncpa [#allocation3], 1 }

// kernel: bottleneck_forward.4
= control target key start
LH: loop header
LB: loop body
LE: loop exit
PB: predicated region body
PF: predicated region fallthrough
CT: control target
= control target key end

     0   :  { %vm483_vm0 = vcmask 261120   ;;  %vm2256_vm1 = vcmask 1040384   ;;  %s4174_s1 = inlined_call_operand.vmem [shape: bf16[32,128], index: 1, kind: input, shape index: {}]   ;;  %s4175_s0 = inlined_call_operand.vmem [shape: bf16[1024,32], index: 0, kind: input, shape index: {}]   ;;  %s4176_s2 = inlined_call_operand.vmem [shape: bf16[1024,128], index: 2, kind: output, shape index: {0}]   ;;  %s4177_s3 = inlined_call_operand.vmem [shape: f32[2,128], index: 3, kind: output, shape index: {1}]  }
   0x1   :  { %v3240_v0 = vld [vmem:[%s4174_s1 + $0x8] sm:$0xff]   ;;  %v3241_v1 = vld [vmem:[%s4174_s1] sm:$0xff]   ;;  %v3244_v4 = vld [vmem:[%s4175_s0 + $0x10] sm:$0xff]  }
   0x2   :  { %3103 = vmatprep.subr.bf16.mxu0 %v3240_v0  ;;  %v3242_v2 = vld [vmem:[%s4175_s0] sm:$0xff]   ;;  %3235 = vmatprep.subr.bf16.mxu1 %v3240_v0  ;;  %v3243_v3 = vld [vmem:[%s4175_s0 + $0x8] sm:$0xff]   ;;  %v3245_v5 = vld [vmem:[%s4175_s0 + $0x18] sm:$0xff]  }
   0x3   :  { %3104 = vmatpush3.bf16.msra.mxu0 %v3240_v0  ;;  %3237 = vmatpush3.bf16.msra.mxu1 %v3240_v0  ;;  %v3246_v6 = vld [vmem:[%s4175_s0 + $0x20] sm:$0xff]   ;;  %v3247_v7 = vld [vmem:[%s4175_s0 + $0x28] sm:$0xff]   ;;  %v3248_v8 = vld [vmem:[%s4175_s0 + $0x30] sm:$0xff]  }
   0x4   :  { %3105 = vmatprep.subr.bf16.mxu0 %v3241_v1  ;;  %3107 = vmatprep.mubr.msk.bf16.mxu0 %vm483_vm0, %v3242_v2  ;;  %v3249_v9 = vld [vmem:[%s4175_s0 + $0x38] sm:$0xff]   ;;  %v3250_v10 = vld [vmem:[%s4175_s0 + $0x40] sm:$0xff]   ;;  %v3275_v12 = vld [vmem:[%s4175_s0 + $0x108] sm:$0xff]  }
   0x5   :  { %3236 = vmatprep.subr.bf16.mxu1 %v3241_v1  ;;  %v3274_v11 = vld [vmem:[%s4175_s0 + $0x100] sm:$0xff]   ;;  %v3276_v13 = vld [vmem:[%s4175_s0 + $0x110] sm:$0xff]   ;;  %v3251_v14 = vld [vmem:[%s4175_s0 + $0x48] sm:$0xff]  }
   0x6   :  { %3171 = vmatprep.mubr.msk.bf16.mxu1 %vm483_vm0, %v3274_v11  ;;  %v3252_v15 = vld [vmem:[%s4175_s0 + $0x50] sm:$0xff]   ;;  %v3277_v16 = vld [vmem:[%s4175_s0 + $0x118] sm:$0xff]   ;;  %v3278_v17 = vld [vmem:[%s4175_s0 + $0x120] sm:$0xff]  }
   0x7   :  { %3106 = vmatpush3.bf16.msra.mxu0 %v3241_v1  ;;  %3238 = vmatpush3.bf16.msra.mxu1 %v3241_v1  ;;  %v3253_v18 = vld [vmem:[%s4175_s0 + $0x58] sm:$0xff]   ;;  %v3254_v19 = vld [vmem:[%s4175_s0 + $0x60] sm:$0xff]   ;;  %v3279_v20 = vld [vmem:[%s4175_s0 + $0x128] sm:$0xff]  }
   0x8   :  { %v3280_v21 = vld [vmem:[%s4175_s0 + $0x130] sm:$0xff]   ;;  %v3255_v22 = vld [vmem:[%s4175_s0 + $0x68] sm:$0xff]   ;;  %v3281_v24 = vld [vmem:[%s4175_s0 + $0x138] sm:$0xff]  }
   0x9   :  { %v3256_v23 = vld [vmem:[%s4175_s0 + $0x70] sm:$0xff]   ;;  %v3282_v25 = vld [vmem:[%s4175_s0 + $0x140] sm:$0xff]   ;;  %v3257_v26 = vld [vmem:[%s4175_s0 + $0x78] sm:$0xff]  }
   0xa   :  { %3108 = vmatmul.mubr.msk.bf16.vlgmr.msra.gmra.mxu0 %vm483_vm0, %v3243_v3  ;;  %3172 = vmatmul.mubr.msk.bf16.vlgmr.msra.gmra.mxu1 %vm483_vm0, %v3275_v12  ;;  %v3258_v27 = vld [vmem:[%s4175_s0 + $0x80] sm:$0xff]   ;;  %v3283_v28 = vld [vmem:[%s4175_s0 + $0x148] sm:$0xff]   ;;  %v3284_v29 = vld [vmem:[%s4175_s0 + $0x150] sm:$0xff]  }
   0xb   :  { %3111 = vmatprep.mubr.msk.bf16.mxu0 %vm483_vm0, %v3244_v4  ;;  %3175 = vmatprep.mubr.msk.bf16.mxu1 %vm483_vm0, %v3276_v13  ;;  %v3259_v30 = vld [vmem:[%s4175_s0 + $0x88] sm:$0xff]   ;;  %v3260_v31 = vld [vmem:[%s4175_s0 + $0x90] sm:$0xff]   ;;  %v3285_v32 = vld [vmem:[%s4175_s0 + $0x158] sm:$0xff]  }
   0xc   :  { %v3286_v33 = vld [vmem:[%s4175_s0 + $0x160] sm:$0xff]   ;;  %v3261_v34 = vld [vmem:[%s4175_s0 + $0x98] sm:$0xff]   ;;  %v3287_v36 = vld [vmem:[%s4175_s0 + $0x168] sm:$0xff]  }
   0xd   :  { %v3262_v35 = vld [vmem:[%s4175_s0 + $0xa0] sm:$0xff]   ;;  %v3288_v37 = vld [vmem:[%s4175_s0 + $0x170] sm:$0xff]   ;;  %v3263_v38 = vld [vmem:[%s4175_s0 + $0xa8] sm:$0xff]  }
   0xe   :  { %v3264_v39 = vld [vmem:[%s4175_s0 + $0xb0] sm:$0xff]   ;;  %v3289_v40 = vld [vmem:[%s4175_s0 + $0x178] sm:$0xff]   ;;  %v3290_v41 = vld [vmem:[%s4175_s0 + $0x180] sm:$0xff]  }
   0xf   :  { %v3265_v42 = vld [vmem:[%s4175_s0 + $0xb8] sm:$0xff]   ;;  %v3266_v43 = vld [vmem:[%s4175_s0 + $0xc0] sm:$0xff]   ;;  %v3291_v44 = vld [vmem:[%s4175_s0 + $0x188] sm:$0xff]  }
  0x10   :  { %v3292_v45 = vld [vmem:[%s4175_s0 + $0x190] sm:$0xff]   ;;  %v3267_v46 = vld [vmem:[%s4175_s0 + $0xc8] sm:$0xff]   ;;  %v3293_v48 = vld [vmem:[%s4175_s0 + $0x198] sm:$0xff]  }
  0x11   :  { %v3268_v47 = vld [vmem:[%s4175_s0 + $0xd0] sm:$0xff]   ;;  %v3294_v49 = vld [vmem:[%s4175_s0 + $0x1a0] sm:$0xff]   ;;  %v3269_v50 = vld [vmem:[%s4175_s0 + $0xd8] sm:$0xff]  }
  0x12   :  { %3112 = vmatmul.mubr.msk.bf16.gmra.mxu0 %vm483_vm0, %v3245_v5  ;;  %3176 = vmatmul.mubr.msk.bf16.gmra.mxu1 %vm483_vm0, %v3277_v16  ;;  %v3270_v51 = vld [vmem:[%s4175_s0 + $0xe0] sm:$0xff]   ;;  %v3295_v52 = vld [vmem:[%s4175_s0 + $0x1a8] sm:$0xff]   ;;  %v3296_v53 = vld [vmem:[%s4175_s0 + $0x1b0] sm:$0xff]  }
  0x13   :  { %3115 = vmatprep.mubr.msk.bf16.mxu0 %vm483_vm0, %v3246_v6  ;;  %3179 = vmatprep.mubr.msk.bf16.mxu1 %vm483_vm0, %v3278_v17  ;;  %v3271_v54 = vld [vmem:[%s4175_s0 + $0xe8] sm:$0xff]   ;;  %v3272_v55 = vld [vmem:[%s4175_s0 + $0xf0] sm:$0xff]   ;;  %v3297_v56 = vld [vmem:[%s4175_s0 + $0x1b8] sm:$0xff]  }
  0x14   :  { %v3298_v57 = vld [vmem:[%s4175_s0 + $0x1c0] sm:$0xff]   ;;  %v3273_v58 = vld [vmem:[%s4175_s0 + $0xf8] sm:$0xff]   ;;  %v3299_v59 = vld [vmem:[%s4175_s0 + $0x1c8] sm:$0xff]  }
  0x15   :  { %v3300_v60 = vld [vmem:[%s4175_s0 + $0x1d0] sm:$0xff]   ;;  %v3301_v61 = vld [vmem:[%s4175_s0 + $0x1d8] sm:$0xff]   ;;  %v3302_v62 = vld [vmem:[%s4175_s0 + $0x1e0] sm:$0xff]  }
  0x16   :  { %v3303_v63 = vld [vmem:[%s4175_s0 + $0x1e8] sm:$0xff]   ;;  %v3304_v0 = vld [vmem:[%s4175_s0 + $0x1f0] sm:$0xff]   ;;  %v3305_v1 = vld [vmem:[%s4175_s0 + $0x1f8] sm:$0xff]  }
  0x1a   :  { %3116 = vmatmul.mubr.msk.bf16.gmra.mxu0 %vm483_vm0, %v3247_v7  ;;  %3180 = vmatmul.mubr.msk.bf16.gmra.mxu1 %vm483_vm0, %v3279_v20 }
  0x1b   :  { %3119 = vmatprep.mubr.msk.bf16.mxu0 %vm483_vm0, %v3248_v8  ;;  %3183 = vmatprep.mubr.msk.bf16.mxu1 %vm483_vm0, %v3280_v21 }
  0x22   :  { %3120 = vmatmul.mubr.msk.bf16.gmra.mxu0 %vm483_vm0, %v3249_v9  ;;  %3184 = vmatmul.mubr.msk.bf16.gmra.mxu1 %vm483_vm0, %v3281_v24 }
  0x23   :  { %3123 = vmatprep.mubr.msk.bf16.mxu0 %vm483_vm0, %v3250_v10  ;;  %3187 = vmatprep.mubr.msk.bf16.mxu1 %vm483_vm0, %v3282_v25 }
  0x2a   :  { %3124 = vmatmul.mubr.msk.bf16.gmra.mxu0 %vm483_vm0, %v3251_v14  ;;  %3188 = vmatmul.mubr.msk.bf16.gmra.mxu1 %vm483_vm0, %v3283_v28 }
  0x2b   :  { %3127 = vmatprep.mubr.msk.bf16.mxu0 %vm483_vm0, %v3252_v15  ;;  %3191 = vmatprep.mubr.msk.bf16.mxu1 %vm483_vm0, %v3284_v29 }
  0x32   :  { %3128 = vmatmul.mubr.msk.bf16.gmra.mxu0 %vm483_vm0, %v3253_v18  ;;  %3192 = vmatmul.mubr.msk.bf16.gmra.mxu1 %vm483_vm0, %v3285_v32 }
  0x33   :  { %3131 = vmatprep.mubr.msk.bf16.mxu0 %vm483_vm0, %v3254_v19  ;;  %3195 = vmatprep.mubr.msk.bf16.mxu1 %vm483_vm0, %v3286_v33 }
  0x3a   :  { %3132 = vmatmul.mubr.msk.bf16.gmra.mxu0 %vm483_vm0, %v3255_v22  ;;  %3196 = vmatmul.mubr.msk.bf16.gmra.mxu1 %vm483_vm0, %v3287_v36 }
  0x3b   :  { %3135 = vmatprep.mubr.msk.bf16.mxu0 %vm483_vm0, %v3256_v23  ;;  %3199 = vmatprep.mubr.msk.bf16.mxu1 %vm483_vm0, %v3288_v37 }
  0x42   :  { %3136 = vmatmul.mubr.msk.bf16.gmra.mxu0 %vm483_vm0, %v3257_v26  ;;  %3200 = vmatmul.mubr.msk.bf16.gmra.mxu1 %vm483_vm0, %v3289_v40 }
  0x43   :  { %3139 = vmatprep.mubr.msk.bf16.mxu0 %vm483_vm0, %v3258_v27  ;;  %3203 = vmatprep.mubr.msk.bf16.mxu1 %vm483_vm0, %v3290_v41 }
  0x4a   :  { %3140 = vmatmul.mubr.msk.bf16.gmra.mxu0 %vm483_vm0, %v3259_v30  ;;  %3204 = vmatmul.mubr.msk.bf16.gmra.mxu1 %vm483_vm0, %v3291_v44 }
  0x4b   :  { %3143 = vmatprep.mubr.msk.bf16.mxu0 %vm483_vm0, %v3260_v31  ;;  %3207 = vmatprep.mubr.msk.bf16.mxu1 %vm483_vm0, %v3292_v45 }
  0x52   :  { %3144 = vmatmul.mubr.msk.bf16.gmra.mxu0 %vm483_vm0, %v3261_v34  ;;  %3208 = vmatmul.mubr.msk.bf16.gmra.mxu1 %vm483_vm0, %v3293_v48 }
  0x53   :  { %3147 = vmatprep.mubr.msk.bf16.mxu0 %vm483_vm0, %v3262_v35  ;;  %3211 = vmatprep.mubr.msk.bf16.mxu1 %vm483_vm0, %v3294_v49 }
  0x5a   :  { %3148 = vmatmul.mubr.msk.bf16.gmra.mxu0 %vm483_vm0, %v3263_v38  ;;  %3212 = vmatmul.mubr.msk.bf16.gmra.mxu1 %vm483_vm0, %v3295_v52 }
  0x5b   :  { %3151 = vmatprep.mubr.msk.bf16.mxu0 %vm483_vm0, %v3264_v39  ;;  %3215 = vmatprep.mubr.msk.bf16.mxu1 %vm483_vm0, %v3296_v53 }
  0x62   :  { %3152 = vmatmul.mubr.msk.bf16.gmra.mxu0 %vm483_vm0, %v3265_v42  ;;  %3216 = vmatmul.mubr.msk.bf16.gmra.mxu1 %vm483_vm0, %v3297_v56 }
  0x63   :  { %3155 = vmatprep.mubr.msk.bf16.mxu0 %vm483_vm0, %v3266_v43  ;;  %3219 = vmatprep.mubr.msk.bf16.mxu1 %vm483_vm0, %v3298_v57 }
  0x6a   :  { %3156 = vmatmul.mubr.msk.bf16.gmra.mxu0 %vm483_vm0, %v3267_v46  ;;  %3220 = vmatmul.mubr.msk.bf16.gmra.mxu1 %vm483_vm0, %v3299_v59 }
  0x6b   :  { %3159 = vmatprep.mubr.msk.bf16.mxu0 %vm483_vm0, %v3268_v47  ;;  %3223 = vmatprep.mubr.msk.bf16.mxu1 %vm483_vm0, %v3300_v60 }
  0x72   :  { %3160 = vmatmul.mubr.msk.bf16.gmra.mxu0 %vm483_vm0, %v3269_v50  ;;  %3224 = vmatmul.mubr.msk.bf16.gmra.mxu1 %vm483_vm0, %v3301_v61 }
  0x73   :  { %3163 = vmatprep.mubr.msk.bf16.mxu0 %vm483_vm0, %v3270_v51  ;;  %3227 = vmatprep.mubr.msk.bf16.mxu1 %vm483_vm0, %v3302_v62 }
  0x7a   :  { %3164 = vmatmul.mubr.msk.bf16.gmra.mxu0 %vm483_vm0, %v3271_v54  ;;  %3228 = vmatmul.mubr.msk.bf16.gmra.mxu1 %vm483_vm0, %v3303_v63 }
  0x7b   :  { %3167 = vmatprep.mubr.msk.bf16.mxu0 %vm483_vm0, %v3272_v55  ;;  %3231 = vmatprep.mubr.msk.bf16.mxu1 %vm483_vm0, %v3304_v0 }
  0x82   :  { %3168 = vmatmul.mubr.msk.bf16.gmra.mxu0 %vm483_vm0, %v3273_v58  ;;  %3232 = vmatmul.mubr.msk.bf16.gmra.mxu1 %vm483_vm0, %v3305_v1 }
  0xca   :  { %v3109_v2 = vpop.f32.mrf.mxu0  ;;  %v3607_v55 = vpop.f32.mrf.mxu1 }
  0xcb   :  { %v1997_v12 = vmul.f32 %v3109_v2, %v3109_v2 }
  0xcc   :  { %v710_v3 = vpop.f32.mrf.mxu0  ;;  %v3609_v61 = vpop.f32.mrf.mxu1 }
  0xcd   :  { %v1995_v7 = vmul.f32 %v710_v3, %v710_v3 }
  0xce   :  { %v3110_v4 = vpop.f32.mrf.mxu0 }
  0xcf   :  { %v2662_v5 = vpack.c.bf16 %v3110_v4, %v3109_v2  ;;  %v1998_v16 = vmul.f32 %v3110_v4, %v3110_v4 }
  0xd0   :  { %v713_v6 = vpop.f32.mrf.mxu0 }
  0xd1   :  { %2974 = vst [vmem:[%s4176_s2 + $0x8] sm:$0xff] %v2662_v5   ;;  %v2657_v8 = vpack.c.bf16 %v713_v6, %v710_v3  ;;  %v1862_v9 = vadd.f32 %v713_v6, %v710_v3  ;;  %v1996_v10 = vmul.f32 %v713_v6, %v713_v6  ;;  %v3614_v3 = vpop.f32.mrf.mxu1 }
  0xd2   :  { %v3113_v11 = vpop.f32.mrf.mxu0  ;;  %v2822_v5 = vpack.c.bf16 %v3614_v3, %v3607_v55 }
  0xd3   :  { %2658 = vst [vmem:[%s4176_s2] sm:$0xff] %v2657_v8   ;;  %v1863_v13 = vadd.f32 %v3109_v2, %v1862_v9  ;;  %v2123_v14 = vadd.f32 %v1996_v10, %v1995_v7  ;;  %v2001_v30 = vmul.f32 %v3113_v11, %v3113_v11  ;;  %v3621_v9 = vpop.f32.mrf.mxu1 }
  0xd4   :  { %v726_v15 = vpop.f32.mrf.mxu0  ;;  %3006 = vst [vmem:[%s4176_s2 + $0x108] sm:$0xff] %v2822_v5  }
  0xd5   :  { %v2124_v17 = vadd.f32 %v2123_v14, %v1997_v12  ;;  %v1864_v18 = vadd.f32 %v3110_v4, %v1863_v13  ;;  %v1999_v21 = vmul.f32 %v726_v15, %v726_v15 }
  0xd6   :  { %v3114_v19 = vpop.f32.mrf.mxu0 }
  0xd7   :  { %v1865_v20 = vadd.f32 %v1864_v18, %v726_v15  ;;  %v2125_v22 = vadd.f32 %v2124_v17, %v1998_v16  ;;  %v2672_v23 = vpack.c.bf16 %v3114_v19, %v3113_v11  ;;  %v2002_v34 = vmul.f32 %v3114_v19, %v3114_v19 }
  0xd8   :  { %v729_v24 = vpop.f32.mrf.mxu0 }
  0xd9   :  { %v2126_v25 = vadd.f32 %v2125_v22, %v1999_v21  ;;  %2976 = vst [vmem:[%s4176_s2 + $0x18] sm:$0xff] %v2672_v23   ;;  %v2667_v26 = vpack.c.bf16 %v729_v24, %v726_v15  ;;  %v1866_v27 = vadd.f32 %v1865_v20, %v729_v24  ;;  %v2000_v28 = vmul.f32 %v729_v24, %v729_v24  ;;  %v3628_v15 = vpop.f32.mrf.mxu1 }
  0xda   :  { %v3117_v29 = vpop.f32.mrf.mxu0 }
  0xdb   :  { %2975 = vst [vmem:[%s4176_s2 + $0x10] sm:$0xff] %v2667_v26   ;;  %v1867_v31 = vadd.f32 %v3113_v11, %v1866_v27  ;;  %v2127_v32 = vadd.f32 %v2126_v25, %v2000_v28  ;;  %v2005_v48 = vmul.f32 %v3117_v29, %v3117_v29  ;;  %v2817_v11 = vpack.c.bf16 %v3621_v9, %v3609_v61  ;;  %v3633_v21 = vpop.f32.mrf.mxu1 }
  0xdc   :  { %v742_v33 = vpop.f32.mrf.mxu0 }
  0xdd   :  { %v2128_v35 = vadd.f32 %v2127_v32, %v2001_v30  ;;  %v1868_v36 = vadd.f32 %v3114_v19, %v1867_v31  ;;  %v2003_v39 = vmul.f32 %v742_v33, %v742_v33  ;;  %3005 = vst [vmem:[%s4176_s2 + $0x100] sm:$0xff] %v2817_v11   ;;  %v3638_v27 = vpop.f32.mrf.mxu1 }
  0xde   :  { %v3118_v37 = vpop.f32.mrf.mxu0 }
  0xdf   :  { %v1869_v38 = vadd.f32 %v1868_v36, %v742_v33  ;;  %v2129_v40 = vadd.f32 %v2128_v35, %v2002_v34  ;;  %v2682_v41 = vpack.c.bf16 %v3118_v37, %v3117_v29  ;;  %v2006_v52 = vmul.f32 %v3118_v37, %v3118_v37 }
  0xe0   :  { %v745_v42 = vpop.f32.mrf.mxu0 }
  0xe1   :  { %v2130_v43 = vadd.f32 %v2129_v40, %v2003_v39  ;;  %2978 = vst [vmem:[%s4176_s2 + $0x28] sm:$0xff] %v2682_v41   ;;  %v2677_v44 = vpack.c.bf16 %v745_v42, %v742_v33  ;;  %v1870_v45 = vadd.f32 %v1869_v38, %v745_v42  ;;  %v2004_v46 = vmul.f32 %v745_v42, %v745_v42  ;;  %v3645_v33 = vpop.f32.mrf.mxu1 }
  0xe2   :  { %v3121_v47 = vpop.f32.mrf.mxu0  ;;  %v2827_v35 = vpack.c.bf16 %v3645_v33, %v3633_v21 }
  0xe3   :  { %2977 = vst [vmem:[%s4176_s2 + $0x20] sm:$0xff] %v2677_v44   ;;  %v1871_v49 = vadd.f32 %v3117_v29, %v1870_v45  ;;  %v2131_v50 = vadd.f32 %v2130_v43, %v2004_v46  ;;  %v2009_v6 = vmul.f32 %v3121_v47, %v3121_v47  ;;  %v2832_v29 = vpack.c.bf16 %v3638_v27, %v3628_v15  ;;  %v3652_v39 = vpop.f32.mrf.mxu1 }
  0xe4   :  { %v758_v51 = vpop.f32.mrf.mxu0  ;;  %3007 = vst [vmem:[%s4176_s2 + $0x110] sm:$0xff] %v2827_v35  }
  0xe5   :  { %v2132_v53 = vadd.f32 %v2131_v50, %v2005_v48  ;;  %v1872_v54 = vadd.f32 %v3118_v37, %v1871_v49  ;;  %v2007_v58 = vmul.f32 %v758_v51, %v758_v51  ;;  %3008 = vst [vmem:[%s4176_s2 + $0x118] sm:$0xff] %v2832_v29   ;;  %v3657_v45 = vpop.f32.mrf.mxu1 }
  0xe6   :  { %v3122_v56 = vpop.f32.mrf.mxu0 }
  0xe7   :  { %v1873_v57 = vadd.f32 %v1872_v54, %v758_v51  ;;  %v2133_v59 = vadd.f32 %v2132_v53, %v2006_v52  ;;  %v2692_v60 = vpack.c.bf16 %v3122_v56, %v3121_v47  ;;  %v2010_v12 = vmul.f32 %v3122_v56, %v3122_v56 }
  0xe8   :  { %v761_v62 = vpop.f32.mrf.mxu0 }
  0xe9   :  { %v2134_v63 = vadd.f32 %v2133_v59, %v2007_v58  ;;  %2980 = vst [vmem:[%s4176_s2 + $0x38] sm:$0xff] %v2692_v60   ;;  %v2687_v0 = vpack.c.bf16 %v761_v62, %v758_v51  ;;  %v1874_v1 = vadd.f32 %v1873_v57, %v761_v62  ;;  %v2008_v2 = vmul.f32 %v761_v62, %v761_v62  ;;  %v3662_v51 = vpop.f32.mrf.mxu1 }
  0xea   :  { %v3125_v4 = vpop.f32.mrf.mxu0  ;;  %v2842_v53 = vpack.c.bf16 %v3662_v51, %v3652_v39 }
  0xeb   :  { %2979 = vst [vmem:[%s4176_s2 + $0x30] sm:$0xff] %v2687_v0   ;;  %v1875_v7 = vadd.f32 %v3121_v47, %v1874_v1  ;;  %v2135_v8 = vadd.f32 %v2134_v63, %v2008_v2  ;;  %v2013_v30 = vmul.f32 %v3125_v4, %v3125_v4  ;;  %v3669_v58 = vpop.f32.mrf.mxu1 }
  0xec   :  { %v774_v10 = vpop.f32.mrf.mxu0  ;;  %3010 = vst [vmem:[%s4176_s2 + $0x128] sm:$0xff] %v2842_v53   ;;  %v2837_v60 = vpack.c.bf16 %v3669_v58, %v3657_v45 }
  0xed   :  { %v2136_v13 = vadd.f32 %v2135_v8, %v2009_v6  ;;  %v1876_v14 = vadd.f32 %v3122_v56, %v1875_v7  ;;  %v2011_v18 = vmul.f32 %v774_v10, %v774_v10  ;;  %v3676_v1 = vpop.f32.mrf.mxu1 }
  0xee   :  { %v3126_v16 = vpop.f32.mrf.mxu0  ;;  %3009 = vst [vmem:[%s4176_s2 + $0x120] sm:$0xff] %v2837_v60  }
  0xef   :  { %v1877_v17 = vadd.f32 %v1876_v14, %v774_v10  ;;  %v2137_v19 = vadd.f32 %v2136_v13, %v2010_v12  ;;  %v2702_v20 = vpack.c.bf16 %v3126_v16, %v3125_v4  ;;  %v2014_v36 = vmul.f32 %v3126_v16, %v3126_v16  ;;  %v3681_v8 = vpop.f32.mrf.mxu1 }
  0xf0   :  { %v777_v22 = vpop.f32.mrf.mxu0 }
  0xf1   :  { %v2138_v23 = vadd.f32 %v2137_v19, %v2011_v18  ;;  %2982 = vst [vmem:[%s4176_s2 + $0x48] sm:$0xff] %v2702_v20   ;;  %v2697_v24 = vpack.c.bf16 %v777_v22, %v774_v10  ;;  %v1878_v25 = vadd.f32 %v1877_v17, %v777_v22  ;;  %v2012_v26 = vmul.f32 %v777_v22, %v777_v22 }
  0xf2   :  { %v3129_v28 = vpop.f32.mrf.mxu0 }
  0xf3   :  { %2981 = vst [vmem:[%s4176_s2 + $0x40] sm:$0xff] %v2697_v24   ;;  %v1879_v31 = vadd.f32 %v3125_v4, %v1878_v25  ;;  %v2139_v32 = vadd.f32 %v2138_v23, %v2012_v26  ;;  %v2017_v54 = vmul.f32 %v3129_v28, %v3129_v28 }
  0xf4   :  { %v790_v34 = vpop.f32.mrf.mxu0 }
  0xf5   :  { %v2140_v37 = vadd.f32 %v2139_v32, %v2013_v30  ;;  %v1880_v38 = vadd.f32 %v3126_v16, %v1879_v31  ;;  %v2015_v42 = vmul.f32 %v790_v34, %v790_v34  ;;  %v3686_v16 = vpop.f32.mrf.mxu1 }
  0xf6   :  { %v3130_v40 = vpop.f32.mrf.mxu0  ;;  %v2852_v18 = vpack.c.bf16 %v3686_v16, %v3676_v1 }
  0xf7   :  { %v1881_v41 = vadd.f32 %v1880_v38, %v790_v34  ;;  %v2141_v43 = vadd.f32 %v2140_v37, %v2014_v36  ;;  %v2712_v44 = vpack.c.bf16 %v3130_v40, %v3129_v28  ;;  %v2018_v62 = vmul.f32 %v3130_v40, %v3130_v40  ;;  %v3693_v23 = vpop.f32.mrf.mxu1 }
  0xf8   :  { %v793_v46 = vpop.f32.mrf.mxu0  ;;  %3012 = vst [vmem:[%s4176_s2 + $0x138] sm:$0xff] %v2852_v18   ;;  %v2847_v25 = vpack.c.bf16 %v3693_v23, %v3681_v8 }
  0xf9   :  { %v2142_v47 = vadd.f32 %v2141_v43, %v2015_v42  ;;  %2984 = vst [vmem:[%s4176_s2 + $0x58] sm:$0xff] %v2712_v44   ;;  %v2707_v48 = vpack.c.bf16 %v793_v46, %v790_v34  ;;  %v1882_v49 = vadd.f32 %v1881_v41, %v793_v46  ;;  %v2016_v50 = vmul.f32 %v793_v46, %v793_v46  ;;  %v3700_v30 = vpop.f32.mrf.mxu1 }
  0xfa   :  { %v3133_v52 = vpop.f32.mrf.mxu0  ;;  %3011 = vst [vmem:[%s4176_s2 + $0x130] sm:$0xff] %v2847_v25  }
  0xfb   :  { %2983 = vst [vmem:[%s4176_s2 + $0x50] sm:$0xff] %v2707_v48   ;;  %v1883_v56 = vadd.f32 %v3129_v28, %v1882_v49  ;;  %v2143_v57 = vadd.f32 %v2142_v47, %v2016_v50  ;;  %v2021_v19 = vmul.f32 %v3133_v52, %v3133_v52  ;;  %v3705_v37 = vpop.f32.mrf.mxu1 }
  0xfc   :  { %v806_v59 = vpop.f32.mrf.mxu0 }
  0xfd   :  { %v2144_v63 = vadd.f32 %v2143_v57, %v2017_v54  ;;  %v1884_v0 = vadd.f32 %v3130_v40, %v1883_v56  ;;  %v2019_v5 = vmul.f32 %v806_v59, %v806_v59  ;;  %v3710_v44 = vpop.f32.mrf.mxu1 }
  0xfe   :  { %v3134_v2 = vpop.f32.mrf.mxu0  ;;  %v2862_v47 = vpack.c.bf16 %v3710_v44, %v3700_v30 }
  0xff   :  { %v1885_v4 = vadd.f32 %v1884_v0, %v806_v59  ;;  %v2145_v6 = vadd.f32 %v2144_v63, %v2018_v62  ;;  %v2722_v7 = vpack.c.bf16 %v3134_v2, %v3133_v52  ;;  %v2022_v26 = vmul.f32 %v3134_v2, %v3134_v2 }
 0x100   :  { %v809_v10 = vpop.f32.mrf.mxu0  ;;  %3014 = vst [vmem:[%s4176_s2 + $0x148] sm:$0xff] %v2862_v47  }
 0x101   :  { %v2146_v11 = vadd.f32 %v2145_v6, %v2019_v5  ;;  %2986 = vst [vmem:[%s4176_s2 + $0x68] sm:$0xff] %v2722_v7   ;;  %v2717_v12 = vpack.c.bf16 %v809_v10, %v806_v59  ;;  %v1886_v13 = vadd.f32 %v1885_v4, %v809_v10  ;;  %v2020_v14 = vmul.f32 %v809_v10, %v809_v10 }
 0x102   :  { %v3137_v17 = vpop.f32.mrf.mxu0 }
 0x103   :  { %2985 = vst [vmem:[%s4176_s2 + $0x60] sm:$0xff] %v2717_v12   ;;  %v1887_v20 = vadd.f32 %v3133_v52, %v1886_v13  ;;  %v2147_v22 = vadd.f32 %v2146_v11, %v2020_v14  ;;  %v2025_v48 = vmul.f32 %v3137_v17, %v3137_v17  ;;  %v3717_v52 = vpop.f32.mrf.mxu1 }
 0x104   :  { %v822_v24 = vpop.f32.mrf.mxu0  ;;  %v2857_v54 = vpack.c.bf16 %v3717_v52, %v3705_v37 }
 0x105   :  { %v2148_v28 = vadd.f32 %v2147_v22, %v2021_v19  ;;  %v1888_v29 = vadd.f32 %v3134_v2, %v1887_v20  ;;  %v2023_v34 = vmul.f32 %v822_v24, %v822_v24  ;;  %v3724_v60 = vpop.f32.mrf.mxu1 }
 0x106   :  { %v3138_v31 = vpop.f32.mrf.mxu0  ;;  %3013 = vst [vmem:[%s4176_s2 + $0x140] sm:$0xff] %v2857_v54  }
 0x107   :  { %v1889_v32 = vadd.f32 %v1888_v29, %v822_v24  ;;  %v2149_v35 = vadd.f32 %v2148_v28, %v2022_v26  ;;  %v2732_v36 = vpack.c.bf16 %v3138_v31, %v3137_v17  ;;  %v2026_v56 = vmul.f32 %v3138_v31, %v3138_v31  ;;  %v3729_v5 = vpop.f32.mrf.mxu1 }
 0x108   :  { %v825_v38 = vpop.f32.mrf.mxu0 }
 0x109   :  { %v2150_v40 = vadd.f32 %v2149_v35, %v2023_v34  ;;  %2988 = vst [vmem:[%s4176_s2 + $0x78] sm:$0xff] %v2732_v36   ;;  %v2727_v41 = vpack.c.bf16 %v825_v38, %v822_v24  ;;  %v1890_v42 = vadd.f32 %v1889_v32, %v825_v38  ;;  %v2024_v43 = vmul.f32 %v825_v38, %v825_v38  ;;  %v3734_v13 = vpop.f32.mrf.mxu1 }
 0x10a   :  { %v3141_v46 = vpop.f32.mrf.mxu0 }
 0x10b   :  { %2987 = vst [vmem:[%s4176_s2 + $0x70] sm:$0xff] %v2727_v41   ;;  %v1891_v49 = vadd.f32 %v3137_v17, %v1890_v42  ;;  %v2151_v50 = vadd.f32 %v2150_v40, %v2024_v43  ;;  %v2872_v17 = vpack.c.bf16 %v3734_v13, %v3724_v60  ;;  %v2029_v18 = vmul.f32 %v3141_v46, %v3141_v46  ;;  %v3741_v22 = vpop.f32.mrf.mxu1 }
 0x10c   :  { %v838_v53 = vpop.f32.mrf.mxu0  ;;  %v2867_v25 = vpack.c.bf16 %v3741_v22, %v3729_v5 }
 0x10d   :  { %v2152_v57 = vadd.f32 %v2151_v50, %v2025_v48  ;;  %v1892_v59 = vadd.f32 %v3138_v31, %v1891_v49  ;;  %v2027_v0 = vmul.f32 %v838_v53, %v838_v53  ;;  %3016 = vst [vmem:[%s4176_s2 + $0x158] sm:$0xff] %v2872_v17   ;;  %v3748_v31 = vpop.f32.mrf.mxu1 }
 0x10e   :  { %v3142_v62 = vpop.f32.mrf.mxu0  ;;  %3015 = vst [vmem:[%s4176_s2 + $0x150] sm:$0xff] %v2867_v25  }
 0x10f   :  { %v1893_v63 = vadd.f32 %v1892_v59, %v838_v53  ;;  %v2153_v2 = vadd.f32 %v2152_v57, %v2026_v56  ;;  %v2742_v4 = vpack.c.bf16 %v3142_v62, %v3141_v46  ;;  %v2030_v26 = vmul.f32 %v3142_v62, %v3142_v62  ;;  %v3753_v40 = vpop.f32.mrf.mxu1 }
 0x110   :  { %v841_v6 = vpop.f32.mrf.mxu0 }
 0x111   :  { %v2154_v7 = vadd.f32 %v2153_v2, %v2027_v0  ;;  %2990 = vst [vmem:[%s4176_s2 + $0x88] sm:$0xff] %v2742_v4   ;;  %v2737_v10 = vpack.c.bf16 %v841_v6, %v838_v53  ;;  %v1894_v11 = vadd.f32 %v1893_v63, %v841_v6  ;;  %v2028_v12 = vmul.f32 %v841_v6, %v841_v6  ;;  %v3758_v48 = vpop.f32.mrf.mxu1 }
 0x112   :  { %v3145_v14 = vpop.f32.mrf.mxu0  ;;  %v2882_v50 = vpack.c.bf16 %v3758_v48, %v3748_v31 }
 0x113   :  { %2989 = vst [vmem:[%s4176_s2 + $0x80] sm:$0xff] %v2737_v10   ;;  %v1895_v19 = vadd.f32 %v3141_v46, %v1894_v11  ;;  %v2155_v20 = vadd.f32 %v2154_v7, %v2028_v12  ;;  %v2033_v53 = vmul.f32 %v3145_v14, %v3145_v14  ;;  %v3765_v57 = vpop.f32.mrf.mxu1 }
 0x114   :  { %v854_v24 = vpop.f32.mrf.mxu0  ;;  %3018 = vst [vmem:[%s4176_s2 + $0x168] sm:$0xff] %v2882_v50  }
 0x115   :  { %v2156_v28 = vadd.f32 %v2155_v20, %v2029_v18  ;;  %v1896_v29 = vadd.f32 %v3142_v62, %v1895_v19  ;;  %v2031_v35 = vmul.f32 %v854_v24, %v854_v24  ;;  %v2877_v62 = vpack.c.bf16 %v3765_v57, %v3753_v40  ;;  %v3772_v4 = vpop.f32.mrf.mxu1 }
 0x116   :  { %v3146_v32 = vpop.f32.mrf.mxu0 }
 0x117   :  { %v1897_v34 = vadd.f32 %v1896_v29, %v854_v24  ;;  %v2157_v36 = vadd.f32 %v2156_v28, %v2030_v26  ;;  %v2752_v38 = vpack.c.bf16 %v3146_v32, %v3145_v14  ;;  %v2034_v63 = vmul.f32 %v3146_v32, %v3146_v32  ;;  %3017 = vst [vmem:[%s4176_s2 + $0x160] sm:$0xff] %v2877_v62  }
 0x118   :  { %v857_v41 = vpop.f32.mrf.mxu0 }
 0x119   :  { %v2158_v42 = vadd.f32 %v2157_v36, %v2031_v35  ;;  %2992 = vst [vmem:[%s4176_s2 + $0x98] sm:$0xff] %v2752_v38   ;;  %v2747_v43 = vpack.c.bf16 %v857_v41, %v854_v24  ;;  %v1898_v46 = vadd.f32 %v1897_v34, %v857_v41  ;;  %v2032_v47 = vmul.f32 %v857_v41, %v857_v41 }
 0x11a   :  { %v3149_v49 = vpop.f32.mrf.mxu0 }
 0x11b   :  { %2991 = vst [vmem:[%s4176_s2 + $0x90] sm:$0xff] %v2747_v43   ;;  %v1899_v54 = vadd.f32 %v3145_v14, %v1898_v46  ;;  %v2159_v56 = vadd.f32 %v2158_v42, %v2032_v47  ;;  %v3777_v14 = vpop.f32.mrf.mxu1  ;;  %v2037_v29 = vmul.f32 %v3149_v49, %v3149_v49 }
 0x11c   :  { %v870_v59 = vpop.f32.mrf.mxu0 }
 0x11d   :  { %v2160_v0 = vadd.f32 %v2159_v56, %v2033_v53  ;;  %v1900_v2 = vadd.f32 %v3146_v32, %v1899_v54  ;;  %v2035_v10 = vmul.f32 %v870_v59, %v870_v59  ;;  %v3782_v25 = vpop.f32.mrf.mxu1 }
 0x11e   :  { %v3150_v6 = vpop.f32.mrf.mxu0  ;;  %v2892_v28 = vpack.c.bf16 %v3782_v25, %v3772_v4 }
 0x11f   :  { %v1901_v7 = vadd.f32 %v1900_v2, %v870_v59  ;;  %v2161_v11 = vadd.f32 %v2160_v0, %v2034_v63  ;;  %v2762_v12 = vpack.c.bf16 %v3150_v6, %v3149_v49  ;;  %v3789_v35 = vpop.f32.mrf.mxu1  ;;  %v2038_v41 = vmul.f32 %v3150_v6, %v3150_v6 }
 0x120   :  { %v873_v17 = vpop.f32.mrf.mxu0  ;;  %3020 = vst [vmem:[%s4176_s2 + $0x178] sm:$0xff] %v2892_v28   ;;  %v2887_v38 = vpack.c.bf16 %v3789_v35, %v3777_v14 }
 0x121   :  { %v2162_v18 = vadd.f32 %v2161_v11, %v2035_v10  ;;  %2994 = vst [vmem:[%s4176_s2 + $0xa8] sm:$0xff] %v2762_v12   ;;  %v2757_v19 = vpack.c.bf16 %v873_v17, %v870_v59  ;;  %v1902_v20 = vadd.f32 %v1901_v7, %v873_v17  ;;  %v2036_v24 = vmul.f32 %v873_v17, %v873_v17  ;;  %v3796_v46 = vpop.f32.mrf.mxu1 }
 0x122   :  { %v3153_v26 = vpop.f32.mrf.mxu0  ;;  %3019 = vst [vmem:[%s4176_s2 + $0x170] sm:$0xff] %v2887_v38  }
 0x123   :  { %2993 = vst [vmem:[%s4176_s2 + $0xa0] sm:$0xff] %v2757_v19   ;;  %v1903_v32 = vadd.f32 %v3149_v49, %v1902_v20  ;;  %v2163_v34 = vadd.f32 %v2162_v18, %v2036_v24  ;;  %v3801_v56 = vpop.f32.mrf.mxu1  ;;  %v2041_v11 = vmul.f32 %v3153_v26, %v3153_v26 }
 0x124   :  { %v886_v36 = vpop.f32.mrf.mxu0 }
 0x125   :  { %v2164_v42 = vadd.f32 %v2163_v34, %v2037_v29  ;;  %v1904_v43 = vadd.f32 %v3150_v6, %v1903_v32  ;;  %v2039_v50 = vmul.f32 %v886_v36, %v886_v36  ;;  %v3806_v6 = vpop.f32.mrf.mxu1 }
 0x126   :  { %v3154_v47 = vpop.f32.mrf.mxu0  ;;  %v2902_v10 = vpack.c.bf16 %v3806_v6, %v3796_v46 }
 0x127   :  { %v1905_v49 = vadd.f32 %v1904_v43, %v886_v36  ;;  %v2165_v53 = vadd.f32 %v2164_v42, %v2038_v41  ;;  %v2772_v54 = vpack.c.bf16 %v3154_v47, %v3153_v26  ;;  %v3813_v18 = vpop.f32.mrf.mxu1  ;;  %v2042_v24 = vmul.f32 %v3154_v47, %v3154_v47 }
 0x128   :  { %v889_v59 = vpop.f32.mrf.mxu0  ;;  %3022 = vst [vmem:[%s4176_s2 + $0x188] sm:$0xff] %v2902_v10   ;;  %v2897_v20 = vpack.c.bf16 %v3813_v18, %v3801_v56 }
 0x129   :  { %v2166_v62 = vadd.f32 %v2165_v53, %v2039_v50  ;;  %2996 = vst [vmem:[%s4176_s2 + $0xb8] sm:$0xff] %v2772_v54   ;;  %v2767_v63 = vpack.c.bf16 %v889_v59, %v886_v36  ;;  %v1906_v0 = vadd.f32 %v1905_v49, %v889_v59  ;;  %v2040_v2 = vmul.f32 %v889_v59, %v889_v59  ;;  %v3820_v32 = vpop.f32.mrf.mxu1 }
 0x12a   :  { %v3157_v7 = vpop.f32.mrf.mxu0  ;;  %3021 = vst [vmem:[%s4176_s2 + $0x180] sm:$0xff] %v2897_v20  }
 0x12b   :  { %2995 = vst [vmem:[%s4176_s2 + $0xb0] sm:$0xff] %v2767_v63   ;;  %v1907_v12 = vadd.f32 %v3153_v26, %v1906_v0  ;;  %v2167_v17 = vadd.f32 %v2166_v62, %v2040_v2  ;;  %v3825_v42 = vpop.f32.mrf.mxu1  ;;  %v2045_v63 = vmul.f32 %v3157_v7, %v3157_v7 }
 0x12c   :  { %v902_v19 = vpop.f32.mrf.mxu0 }
 0x12d   :  { %v2168_v28 = vadd.f32 %v2167_v17, %v2041_v11  ;;  %v1908_v29 = vadd.f32 %v3154_v47, %v1907_v12  ;;  %v2043_v36 = vmul.f32 %v902_v19, %v902_v19  ;;  %v3830_v54 = vpop.f32.mrf.mxu1 }
 0x12e   :  { %v3158_v34 = vpop.f32.mrf.mxu0  ;;  %v2912_v62 = vpack.c.bf16 %v3830_v54, %v3820_v32 }
 0x12f   :  { %v1909_v26 = vadd.f32 %v1908_v29, %v902_v19  ;;  %v2169_v38 = vadd.f32 %v2168_v28, %v2042_v24  ;;  %v2782_v41 = vpack.c.bf16 %v3158_v34, %v3157_v7  ;;  %v3837_v10 = vpop.f32.mrf.mxu1  ;;  %v2046_v17 = vmul.f32 %v3158_v34, %v3158_v34 }
 0x130   :  { %v905_v43 = vpop.f32.mrf.mxu0  ;;  %3024 = vst [vmem:[%s4176_s2 + $0x198] sm:$0xff] %v2912_v62   ;;  %v2907_v12 = vpack.c.bf16 %v3837_v10, %v3825_v42 }
 0x131   :  { %v2170_v49 = vadd.f32 %v2169_v38, %v2043_v36  ;;  %2998 = vst [vmem:[%s4176_s2 + $0xc8] sm:$0xff] %v2782_v41   ;;  %v2777_v47 = vpack.c.bf16 %v905_v43, %v902_v19  ;;  %v1910_v50 = vadd.f32 %v1909_v26, %v905_v43  ;;  %v2044_v53 = vmul.f32 %v905_v43, %v905_v43  ;;  %v3844_v24 = vpop.f32.mrf.mxu1 }
 0x132   :  { %v3161_v59 = vpop.f32.mrf.mxu0  ;;  %3023 = vst [vmem:[%s4176_s2 + $0x190] sm:$0xff] %v2907_v12  }
 0x133   :  { %2997 = vst [vmem:[%s4176_s2 + $0xc0] sm:$0xff] %v2777_v47   ;;  %v1911_v0 = vadd.f32 %v3157_v7, %v1910_v50  ;;  %v2171_v2 = vadd.f32 %v2170_v49, %v2044_v53  ;;  %v3849_v38 = vpop.f32.mrf.mxu1 }
 0x134   :  { %v918_v11 = vpop.f32.mrf.mxu0 }
 0x135   :  { %v2172_v19 = vadd.f32 %v2171_v2, %v2045_v63  ;;  %v1912_v20 = vadd.f32 %v3158_v34, %v1911_v0  ;;  %v2047_v29 = vmul.f32 %v918_v11, %v918_v11  ;;  %v3854_v50 = vpop.f32.mrf.mxu1  ;;  %v2049_v63 = vmul.f32 %v3161_v59, %v3161_v59 }
 0x136   :  { %v3162_v28 = vpop.f32.mrf.mxu0  ;;  %4184 = vst [vmem:[#allocation2_spill] sm:$0xff] %v3854_v50  ;;  %v2922_v62 = vpack.c.bf16 %v3854_v50, %v3844_v24 }
 0x137   :  { %v1913_v7 = vadd.f32 %v1912_v20, %v918_v11  ;;  %v2173_v26 = vadd.f32 %v2172_v19, %v2046_v17  ;;  %v2792_v36 = vpack.c.bf16 %v3162_v28, %v3161_v59  ;;  %v3861_v12 = vpop.f32.mrf.mxu1  ;;  %v2050_v19 = vmul.f32 %v3162_v28, %v3162_v28 }
 0x138   :  { %v921_v41 = vpop.f32.mrf.mxu0  ;;  %3026 = vst [vmem:[%s4176_s2 + $0x1a8] sm:$0xff] %v2922_v62  }
 0x139   :  { %v2174_v43 = vadd.f32 %v2173_v26, %v2047_v29  ;;  %3000 = vst [vmem:[%s4176_s2 + $0xd8] sm:$0xff] %v2792_v36   ;;  %v2787_v34 = vpack.c.bf16 %v921_v41, %v918_v11  ;;  %v1914_v49 = vadd.f32 %v1913_v7, %v921_v41  ;;  %v2048_v47 = vmul.f32 %v921_v41, %v921_v41  ;;  %v3868_v29 = vpop.f32.mrf.mxu1 }
 0x13a   :  { %v3165_v53 = vpop.f32.mrf.mxu0  ;;  %v2917_v11 = vpack.c.bf16 %v3861_v12, %v3849_v38  ;;  %4185 = vst [vmem:[#allocation3_spill] sm:$0xff] %v3868_v29 }
 0x13b   :  { %2999 = vst [vmem:[%s4176_s2 + $0xd0] sm:$0xff] %v2787_v34   ;;  %v1915_v0 = vadd.f32 %v3161_v59, %v1914_v49  ;;  %v2175_v2 = vadd.f32 %v2174_v43, %v2048_v47  ;;  %v3873_v34 = vpop.f32.mrf.mxu1 }
 0x13c   :  { %v934_v17 = vpop.f32.mrf.mxu0  ;;  %3025 = vst [vmem:[%s4176_s2 + $0x1a0] sm:$0xff] %v2917_v11  }
 0x13d   :  { %v2176_v20 = vadd.f32 %v2175_v2, %v2049_v63  ;;  %v1916_v7 = vadd.f32 %v3162_v28, %v1915_v0  ;;  %v2051_v36 = vmul.f32 %v934_v17, %v934_v17  ;;  %v3878_v0 = vpop.f32.mrf.mxu1 }
 0x13e   :  { %v3166_v26 = vpop.f32.mrf.mxu0  ;;  %4186 = vst [vmem:[#allocation4_spill] sm:$0xff] %v3878_v0  ;;  %v2932_v11 = vpack.c.bf16 %v3878_v0, %v3868_v29 }
 0x13f   :  { %v1917_v59 = vadd.f32 %v1916_v7, %v934_v17  ;;  %v2177_v41 = vadd.f32 %v2176_v20, %v2050_v19  ;;  %v2802_v43 = vpack.c.bf16 %v3166_v26, %v3165_v53  ;;  %v2053_v7 = vmul.f32 %v3165_v53, %v3165_v53 }
 0x140   :  { %v937_v49 = vpop.f32.mrf.mxu0  ;;  %3028 = vst [vmem:[%s4176_s2 + $0x1b8] sm:$0xff] %v2932_v11  }
 0x141   :  { %v2178_v47 = vadd.f32 %v2177_v41, %v2051_v36  ;;  %3002 = vst [vmem:[%s4176_s2 + $0xe8] sm:$0xff] %v2802_v43   ;;  %v2797_v28 = vpack.c.bf16 %v937_v49, %v934_v17  ;;  %v1918_v62 = vadd.f32 %v1917_v59, %v937_v49  ;;  %v2052_v63 = vmul.f32 %v937_v49, %v937_v49  ;;  %v3885_v36 = vpop.f32.mrf.mxu1 }
 0x142   :  { %v3169_v2 = vpop.f32.mrf.mxu0  ;;  %v2927_v17 = vpack.c.bf16 %v3885_v36, %v3873_v34  ;;  %v2054_v59 = vmul.f32 %v3166_v26, %v3166_v26 }
 0x143   :  { %3001 = vst [vmem:[%s4176_s2 + $0xe0] sm:$0xff] %v2797_v28   ;;  %v1919_v19 = vadd.f32 %v3165_v53, %v1918_v62  ;;  %v2179_v20 = vadd.f32 %v2178_v47, %v2052_v63  ;;  %v3892_v0 = vpop.f32.mrf.mxu1 }
 0x144   :  { %v950_v41 = vpop.f32.mrf.mxu0  ;;  %3027 = vst [vmem:[%s4176_s2 + $0x1b0] sm:$0xff] %v2927_v17  }
 0x145   :  { %v2180_v43 = vadd.f32 %v2179_v20, %v2053_v7  ;;  %v1920_v49 = vadd.f32 %v3166_v26, %v1919_v19  ;;  %v2055_v47 = vmul.f32 %v950_v41, %v950_v41  ;;  %v3897_v63 = vpop.f32.mrf.mxu1 }
 0x146   :  { %v3170_v29 = vpop.f32.mrf.mxu0 }
 0x147   :  { %v1921_v53 = vadd.f32 %v1920_v49, %v950_v41  ;;  %v2181_v28 = vadd.f32 %v2180_v43, %v2054_v59  ;;  %v2812_v62 = vpack.c.bf16 %v3170_v29, %v3169_v2  ;;  %v3902_v20 = vpop.f32.mrf.mxu1  ;;  %v2057_v49 = vmul.f32 %v3169_v2, %v3169_v2 }
 0x148   :  { %v953_v11 = vpop.f32.mrf.mxu0  ;;  %v2942_v17 = vpack.c.bf16 %v3902_v20, %v3892_v0 }
 0x149   :  { %v2182_v50 = vadd.f32 %v2181_v28, %v2055_v47  ;;  %3004 = vst [vmem:[%s4176_s2 + $0xf8] sm:$0xff] %v2812_v62   ;;  %v2807_v26 = vpack.c.bf16 %v953_v11, %v950_v41  ;;  %v1922_v7 = vadd.f32 %v1921_v53, %v953_v11  ;;  %v2056_v19 = vmul.f32 %v953_v11, %v953_v11  ;;  %v3909_v47 = vpop.f32.mrf.mxu1 }
 0x14a   :  { %v3306_v28 = vmov 0.0   ;;  %3030 = vst [vmem:[%s4176_s2 + $0x1c8] sm:$0xff] %v2942_v17   ;;  %v2937_v41 = vpack.c.bf16 %v3909_v47, %v3897_v63  ;;  %v2058_v53 = vmul.f32 %v3170_v29, %v3170_v29 }
 0x14b   :  { %3003 = vst [vmem:[%s4176_s2 + $0xf0] sm:$0xff] %v2807_v26   ;;  %v1923_v59 = vadd.f32 %v3169_v2, %v1922_v7  ;;  %v2183_v43 = vadd.f32 %v2182_v50, %v2056_v19  ;;  %18 = vst [vmem:[%s4177_s3] sm:$0x3] %v3306_v28  ;;  %v3919_v26 = vpop.f32.mrf.mxu1  ;;  %v2059_v50 = vmul.f32 %v3609_v61, %v3609_v61 }
 0x14c   :  { %3029 = vst [vmem:[%s4176_s2 + $0x1c0] sm:$0xff] %v2937_v41  }
 0x14d   :  { %v1924_v62 = vadd.f32 %v3170_v29, %v1923_v59  ;;  %v2184_v11 = vadd.f32 %v2183_v43, %v2057_v49  ;;  %v3927_v19 = vpop.f32.mrf.mxu1  ;;  %v2060_v29 = vmul.f32 %v3621_v9, %v3621_v9  ;;  %v2061_v43 = vmul.f32 %v3607_v55, %v3607_v55 }
 0x14f   :  { %v1925_v2 = vadd.f32 %v1924_v62, %v3609_v61  ;;  %v2185_v7 = vadd.f32 %v2184_v11, %v2058_v53  ;;  %v3932_v49 = vpop.f32.mrf.mxu1  ;;  %v2062_v62 = vmul.f32 %v3614_v3, %v3614_v3 }
 0x150   :  { %v2952_v59 = vpack.c.bf16 %v3932_v49, %v3919_v26 }
 0x151   :  { %v2186_v17 = vadd.f32 %v2185_v7, %v2059_v50  ;;  %v1926_v28 = vadd.f32 %v1925_v2, %v3621_v9  ;;  %v3939_v53 = vpop.f32.mrf.mxu1  ;;  %v2063_v7 = vmul.f32 %v3633_v21, %v3633_v21 }
 0x152   :  { %3032 = vst [vmem:[%s4176_s2 + $0x1d8] sm:$0xff] %v2952_v59   ;;  %v2947_v9 = vpack.c.bf16 %v3939_v53, %v3927_v19 }
 0x153   :  { %v1927_v41 = vadd.f32 %v3607_v55, %v1926_v28  ;;  %v2187_v61 = vadd.f32 %v2186_v17, %v2060_v29  ;;  %v3949_v2 = vpop.f32.mrf.mxu1 }
 0x154   :  { %3031 = vst [vmem:[%s4176_s2 + $0x1d0] sm:$0xff] %v2947_v9  }
 0x155   :  { %v2188_v11 = vadd.f32 %v2187_v61, %v2061_v43  ;;  %v1928_v50 = vadd.f32 %v3614_v3, %v1927_v41  ;;  %v3957_v28 = vpop.f32.mrf.mxu1  ;;  %v2064_v3 = vmul.f32 %v3645_v33, %v3645_v33  ;;  %v2065_v61 = vmul.f32 %v3628_v15, %v3628_v15 }
 0x157   :  { %v1929_v55 = vadd.f32 %v1928_v50, %v3633_v21  ;;  %v2189_v17 = vadd.f32 %v2188_v11, %v2062_v62  ;;  %v3962_v43 = vpop.f32.mrf.mxu1  ;;  %v2066_v11 = vmul.f32 %v3638_v27, %v3638_v27 }
 0x158   :  { %v2962_v41 = vpack.c.bf16 %v3962_v43, %v3949_v2 }
 0x159   :  { %v2190_v29 = vadd.f32 %v2189_v17, %v2063_v7  ;;  %v1930_v59 = vadd.f32 %v1929_v55, %v3645_v33  ;;  %v3969_v62 = vpop.f32.mrf.mxu1  ;;  %v2067_v17 = vmul.f32 %v3657_v45, %v3657_v45 }
 0x15a   :  { %3034 = vst [vmem:[%s4176_s2 + $0x1e8] sm:$0xff] %v2962_v41   ;;  %v2957_v33 = vpack.c.bf16 %v3969_v62, %v3957_v28 }
 0x15b   :  { %v1931_v9 = vadd.f32 %v3628_v15, %v1930_v59  ;;  %v2191_v21 = vadd.f32 %v2190_v29, %v2064_v3  ;;  %v3979_v7 = vpop.f32.mrf.mxu1 }
 0x15c   :  { %3033 = vst [vmem:[%s4176_s2 + $0x1e0] sm:$0xff] %v2957_v33  }
 0x15d   :  { %v2192_v50 = vadd.f32 %v2191_v21, %v2065_v61  ;;  %v1932_v55 = vadd.f32 %v3638_v27, %v1931_v9  ;;  %v3987_v59 = vpop.f32.mrf.mxu1  ;;  %v2068_v27 = vmul.f32 %v3669_v58, %v3669_v58  ;;  %v2069_v21 = vmul.f32 %v3652_v39, %v3652_v39 }
 0x15f   :  { %v1933_v15 = vadd.f32 %v1932_v55, %v3657_v45  ;;  %v2193_v29 = vadd.f32 %v2192_v50, %v2066_v11  ;;  %v3992_v61 = vpop.f32.mrf.mxu1  ;;  %v2070_v50 = vmul.f32 %v3662_v51, %v3662_v51 }
 0x160   :  { %v2972_v9 = vpack.c.bf16 %v3992_v61, %v3979_v7 }
 0x161   :  { %v2194_v3 = vadd.f32 %v2193_v29, %v2067_v17  ;;  %v1934_v41 = vadd.f32 %v1933_v15, %v3669_v58  ;;  %v3999_v11 = vpop.f32.mrf.mxu1  ;;  %v2071_v17 = vmul.f32 %v3681_v8, %v3681_v8 }
 0x162   :  { %3036 = vst [vmem:[%s4176_s2 + $0x1f8] sm:$0xff] %v2972_v9   ;;  %v2967_v58 = vpack.c.bf16 %v3999_v11, %v3987_v59  ;;  %v2073_v9 = vmul.f32 %v3676_v1, %v3676_v1 }
 0x163   :  { %v1935_v33 = vadd.f32 %v3652_v39, %v1934_v41  ;;  %v2195_v45 = vadd.f32 %v2194_v3, %v2068_v27  ;;  %v2072_v27 = vmul.f32 %v3693_v23, %v3693_v23 }
 0x164   :  { %3035 = vst [vmem:[%s4176_s2 + $0x1f0] sm:$0xff] %v2967_v58  }
 0x165   :  { %v2196_v55 = vadd.f32 %v2195_v45, %v2069_v21  ;;  %v1936_v15 = vadd.f32 %v3662_v51, %v1935_v33  ;;  %v2074_v33 = vmul.f32 %v3686_v16, %v3686_v16 }
 0x167   :  { %v1937_v39 = vadd.f32 %v1936_v15, %v3681_v8  ;;  %v2197_v29 = vadd.f32 %v2196_v55, %v2070_v50  ;;  %v2075_v50 = vmul.f32 %v3705_v37, %v3705_v37 }
 0x169   :  { %v2198_v3 = vadd.f32 %v2197_v29, %v2071_v17  ;;  %v1938_v41 = vadd.f32 %v1937_v39, %v3693_v23  ;;  %v2076_v39 = vmul.f32 %v3717_v52, %v3717_v52 }
 0x16b   :  { %v1939_v51 = vadd.f32 %v3676_v1, %v1938_v41  ;;  %v2199_v21 = vadd.f32 %v2198_v3, %v2072_v27  ;;  %v2077_v1 = vmul.f32 %v3700_v30, %v3700_v30  ;;  %v2079_v27 = vmul.f32 %v3729_v5, %v3729_v5 }
 0x16d   :  { %v2200_v45 = vadd.f32 %v2199_v21, %v2073_v9  ;;  %v1940_v58 = vadd.f32 %v3686_v16, %v1939_v51  ;;  %v2078_v16 = vmul.f32 %v3710_v44, %v3710_v44  ;;  %v2080_v21 = vmul.f32 %v3741_v22, %v3741_v22 }
 0x16f   :  { %v1941_v8 = vadd.f32 %v1940_v58, %v3705_v37  ;;  %v2201_v55 = vadd.f32 %v2200_v45, %v2074_v33 }
 0x171   :  { %v2202_v15 = vadd.f32 %v2201_v55, %v2075_v50  ;;  %v1942_v23 = vadd.f32 %v1941_v8, %v3717_v52  ;;  %v2083_v50 = vmul.f32 %v3753_v40, %v3753_v40 }
 0x173   :  { %v1943_v17 = vadd.f32 %v3700_v30, %v1942_v23  ;;  %v2203_v29 = vadd.f32 %v2202_v15, %v2076_v39  ;;  %v2081_v30 = vmul.f32 %v3724_v60, %v3724_v60  ;;  %v2084_v23 = vmul.f32 %v3765_v57, %v3765_v57 }
 0x175   :  { %v2204_v3 = vadd.f32 %v2203_v29, %v2077_v1  ;;  %v1944_v41 = vadd.f32 %v3710_v44, %v1943_v17  ;;  %v2082_v44 = vmul.f32 %v3734_v13, %v3734_v13 }
 0x177   :  { %v1945_v37 = vadd.f32 %v1944_v41, %v3729_v5  ;;  %v2205_v9 = vadd.f32 %v2204_v3, %v2078_v16  ;;  %v2087_v16 = vmul.f32 %v3777_v14, %v3777_v14 }
 0x179   :  { %v2206_v51 = vadd.f32 %v2205_v9, %v2079_v27  ;;  %v1946_v52 = vadd.f32 %v1945_v37, %v3741_v22  ;;  %v2088_v37 = vmul.f32 %v3789_v35, %v3789_v35 }
 0x17b   :  { %v1947_v33 = vadd.f32 %v3724_v60, %v1946_v52  ;;  %v2207_v45 = vadd.f32 %v2206_v51, %v2080_v21  ;;  %v2085_v60 = vmul.f32 %v3748_v31, %v3748_v31  ;;  %v2091_v21 = vmul.f32 %v3801_v56, %v3801_v56 }
 0x17d   :  { %v2208_v58 = vadd.f32 %v2207_v45, %v2081_v30  ;;  %v1948_v8 = vadd.f32 %v3734_v13, %v1947_v33  ;;  %v2086_v13 = vmul.f32 %v3758_v48, %v3758_v48  ;;  %v2092_v45 = vmul.f32 %v3813_v18, %v3813_v18 }
 0x17f   :  { %v1949_v5 = vadd.f32 %v1948_v8, %v3753_v40  ;;  %v2209_v55 = vadd.f32 %v2208_v58, %v2082_v44 }
 0x181   :  { %v2210_v15 = vadd.f32 %v2209_v55, %v2083_v50  ;;  %v1950_v22 = vadd.f32 %v1949_v5, %v3765_v57  ;;  %v2095_v50 = vmul.f32 %v3825_v42, %v3825_v42 }
 0x183   :  { %v1951_v39 = vadd.f32 %v3748_v31, %v1950_v22  ;;  %v2211_v1 = vadd.f32 %v2210_v15, %v2084_v23  ;;  %v2089_v31 = vmul.f32 %v3772_v4, %v3772_v4  ;;  %v2096_v22 = vmul.f32 %v3837_v10, %v3837_v10 }
 0x185   :  { %v2212_v17 = vadd.f32 %v2211_v1, %v2085_v60  ;;  %v1952_v29 = vadd.f32 %v3758_v48, %v1951_v39  ;;  %v2090_v48 = vmul.f32 %v3782_v25, %v3782_v25 }
 0x187   :  { %v1953_v40 = vadd.f32 %v1952_v29, %v3777_v14  ;;  %v2213_v3 = vadd.f32 %v2212_v17, %v2086_v13  ;;  %v2099_v13 = vmul.f32 %v3849_v38, %v3849_v38 }
 0x189   :  { %v2214_v41 = vadd.f32 %v2213_v3, %v2087_v16  ;;  %v1954_v57 = vadd.f32 %v1953_v40, %v3789_v35  ;;  %v2100_v40 = vmul.f32 %v3861_v12, %v3861_v12 }
 0x18b   :  { %v1955_v27 = vadd.f32 %v3772_v4, %v1954_v57  ;;  %v2215_v9 = vadd.f32 %v2214_v41, %v2088_v37  ;;  %v2093_v4 = vmul.f32 %v3796_v46, %v3796_v46  ;;  %v4187_v41 = vld [vmem:[#allocation2_spill] sm:$0xff] }
 0x18d   :  { %v2216_v51 = vadd.f32 %v2215_v9, %v2089_v31  ;;  %v1956_v52 = vadd.f32 %v3782_v25, %v1955_v27  ;;  %v2094_v25 = vmul.f32 %v3806_v6, %v3806_v6  ;;  %v2103_v31 = vmul.f32 %v3873_v34, %v3873_v34 }
 0x18f   :  { %v1957_v14 = vadd.f32 %v1956_v52, %v3801_v56  ;;  %v2217_v30 = vadd.f32 %v2216_v51, %v2090_v48  ;;  %v2104_v48 = vmul.f32 %v3885_v36, %v3885_v36 }
 0x191   :  { %v2218_v33 = vadd.f32 %v2217_v30, %v2091_v21  ;;  %v1958_v35 = vadd.f32 %v1957_v14, %v3813_v18  ;;  %v4189_v21 = vld [vmem:[#allocation4_spill] sm:$0xff] }
 0x192   :  { %v2106_v30 = vmul.f32 %v4189_v21, %v4189_v21 }
 0x193   :  { %v1959_v44 = vadd.f32 %v3796_v46, %v1958_v35  ;;  %v2219_v58 = vadd.f32 %v2218_v33, %v2092_v45  ;;  %v2097_v46 = vmul.f32 %v3820_v32, %v3820_v32  ;;  %v2107_v45 = vmul.f32 %v3897_v63, %v3897_v63 }
 0x195   :  { %v2220_v8 = vadd.f32 %v2219_v58, %v2093_v4  ;;  %v1960_v5 = vadd.f32 %v3806_v6, %v1959_v44  ;;  %v2098_v6 = vmul.f32 %v3830_v54, %v3830_v54  ;;  %v2108_v58 = vmul.f32 %v3909_v47, %v3909_v47 }
 0x197   :  { %v1961_v56 = vadd.f32 %v1960_v5, %v3825_v42  ;;  %v2221_v55 = vadd.f32 %v2220_v8, %v2094_v25  ;;  %v2109_v25 = vmul.f32 %v3892_v0, %v3892_v0 }
 0x199   :  { %v2222_v15 = vadd.f32 %v2221_v55, %v2095_v50  ;;  %v1962_v18 = vadd.f32 %v1961_v56, %v3837_v10  ;;  %v2110_v56 = vmul.f32 %v3902_v20, %v3902_v20 }
 0x19b   :  { %v1963_v23 = vadd.f32 %v3820_v32, %v1962_v18  ;;  %v2223_v60 = vadd.f32 %v2222_v15, %v2096_v22  ;;  %v2101_v32 = vmul.f32 %v3844_v24, %v3844_v24  ;;  %v2111_v15 = vmul.f32 %v3927_v19, %v3927_v19 }
 0x19d   :  { %v2224_v39 = vadd.f32 %v2223_v60, %v2097_v46  ;;  %v1964_v1 = vadd.f32 %v3830_v54, %v1963_v23  ;;  %v2102_v54 = vmul.f32 %v4187_v41, %v4187_v41  ;;  %v2112_v46 = vmul.f32 %v3939_v53, %v3939_v53 }
 0x19f   :  { %v1965_v42 = vadd.f32 %v1964_v1, %v3849_v38  ;;  %v2225_v17 = vadd.f32 %v2224_v39, %v2098_v6  ;;  %v2115_v1 = vmul.f32 %v3957_v28, %v3957_v28 }
 0x1a1   :  { %v2226_v29 = vadd.f32 %v2225_v17, %v2099_v13  ;;  %v1966_v10 = vadd.f32 %v1965_v42, %v3861_v12  ;;  %v2116_v17 = vmul.f32 %v3969_v62, %v3969_v62 }
 0x1a3   :  { %v1967_v16 = vadd.f32 %v3844_v24, %v1966_v10  ;;  %v2227_v3 = vadd.f32 %v2226_v29, %v2100_v40  ;;  %v4188_v24 = vld [vmem:[#allocation3_spill] sm:$0xff] }
 0x1a4   :  { %v2105_v51 = vmul.f32 %v4188_v24, %v4188_v24 }
 0x1a5   :  { %v2228_v57 = vadd.f32 %v2227_v3, %v2101_v32  ;;  %v1968_v37 = vadd.f32 %v4187_v41, %v1967_v16  ;;  %v2119_v16 = vmul.f32 %v3987_v59, %v3987_v59 }
 0x1a7   :  { %v1969_v38 = vadd.f32 %v1968_v37, %v3873_v34  ;;  %v2229_v27 = vadd.f32 %v2228_v57, %v2102_v54  ;;  %v2120_v54 = vmul.f32 %v3999_v11, %v3999_v11 }
 0x1a9   :  { %v2230_v9 = vadd.f32 %v2229_v27, %v2103_v31  ;;  %v1970_v12 = vadd.f32 %v1969_v38, %v3885_v36 }
 0x1ab   :  { %v1971_v52 = vadd.f32 %v4188_v24, %v1970_v12  ;;  %v2231_v14 = vadd.f32 %v2230_v9, %v2104_v48 }
 0x1ad   :  { %v2232_v33 = vadd.f32 %v2231_v14, %v2105_v51  ;;  %v1972_v35 = vadd.f32 %v4189_v21, %v1971_v52 }
 0x1af   :  { %v1973_v34 = vadd.f32 %v1972_v35, %v3897_v63  ;;  %v2233_v4 = vadd.f32 %v2232_v33, %v2106_v30 }
 0x1b1   :  { %v2234_v44 = vadd.f32 %v2233_v4, %v2107_v45  ;;  %v1974_v36 = vadd.f32 %v1973_v34, %v3909_v47 }
 0x1b3   :  { %v1975_v8 = vadd.f32 %v3892_v0, %v1974_v36  ;;  %v2235_v5 = vadd.f32 %v2234_v44, %v2108_v58  ;;  %v2113_v0 = vmul.f32 %v3919_v26, %v3919_v26 }
 0x1b5   :  { %v2236_v50 = vadd.f32 %v2235_v5, %v2109_v25  ;;  %v1976_v55 = vadd.f32 %v3902_v20, %v1975_v8  ;;  %v2114_v20 = vmul.f32 %v3932_v49, %v3932_v49 }
 0x1b7   :  { %v1977_v63 = vadd.f32 %v1976_v55, %v3927_v19  ;;  %v2237_v18 = vadd.f32 %v2236_v50, %v2110_v56 }
 0x1b9   :  { %v2238_v22 = vadd.f32 %v2237_v18, %v2111_v15  ;;  %v1978_v47 = vadd.f32 %v1977_v63, %v3939_v53 }
 0x1bb   :  { %v1979_v23 = vadd.f32 %v3919_v26, %v1978_v47  ;;  %v2239_v60 = vadd.f32 %v2238_v22, %v2112_v46  ;;  %v2117_v26 = vmul.f32 %v3949_v2, %v3949_v2 }
 0x1bd   :  { %v2240_v6 = vadd.f32 %v2239_v60, %v2113_v0  ;;  %v1980_v39 = vadd.f32 %v3932_v49, %v1979_v23  ;;  %v2118_v49 = vmul.f32 %v3962_v43, %v3962_v43 }
 0x1bf   :  { %v1981_v19 = vadd.f32 %v1980_v39, %v3957_v28  ;;  %v2241_v42 = vadd.f32 %v2240_v6, %v2114_v20 }
 0x1c1   :  { %v2242_v13 = vadd.f32 %v2241_v42, %v2115_v1  ;;  %v1982_v53 = vadd.f32 %v1981_v19, %v3969_v62 }
 0x1c3   :  { %v1983_v29 = vadd.f32 %v3949_v2, %v1982_v53  ;;  %v2243_v10 = vadd.f32 %v2242_v13, %v2116_v17  ;;  %v2121_v2 = vmul.f32 %v3979_v7, %v3979_v7 }
 0x1c5   :  { %v2244_v40 = vadd.f32 %v2243_v10, %v2117_v26  ;;  %v1984_v32 = vadd.f32 %v3962_v43, %v1983_v29  ;;  %v2122_v43 = vmul.f32 %v3992_v61, %v3992_v61 }
 0x1c7   :  { %v1985_v28 = vadd.f32 %v1984_v32, %v3987_v59  ;;  %v2245_v3 = vadd.f32 %v2244_v40, %v2118_v49 }
 0x1c9   :  { %v2246_v41 = vadd.f32 %v2245_v3, %v2119_v16  ;;  %v1986_v62 = vadd.f32 %v1985_v28, %v3999_v11 }
 0x1cb   :  { %v1987_v57 = vadd.f32 %v3979_v7, %v1986_v62  ;;  %v2247_v37 = vadd.f32 %v2246_v41, %v2120_v54  ;;  %v1861_v7 = vld [vmem:[%s4177_s3] sm:$0x3] }
 0x1cd   :  { %v1988_v38 = vadd.f32 %v3992_v61, %v1987_v57  ;;  %v2248_v31 = vadd.f32 %v2247_v37, %v2121_v2 }
 0x1cf   :  { %v1989_v59 = vrot.slane %v1988_v38, 4  ;;  %v2249_v27 = vadd.f32 %v2248_v31, %v2122_v43 }
 0x1d1   :  { %v1990_v9 = vadd.f32 %v1989_v59, %v1988_v38  ;;  %v2250_v12 = vrot.slane %v2249_v27, 4 }
 0x1d3   :  { %v1991_v48 = vrot.slane %v1990_v9, 2  ;;  %v2251_v24 = vadd.f32 %v2250_v12, %v2249_v27 }
 0x1d5   :  { %v1992_v51 = vadd.f32 %v1991_v48, %v1990_v9  ;;  %v2252_v11 = vrot.slane %v2251_v24, 2 }
 0x1d7   :  { %v1993_v52 = vrot.slane %v1992_v51, 1  ;;  %v2253_v14 = vadd.f32 %v2252_v11, %v2251_v24 }
 0x1d9   :  { %v2254_v21 = vrot.slane %v2253_v14, 1  ;;  %v1994_v30 = vadd.f32 %v1993_v52, %v1992_v51 }
 0x1db   :  { %v2255_v33 = vadd.f32 %v2254_v21, %v2253_v14 }
 0x1dd   :  { %v2257_v61 = vsel %vm2256_vm1, %v1994_v30, %v2255_v33 }
 0x1de   :  { %v2258_v35 = vadd.f32 %v2257_v61, %v1861_v7 }
 0x1e0   :  { %2259 = vst [vmem:[%s4177_s3] sm:$0x3] %v2258_v35 }

// kernel: bottleneck_forward.5
= control target key start
LH: loop header
LB: loop body
LE: loop exit
PB: predicated region body
PF: predicated region fallthrough
CT: control target
= control target key end

     0   :  { %s3843_s18 = smov 0   ;;  %s4961_s0 = inlined_call_operand.vmem [shape: bf16[4,16,16,128], index: 0, kind: input, shape index: {}]   ;;  %s4962_s1 = inlined_call_operand.vmem [shape: f32[1,128], index: 1, kind: input, shape index: {}]   ;;  %s4963_s2 = inlined_call_operand.vmem [shape: f32[1,128], index: 2, kind: input, shape index: {}]   ;;  %s4964_s3 = inlined_call_operand.vmem [shape: bf16[1152,128], index: 3, kind: input, shape index: {}]   ;;  %s4965_s4 = inlined_call_operand.vmem [shape: bf16[4,16,16,128], index: 4, kind: output, shape index: {0}]   ;;  %s4966_s5 = inlined_call_operand.vmem [shape: f32[2,128], index: 5, kind: output, shape index: {1}]  }
   0x1 LB: > { %s2829_s19 = sadd.s32 4294967295, %s3810_s18   ;;  %p2833_p0 = scmp.ge.s32.totalorder %s3810_s18, 1  ;;  %s3810_s18 = sphi %s3843_s18, %s16_s18  }
   0x2   : > { %p185_p1 = scmp.lt.s32.totalorder %s3810_s18, 5 }
   0x4   : > { %p186_p2 = pnand %p2833_p0, %p185_p1 }
   0x6   : > { %189 = sbr.rel (%p186_p2) target bundleno = 590 (0x24e), region = 36 }
   0xb   : > { %p213_p3 = scmp.lt.s32.totalorder %s2829_s19, 3  ;;  %p2838_p4 = scmp.ne.s32.totalorder %s2829_s19, 0 }
   0xd   : > { %s214_s20 = scalar_select %p213_p3, %s2829_s19, 3 }
   0xe   : > { %227 = sbr.rel (%p2838_p4) target bundleno = 48 (0x30), region = 40 }
   0xf   : > { %s2947_s21 = sshll.u32 %s214_s20, 7 }
  0x10   : > { %s3854_s24 = scalar_lea.vmem %s4961_s0, %s2947_s21  ;;  %s3859_s27 = scalar_lea.vmem %s4965_s4, %s2947_s21 }
  0x13   : > { %v3812_v0 = vmov 0.0  }
  0x14   : > { %228 = vst [vmem:[%s4966_s5] sm:$0x3] %v3812_v0  ;;  %229 = vst [vmem:[#allocation2] sm:$0xff] %v3812_v0 }
  0x15   : > { %230 = vst [vmem:[#allocation2 + $0x8] sm:$0xff] %v3812_v0  ;;  %231 = vst [vmem:[#allocation2 + $0x10] sm:$0xff] %v3812_v0 }
  0x16   : > { %232 = vst [vmem:[#allocation2 + $0x18] sm:$0xff] %v3812_v0  ;;  %233 = vst [vmem:[#allocation2 + $0x20] sm:$0xff] %v3812_v0 }
  0x17   : > { %234 = vst [vmem:[#allocation2 + $0x28] sm:$0xff] %v3812_v0  ;;  %235 = vst [vmem:[#allocation2 + $0x30] sm:$0xff] %v3812_v0 }
  0x18   : > { %236 = vst [vmem:[#allocation2 + $0x38] sm:$0xff] %v3812_v0  ;;  %237 = vst [vmem:[#allocation2 + $0x40] sm:$0xff] %v3812_v0 }
  0x19   : > { %238 = vst [vmem:[#allocation2 + $0x48] sm:$0xff] %v3812_v0  ;;  %239 = vst [vmem:[#allocation2 + $0x50] sm:$0xff] %v3812_v0 }
  0x1a   : > { %240 = vst [vmem:[#allocation2 + $0x58] sm:$0xff] %v3812_v0  ;;  %241 = vst [vmem:[#allocation2 + $0x60] sm:$0xff] %v3812_v0 }
  0x1b   : > { %242 = vst [vmem:[#allocation2 + $0x68] sm:$0xff] %v3812_v0  ;;  %243 = vst [vmem:[#allocation2 + $0x70] sm:$0xff] %v3812_v0 }
  0x1c   : > { %244 = vst [vmem:[#allocation2 + $0x78] sm:$0xff] %v3812_v0  ;;  %245 = vst [vmem:[#allocation2 + $0x80] sm:$0xff] %v3812_v0 }
  0x1d   : > { %246 = vst [vmem:[#allocation2 + $0x88] sm:$0xff] %v3812_v0  ;;  %247 = vst [vmem:[#allocation2 + $0x90] sm:$0xff] %v3812_v0 }
  0x1e   : > { %248 = vst [vmem:[#allocation2 + $0x98] sm:$0xff] %v3812_v0  ;;  %249 = vst [vmem:[#allocation2 + $0xa0] sm:$0xff] %v3812_v0 }
  0x1f   : > { %250 = vst [vmem:[#allocation2 + $0xa8] sm:$0xff] %v3812_v0  ;;  %251 = vst [vmem:[#allocation2 + $0xb0] sm:$0xff] %v3812_v0 }
  0x20   : > { %252 = vst [vmem:[#allocation2 + $0xb8] sm:$0xff] %v3812_v0  ;;  %253 = vst [vmem:[#allocation2 + $0xc0] sm:$0xff] %v3812_v0 }
  0x21   : > { %254 = vst [vmem:[#allocation2 + $0xc8] sm:$0xff] %v3812_v0  ;;  %255 = vst [vmem:[#allocation2 + $0xd0] sm:$0xff] %v3812_v0 }
  0x22   : > { %256 = vst [vmem:[#allocation2 + $0xd8] sm:$0xff] %v3812_v0  ;;  %257 = vst [vmem:[#allocation2 + $0xe0] sm:$0xff] %v3812_v0 }
  0x23   : > { %258 = vst [vmem:[#allocation2 + $0xe8] sm:$0xff] %v3812_v0  ;;  %259 = vst [vmem:[#allocation2 + $0xf0] sm:$0xff] %v3812_v0 }
  0x24   : > { %260 = vst [vmem:[#allocation2 + $0xf8] sm:$0xff] %v3812_v0  ;;  %261 = vst [vmem:[#allocation2 + $0x100] sm:$0xff] %v3812_v0 }
  0x25   : > { %262 = vst [vmem:[#allocation2 + $0x108] sm:$0xff] %v3812_v0  ;;  %263 = vst [vmem:[#allocation2 + $0x110] sm:$0xff] %v3812_v0 }
  0x26   : > { %264 = vst [vmem:[#allocation2 + $0x118] sm:$0xff] %v3812_v0  ;;  %265 = vst [vmem:[#allocation2 + $0x120] sm:$0xff] %v3812_v0 }
  0x27   : > { %266 = vst [vmem:[#allocation2 + $0x128] sm:$0xff] %v3812_v0  ;;  %267 = vst [vmem:[#allocation2 + $0x130] sm:$0xff] %v3812_v0 }
  0x28   : > { %268 = vst [vmem:[#allocation2 + $0x138] sm:$0xff] %v3812_v0  ;;  %269 = vst [vmem:[#allocation2 + $0x140] sm:$0xff] %v3812_v0 }
  0x29   : > { %270 = vst [vmem:[#allocation2 + $0x148] sm:$0xff] %v3812_v0  ;;  %271 = vst [vmem:[#allocation2 + $0x150] sm:$0xff] %v3812_v0 }
  0x2a   : > { %272 = vst [vmem:[#allocation2 + $0x158] sm:$0xff] %v3812_v0  ;;  %273 = vst [vmem:[#allocation2 + $0x160] sm:$0xff] %v3812_v0 }
  0x2b   : > { %274 = vst [vmem:[#allocation2 + $0x168] sm:$0xff] %v3812_v0  ;;  %275 = vst [vmem:[#allocation2 + $0x170] sm:$0xff] %v3812_v0 }
  0x2c   : > { %276 = vst [vmem:[#allocation2 + $0x178] sm:$0xff] %v3812_v0  ;;  %277 = vst [vmem:[#allocation2 + $0x180] sm:$0xff] %v3812_v0 }
  0x2d   : > { %278 = vst [vmem:[#allocation2 + $0x188] sm:$0xff] %v3812_v0  ;;  %279 = vst [vmem:[#allocation2 + $0x190] sm:$0xff] %v3812_v0 }
  0x2e   : > { %280 = vst [vmem:[#allocation2 + $0x198] sm:$0xff] %v3812_v0  ;;  %281 = vst [vmem:[#allocation2 + $0x1a0] sm:$0xff] %v3812_v0 }
  0x2f   : > { %282 = vst [vmem:[#allocation2 + $0x1a8] sm:$0xff] %v3812_v0 }
  0x30 PF: > { %v3732_v1 = vld [vmem:[%s4964_s3 + $0x138] sm:$0xff]   ;;  %v3734_v3 = vld [vmem:[%s4964_s3 + $0x130] sm:$0xff]   ;;  %v3736_v5 = vld [vmem:[%s4964_s3 + $0x128] sm:$0xff]   ;;  %vm2764_vm0 = vcmask 1040384  }
  0x31   : > { %v3733_v2 = vld [vmem:[%s4964_s3 + $0xf8] sm:$0xff]   ;;  %3155 = vmatprep.subr.bf16.mxu0 %v3732_v1  ;;  %3707 = vmatprep.subr.bf16.mxu1 %v3732_v1  ;;  %v3735_v4 = vld [vmem:[%s4964_s3 + $0xf0] sm:$0xff]   ;;  %v3737_v6 = vld [vmem:[%s4964_s3 + $0xe8] sm:$0xff]  }
  0x32   : > { %3156 = vmatpush3.bf16.msra.mxu0 %v3733_v2  ;;  %3715 = vmatpush3.bf16.msra.mxu1 %v3733_v2  ;;  %v3738_v7 = vld [vmem:[%s4964_s3 + $0x120] sm:$0xff]   ;;  %v3740_v9 = vld [vmem:[%s4964_s3 + $0x118] sm:$0xff]   ;;  %v3742_v11 = vld [vmem:[%s4964_s3 + $0x110] sm:$0xff]  }
  0x33   : > { %3157 = vmatprep.subr.bf16.mxu0 %v3734_v3  ;;  %3708 = vmatprep.subr.bf16.mxu1 %v3734_v3  ;;  %v3739_v8 = vld [vmem:[%s4964_s3 + $0xe0] sm:$0xff]   ;;  %v3741_v10 = vld [vmem:[%s4964_s3 + $0xd8] sm:$0xff]   ;;  %v3743_v20 = vld [vmem:[%s4964_s3 + $0xd0] sm:$0xff]  }
  0x34   : > { %v2982_v12 = vld [vmem:[%s3854_s24] sm:$0xff]   ;;  %v3744_v23 = vld [vmem:[%s4964_s3 + $0x108] sm:$0xff]   ;;  %v3126_v46 = vld [vmem:[%s3854_s24 + $0x10] sm:$0xff]  }
  0x35   : > { %v3901_v13 = vld [vmem:[%s4962_s1] ss:$0 sm:$0xff]  ;;  %v2983_v14 = vunpack.c.l.bf16 %v2982_v12  ;;  %v2984_v15 = vunpack.c.h.bf16 %v2982_v12  ;;  %v3125_v26 = vld [vmem:[%s3854_s24 + $0x8] sm:$0xff]   ;;  %v3138_v47 = vld [vmem:[%s3854_s24 + $0x70] sm:$0xff]   ;;  %v2991_v51 = vunpack.c.l.bf16 %v3126_v46  ;;  %v2992_v56 = vunpack.c.h.bf16 %v3126_v46 }
  0x36   : > { %3158 = vmatpush3.bf16.msra.mxu0 %v3735_v4  ;;  %3716 = vmatpush3.bf16.msra.mxu1 %v3735_v4  ;;  %v3136_v16 = vld [vmem:[%s3854_s24 + $0x60] sm:$0xff]   ;;  %v3137_v27 = vld [vmem:[%s3854_s24 + $0x68] sm:$0xff]   ;;  %v2987_v30 = vunpack.c.l.bf16 %v3125_v26  ;;  %v2988_v31 = vunpack.c.h.bf16 %v3125_v26  ;;  %v3947_v57 = vld [vmem:[%s4964_s3 + $0x178] sm:$0xff]   ;;  %v3039_v61 = vunpack.c.l.bf16 %v3138_v47  ;;  %v3040_v3 = vunpack.c.h.bf16 %v3138_v47 }
  0x37   : > { %3159 = vmatprep.subr.bf16.mxu0 %v3736_v5  ;;  %3709 = vmatprep.subr.bf16.mxu1 %v3736_v5  ;;  %v3907_v17 = vld [vmem:[%s4963_s2] ss:$0 sm:$0xff]  ;;  %v3031_v18 = vunpack.c.l.bf16 %v3136_v16  ;;  %v3032_v19 = vunpack.c.h.bf16 %v3136_v16  ;;  %v354_v21 = vmul.f32 %v2983_v14, %v3901_v13  ;;  %v355_v22 = vmul.f32 %v2984_v15, %v3901_v13  ;;  %v3745_v32 = vld [vmem:[%s4964_s3 + $0xc8] sm:$0xff]   ;;  %v3127_v62 = vld [vmem:[%s3854_s24 + $0x18] sm:$0xff]  }
  0x38   : > { %v3035_v35 = vunpack.c.l.bf16 %v3137_v27  ;;  %v3036_v36 = vunpack.c.h.bf16 %v3137_v27  ;;  %v356_v39 = vmul.f32 %v2987_v30, %v3901_v13  ;;  %v357_v40 = vmul.f32 %v2988_v31, %v3901_v13  ;;  %v3746_v41 = vld [vmem:[%s4964_s3 + $0x100] sm:$0xff]   ;;  %v3749_v63 = vld [vmem:[%s4964_s3 + $0xb8] sm:$0xff]  }
  0x39   : > { %v378_v24 = vmul.f32 %v3031_v18, %v3901_v13  ;;  %v379_v25 = vmul.f32 %v3032_v19, %v3901_v13  ;;  %v393_v28 = vadd.f32 %v3907_v17, %v354_v21  ;;  %v394_v29 = vadd.f32 %v3907_v17, %v355_v22  ;;  %v3747_v52 = vld [vmem:[%s4964_s3 + $0xc0] sm:$0xff]   ;;  %v3139_v4 = vld [vmem:[%s3854_s24 + $0x78] sm:$0xff]  }
  0x3a   : > { %3160 = vmatpush3.bf16.msra.mxu0 %v3737_v6  ;;  %3717 = vmatpush3.bf16.msra.mxu1 %v3737_v6  ;;  %v380_v44 = vmul.f32 %v3035_v35, %v3901_v13  ;;  %v381_v45 = vmul.f32 %v3036_v36, %v3901_v13  ;;  %v395_v49 = vadd.f32 %v3907_v17, %v356_v39  ;;  %v3043_v16 = vunpack.c.l.bf16 %v3139_v4  ;;  %v3753_v36 = vld [vmem:[%s4964_s3 + $0xb0] sm:$0xff]  }
  0x3b   : > { %3161 = vmatprep.subr.bf16.mxu0 %v3738_v7  ;;  %3710 = vmatprep.subr.bf16.mxu1 %v3738_v7  ;;  %v417_v33 = vadd.f32 %v3907_v17, %v378_v24  ;;  %v418_v34 = vadd.f32 %v3907_v17, %v379_v25  ;;  %v425_v37 = vmax.f32 %v393_v28, 0.0  ;;  %v426_v38 = vmax.f32 %v394_v29, 0.0  ;;  %v3128_v24 = vld [vmem:[%s3854_s24 + $0x20] sm:$0xff]  }
  0x3c   : > { %v396_v50 = vadd.f32 %v3907_v17, %v357_v40  ;;  %v419_v54 = vadd.f32 %v3907_v17, %v380_v44  ;;  %v420_v55 = vadd.f32 %v3907_v17, %v381_v45  ;;  %v427_v58 = vmax.f32 %v395_v49, 0.0 }
  0x3d   : > { %v449_v42 = vmax.f32 %v417_v33, 0.0  ;;  %v450_v43 = vmax.f32 %v418_v34, 0.0  ;;  %458 = vst [vmem:[#allocation2 + $0x19] sm:$0xff] %v425_v37  ;;  %459 = vst [vmem:[#allocation2 + $0x21] sm:$0xff] %v426_v38  ;;  %v779_v48 = vpack.c.bf16 %v426_v38, %v425_v37  ;;  %v358_v60 = vmul.f32 %v2991_v51, %v3901_v13 }
  0x3e   : > { %3162 = vmatpush3.bf16.msra.mxu0 %v3739_v8  ;;  %3718 = vmatpush3.bf16.msra.mxu1 %v3739_v8  ;;  %v428_v59 = vmax.f32 %v396_v50, 0.0  ;;  %v451_v0 = vmax.f32 %v419_v54, 0.0  ;;  %v452_v1 = vmax.f32 %v420_v55, 0.0  ;;  %v359_v2 = vmul.f32 %v2992_v56, %v3901_v13  ;;  %460 = vst [vmem:[#allocation2 + $0x31] sm:$0xff] %v427_v58  ;;  %v3757_v50 = vld [vmem:[%s4964_s3 + $0xa8] sm:$0xff]  }
  0x3f   : > { %3163 = vmatprep.subr.bf16.mxu0 %v3740_v9  ;;  %3711 = vmatprep.subr.bf16.mxu1 %v3740_v9  ;;  %482 = vst [vmem:[#allocation2 + $0x139] sm:$0xff] %v449_v42  ;;  %483 = vst [vmem:[#allocation2 + $0x141] sm:$0xff] %v450_v43  ;;  %v815_v53 = vpack.c.bf16 %v450_v43, %v449_v42  ;;  %v3957_v5 = vadd.f32 %v3907_v17, %v358_v60  ;;  %v2995_v7 = vunpack.c.l.bf16 %v3127_v62  ;;  %v3751_v43 = vld [vmem:[%s4964_s3 + $0x168] sm:$0xff]  }
  0x40   : > { %1050 = vmatprep.mubr.bf16.mxu0 %v779_v48  ;;  %461 = vst [vmem:[#allocation2 + $0x39] sm:$0xff] %v428_v59  ;;  %v382_v6 = vmul.f32 %v3039_v61, %v3901_v13  ;;  %v3960_v8 = vpack.c.bf16 %v428_v59, %v427_v58  ;;  %484 = vst [vmem:[#allocation2 + $0x151] sm:$0xff] %v451_v0  ;;  %v3963_v9 = vadd.f32 %v3907_v17, %v359_v2 }
  0x41   : > { %1146 = vmatprep.mubr.bf16.mxu1 %v815_v53  ;;  %485 = vst [vmem:[#allocation2 + $0x159] sm:$0xff] %v452_v1  ;;  %v429_v12 = vmax.f32 %v3957_v5, 0.0  ;;  %v360_v15 = vmul.f32 %v2995_v7, %v3901_v13  ;;  %v384_v30 = vmul.f32 %v3043_v16, %v3901_v13  ;;  %v818_v33 = vpack.c.bf16 %v452_v1, %v451_v0  ;;  %v3129_v53 = vld [vmem:[%s3854_s24 + $0x28] sm:$0xff]  }
  0x42   : > { %3164 = vmatpush3.bf16.msra.mxu0 %v3741_v10  ;;  %3719 = vmatpush3.bf16.msra.mxu1 %v3741_v10  ;;  %v383_v10 = vmul.f32 %v3040_v3, %v3901_v13  ;;  %v3968_v14 = vadd.f32 %v3907_v17, %v382_v6  ;;  %v2999_v40 = vunpack.c.l.bf16 %v3128_v24  ;;  %v3000_v45 = vunpack.c.h.bf16 %v3128_v24  ;;  %v3752_v3 = vld [vmem:[%s4964_s3 + $0x160] sm:$0xff]  }
  0x43   : > { %3165 = vmatprep.subr.bf16.mxu0 %v3742_v11  ;;  %3712 = vmatprep.subr.bf16.mxu1 %v3742_v11  ;;  %v2996_v11 = vunpack.c.h.bf16 %v3127_v62  ;;  %462 = vst [vmem:[#allocation2 + $0x49] sm:$0xff] %v429_v12  ;;  %v3978_v29 = vadd.f32 %v3907_v17, %v360_v15  ;;  %v3993_v39 = vadd.f32 %v3907_v17, %v384_v30  ;;  %v3004_v61 = vunpack.c.h.bf16 %v3129_v53  ;;  %v3130_v62 = vld [vmem:[%s3854_s24 + $0x30] sm:$0xff]   ;;  %v3761_v6 = vld [vmem:[%s4964_s3 + $0xa0] sm:$0xff]  }
  0x44   : > { %v682_v18 = vld [vmem:[#allocation2 + $0x18] sm:$0xff]  ;;  %v683_v19 = vld [vmem:[#allocation2 + $0x20] sm:$0xff]  ;;  %v422_v21 = vadd.f32 %v3907_v17, %v383_v10  ;;  %v453_v28 = vmax.f32 %v3968_v14, 0.0  ;;  %v362_v51 = vmul.f32 %v2999_v40, %v3901_v13  ;;  %v3007_v2 = vunpack.c.l.bf16 %v3130_v62  ;;  %v3756_v40 = vld [vmem:[%s4964_s3 + $0x148] sm:$0xff]  }
  0x45   : > { %v361_v22 = vmul.f32 %v2996_v11, %v3901_v13  ;;  %v778_v25 = vpack.c.bf16 %v683_v19, %v682_v18  ;;  %v431_v37 = vmax.f32 %v3978_v29, 0.0  ;;  %v455_v49 = vmax.f32 %v3993_v39, 0.0  ;;  %v3755_v29 = vld [vmem:[%s4964_s3 + $0x150] sm:$0xff]  }
  0x46   : > { %3166 = vmatpush3.bf16.msra.mxu0 %v3743_v20  ;;  %3720 = vmatpush3.bf16.msra.mxu1 %v3743_v20  ;;  %v430_v20 = vmax.f32 %v3963_v9, 0.0  ;;  %v706_v26 = vld [vmem:[#allocation2 + $0x138] sm:$0xff]  ;;  %v707_v27 = vld [vmem:[#allocation2 + $0x140] sm:$0xff]  ;;  %v454_v34 = vmax.f32 %v422_v21, 0.0  ;;  %486 = vst [vmem:[#allocation2 + $0x169] sm:$0xff] %v453_v28  ;;  %v4021_v56 = vadd.f32 %v3907_v17, %v362_v51  ;;  %v365_v5 = vmul.f32 %v3004_v61, %v3901_v13 }
  0x47   : > { %3167 = vmatprep.subr.bf16.mxu0 %v3744_v23  ;;  %3713 = vmatprep.subr.bf16.mxu1 %v3744_v23  ;;  %v3044_v23 = vunpack.c.h.bf16 %v3139_v4  ;;  %v814_v31 = vpack.c.bf16 %v707_v27, %v706_v26  ;;  %v3985_v35 = vadd.f32 %v3907_v17, %v361_v22  ;;  %v685_v42 = vld [vmem:[#allocation2 + $0x38] sm:$0xff]  ;;  %v708_v46 = vld [vmem:[#allocation2 + $0x150] sm:$0xff]  ;;  %464 = vst [vmem:[#allocation2 + $0x61] sm:$0xff] %v431_v37  ;;  %488 = vst [vmem:[#allocation2 + $0x181] sm:$0xff] %v455_v49 }
  0x48   : > { %463 = vst [vmem:[#allocation2 + $0x51] sm:$0xff] %v430_v20  ;;  %487 = vst [vmem:[#allocation2 + $0x171] sm:$0xff] %v454_v34  ;;  %v709_v47 = vld [vmem:[#allocation2 + $0x158] sm:$0xff]  ;;  %v4023_v59 = vpack.c.bf16 %v430_v20, %v429_v12  ;;  %v433_v0 = vmax.f32 %v4021_v56, 0.0  ;;  %v3008_v9 = vunpack.c.h.bf16 %v3130_v62  ;;  %v366_v10 = vmul.f32 %v3007_v2, %v3901_v13 }
  0x49   : > { %v385_v38 = vmul.f32 %v3044_v23, %v3901_v13  ;;  %v432_v44 = vmax.f32 %v3985_v35, 0.0  ;;  %v817_v58 = vpack.c.bf16 %v709_v47, %v708_v46  ;;  %v4050_v14 = vadd.f32 %v3907_v17, %v365_v5  ;;  %v3754_v21 = vld [vmem:[%s4964_s3 + $0x158] sm:$0xff]  }
  0x4a   : > { %3168 = vmatpush3.bf16.msra.mxu0 %v3745_v32  ;;  %3721 = vmatpush3.bf16.msra.mxu1 %v3745_v32  ;;  %v3750_v32 = vld [vmem:[%s4964_s3 + $0x170] sm:$0xff]   ;;  %466 = vst [vmem:[#allocation2 + $0x79] sm:$0xff] %v433_v0  ;;  %v686_v11 = vld [vmem:[#allocation2 + $0x48] sm:$0xff]  ;;  %v367_v19 = vmul.f32 %v3008_v9, %v3901_v13  ;;  %v4055_v20 = vadd.f32 %v3907_v17, %v366_v10  ;;  %v3766_v26 = vld [vmem:[%s4964_s3 + $0x98] sm:$0xff]  }
  0x4b   : > { %3169 = vmatprep.subr.bf16.mxu0 %v3746_v41  ;;  %3714 = vmatprep.subr.bf16.mxu1 %v3746_v41  ;;  %v684_v41 = vld [vmem:[#allocation2 + $0x30] sm:$0xff]  ;;  %v4004_v48 = vadd.f32 %v3907_v17, %v385_v38  ;;  %465 = vst [vmem:[#allocation2 + $0x69] sm:$0xff] %v432_v44  ;;  %v436_v22 = vmax.f32 %v4050_v14, 0.0  ;;  %v3131_v27 = vld [vmem:[%s3854_s24 + $0x38] sm:$0xff]   ;;  %v4077_v30 = vpack.c.bf16 %v432_v44, %v431_v37  ;;  %v3132_v44 = vld [vmem:[%s3854_s24 + $0x40] sm:$0xff]  }
  0x4c   : > { %v4015_v54 = vpack.c.bf16 %v685_v42, %v684_v41  ;;  %v4066_v24 = vadd.f32 %v3907_v17, %v367_v19  ;;  %v746_v41 = vld [vmem:[#allocation2 + $0x1a] sm:$0xff]  ;;  %v748_v19 = vld [vmem:[#allocation2 + $0x32] sm:$0xff] }
  0x4d   : > { %v456_v55 = vmax.f32 %v4004_v48, 0.0  ;;  %v710_v15 = vld [vmem:[#allocation2 + $0x168] sm:$0xff]  ;;  %469 = vst [vmem:[#allocation2 + $0x99] sm:$0xff] %v436_v22  ;;  %v3015_v48 = vunpack.c.l.bf16 %v3132_v44  ;;  %v3762_v14 = vld [vmem:[%s4964_s3 + $0x70] sm:$0xff]  }
  0x4e   : > { %3170 = vmatpush3.bf16.msra.mxu0 %v3747_v52  ;;  %3722 = vmatpush3.bf16.msra.mxu1 %v3747_v52  ;;  %v363_v52 = vmul.f32 %v3000_v45, %v3901_v13  ;;  %v688_v37 = vld [vmem:[#allocation2 + $0x60] sm:$0xff]  ;;  %v3133_v45 = vld [vmem:[%s3854_s24 + $0x48] sm:$0xff]  }
  0x4f   : > { %3563 = vmatprep.subr.bf16.mxu1 %v3947_v57  ;;  %3611 = vmatprep.subr.bf16.mxu0 %v3749_v63  ;;  %489 = vst [vmem:[#allocation2 + $0x189] sm:$0xff] %v456_v55  ;;  %v687_v12 = vld [vmem:[#allocation2 + $0x50] sm:$0xff]  ;;  %v712_v39 = vld [vmem:[#allocation2 + $0x180] sm:$0xff] }
  0x50   : > { %v4026_v60 = vadd.f32 %v3907_v17, %v363_v52  ;;  %v711_v16 = vld [vmem:[#allocation2 + $0x170] sm:$0xff]  ;;  %v4061_v23 = vpack.c.bf16 %v687_v12, %v686_v11  ;;  %v747_v52 = vld [vmem:[#allocation2 + $0x22] sm:$0xff] }
  0x51   : > { %1051 = vmatmul.mubr.bf16.vlgmr.msra.gmra.mxu0 %v778_v25  ;;  %1147 = vmatmul.mubr.bf16.vlgmr.msra.gmra.mxu1 %v814_v31  ;;  %v437_v25 = vmax.f32 %v4055_v20, 0.0  ;;  %v3011_v31 = vunpack.c.l.bf16 %v3131_v27  ;;  %v4126_v5 = vpack.c.bf16 %v747_v52, %v746_v41  ;;  %v3768_v20 = vld [vmem:[%s4964_s3 + $0x20] sm:$0xff]  }
  0x52   : > { %3612 = vmatpush3.bf16.msra.mxu0 %v3749_v63  ;;  %3564 = vmatpush3.bf16.msra.mxu1 %v3947_v57  ;;  %v3003_v57 = vunpack.c.l.bf16 %v3129_v53  ;;  %v821_v63 = vpack.c.bf16 %v454_v34, %v453_v28  ;;  %v434_v4 = vmax.f32 %v4026_v60, 0.0  ;;  %v820_v28 = vpack.c.bf16 %v711_v16, %v710_v15  ;;  %v689_v38 = vld [vmem:[#allocation2 + $0x68] sm:$0xff]  ;;  %v690_v15 = vld [vmem:[#allocation2 + $0x78] sm:$0xff] }
  0x53   : > { %1058 = vmatprep.mubr.bf16.mxu0 %v3960_v8  ;;  %3565 = vmatprep.subr.bf16.mxu1 %v3750_v32  ;;  %v438_v34 = vmax.f32 %v4066_v24, 0.0  ;;  %470 = vst [vmem:[#allocation2 + $0xa9] sm:$0xff] %v437_v25  ;;  %v368_v35 = vmul.f32 %v3011_v31, %v3901_v13  ;;  %v4109_v51 = vpack.c.bf16 %v689_v38, %v688_v37  ;;  %v3759_v37 = vld [vmem:[%s4964_s3 + $0x78] sm:$0xff]   ;;  %v750_v38 = vld [vmem:[#allocation2 + $0x4a] sm:$0xff] }
  0x54   : > { %1154 = vmatprep.mubr.bf16.mxu1 %v818_v33  ;;  %3613 = vmatprep.subr.bf16.mxu0 %v3753_v36  ;;  %v364_v1 = vmul.f32 %v3003_v57, %v3901_v13  ;;  %467 = vst [vmem:[#allocation2 + $0x81] sm:$0xff] %v434_v4  ;;  %v824_v33 = vpack.c.bf16 %v456_v55, %v455_v49  ;;  %v3016_v49 = vunpack.c.h.bf16 %v3132_v44  ;;  %v3020_v55 = vunpack.c.h.bf16 %v3133_v45 }
  0x55   : > { %471 = vst [vmem:[#allocation2 + $0xb1] sm:$0xff] %v438_v34  ;;  %v4099_v42 = vadd.f32 %v3907_v17, %v368_v35 }
  0x56   : > { %3614 = vmatpush3.bf16.msra.mxu0 %v3753_v36  ;;  %3566 = vmatpush3.bf16.msra.mxu1 %v3750_v32  ;;  %v4043_v7 = vadd.f32 %v3907_v17, %v364_v1  ;;  %v3012_v32 = vunpack.c.h.bf16 %v3131_v27  ;;  %v713_v46 = vld [vmem:[#allocation2 + $0x188] sm:$0xff]  ;;  %v371_v61 = vmul.f32 %v3016_v49, %v3901_v13  ;;  %v4120_v1 = vpack.c.bf16 %v434_v4, %v433_v0  ;;  %v3135_v0 = vld [vmem:[%s3854_s24 + $0x58] sm:$0xff]   ;;  %v3758_v4 = vld [vmem:[%s4964_s3 + $0x140] sm:$0xff]  }
  0x57   : > { %3615 = vmatprep.subr.bf16.mxu0 %v3757_v50  ;;  %3567 = vmatprep.subr.bf16.mxu1 %v3751_v43  ;;  %v439_v53 = vmax.f32 %v4099_v42, 0.0  ;;  %v373_v2 = vmul.f32 %v3020_v55, %v3901_v13  ;;  %v3027_v12 = vunpack.c.l.bf16 %v3135_v0 }
  0x58   : > { %v435_v18 = vmax.f32 %v4043_v7, 0.0  ;;  %v369_v36 = vmul.f32 %v3012_v32, %v3901_v13  ;;  %v4134_v56 = vadd.f32 %v3907_v17, %v371_v61  ;;  %v752_v61 = vld [vmem:[#allocation2 + $0x62] sm:$0xff] }
  0x59   : > { %1059 = vmatmul.mubr.bf16.gmra.mxu0 %v4015_v54  ;;  %1155 = vmatmul.mubr.bf16.gmra.mxu1 %v817_v58  ;;  %v370_v58 = vmul.f32 %v3015_v48, %v3901_v13  ;;  %472 = vst [vmem:[#allocation2 + $0xc1] sm:$0xff] %v439_v53  ;;  %v4144_v9 = vadd.f32 %v3907_v17, %v373_v2 }
  0x5a   : > { %1066 = vmatprep.mubr.bf16.mxu0 %v4023_v59  ;;  %3568 = vmatpush3.bf16.msra.mxu1 %v3751_v43  ;;  %468 = vst [vmem:[#allocation2 + $0x91] sm:$0xff] %v435_v18  ;;  %v3769_v43 = vld [vmem:[%s4964_s3 + $0x90] sm:$0xff]   ;;  %v4107_v47 = vadd.f32 %v3907_v17, %v369_v36  ;;  %v376_v35 = vmul.f32 %v3027_v12, %v3901_v13  ;;  %v3774_v36 = vld [vmem:[%s4964_s3 + $0x88] sm:$0xff]  }
  0x5b   : > { %1162 = vmatprep.mubr.bf16.mxu1 %v821_v63  ;;  %3569 = vmatprep.subr.bf16.mxu1 %v3752_v3  ;;  %v823_v63 = vpack.c.bf16 %v713_v46, %v712_v39  ;;  %v691_v16 = vld [vmem:[#allocation2 + $0x80] sm:$0xff]  ;;  %v751_v39 = vld [vmem:[#allocation2 + $0x52] sm:$0xff]  ;;  %v4188_v48 = vpack.c.bf16 %v436_v22, %v435_v18  ;;  %v694_v24 = vld [vmem:[#allocation2 + $0xa8] sm:$0xff] }
  0x5c   : > { %3616 = vmatpush3.bf16.msra.mxu0 %v3757_v50  ;;  %v3019_v50 = vunpack.c.l.bf16 %v3133_v45  ;;  %v440_v57 = vmax.f32 %v4107_v47, 0.0  ;;  %v4180_v45 = vadd.f32 %v3907_v17, %v376_v35  ;;  %v4195_v52 = vpack.c.bf16 %v751_v39, %v750_v38  ;;  %v754_v2 = vld [vmem:[#allocation2 + $0x7a] sm:$0xff] }
  0x5d   : > { %3617 = vmatprep.subr.bf16.mxu0 %v3761_v6  ;;  %v3781_v35 = vld [vmem:[%s4964_s3 + $0x1f8] sm:$0xff]  }
  0x5e   : > { %3570 = vmatpush3.bf16.msra.mxu1 %v3752_v3  ;;  %v372_v62 = vmul.f32 %v3019_v50, %v3901_v13  ;;  %v3134_v3 = vld [vmem:[%s3854_s24 + $0x50] sm:$0xff]   ;;  %473 = vst [vmem:[#allocation2 + $0xc9] sm:$0xff] %v440_v57  ;;  %v447_v7 = vmax.f32 %v4180_v45, 0.0  ;;  %v3771_v39 = vld [vmem:[%s4964_s3 + $0x18] sm:$0xff]  }
  0x5f   : > { %3571 = vmatprep.subr.bf16.mxu1 %v3754_v21  ;;  %v3023_v10 = vunpack.c.l.bf16 %v3134_v3  ;;  %v3024_v11 = vunpack.c.h.bf16 %v3134_v3  ;;  %v755_v3 = vld [vmem:[#allocation2 + $0x82] sm:$0xff]  ;;  %v555_v45 = vld [vmem:[#allocation2 + $0xa] sm:$0xff] }
  0x60   : > { %3618 = vmatpush3.bf16.msra.mxu0 %v3761_v6  ;;  %v4131_v6 = vadd.f32 %v3907_v17, %v370_v58  ;;  %v4137_v60 = vadd.f32 %v3907_v17, %v372_v62  ;;  %480 = vst [vmem:[#allocation2 + $0x121] sm:$0xff] %v447_v7  ;;  %v753_v62 = vld [vmem:[#allocation2 + $0x6a] sm:$0xff]  ;;  %v4236_v12 = vpack.c.bf16 %v755_v3, %v754_v2 }
  0x61   : > { %1067 = vmatmul.mubr.bf16.gmra.mxu0 %v4061_v23  ;;  %3619 = vmatprep.subr.bf16.mxu0 %v3766_v26  ;;  %v374_v31 = vmul.f32 %v3023_v10, %v3901_v13  ;;  %v375_v32 = vmul.f32 %v3024_v11, %v3901_v13  ;;  %v692_v22 = vld [vmem:[#allocation2 + $0x90] sm:$0xff]  ;;  %v693_v58 = vld [vmem:[#allocation2 + $0x98] sm:$0xff]  ;;  %v4228_v10 = vpack.c.bf16 %v753_v62, %v752_v61  ;;  %v3776_v2 = vld [vmem:[%s4964_s3 + $0x8] sm:$0xff]  }
  0x62   : > { %1163 = vmatmul.mubr.bf16.gmra.mxu1 %v820_v28  ;;  %1074 = vmatprep.mubr.bf16.mxu0 %v4077_v30  ;;  %v443_v27 = vmax.f32 %v4137_v60, 0.0  ;;  %v444_v28 = vmax.f32 %v4144_v9, 0.0  ;;  %v4234_v11 = vpack.c.bf16 %v438_v34, %v437_v25  ;;  %v695_v25 = vld [vmem:[#allocation2 + $0xb0] sm:$0xff]  ;;  %v3770_v34 = vld [vmem:[%s4964_s3 + $0x58] sm:$0xff]  }
  0x63   : > { %3572 = vmatpush3.bf16.msra.mxu1 %v3754_v21  ;;  %1170 = vmatprep.mubr.bf16.mxu1 %v824_v33  ;;  %v441_v21 = vmax.f32 %v4131_v6, 0.0  ;;  %v749_v33 = vld [vmem:[#allocation2 + $0x3a] sm:$0xff]  ;;  %v4174_v41 = vadd.f32 %v3907_v17, %v375_v32  ;;  %v758_v32 = vld [vmem:[#allocation2 + $0xaa] sm:$0xff] }
  0x64   : > { %3573 = vmatprep.subr.bf16.mxu1 %v3755_v29  ;;  %3620 = vmatpush3.bf16.msra.mxu0 %v3766_v26  ;;  %v442_v26 = vmax.f32 %v4134_v56, 0.0  ;;  %476 = vst [vmem:[#allocation2 + $0xf1] sm:$0xff] %v443_v27  ;;  %477 = vst [vmem:[#allocation2 + $0xf9] sm:$0xff] %v444_v28  ;;  %v4182_v46 = vpack.c.bf16 %v749_v33, %v748_v19  ;;  %v756_v19 = vld [vmem:[#allocation2 + $0x92] sm:$0xff]  ;;  %v770_v9 = vld [vmem:[#allocation2 + $0x13a] sm:$0xff] }
  0x65   : > { %3621 = vmatprep.subr.bf16.mxu0 %v3769_v43  ;;  %474 = vst [vmem:[#allocation2 + $0xd9] sm:$0xff] %v441_v21  ;;  %v446_v50 = vmax.f32 %v4174_v41, 0.0  ;;  %v759_v33 = vld [vmem:[#allocation2 + $0xb2] sm:$0xff]  ;;  %v760_v42 = vld [vmem:[#allocation2 + $0xc2] sm:$0xff]  ;;  %v761_v47 = vld [vmem:[#allocation2 + $0xca] sm:$0xff] }
  0x66   : > { %475 = vst [vmem:[#allocation2 + $0xe1] sm:$0xff] %v442_v26  ;;  %v4267_v38 = vpack.c.bf16 %v759_v33, %v758_v32  ;;  %v4287_v61 = vpack.c.bf16 %v761_v47, %v760_v42  ;;  %v4293_v62 = vpack.c.bf16 %v442_v26, %v441_v21  ;;  %v772_v42 = vld [vmem:[#allocation2 + $0x152] sm:$0xff]  ;;  %v773_v47 = vld [vmem:[#allocation2 + $0x15a] sm:$0xff] }
  0x67   : > { %3574 = vmatpush3.bf16.msra.mxu1 %v3755_v29  ;;  %v3028_v29 = vunpack.c.h.bf16 %v3135_v0  ;;  %479 = vst [vmem:[#allocation2 + $0x111] sm:$0xff] %v446_v50  ;;  %v3764_v0 = vld [vmem:[%s4964_s3 + $0x68] sm:$0xff]   ;;  %v4350_v41 = vpack.c.bf16 %v773_v47, %v772_v42  ;;  %v493_v42 = vld [vmem:[#allocation2 + $0x20] sm:$0xff] }
  0x68   : > { %3575 = vmatprep.subr.bf16.mxu1 %v3756_v40  ;;  %3622 = vmatpush3.bf16.msra.mxu0 %v3769_v43  ;;  %v4176_v43 = vpack.c.bf16 %v691_v16, %v690_v15  ;;  %v3765_v15 = vld [vmem:[%s4964_s3 + $0x28] sm:$0xff]   ;;  %v3767_v16 = vld [vmem:[%s4964_s3 + $0x60] sm:$0xff]  }
  0x69   : > { %1075 = vmatmul.mubr.bf16.gmra.mxu0 %v4109_v51  ;;  %v377_v44 = vmul.f32 %v3028_v29, %v3901_v13  ;;  %3623 = vmatprep.subr.bf16.mxu0 %v3774_v36  ;;  %v3760_v13 = vld [vmem:[%s4964_s3 + $0x38] sm:$0xff]   ;;  %v4254_v29 = vpack.c.bf16 %v695_v25, %v694_v24  ;;  %v3786_v47 = vld [vmem:[%s4964_s3 + $0x1e8] sm:$0xff]  }
  0x6a   : > { %1171 = vmatmul.mubr.bf16.gmra.mxu1 %v823_v63  ;;  %1082 = vmatprep.mubr.bf16.mxu0 %v4120_v1  ;;  %v3763_v63 = vld [vmem:[%s4964_s3 + $0x30] sm:$0xff]  }
  0x6b   : > { %3576 = vmatpush3.bf16.msra.mxu1 %v3756_v40  ;;  %3579 = vmatprep.mubr.bf16.mxu1 %v4126_v5  ;;  %v4171_v40 = vadd.f32 %v3907_v17, %v374_v31  ;;  %v4198_v55 = vadd.f32 %v3907_v17, %v377_v44  ;;  %v3777_v17 = vld [vmem:[%s4964_s3 + $0x80] sm:$0xff]   ;;  %v3772_v44 = vld [vmem:[%s4964_s3 + $0x50] sm:$0xff]   ;;  %v701_v32 = vld [vmem:[#allocation2 + $0xf8] sm:$0xff] }
  0x6c   : > { %3577 = vmatprep.subr.bf16.mxu1 %v3758_v4  ;;  %3624 = vmatpush3.bf16.msra.mxu0 %v3774_v36  ;;  %v757_v31 = vld [vmem:[#allocation2 + $0x9a] sm:$0xff]  ;;  %v764_v6 = vld [vmem:[#allocation2 + $0xf2] sm:$0xff] }
  0x6d   : > { %v445_v49 = vmax.f32 %v4171_v40, 0.0  ;;  %v448_v18 = vmax.f32 %v4198_v55, 0.0  ;;  %3625 = vmatprep.subr.bf16.mxu0 %v3777_v17  ;;  %v4259_v36 = vpack.c.bf16 %v757_v31, %v756_v19  ;;  %v698_v3 = vld [vmem:[#allocation2 + $0xd8] sm:$0xff]  ;;  %v700_v31 = vld [vmem:[#allocation2 + $0xf0] sm:$0xff] }
  0x6e   : > { %v765_v56 = vld [vmem:[#allocation2 + $0xfa] sm:$0xff]  ;;  %v767_v26 = vld [vmem:[#allocation2 + $0x112] sm:$0xff]  ;;  %v523_v55 = vld [vmem:[#allocation2 + $0x9] sm:$0xff] }
  0x6f   : > { %3578 = vmatpush3.bf16.msra.mxu1 %v3758_v4  ;;  %478 = vst [vmem:[#allocation2 + $0x109] sm:$0xff] %v445_v49  ;;  %481 = vst [vmem:[#allocation2 + $0x129] sm:$0xff] %v448_v18  ;;  %v4226_v4 = vpack.c.bf16 %v693_v58, %v692_v22  ;;  %v763_v22 = vld [vmem:[#allocation2 + $0xe2] sm:$0xff]  ;;  %v4317_v25 = vpack.c.bf16 %v765_v56, %v764_v6  ;;  %v775_v40 = vld [vmem:[#allocation2 + $0x172] sm:$0xff] }
  0x70   : > { %3291 = vmatprep.subr.bf16.mxu1 %v3759_v37  ;;  %3626 = vmatpush3.bf16.msra.mxu0 %v3777_v17  ;;  %v4265_v37 = vpack.c.bf16 %v440_v57, %v439_v53  ;;  %v3773_v53 = vld [vmem:[%s4964_s3 + $0x10] sm:$0xff]   ;;  %v3775_v57 = vld [vmem:[%s4964_s3 + $0x48] sm:$0xff]   ;;  %v762_v17 = vld [vmem:[#allocation2 + $0xda] sm:$0xff] }
  0x71   : > { %1083 = vmatmul.mubr.bf16.gmra.mxu0 %v4176_v43  ;;  %3427 = vmatprep.subr.bf16.mxu0 %v3781_v35 }
  0x72   : > { %3580 = vmatmul.mubr.bf16.vlgmr.msra.gmra.mxu1 %v4182_v46  ;;  %1090 = vmatprep.mubr.bf16.mxu0 %v4188_v48 }
  0x73   : > { %3292 = vmatpush3.bf16.msra.mxu1 %v3760_v13  ;;  %3583 = vmatprep.mubr.bf16.mxu1 %v4195_v52  ;;  %v696_v13 = vld [vmem:[#allocation2 + $0xc0] sm:$0xff] }
  0x74   : > { %3293 = vmatprep.subr.bf16.mxu1 %v3762_v14  ;;  %v697_v14 = vld [vmem:[#allocation2 + $0xc8] sm:$0xff] }
  0x75   : > { %v4285_v58 = vpack.c.bf16 %v697_v14, %v696_v13 }
  0x76   : > { %v766_v21 = vld [vmem:[#allocation2 + $0x10a] sm:$0xff]  ;;  %v768_v60 = vld [vmem:[#allocation2 + $0x122] sm:$0xff] }
  0x77   : > { %3294 = vmatpush3.bf16.msra.mxu1 %v3763_v63  ;;  %v4295_v63 = vpack.c.bf16 %v763_v22, %v762_v17  ;;  %v4325_v19 = vpack.c.bf16 %v767_v26, %v766_v21  ;;  %v769_v33 = vld [vmem:[#allocation2 + $0x12a] sm:$0xff]  ;;  %v704_v17 = vld [vmem:[#allocation2 + $0x120] sm:$0xff] }
  0x78   : > { %3295 = vmatprep.subr.bf16.mxu1 %v3764_v0  ;;  %v699_v0 = vld [vmem:[#allocation2 + $0xe0] sm:$0xff]  ;;  %v4334_v35 = vpack.c.bf16 %v769_v33, %v768_v60  ;;  %v702_v13 = vld [vmem:[#allocation2 + $0x108] sm:$0xff]  ;;  %v703_v14 = vld [vmem:[#allocation2 + $0x110] sm:$0xff] }
  0x79   : > { %1091 = vmatmul.mubr.bf16.gmra.mxu0 %v4226_v4  ;;  %v4315_v24 = vpack.c.bf16 %v699_v0, %v698_v3  ;;  %v705_v22 = vld [vmem:[#allocation2 + $0x128] sm:$0xff]  ;;  %v490_v21 = vld [vmem:[#allocation2] sm:$0xff]  ;;  %v3782_v60 = vld [vmem:[%s4964_s3 + $0x1b8] sm:$0xff]  }
  0x7a   : > { %3584 = vmatmul.mubr.bf16.gmra.mxu1 %v4228_v10  ;;  %1098 = vmatprep.mubr.bf16.mxu0 %v4234_v11  ;;  %v777_v3 = vld [vmem:[#allocation2 + $0x18a] sm:$0xff]  ;;  %v554_v0 = vld [vmem:[#allocation2 + $0x2] sm:$0xff] }
  0x7b   : > { %3587 = vmatprep.mubr.bf16.mxu1 %v4236_v12  ;;  %3296 = vmatpush3.bf16.msra.mxu1 %v3765_v15  ;;  %v3778_v15 = vld [vmem:[%s4964_s3 + $0x40] sm:$0xff]   ;;  %v588_v6 = vpack.c.bf16 %v555_v45, %v554_v0  ;;  %v491_v26 = vld [vmem:[#allocation2 + $0x8] sm:$0xff] }
  0x7c   : > { %3297 = vmatprep.subr.bf16.mxu1 %v3767_v16  ;;  %v3779_v16 = vld [vmem:[%s4964_s3] sm:$0xff]  }
  0x7d   : > { %v3803_v0 = vld [vmem:[%s4964_s3 + $0x200] sm:$0xff]  }
  0x7e   : > { %v3799_v45 = vld [vmem:[%s4964_s3 + $0x180] sm:$0xff]  }
  0x7f   : > { %3298 = vmatpush3.bf16.msra.mxu1 %v3768_v20  ;;  %v4313_v20 = vld [vmem:[%s4964_s3 + $0x238] sm:$0xff]  }
  0x80   : > { %3299 = vmatprep.subr.bf16.mxu1 %v3770_v34  ;;  %v4323_v34 = vpack.c.bf16 %v444_v28, %v443_v27  ;;  %v771_v27 = vld [vmem:[#allocation2 + $0x142] sm:$0xff]  ;;  %v4332_v28 = vpack.c.bf16 %v701_v32, %v700_v31  ;;  %v586_v32 = vpack.c.bf16 %v491_v26, %v490_v21  ;;  %v1816_v21 = vld [vmem:[#allocation2 + $0x98] sm:$0xff] }
  0x81   : > { %1099 = vmatmul.mubr.bf16.gmra.mxu0 %v4254_v29  ;;  %v525_v31 = vld [vmem:[#allocation2 + $0x21] sm:$0xff]  ;;  %v1849_v26 = vld [vmem:[#allocation2 + $0xa9] sm:$0xff] }
  0x82   : > { %3588 = vmatmul.mubr.bf16.gmra.mxu1 %v4259_v36  ;;  %1106 = vmatprep.mubr.bf16.mxu0 %v4265_v37 }
  0x83   : > { %3591 = vmatprep.mubr.bf16.mxu1 %v4267_v38  ;;  %3300 = vmatpush3.bf16.msra.mxu1 %v3771_v39  ;;  %v4340_v39 = vpack.c.bf16 %v446_v50, %v445_v49  ;;  %v4356_v49 = vpack.c.bf16 %v448_v18, %v447_v7  ;;  %v4364_v7 = vpack.c.bf16 %v705_v22, %v704_v17  ;;  %v3789_v17 = vld [vmem:[%s4964_s3 + $0x1a0] sm:$0xff]   ;;  %v3800_v22 = vld [vmem:[%s4964_s3 + $0x218] sm:$0xff]  }
  0x84   : > { %3301 = vmatprep.subr.bf16.mxu1 %v3772_v44  ;;  %v4342_v44 = vpack.c.bf16 %v771_v27, %v770_v9  ;;  %v3783_v9 = vld [vmem:[%s4964_s3 + $0x1f0] sm:$0xff]  }
  0x85   : > { %v3785_v27 = vld [vmem:[%s4964_s3 + $0x230] sm:$0xff]  }
  0x87   : > { %3302 = vmatpush3.bf16.msra.mxu1 %v3773_v53  ;;  %v774_v53 = vld [vmem:[#allocation2 + $0x16a] sm:$0xff] }
  0x88   : > { %3303 = vmatprep.subr.bf16.mxu1 %v3775_v57  ;;  %v4348_v57 = vpack.c.bf16 %v703_v14, %v702_v13  ;;  %v4358_v50 = vpack.c.bf16 %v775_v40, %v774_v53  ;;  %v3784_v13 = vld [vmem:[%s4964_s3 + $0x1b0] sm:$0xff]   ;;  %v492_v14 = vld [vmem:[#allocation2 + $0x18] sm:$0xff]  ;;  %v3788_v40 = vld [vmem:[%s4964_s3 + $0x1e0] sm:$0xff]  }
  0x89   : > { %1107 = vmatmul.mubr.bf16.gmra.mxu0 %v4285_v58  ;;  %v589_v53 = vpack.c.bf16 %v493_v42, %v492_v14  ;;  %v1817_v14 = vld [vmem:[#allocation2 + $0xa8] sm:$0xff]  ;;  %v1818_v42 = vld [vmem:[#allocation2 + $0xb0] sm:$0xff] }
  0x8a   : > { %3592 = vmatmul.mubr.bf16.gmra.mxu1 %v4287_v61  ;;  %1114 = vmatprep.mubr.bf16.mxu0 %v4293_v62 }
  0x8b   : > { %3595 = vmatprep.mubr.bf16.mxu1 %v4295_v63  ;;  %3304 = vmatpush3.bf16.msra.mxu1 %v3776_v2  ;;  %v776_v2 = vld [vmem:[#allocation2 + $0x182] sm:$0xff] }
  0x8c   : > { %3305 = vmatprep.subr.bf16.mxu1 %v3778_v15  ;;  %v522_v15 = vld [vmem:[#allocation2 + $0x1] sm:$0xff]  ;;  %v825_v18 = vpack.c.bf16 %v777_v3, %v776_v2  ;;  %v3801_v2 = vld [vmem:[%s4964_s3 + $0x210] sm:$0xff]  }
  0x8d   : > { %v587_v56 = vpack.c.bf16 %v523_v55, %v522_v15  ;;  %v3794_v3 = vld [vmem:[%s4964_s3 + $0x190] sm:$0xff]   ;;  %v1814_v55 = vld [vmem:[#allocation2 + $0x80] sm:$0xff] }
  0x8f   : > { %3306 = vmatpush3.bf16.msra.mxu1 %v3779_v16  ;;  %v524_v16 = vld [vmem:[#allocation2 + $0x19] sm:$0xff] }
  0x90   : > { %3659 = vmatprep.subr.bf16.mxu1 %v4313_v20  ;;  %v590_v33 = vpack.c.bf16 %v525_v31, %v524_v16  ;;  %v1850_v16 = vld [vmem:[#allocation2 + $0xb1] sm:$0xff]  ;;  %v548_v31 = vld [vmem:[#allocation2 + $0x139] sm:$0xff] }
  0x91   : > { %1115 = vmatmul.mubr.bf16.gmra.mxu0 %v4315_v24 }
  0x92   : > { %3596 = vmatmul.mubr.bf16.gmra.mxu1 %v4317_v25  ;;  %1122 = vmatprep.mubr.bf16.mxu0 %v4323_v34 }
  0x93   : > { %3599 = vmatprep.mubr.bf16.mxu1 %v4325_v19 }
  0x99   : > { %1123 = vmatmul.mubr.bf16.gmra.mxu0 %v4332_v28 }
  0x9a   : > { %3600 = vmatmul.mubr.bf16.gmra.mxu1 %v4334_v35  ;;  %1130 = vmatprep.mubr.bf16.mxu0 %v4340_v39 }
  0x9b   : > { %3603 = vmatprep.mubr.bf16.mxu1 %v4342_v44 }
  0xa1   : > { %1131 = vmatmul.mubr.bf16.gmra.mxu0 %v4348_v57 }
  0xa2   : > { %3604 = vmatmul.mubr.bf16.gmra.mxu1 %v4350_v41  ;;  %1138 = vmatprep.mubr.bf16.mxu0 %v4356_v49 }
  0xa3   : > { %3607 = vmatprep.mubr.bf16.mxu1 %v4358_v50 }
  0xa9   : > { %1139 = vmatmul.mubr.bf16.gmra.mxu0 %v4364_v7 }
  0xaa   : > { %3608 = vmatmul.mubr.bf16.gmra.mxu1 %v825_v18  ;;  %3627 = vmatprep.mubr.bf16.mxu0 %v588_v6  ;;  %v1847_v18 = vld [vmem:[#allocation2 + $0x91] sm:$0xff]  ;;  %v1848_v6 = vld [vmem:[#allocation2 + $0x99] sm:$0xff] }
  0xab   : > { %1516 = vmatprep.mubr.bf16.mxu1 %v587_v56  ;;  %v1916_v56 = vpack.c.bf16 %v1848_v6, %v1847_v18 }
  0xb1   : > { %3628 = vmatmul.mubr.bf16.vlgmr.msra.gmra.mxu0 %v4126_v5  ;;  %v3790_v5 = vld [vmem:[%s4964_s3 + $0x228] sm:$0xff]  }
  0xb2   : > { %1517 = vmatmul.mubr.bf16.vlgmr.msra.gmra.mxu1 %v586_v32  ;;  %3428 = vmatpush3.bf16.msra.mxu0 %v3782_v60  ;;  %v549_v32 = vld [vmem:[#allocation2 + $0x141] sm:$0xff] }
  0xb3   : > { %3660 = vmatpush3.bf16.msra.mxu1 %v4313_v20  ;;  %1524 = vmatprep.mubr.bf16.mxu1 %v590_v33  ;;  %v3787_v20 = vld [vmem:[%s4964_s3 + $0x1a8] sm:$0xff]   ;;  %v1919_v33 = vpack.c.bf16 %v1850_v16, %v1849_v26  ;;  %v521_v26 = vld [vmem:[#allocation2 + $0x170] sm:$0xff] }
  0xb4   : > { %3631 = vmatprep.mubr.bf16.mxu0 %v4182_v46  ;;  %3429 = vmatprep.subr.bf16.mxu0 %v3783_v9  ;;  %v3795_v46 = vld [vmem:[%s4964_s3 + $0x220] sm:$0xff]   ;;  %v4470_v9 = vpack.c.bf16 %v549_v32, %v548_v31  ;;  %v1855_v16 = vld [vmem:[#allocation2 + $0xf1] sm:$0xff] }
  0xb5   : > { %3661 = vmatprep.subr.bf16.mxu1 %v3785_v27  ;;  %v1856_v31 = vld [vmem:[#allocation2 + $0xf9] sm:$0xff] }
  0xb6   : > { %3430 = vmatpush3.bf16.msra.mxu0 %v3784_v13  ;;  %v516_v13 = vld [vmem:[#allocation2 + $0x138] sm:$0xff] }
  0xb7   : > { %3662 = vmatpush3.bf16.msra.mxu1 %v3785_v27  ;;  %3431 = vmatprep.subr.bf16.mxu0 %v3786_v47 }
  0xb8   : > { %3663 = vmatprep.subr.bf16.mxu1 %v3790_v5 }
  0xb9   : > { %3632 = vmatmul.mubr.bf16.gmra.mxu0 %v4195_v52  ;;  %v3791_v52 = vld [vmem:[%s4964_s3 + $0x1d8] sm:$0xff]  }
  0xba   : > { %1525 = vmatmul.mubr.bf16.gmra.mxu1 %v589_v53  ;;  %3635 = vmatprep.mubr.bf16.mxu0 %v4228_v10  ;;  %v3793_v10 = vld [vmem:[%s4964_s3 + $0x1d0] sm:$0xff]  }
  0xbb   : > { %1532 = vmatprep.mubr.bf16.mxu1 %v3960_v8  ;;  %3432 = vmatpush3.bf16.msra.mxu0 %v3787_v20  ;;  %v3792_v8 = vld [vmem:[%s4964_s3 + $0x198] sm:$0xff]   ;;  %v1852_v53 = vld [vmem:[#allocation2 + $0xc9] sm:$0xff] }
  0xbc   : > { %3433 = vmatprep.subr.bf16.mxu0 %v3788_v40  ;;  %3664 = vmatpush3.bf16.msra.mxu1 %v3790_v5  ;;  %v1851_v5 = vld [vmem:[#allocation2 + $0xc1] sm:$0xff] }
  0xbd   : > { %3665 = vmatprep.subr.bf16.mxu1 %v3795_v46 }
  0xbf   : > { %3434 = vmatpush3.bf16.msra.mxu0 %v3789_v17  ;;  %v551_v17 = vld [vmem:[#allocation2 + $0x159] sm:$0xff] }
  0xc0   : > { %3435 = vmatprep.subr.bf16.mxu0 %v3791_v52  ;;  %3666 = vmatpush3.bf16.msra.mxu1 %v3795_v46  ;;  %v550_v46 = vld [vmem:[#allocation2 + $0x151] sm:$0xff] }
  0xc1   : > { %3636 = vmatmul.mubr.bf16.gmra.mxu0 %v4236_v12  ;;  %3667 = vmatprep.subr.bf16.mxu1 %v3800_v22  ;;  %v3796_v12 = vld [vmem:[%s4964_s3 + $0x1c8] sm:$0xff]  }
  0xc2   : > { %1533 = vmatmul.mubr.bf16.gmra.mxu1 %v4015_v54  ;;  %3639 = vmatprep.mubr.bf16.mxu0 %v4259_v36  ;;  %v3802_v54 = vld [vmem:[%s4964_s3 + $0x208] sm:$0xff]   ;;  %v3798_v36 = vld [vmem:[%s4964_s3 + $0x1c0] sm:$0xff]  }
  0xc3   : > { %1540 = vmatprep.mubr.bf16.mxu1 %v4023_v59  ;;  %3436 = vmatpush3.bf16.msra.mxu0 %v3792_v8  ;;  %v3797_v59 = vld [vmem:[%s4964_s3 + $0x188] sm:$0xff]   ;;  %v1918_v8 = vpack.c.bf16 %v1818_v42, %v1817_v14 }
  0xc4   : > { %3437 = vmatprep.subr.bf16.mxu0 %v3793_v10  ;;  %3668 = vmatpush3.bf16.msra.mxu1 %v3800_v22 }
  0xc5   : > { %3669 = vmatprep.subr.bf16.mxu1 %v3801_v2 }
  0xc7   : > { %3438 = vmatpush3.bf16.msra.mxu0 %v3794_v3  ;;  %v1922_v3 = vpack.c.bf16 %v1852_v53, %v1851_v5 }
  0xc8   : > { %3439 = vmatprep.subr.bf16.mxu0 %v3796_v12  ;;  %3670 = vmatpush3.bf16.msra.mxu1 %v3801_v2 }
  0xc9   : > { %3640 = vmatmul.mubr.bf16.gmra.mxu0 %v4267_v38  ;;  %3671 = vmatprep.subr.bf16.mxu1 %v3802_v54  ;;  %v1842_v38 = vld [vmem:[#allocation2 + $0x51] sm:$0xff] }
  0xca   : > { %1541 = vmatmul.mubr.bf16.gmra.mxu1 %v4061_v23  ;;  %3643 = vmatprep.mubr.bf16.mxu0 %v4287_v61  ;;  %v1839_v23 = vld [vmem:[#allocation2 + $0x31] sm:$0xff] }
  0xcb   : > { %1548 = vmatprep.mubr.bf16.mxu1 %v4077_v30  ;;  %3440 = vmatpush3.bf16.msra.mxu0 %v3797_v59  ;;  %v1840_v30 = vld [vmem:[#allocation2 + $0x39] sm:$0xff] }
  0xcc   : > { %3441 = vmatprep.subr.bf16.mxu0 %v3798_v36  ;;  %3672 = vmatpush3.bf16.msra.mxu1 %v3802_v54  ;;  %v4480_v54 = vpack.c.bf16 %v551_v17, %v550_v46 }
  0xcd   : > { %3673 = vmatprep.subr.bf16.mxu1 %v3803_v0 }
  0xcf   : > { %3442 = vmatpush3.bf16.msra.mxu0 %v3799_v45 }
  0xd0   : > { %3674 = vmatpush3.bf16.msra.mxu1 %v3803_v0 }
  0xd1   : > { %3644 = vmatmul.mubr.bf16.gmra.mxu0 %v4295_v63  ;;  %v1810_v63 = vld [vmem:[#allocation2 + $0x50] sm:$0xff] }
  0xd2   : > { %1549 = vmatmul.mubr.bf16.gmra.mxu1 %v4109_v51  ;;  %3647 = vmatprep.mubr.bf16.mxu0 %v4317_v25  ;;  %v1904_v51 = vpack.c.bf16 %v1840_v30, %v1839_v23  ;;  %v1843_v25 = vld [vmem:[#allocation2 + $0x61] sm:$0xff]  ;;  %v518_v30 = vld [vmem:[#allocation2 + $0x150] sm:$0xff] }
  0xd3   : > { %1556 = vmatprep.mubr.bf16.mxu1 %v4120_v1  ;;  %v1807_v1 = vld [vmem:[#allocation2 + $0x30] sm:$0xff] }
  0xd9   : > { %3648 = vmatmul.mubr.bf16.gmra.mxu0 %v4325_v19  ;;  %v1844_v19 = vld [vmem:[#allocation2 + $0x69] sm:$0xff] }
  0xda   : > { %1557 = vmatmul.mubr.bf16.gmra.mxu1 %v4176_v43  ;;  %3651 = vmatprep.mubr.bf16.mxu0 %v4334_v35  ;;  %v1808_v43 = vld [vmem:[#allocation2 + $0x38] sm:$0xff]  ;;  %v1910_v35 = vpack.c.bf16 %v1844_v19, %v1843_v25 }
  0xdb   : > { %1564 = vmatprep.mubr.bf16.mxu1 %v4188_v48  ;;  %v1841_v48 = vld [vmem:[#allocation2 + $0x49] sm:$0xff]  ;;  %v1903_v61 = vpack.c.bf16 %v1808_v43, %v1807_v1  ;;  %v553_v25 = vld [vmem:[#allocation2 + $0x171] sm:$0xff] }
  0xdc   : > { %v1820_v1 = vld [vmem:[#allocation2 + $0xc8] sm:$0xff] }
  0xe1   : > { %3652 = vmatmul.mubr.bf16.gmra.mxu0 %v4342_v44  ;;  %v1812_v44 = vld [vmem:[#allocation2 + $0x68] sm:$0xff] }
  0xe2   : > { %1565 = vmatmul.mubr.bf16.gmra.mxu1 %v4226_v4  ;;  %3655 = vmatprep.mubr.bf16.mxu0 %v4350_v41  ;;  %v1907_v4 = vpack.c.bf16 %v1842_v38, %v1841_v48  ;;  %v1845_v41 = vld [vmem:[#allocation2 + $0x79] sm:$0xff] }
  0xe3   : > { %1572 = vmatprep.mubr.bf16.mxu1 %v4234_v11  ;;  %v1809_v11 = vld [vmem:[#allocation2 + $0x48] sm:$0xff]  ;;  %v519_v48 = vld [vmem:[#allocation2 + $0x158] sm:$0xff] }
  0xe4   : > { %v1853_v38 = vld [vmem:[#allocation2 + $0xd9] sm:$0xff] }
  0xe9   : > { %3656 = vmatmul.mubr.bf16.gmra.mxu0 %v4358_v50  ;;  %v1846_v50 = vld [vmem:[#allocation2 + $0x81] sm:$0xff] }
  0xea   : > { %1573 = vmatmul.mubr.bf16.gmra.mxu1 %v4254_v29  ;;  %2175 = vmatprep.mubr.bf16.mxu0 %v1904_v51  ;;  %v1906_v29 = vpack.c.bf16 %v1810_v63, %v1809_v11  ;;  %v1913_v15 = vpack.c.bf16 %v1846_v50, %v1845_v41  ;;  %v1819_v51 = vld [vmem:[#allocation2 + $0xc0] sm:$0xff]  ;;  %v552_v63 = vld [vmem:[#allocation2 + $0x169] sm:$0xff] }
  0xeb   : > { %1580 = vmatprep.mubr.bf16.mxu1 %v4265_v37  ;;  %v1811_v37 = vld [vmem:[#allocation2 + $0x60] sm:$0xff] }
  0xf1   : > { %2176 = vmatmul.mubr.bf16.vlgmr.msra.gmra.mxu0 %v1903_v61  ;;  %v1854_v61 = vld [vmem:[#allocation2 + $0xe1] sm:$0xff] }
  0xf2   : > { %1581 = vmatmul.mubr.bf16.gmra.mxu1 %v4285_v58  ;;  %2183 = vmatprep.mubr.bf16.mxu0 %v1907_v4  ;;  %v1909_v58 = vpack.c.bf16 %v1812_v44, %v1811_v37  ;;  %v4492_v44 = vpack.c.bf16 %v519_v48, %v518_v30  ;;  %v1925_v41 = vpack.c.bf16 %v1854_v61, %v1853_v38 }
  0xf3   : > { %1588 = vmatprep.mubr.bf16.mxu1 %v4293_v62  ;;  %v1813_v62 = vld [vmem:[#allocation2 + $0x78] sm:$0xff] }
  0xf9   : > { %2184 = vmatmul.mubr.bf16.gmra.mxu0 %v1906_v29 }
  0xfa   : > { %1589 = vmatmul.mubr.bf16.gmra.mxu1 %v4315_v24  ;;  %2191 = vmatprep.mubr.bf16.mxu0 %v1910_v35  ;;  %v1912_v24 = vpack.c.bf16 %v1814_v55, %v1813_v62  ;;  %v1921_v35 = vpack.c.bf16 %v1820_v1, %v1819_v51  ;;  %v1875_v51 = vld [vmem:[#allocation2 + $0x62] sm:$0xff]  ;;  %v1876_v1 = vld [vmem:[#allocation2 + $0x6a] sm:$0xff] }
  0xfb   : > { %1596 = vmatprep.mubr.bf16.mxu1 %v4323_v34  ;;  %v1815_v34 = vld [vmem:[#allocation2 + $0x90] sm:$0xff] }
  0xfc   : > { %v1915_v60 = vpack.c.bf16 %v1816_v21, %v1815_v34  ;;  %v1822_v34 = vld [vmem:[#allocation2 + $0xe0] sm:$0xff] }
 0x101   : > { %2192 = vmatmul.mubr.bf16.gmra.mxu0 %v1909_v58  ;;  %v4494_v58 = vpack.c.bf16 %v553_v25, %v552_v63  ;;  %v1911_v25 = vpack.c.bf16 %v1876_v1, %v1875_v51 }
 0x102   : > { %1597 = vmatmul.mubr.bf16.gmra.mxu1 %v4332_v28  ;;  %2199 = vmatprep.mubr.bf16.mxu0 %v1913_v15 }
 0x103   : > { %1604 = vmatprep.mubr.bf16.mxu1 %v4340_v39 }
 0x109   : > { %2200 = vmatmul.mubr.bf16.gmra.mxu0 %v1912_v24  ;;  %v520_v24 = vld [vmem:[#allocation2 + $0x168] sm:$0xff] }
 0x10a   : > { %1605 = vmatmul.mubr.bf16.gmra.mxu1 %v4348_v57  ;;  %2207 = vmatprep.mubr.bf16.mxu0 %v1916_v56  ;;  %v1821_v56 = vld [vmem:[#allocation2 + $0xd8] sm:$0xff] }
 0x10b   : > { %1612 = vmatprep.mubr.bf16.mxu1 %v4356_v49  ;;  %v517_v49 = vld [vmem:[#allocation2 + $0x140] sm:$0xff]  ;;  %v1924_v14 = vpack.c.bf16 %v1822_v34, %v1821_v56  ;;  %v1860_v34 = vld [vmem:[#allocation2 + $0x129] sm:$0xff] }
 0x10c   : > { %v4478_v2 = vpack.c.bf16 %v517_v49, %v516_v13  ;;  %v1928_v49 = vpack.c.bf16 %v1856_v31, %v1855_v16  ;;  %v1859_v56 = vld [vmem:[#allocation2 + $0x121] sm:$0xff]  ;;  %v1879_v16 = vld [vmem:[#allocation2 + $0x92] sm:$0xff] }
 0x10d   : > { %v1880_v31 = vld [vmem:[#allocation2 + $0x9a] sm:$0xff] }
 0x111   : > { %v3171_v39 = vpop.f32.mrf.mxu0  ;;  %2208 = vmatmul.mubr.bf16.gmra.mxu0 %v1915_v60  ;;  %v3243_v27 = vpop.f32.mrf.mxu1 }
 0x112   : > { %1613 = vmatmul.mubr.bf16.gmra.mxu1 %v4364_v7  ;;  %2215 = vmatprep.mubr.bf16.mxu0 %v1919_v33  ;;  %v1871_v33 = vld [vmem:[#allocation2 + $0x32] sm:$0xff] }
 0x113   : > { %v3172_v47 = vpop.f32.mrf.mxu0  ;;  %1620 = vmatprep.mubr.bf16.mxu1 %v4470_v9  ;;  %v3244_v40 = vpop.f32.mrf.mxu1 }
 0x114   : > { %v4474_v20 = vadd.f32 %v3172_v47, %v3171_v39  ;;  %v4476_v52 = vadd.f32 %v3244_v40, %v3243_v27  ;;  %v1872_v39 = vld [vmem:[#allocation2 + $0x3a] sm:$0xff]  ;;  %v4506_v47 = vpack.c.bf16 %v521_v26, %v520_v24  ;;  %v1878_v24 = vld [vmem:[#allocation2 + $0x82] sm:$0xff] }
 0x115   : > { %v3174_v22 = vpop.f32.mrf.mxu0  ;;  %v3246_v10 = vpop.f32.mrf.mxu1  ;;  %v1905_v53 = vpack.c.bf16 %v1872_v39, %v1871_v33 }
 0x117   : > { %v3175_v12 = vpop.f32.mrf.mxu0  ;;  %v3247_v36 = vpop.f32.mrf.mxu1 }
 0x118   : > { %v4482_v59 = vadd.f32 %v3175_v12, %v3174_v22  ;;  %v4484_v0 = vadd.f32 %v3247_v36, %v3246_v10  ;;  %v1873_v10 = vld [vmem:[#allocation2 + $0x4a] sm:$0xff]  ;;  %v1874_v12 = vld [vmem:[#allocation2 + $0x52] sm:$0xff] }
 0x119   : > { %v3177_v45 = vpop.f32.mrf.mxu0  ;;  %2216 = vmatmul.mubr.bf16.gmra.mxu0 %v1918_v8  ;;  %v3249_v23 = vpop.f32.mrf.mxu1  ;;  %v1857_v36 = vld [vmem:[#allocation2 + $0x109] sm:$0xff]  ;;  %v1908_v61 = vpack.c.bf16 %v1874_v12, %v1873_v10 }
 0x11a   : > { %1621 = vmatmul.mubr.bf16.gmra.mxu1 %v4478_v2  ;;  %2223 = vmatprep.mubr.bf16.mxu0 %v1922_v3  ;;  %v1881_v10 = vld [vmem:[#allocation2 + $0xaa] sm:$0xff] }
 0x11b   : > { %v3178_v43 = vpop.f32.mrf.mxu0  ;;  %1628 = vmatprep.mubr.bf16.mxu1 %v4480_v54  ;;  %v3250_v11 = vpop.f32.mrf.mxu1 }
 0x11c   : > { %v4488_v4 = vadd.f32 %v3178_v43, %v3177_v45  ;;  %v4490_v19 = vadd.f32 %v3250_v11, %v3249_v23  ;;  %v1858_v45 = vld [vmem:[#allocation2 + $0x111] sm:$0xff] }
 0x11d   : > { %v3180_v29 = vpop.f32.mrf.mxu0  ;;  %v3252_v37 = vpop.f32.mrf.mxu1  ;;  %v1931_v11 = vpack.c.bf16 %v1858_v45, %v1857_v36  ;;  %v1883_v36 = vld [vmem:[#allocation2 + $0xc2] sm:$0xff]  ;;  %v1884_v45 = vld [vmem:[#allocation2 + $0xca] sm:$0xff] }
 0x11f   : > { %v3181_v50 = vpop.f32.mrf.mxu0  ;;  %v3253_v62 = vpop.f32.mrf.mxu1 }
 0x120   : > { %v4496_v15 = vadd.f32 %v3181_v50, %v3180_v29  ;;  %v4498_v55 = vadd.f32 %v3253_v62, %v3252_v37  ;;  %v1877_v62 = vld [vmem:[#allocation2 + $0x7a] sm:$0xff] }
 0x121   : > { %v3183_v18 = vpop.f32.mrf.mxu0  ;;  %2224 = vmatmul.mubr.bf16.gmra.mxu0 %v1921_v35  ;;  %v1914_v39 = vpack.c.bf16 %v1878_v24, %v1877_v62  ;;  %v1888_v24 = vld [vmem:[#allocation2 + $0xfa] sm:$0xff] }
 0x122   : > { %v3255_v6 = vpop.f32.mrf.mxu1  ;;  %1629 = vmatmul.mubr.bf16.gmra.mxu1 %v4492_v44  ;;  %2231 = vmatprep.mubr.bf16.mxu0 %v1925_v41 }
 0x123   : > { %v3184_v21 = vpop.f32.mrf.mxu0  ;;  %1636 = vmatprep.mubr.bf16.mxu1 %v4494_v58 }
 0x124   : > { %v4502_v32 = vadd.f32 %v3184_v21, %v3183_v18  ;;  %v3256_v60 = vpop.f32.mrf.mxu1 }
 0x125   : > { %v4504_v27 = vadd.f32 %v3256_v60, %v3255_v6  ;;  %v3186_v13 = vpop.f32.mrf.mxu0 }
 0x126   : > { %v3258_v42 = vpop.f32.mrf.mxu1 }
 0x127   : > { %v3187_v5 = vpop.f32.mrf.mxu0 }
 0x128   : > { %v4508_v40 = vadd.f32 %v3187_v5, %v3186_v13  ;;  %v3259_v46 = vpop.f32.mrf.mxu1  ;;  %v1934_v13 = vpack.c.bf16 %v1860_v34, %v1859_v56 }
 0x129   : > { %v4510_v17 = vadd.f32 %v3259_v46, %v3258_v42  ;;  %v3189_v22 = vpop.f32.mrf.mxu0  ;;  %2232 = vmatmul.mubr.bf16.gmra.mxu0 %v1924_v14  ;;  %v1917_v42 = vpack.c.bf16 %v1880_v31, %v1879_v16 }
 0x12a   : > { %v3261_v8 = vpop.f32.mrf.mxu1  ;;  %1637 = vmatmul.mubr.bf16.gmra.mxu1 %v4506_v47  ;;  %2239 = vmatprep.mubr.bf16.mxu0 %v1928_v49 }
 0x12b   : > { %v3190_v3 = vpop.f32.mrf.mxu0  ;;  %3675 = vmatprep.mubr.bf16.mxu1 %v1905_v53 }
 0x12c   : > { %v3191_v23 = vadd.f32 %v3190_v3, %v3189_v22  ;;  %v3262_v30 = vpop.f32.mrf.mxu1 }
 0x12d   : > { %v4513_v43 = vadd.f32 %v3262_v30, %v3261_v8  ;;  %v3192_v48 = vpop.f32.mrf.mxu0 }
 0x12e   : > { %v3264_v38 = vpop.f32.mrf.mxu1 }
 0x12f   : > { %v3193_v63 = vpop.f32.mrf.mxu0 }
 0x130   : > { %v3194_v29 = vadd.f32 %v3193_v63, %v3192_v48  ;;  %v3265_v35 = vpop.f32.mrf.mxu1 }
 0x131   : > { %v4515_v37 = vadd.f32 %v3265_v35, %v3264_v38  ;;  %v3195_v41 = vpop.f32.mrf.mxu0  ;;  %2240 = vmatmul.mubr.bf16.gmra.mxu0 %v4332_v28  ;;  %v1923_v38 = vpack.c.bf16 %v1884_v45, %v1883_v36 }
 0x132   : > { %v3581_v50 = vpop.f32.mrf.mxu1  ;;  %3676 = vmatmul.mubr.bf16.vlgmr.msra.gmra.mxu1 %v1908_v61  ;;  %2247 = vmatprep.mubr.bf16.mxu0 %v1931_v11 }
 0x133   : > { %v4519_v18 = vadd.f32 %v3581_v50, %v4488_v4  ;;  %v3196_v6 = vpop.f32.mrf.mxu0  ;;  %3679 = vmatprep.mubr.bf16.mxu1 %v1911_v25 }
 0x134   : > { %v3197_v21 = vadd.f32 %v3196_v6, %v3195_v41  ;;  %v1213_v26 = vpop.f32.mrf.mxu1  ;;  %v1886_v41 = vld [vmem:[#allocation2 + $0xe2] sm:$0xff]  ;;  %v1887_v6 = vld [vmem:[#allocation2 + $0xf2] sm:$0xff] }
 0x135   : > { %v4522_v60 = vadd.f32 %v4474_v20, %v1213_v26  ;;  %v3198_v28 = vpop.f32.mrf.mxu0  ;;  %v1929_v31 = vpack.c.bf16 %v1888_v24, %v1887_v6 }
 0x136   : > { %v3582_v33 = vpop.f32.mrf.mxu1 }
 0x137   : > { %v4525_v14 = vadd.f32 %v3582_v33, %v4496_v15  ;;  %v3199_v4 = vpop.f32.mrf.mxu0  ;;  %v1882_v15 = vld [vmem:[#allocation2 + $0xb2] sm:$0xff] }
 0x138   : > { %v3200_v49 = vadd.f32 %v3199_v4, %v3198_v28  ;;  %v1216_v5 = vpop.f32.mrf.mxu1  ;;  %v1920_v1 = vpack.c.bf16 %v1882_v15, %v1881_v10  ;;  %v1889_v4 = vld [vmem:[#allocation2 + $0x10a] sm:$0xff] }
 0x139   : > { %v4528_v53 = vadd.f32 %v4482_v59, %v1216_v5  ;;  %v3201_v46 = vpop.f32.mrf.mxu0  ;;  %2248 = vmatmul.mubr.bf16.gmra.mxu0 %v4348_v57 }
 0x13a   : > { %v3585_v22 = vpop.f32.mrf.mxu1  ;;  %3680 = vmatmul.mubr.bf16.gmra.mxu1 %v1914_v39  ;;  %2255 = vmatprep.mubr.bf16.mxu0 %v1934_v13 }
 0x13b   : > { %v4531_v20 = vadd.f32 %v3585_v22, %v3191_v23  ;;  %v3202_v8 = vpop.f32.mrf.mxu0  ;;  %3683 = vmatprep.mubr.bf16.mxu1 %v1917_v42  ;;  %v1890_v42 = vld [vmem:[#allocation2 + $0x112] sm:$0xff]  ;;  %v1891_v22 = vld [vmem:[#allocation2 + $0x122] sm:$0xff] }
 0x13c   : > { %v3203_v3 = vadd.f32 %v3202_v8, %v3201_v46  ;;  %v1229_v12 = vpop.f32.mrf.mxu1  ;;  %v1892_v8 = vld [vmem:[#allocation2 + $0x12a] sm:$0xff] }
 0x13d   : > { %v4534_v30 = vadd.f32 %v4502_v32, %v1229_v12  ;;  %v3204_v59 = vpop.f32.mrf.mxu0  ;;  %v1932_v12 = vpack.c.bf16 %v1890_v42, %v1889_v4  ;;  %v1935_v36 = vpack.c.bf16 %v1892_v8, %v1891_v22  ;;  %v1898_v42 = vld [vmem:[#allocation2 + $0x172] sm:$0xff] }
 0x13e   : > { %v3586_v51 = vpop.f32.mrf.mxu1 }
 0x13f   : > { %v4536_v57 = vadd.f32 %v3586_v51, %v3194_v29  ;;  %v3205_v48 = vpop.f32.mrf.mxu0  ;;  %v1885_v29 = vld [vmem:[#allocation2 + $0xda] sm:$0xff] }
 0x140   : > { %v3206_v23 = vadd.f32 %v3205_v48, %v3204_v59  ;;  %v1232_v61 = vpop.f32.mrf.mxu1  ;;  %v1926_v26 = vpack.c.bf16 %v1886_v41, %v1885_v29  ;;  %v1895_v41 = vld [vmem:[#allocation2 + $0x152] sm:$0xff] }
 0x141   : > { %v4539_v11 = vadd.f32 %v4508_v40, %v1232_v61  ;;  %v3207_v63 = vpop.f32.mrf.mxu0  ;;  %2256 = vmatmul.mubr.bf16.gmra.mxu0 %v4364_v7  ;;  %v1894_v61 = vld [vmem:[#allocation2 + $0x142] sm:$0xff] }
 0x142   : > { %v3589_v25 = vpop.f32.mrf.mxu1  ;;  %3684 = vmatmul.mubr.bf16.gmra.mxu1 %v1920_v1  ;;  %2263 = vmatprep.mubr.bf16.mxu0 %v4470_v9 }
 0x143   : > { %v4543_v32 = vadd.f32 %v3589_v25, %v3203_v3  ;;  %v3208_v35 = vpop.f32.mrf.mxu0  ;;  %3687 = vmatprep.mubr.bf16.mxu1 %v1923_v38  ;;  %v1893_v38 = vld [vmem:[#allocation2 + $0x13a] sm:$0xff]  ;;  %v1868_v25 = vld [vmem:[#allocation2 + $0x189] sm:$0xff] }
 0x144   : > { %v3209_v50 = vadd.f32 %v3208_v35, %v3207_v63  ;;  %v1245_v62 = vpop.f32.mrf.mxu1  ;;  %v1867_v63 = vld [vmem:[#allocation2 + $0x181] sm:$0xff]  ;;  %v1938_v24 = vpack.c.bf16 %v1894_v61, %v1893_v38 }
 0x145   : > { %v4545_v56 = vadd.f32 %v3197_v21, %v1245_v62  ;;  %v3210_v40 = vpop.f32.mrf.mxu0 }
 0x146   : > { %v3590_v34 = vpop.f32.mrf.mxu1 }
 0x147   : > { %v4547_v7 = vadd.f32 %v3590_v34, %v3206_v23  ;;  %v3211_v16 = vpop.f32.mrf.mxu0 }
 0x148   : > { %v3212_v9 = vadd.f32 %v3211_v16, %v3210_v40  ;;  %v1248_v28 = vpop.f32.mrf.mxu1  ;;  %v1946_v40 = vpack.c.bf16 %v1868_v25, %v1867_v63 }
 0x149   : > { %v4549_v33 = vadd.f32 %v3200_v49, %v1248_v28  ;;  %v3213_v39 = vpop.f32.mrf.mxu0  ;;  %2264 = vmatmul.mubr.bf16.gmra.mxu0 %v4478_v2 }
 0x14a   : > { %v3593_v13 = vpop.f32.mrf.mxu1  ;;  %3688 = vmatmul.mubr.bf16.gmra.mxu1 %v1926_v26  ;;  %2271 = vmatprep.mubr.bf16.mxu0 %v4480_v54 }
 0x14b   : > { %v3214_v21 = vpop.f32.mrf.mxu0  ;;  %3691 = vmatprep.mubr.bf16.mxu1 %v1929_v31 }
 0x14c   : > { %v3215_v5 = vadd.f32 %v3214_v21, %v3213_v39  ;;  %v1261_v46 = vpop.f32.mrf.mxu1  ;;  %v1835_v39 = vld [vmem:[#allocation2 + $0x180] sm:$0xff]  ;;  %v1897_v21 = vld [vmem:[#allocation2 + $0x16a] sm:$0xff] }
 0x14d   : > { %v4553_v10 = vadd.f32 %v3209_v50, %v1261_v46  ;;  %v3216_v15 = vpop.f32.mrf.mxu0  ;;  %v1896_v50 = vld [vmem:[#allocation2 + $0x15a] sm:$0xff] }
 0x14e   : > { %v4555_v49 = vadd.f32 %v3593_v13, %v3215_v5  ;;  %v3594_v3 = vpop.f32.mrf.mxu1  ;;  %v1941_v26 = vpack.c.bf16 %v1896_v50, %v1895_v41  ;;  %v1836_v13 = vld [vmem:[#allocation2 + $0x188] sm:$0xff]  ;;  %v1869_v5 = vld [vmem:[#allocation2 + $0x199] sm:$0xff] }
 0x14f   : > { %v3217_v2 = vpop.f32.mrf.mxu0  ;;  %v1870_v46 = vld [vmem:[#allocation2 + $0x1a1] sm:$0xff] }
 0x150   : > { %v3218_v45 = vadd.f32 %v3217_v2, %v3216_v15  ;;  %v1264_v59 = vpop.f32.mrf.mxu1  ;;  %v1899_v15 = vld [vmem:[#allocation2 + $0x182] sm:$0xff]  ;;  %v1945_v2 = vpack.c.bf16 %v1836_v13, %v1835_v39 }
 0x151   : > { %v4557_v54 = vadd.f32 %v3212_v9, %v1264_v59  ;;  %v3219_v51 = vpop.f32.mrf.mxu0  ;;  %2272 = vmatmul.mubr.bf16.gmra.mxu0 %v4492_v44  ;;  %v1949_v59 = vpack.c.bf16 %v1870_v46, %v1869_v5  ;;  %v1838_v41 = vld [vmem:[#allocation2 + $0x1a0] sm:$0xff] }
 0x152   : > { %v4560_v1 = vadd.f32 %v3594_v3, %v3218_v45  ;;  %v3597_v48 = vpop.f32.mrf.mxu1  ;;  %3692 = vmatmul.mubr.bf16.gmra.mxu1 %v1932_v12  ;;  %2279 = vmatprep.mubr.bf16.mxu0 %v4494_v58  ;;  %v1900_v3 = vld [vmem:[#allocation2 + $0x18a] sm:$0xff]  ;;  %v1944_v45 = vpack.c.bf16 %v1898_v42, %v1897_v21 }
 0x153   : > { %v3220_v23 = vpop.f32.mrf.mxu0  ;;  %3695 = vmatprep.mubr.bf16.mxu1 %v1935_v36  ;;  %v1947_v38 = vpack.c.bf16 %v1900_v3, %v1899_v15 }
 0x154   : > { %v3221_v35 = vadd.f32 %v3220_v23, %v3219_v51  ;;  %v1277_v29 = vpop.f32.mrf.mxu1 }
 0x155   : > { %v3222_v62 = vpop.f32.mrf.mxu0 }
 0x156   : > { %v4563_v6 = vadd.f32 %v3221_v35, %v1277_v29  ;;  %v3598_v44 = vpop.f32.mrf.mxu1  ;;  %v1837_v29 = vld [vmem:[#allocation2 + $0x198] sm:$0xff] }
 0x157   : > { %v3223_v34 = vpop.f32.mrf.mxu0 }
 0x158   : > { %v3224_v16 = vadd.f32 %v3223_v34, %v3222_v62  ;;  %v1280_v58 = vpop.f32.mrf.mxu1  ;;  %v1901_v62 = vld [vmem:[#allocation2 + $0x19a] sm:$0xff] }
 0x159   : > { %v3225_v31 = vpop.f32.mrf.mxu0  ;;  %2280 = vmatmul.mubr.bf16.gmra.mxu0 %v4506_v47 }
 0x15a   : > { %v4566_v9 = vadd.f32 %v3224_v16, %v1280_v58  ;;  %v3601_v28 = vpop.f32.mrf.mxu1  ;;  %3696 = vmatmul.mubr.bf16.gmra.mxu1 %v1938_v24  ;;  %2287 = vmatprep.mubr.bf16.mxu0 %v1946_v40  ;;  %v1902_v24 = vld [vmem:[#allocation2 + $0x1a2] sm:$0xff] }
 0x15b   : > { %v3226_v4 = vpop.f32.mrf.mxu0  ;;  %3699 = vmatprep.mubr.bf16.mxu1 %v1941_v26  ;;  %v1950_v39 = vpack.c.bf16 %v1902_v24, %v1901_v62 }
 0x15c   : > { %v3227_v22 = vadd.f32 %v3226_v4, %v3225_v31  ;;  %v1293_v8 = vpop.f32.mrf.mxu1 }
 0x15d   : > { %v3228_v12 = vpop.f32.mrf.mxu0 }
 0x15e   : > { %v4568_v47 = vadd.f32 %v3597_v48, %v3227_v22  ;;  %v3602_v36 = vpop.f32.mrf.mxu1 }
 0x15f   : > { %v3229_v51 = vpop.f32.mrf.mxu0 }
 0x160   : > { %v3230_v23 = vadd.f32 %v3229_v51, %v3228_v12  ;;  %v1296_v61 = vpop.f32.mrf.mxu1 }
 0x161   : > { %v3231_v63 = vpop.f32.mrf.mxu0  ;;  %2288 = vmatmul.mubr.bf16.gmra.mxu0 %v1945_v2 }
 0x162   : > { %v4570_v25 = vadd.f32 %v3598_v44, %v3230_v23  ;;  %v3605_v35 = vpop.f32.mrf.mxu1  ;;  %3700 = vmatmul.mubr.bf16.gmra.mxu1 %v1944_v45  ;;  %2295 = vmatprep.mubr.bf16.mxu0 %v1949_v59  ;;  %v1948_v44 = vpack.c.bf16 %v1838_v41, %v1837_v29 }
 0x163   : > { %v4573_v50 = vadd.f32 %v3605_v35, %v4490_v19  ;;  %v3232_v48 = vpop.f32.mrf.mxu0  ;;  %3703 = vmatprep.mubr.bf16.mxu1 %v1947_v38 }
 0x164   : > { %v3233_v40 = vadd.f32 %v3232_v48, %v3231_v63  ;;  %v1309_v34 = vpop.f32.mrf.mxu1 }
 0x165   : > { %v4576_v26 = vadd.f32 %v4476_v52, %v1309_v34  ;;  %v3234_v16 = vpop.f32.mrf.mxu0 }
 0x166   : > { %v4578_v58 = vadd.f32 %v3233_v40, %v1293_v8  ;;  %v3606_v31 = vpop.f32.mrf.mxu1 }
 0x167   : > { %v4581_v13 = vadd.f32 %v3606_v31, %v4498_v55  ;;  %v3235_v19 = vpop.f32.mrf.mxu0 }
 0x168   : > { %v3236_v21 = vadd.f32 %v3235_v19, %v3234_v16  ;;  %v1312_v4 = vpop.f32.mrf.mxu1 }
 0x169   : > { %v4584_v42 = vadd.f32 %v4484_v0, %v1312_v4  ;;  %v3237_v5 = vpop.f32.mrf.mxu0  ;;  %2296 = vmatmul.mubr.bf16.gmra.mxu0 %v1948_v44 }
 0x16a   : > { %v4586_v46 = vadd.f32 %v3236_v21, %v1296_v61  ;;  %v3609_v52 = vpop.f32.mrf.mxu1  ;;  %3704 = vmatmul.mubr.bf16.gmra.mxu1 %v1950_v39 }
 0x16b   : > { %v4589_v22 = vadd.f32 %v3609_v52, %v4513_v43  ;;  %v3238_v8 = vpop.f32.mrf.mxu0 }
 0x16c   : > { %v3239_v15 = vadd.f32 %v3238_v8, %v3237_v5  ;;  %v1325_v3 = vpop.f32.mrf.mxu1 }
 0x16d   : > { %v4592_v55 = vadd.f32 %v4504_v27, %v1325_v3  ;;  %v3240_v12 = vpop.f32.mrf.mxu0 }
 0x16e   : > { %v4594_v2 = vadd.f32 %v3601_v28, %v3239_v15  ;;  %v3610_v0 = vpop.f32.mrf.mxu1 }
 0x16f   : > { %v4597_v45 = vadd.f32 %v3610_v0, %v4515_v37  ;;  %v3241_v59 = vpop.f32.mrf.mxu0 }
 0x170   : > { %v3242_v51 = vadd.f32 %v3241_v59, %v3240_v12  ;;  %v1328_v38 = vpop.f32.mrf.mxu1 }
 0x171   : > { %4967 = vst [vmem:[#allocation3_spill] sm:$0xff] %v4597_v45  ;;  %v4600_v23 = vadd.f32 %v4510_v17, %v1328_v38  ;;  %v3629_v43 = vpop.f32.mrf.mxu0 }
 0x172   : > { %v4602_v61 = vadd.f32 %v3602_v36, %v3242_v51  ;;  %v3307_v63 = vpop.f32.mrf.mxu1 }
 0x173   : > { %v1679_v35 = vpop.f32.mrf.mxu0 }
 0x174   : > { %v3308_v27 = vpop.f32.mrf.mxu1 }
 0x175   : > { %v3309_v29 = vadd.f32 %v3308_v27, %v3307_v63  ;;  %v3630_v41 = vpop.f32.mrf.mxu0 }
 0x176   : > { %v3310_v28 = vpop.f32.mrf.mxu1 }
 0x177   : > { %v1519_v48 = vadd.f32 %v3309_v29, %v4522_v60  ;;  %v1682_v62 = vpop.f32.mrf.mxu0 }
 0x178   : > { %v3311_v37 = vpop.f32.mrf.mxu1 }
 0x179   : > { %v4605_v24 = vadd.f32 %v1679_v35, %v1519_v48  ;;  %v3312_v40 = vadd.f32 %v3311_v37, %v3310_v28  ;;  %v3633_v34 = vpop.f32.mrf.mxu0 }
 0x17a   : > { %v3313_v16 = vpop.f32.mrf.mxu1 }
 0x17b   : > { %v1522_v17 = vadd.f32 %v3312_v40, %v4528_v53  ;;  %v1695_v44 = vpop.f32.mrf.mxu0 }
 0x17c   : > { %v3314_v36 = vpop.f32.mrf.mxu1 }
 0x17d   : > { %v4608_v31 = vadd.f32 %v1682_v62, %v1522_v17  ;;  %v3315_v39 = vadd.f32 %v3314_v36, %v3313_v16  ;;  %v3634_v19 = vpop.f32.mrf.mxu0 }
 0x17e   : > { %v3316_v21 = vpop.f32.mrf.mxu1 }
 0x17f   : > { %v1527_v4 = vadd.f32 %v3315_v39, %v4519_v18  ;;  %v1698_v5 = vpop.f32.mrf.mxu0 }
 0x180   : > { %v3317_v60 = vpop.f32.mrf.mxu1 }
 0x181   : > { %v3318_v52 = vadd.f32 %v3317_v60, %v3316_v21  ;;  %v3637_v8 = vpop.f32.mrf.mxu0  ;;  %v4611_v15 = vadd.f32 %v3629_v43, %v1527_v4 }
 0x182   : > { %v3319_v3 = vpop.f32.mrf.mxu1 }
 0x183   : > { %v1530_v12 = vadd.f32 %v3318_v52, %v4525_v14  ;;  %v1711_v0 = vpop.f32.mrf.mxu0 }
 0x184   : > { %v3320_v53 = vpop.f32.mrf.mxu1 }
 0x185   : > { %v3321_v59 = vadd.f32 %v3320_v53, %v3319_v3  ;;  %v3638_v51 = vpop.f32.mrf.mxu0  ;;  %v4614_v38 = vadd.f32 %v3630_v41, %v1530_v12 }
 0x186   : > { %v3322_v63 = vpop.f32.mrf.mxu1 }
 0x187   : > { %v1535_v35 = vadd.f32 %v3321_v59, %v4534_v30  ;;  %v1714_v27 = vpop.f32.mrf.mxu0 }
 0x188   : > { %v3323_v18 = vpop.f32.mrf.mxu1 }
 0x189   : > { %v3324_v29 = vadd.f32 %v3323_v18, %v3322_v63  ;;  %v4617_v28 = vpop.f32.mrf.mxu0  ;;  %v4619_v48 = vadd.f32 %v1695_v44, %v1535_v35 }
 0x18a   : > { %v3325_v43 = vpop.f32.mrf.mxu1 }
 0x18b   : > { %v1538_v62 = vadd.f32 %v3324_v29, %v4539_v11  ;;  %v1727_v14 = vpop.f32.mrf.mxu0 }
 0x18c   : > { %v3326_v37 = vpop.f32.mrf.mxu1 }
 0x18d   : > { %v3327_v40 = vadd.f32 %v3326_v37, %v3325_v43  ;;  %v4622_v16 = vpop.f32.mrf.mxu0  ;;  %v4624_v41 = vadd.f32 %v1698_v5, %v1538_v62 }
 0x18e   : > { %v3328_v17 = vpop.f32.mrf.mxu1 }
 0x18f   : > { %v1543_v30 = vadd.f32 %v3327_v40, %v4531_v20  ;;  %v1730_v36 = vpop.f32.mrf.mxu0 }
 0x190   : > { %v3329_v39 = vpop.f32.mrf.mxu1 }
 0x191   : > { %v3330_v21 = vadd.f32 %v3329_v39, %v3328_v17  ;;  %v4627_v4 = vpop.f32.mrf.mxu0  ;;  %v4629_v44 = vadd.f32 %v3633_v34, %v1543_v30 }
 0x192   : > { %v3331_v60 = vpop.f32.mrf.mxu1 }
 0x193   : > { %v1546_v11 = vadd.f32 %v3330_v21, %v4536_v57  ;;  %v4632_v52 = vpop.f32.mrf.mxu0 }
 0x194   : > { %v3332_v3 = vpop.f32.mrf.mxu1 }
 0x195   : > { %v3333_v12 = vadd.f32 %v3332_v3, %v3331_v60  ;;  %v4634_v53 = vpop.f32.mrf.mxu0  ;;  %v4636_v5 = vadd.f32 %v3634_v19, %v1546_v11 }
 0x196   : > { %v3334_v59 = vpop.f32.mrf.mxu1 }
 0x197   : > { %v1551_v20 = vadd.f32 %v3333_v12, %v4545_v56  ;;  %v4639_v63 = vpop.f32.mrf.mxu0 }
 0x198   : > { %v3335_v35 = vpop.f32.mrf.mxu1 }
 0x199   : > { %v3336_v18 = vadd.f32 %v3335_v35, %v3334_v59  ;;  %v4641_v34 = vpop.f32.mrf.mxu0  ;;  %v4643_v29 = vadd.f32 %v1711_v0, %v1551_v20 }
 0x19a   : > { %v3337_v57 = vpop.f32.mrf.mxu1 }
 0x19b   : > { %v1554_v43 = vadd.f32 %v3336_v18, %v4549_v33  ;;  %v4646_v62 = vpop.f32.mrf.mxu0 }
 0x19c   : > { %v3338_v37 = vpop.f32.mrf.mxu1 }
 0x19d   : > { %v3339_v40 = vadd.f32 %v3338_v37, %v3337_v57  ;;  %v4648_v19 = vpop.f32.mrf.mxu0  ;;  %v4650_v17 = vadd.f32 %v1714_v27, %v1554_v43 }
 0x19e   : > { %v3340_v56 = vpop.f32.mrf.mxu1 }
 0x19f   : > { %v1559_v30 = vadd.f32 %v3339_v40, %v4543_v32  ;;  %v4653_v39 = vpop.f32.mrf.mxu0 }
 0x1a0   : > { %v3341_v21 = vpop.f32.mrf.mxu1 }
 0x1a1   : > { %v3342_v60 = vadd.f32 %v3341_v21, %v3340_v56  ;;  %v4655_v0 = vpop.f32.mrf.mxu0  ;;  %v4657_v11 = vadd.f32 %v3637_v8, %v1559_v30 }
 0x1a2   : > { %v3343_v33 = vpop.f32.mrf.mxu1 }
 0x1a3   : > { %v1562_v3 = vadd.f32 %v3342_v60, %v4547_v7  ;;  %v4660_v12 = vpop.f32.mrf.mxu0 }
 0x1a4   : > { %v3344_v59 = vpop.f32.mrf.mxu1 }
 0x1a5   : > { %v3345_v20 = vadd.f32 %v3344_v59, %v3343_v33  ;;  %v4662_v27 = vpop.f32.mrf.mxu0  ;;  %v4664_v35 = vadd.f32 %v3638_v51, %v1562_v3 }
 0x1a6   : > { %v3346_v32 = vpop.f32.mrf.mxu1 }
 0x1a7   : > { %v1567_v18 = vadd.f32 %v3345_v20, %v4553_v10  ;;  %v4667_v57 = vpop.f32.mrf.mxu0 }
 0x1a8   : > { %v3347_v43 = vpop.f32.mrf.mxu1 }
 0x1a9   : > { %v3348_v37 = vadd.f32 %v3347_v43, %v3346_v32  ;;  %v4669_v8 = vpop.f32.mrf.mxu0  ;;  %v4671_v40 = vadd.f32 %v1727_v14, %v1567_v18 }
 0x1aa   : > { %4968 = vst [vmem:[#allocation4_spill] sm:$0xff] %v4669_v8  ;;  %v3349_v7 = vpop.f32.mrf.mxu1 }
 0x1ab   : > { %v1570_v56 = vadd.f32 %v3348_v37, %v4557_v54  ;;  %v4674_v30 = vpop.f32.mrf.mxu0 }
 0x1ac   : > { %v3350_v21 = vpop.f32.mrf.mxu1 }
 0x1ad   : > { %v3351_v60 = vadd.f32 %v3350_v21, %v3349_v7  ;;  %v4676_v51 = vpop.f32.mrf.mxu0  ;;  %v4678_v33 = vadd.f32 %v1730_v36, %v1570_v56 }
 0x1ae   : > { %4969 = vst [vmem:[#allocation5_spill] sm:$0xff] %v4676_v51  ;;  %v3352_v10 = vpop.f32.mrf.mxu1 }
 0x1af   : > { %v1575_v3 = vadd.f32 %v3351_v60, %v4555_v49  ;;  %v4681_v59 = vpop.f32.mrf.mxu0 }
 0x1b0   : > { %v3353_v20 = vpop.f32.mrf.mxu1 }
 0x1b1   : > { %v3354_v32 = vadd.f32 %v3353_v20, %v3352_v10  ;;  %v3443_v14 = vpop.f32.mrf.mxu0  ;;  %v4684_v18 = vadd.f32 %v4617_v28, %v1575_v3 }
 0x1b2   : > { %v3355_v54 = vpop.f32.mrf.mxu1 }
 0x1b3   : > { %v1578_v43 = vadd.f32 %v3354_v32, %v4560_v1  ;;  %v3444_v37 = vpop.f32.mrf.mxu0 }
 0x1b4   : > { %v3356_v7 = vpop.f32.mrf.mxu1  ;;  %v4687_v21 = vadd.f32 %v3444_v37, %v3443_v14 }
 0x1b5   : > { %v3357_v36 = vadd.f32 %v3356_v7, %v3355_v54  ;;  %v4689_v56 = vpop.f32.mrf.mxu0  ;;  %v4692_v49 = vadd.f32 %v4622_v16, %v1578_v43 }
 0x1b6   : > { %v3358_v60 = vpop.f32.mrf.mxu1 }
 0x1b7   : > { %v1583_v10 = vadd.f32 %v3357_v36, %v4563_v6  ;;  %v4695_v20 = vpop.f32.mrf.mxu0 }
 0x1b8   : > { %v3359_v28 = vpop.f32.mrf.mxu1 }
 0x1b9   : > { %v3360_v3 = vadd.f32 %v3359_v28, %v3358_v60  ;;  %v4697_v51 = vpop.f32.mrf.mxu0  ;;  %v4700_v1 = vadd.f32 %v4632_v52, %v1583_v10 }
 0x1ba   : > { %v3361_v32 = vpop.f32.mrf.mxu1 }
 0x1bb   : > { %v1586_v14 = vadd.f32 %v3360_v3, %v4566_v9  ;;  %v4703_v54 = vpop.f32.mrf.mxu0 }
 0x1bc   : > { %v3362_v37 = vpop.f32.mrf.mxu1 }
 0x1bd   : > { %v3363_v16 = vadd.f32 %v3362_v37, %v3361_v32  ;;  %v4705_v43 = vpop.f32.mrf.mxu0  ;;  %v4708_v6 = vadd.f32 %v4639_v63, %v1586_v14 }
 0x1be   : > { %v3364_v7 = vpop.f32.mrf.mxu1 }
 0x1bf   : > { %4970 = vst [vmem:[#allocation6_spill] sm:$0xff] %v4708_v6  ;;  %v1591_v36 = vadd.f32 %v3363_v16, %v4568_v47  ;;  %v4711_v60 = vpop.f32.mrf.mxu0 }
 0x1c0   : > { %v3365_v28 = vpop.f32.mrf.mxu1 }
 0x1c1   : > { %v3366_v52 = vadd.f32 %v3365_v28, %v3364_v7  ;;  %v4713_v10 = vpop.f32.mrf.mxu0  ;;  %v4716_v9 = vadd.f32 %v4627_v4, %v1591_v36 }
 0x1c2   : > { %v3367_v3 = vpop.f32.mrf.mxu1 }
 0x1c3   : > { %v1594_v32 = vadd.f32 %v3366_v52, %v4570_v25  ;;  %v4719_v37 = vpop.f32.mrf.mxu0 }
 0x1c4   : > { %v3368_v8 = vpop.f32.mrf.mxu1 }
 0x1c5   : > { %v3369_v63 = vadd.f32 %v3368_v8, %v3367_v3  ;;  %v4721_v14 = vpop.f32.mrf.mxu0  ;;  %v4724_v47 = vadd.f32 %v4634_v53, %v1594_v32 }
 0x1c6   : > { %v3370_v16 = vpop.f32.mrf.mxu1 }
 0x1c7   : > { %4971 = vst [vmem:[#allocation7_spill] sm:$0xff] %v4724_v47  ;;  %v1599_v7 = vadd.f32 %v3369_v63, %v4578_v58  ;;  %v4727_v28 = vpop.f32.mrf.mxu0 }
 0x1c8   : > { %v3371_v45 = vpop.f32.mrf.mxu1 }
 0x1c9   : > { %v3372_v4 = vadd.f32 %v3371_v45, %v3370_v16  ;;  %v4729_v36 = vpop.f32.mrf.mxu0  ;;  %v4732_v25 = vadd.f32 %v4646_v62, %v1599_v7 }
 0x1ca   : > { %v3373_v52 = vpop.f32.mrf.mxu1 }
 0x1cb   : > { %4972 = vst [vmem:[#allocation8_spill] sm:$0xff] %v4732_v25  ;;  %v1602_v8 = vadd.f32 %v3372_v4, %v4586_v46  ;;  %v4735_v3 = vpop.f32.mrf.mxu0 }
 0x1cc   : > { %v3374_v6 = vpop.f32.mrf.mxu1 }
 0x1cd   : > { %v3375_v53 = vadd.f32 %v3374_v6, %v3373_v52  ;;  %v4737_v32 = vpop.f32.mrf.mxu0  ;;  %v4740_v58 = vadd.f32 %v4653_v39, %v1602_v8 }
 0x1ce   : > { %v3376_v63 = vpop.f32.mrf.mxu1 }
 0x1cf   : > { %4973 = vst [vmem:[#allocation9_spill] sm:$0xff] %v4740_v58  ;;  %v1607_v45 = vadd.f32 %v3375_v53, %v4594_v2  ;;  %v4743_v16 = vpop.f32.mrf.mxu0 }
 0x1d0   : > { %v3377_v47 = vpop.f32.mrf.mxu1 }
 0x1d1   : > { %v3378_v62 = vadd.f32 %v3377_v47, %v3376_v63  ;;  %v4745_v7 = vpop.f32.mrf.mxu0  ;;  %v4748_v46 = vadd.f32 %v4641_v34, %v1607_v45 }
 0x1d2   : > { %v3379_v4 = vpop.f32.mrf.mxu1 }
 0x1d3   : > { %4974 = vst [vmem:[#allocation10_spill] sm:$0xff] %v4748_v46  ;;  %v1610_v6 = vadd.f32 %v3378_v62, %v4602_v61  ;;  %v4751_v52 = vpop.f32.mrf.mxu0 }
 0x1d4   : > { %v3380_v25 = vpop.f32.mrf.mxu1 }
 0x1d5   : > { %v3381_v39 = vadd.f32 %v3380_v25, %v3379_v4  ;;  %v4753_v8 = vpop.f32.mrf.mxu0  ;;  %v4756_v2 = vadd.f32 %v4648_v19, %v1610_v6 }
 0x1d6   : > { %v3382_v53 = vpop.f32.mrf.mxu1 }
 0x1d7   : > { %4975 = vst [vmem:[#allocation11_spill] sm:$0xff] %v4756_v2  ;;  %v1615_v47 = vadd.f32 %v3381_v39, %v4576_v26  ;;  %v4759_v63 = vpop.f32.mrf.mxu0 }
 0x1d8   : > { %v3383_v58 = vpop.f32.mrf.mxu1 }
 0x1d9   : > { %v3384_v34 = vadd.f32 %v3383_v58, %v3382_v53  ;;  %v4761_v45 = vpop.f32.mrf.mxu0  ;;  %v4764_v61 = vadd.f32 %v4660_v12, %v1615_v47 }
 0x1da   : > { %v3385_v62 = vpop.f32.mrf.mxu1 }
 0x1db   : > { %4976 = vst [vmem:[#allocation12_spill] sm:$0xff] %v4764_v61  ;;  %v1618_v25 = vadd.f32 %v3384_v34, %v4584_v42  ;;  %v4767_v4 = vpop.f32.mrf.mxu0 }
 0x1dc   : > { %v3386_v46 = vpop.f32.mrf.mxu1 }
 0x1dd   : > { %v3387_v19 = vadd.f32 %v3386_v46, %v3385_v62  ;;  %v4769_v6 = vpop.f32.mrf.mxu0  ;;  %v4772_v26 = vadd.f32 %v4667_v57, %v1618_v25 }
 0x1de   : > { %v3388_v39 = vpop.f32.mrf.mxu1 }
 0x1df   : > { %4977 = vst [vmem:[#allocation13_spill] sm:$0xff] %v4772_v26  ;;  %v1623_v58 = vadd.f32 %v3387_v19, %v4573_v50  ;;  %v4775_v53 = vpop.f32.mrf.mxu0 }
 0x1e0   : > { %v3389_v2 = vpop.f32.mrf.mxu1 }
 0x1e1   : > { %v3390_v12 = vadd.f32 %v3389_v2, %v3388_v39  ;;  %v4777_v47 = vpop.f32.mrf.mxu0  ;;  %v4780_v42 = vadd.f32 %v4655_v0, %v1623_v58 }
 0x1e2   : > { %v3391_v34 = vpop.f32.mrf.mxu1 }
 0x1e3   : > { %4978 = vst [vmem:[#allocation14_spill] sm:$0xff] %v4780_v42  ;;  %v1626_v46 = vadd.f32 %v3390_v12, %v4581_v13  ;;  %v4783_v62 = vpop.f32.mrf.mxu0 }
 0x1e4   : > { %v3392_v61 = vpop.f32.mrf.mxu1 }
 0x1e5   : > { %v3393_v57 = vadd.f32 %v3392_v61, %v3391_v34  ;;  %v4785_v25 = vpop.f32.mrf.mxu0  ;;  %v4788_v50 = vadd.f32 %v4662_v27, %v1626_v46 }
 0x1e6   : > { %v3394_v19 = vpop.f32.mrf.mxu1 }
 0x1e7   : > { %4979 = vst [vmem:[#allocation15_spill] sm:$0xff] %v4788_v50  ;;  %v1631_v2 = vadd.f32 %v3393_v57, %v4592_v55  ;;  %v4791_v39 = vpop.f32.mrf.mxu0 }
 0x1e8   : > { %v3395_v26 = vpop.f32.mrf.mxu1 }
 0x1e9   : > { %v3396_v0 = vadd.f32 %v3395_v26, %v3394_v19  ;;  %v4793_v58 = vpop.f32.mrf.mxu0  ;;  %v4796_v13 = vadd.f32 %v4674_v30, %v1631_v2 }
 0x1ea   : > { %v3397_v12 = vpop.f32.mrf.mxu1 }
 0x1eb   : > { %4980 = vst [vmem:[#allocation16_spill] sm:$0xff] %v4796_v13  ;;  %v1634_v61 = vadd.f32 %v3396_v0, %v4600_v23  ;;  %v4799_v34 = vpop.f32.mrf.mxu0 }
 0x1ec   : > { %v3398_v42 = vpop.f32.mrf.mxu1 }
 0x1ed   : > { %v3399_v27 = vadd.f32 %v3398_v42, %v3397_v12  ;;  %v4801_v46 = vpop.f32.mrf.mxu0  ;;  %v4804_v55 = vadd.f32 %v4681_v59, %v1634_v61  ;;  %v3451_v42 = vadd.f32 %v4703_v54, %v4697_v51  ;;  %v3454_v59 = vadd.f32 %v4711_v60, %v4705_v43 }
 0x1ee   : > { %v4806_v57 = vpop.f32.mrf.mxu1 }
 0x1ef   : > { %4981 = vst [vmem:[#allocation17_spill] sm:$0xff] %v4804_v55  ;;  %v4809_v26 = vadd.f32 %v3399_v27, %v4589_v22  ;;  %v4811_v19 = vpop.f32.mrf.mxu0 }
 0x1f0   : > { %v4813_v30 = vpop.f32.mrf.mxu1 }
 0x1f1   : > { %4982 = vst [vmem:[#allocation18_spill] sm:$0xff] %v4809_v26  ;;  %4983 = vst [vmem:[#allocation19_spill] sm:$0xff] %v4813_v30  ;;  %v4815_v2 = vpop.f32.mrf.mxu0  ;;  %v3448_v26 = vadd.f32 %v4695_v20, %v4689_v56  ;;  %v3457_v20 = vadd.f32 %v4719_v37, %v4713_v10 }
 0x1f2   : > { %v3677_v23 = vpop.f32.mrf.mxu1 }
 0x1f3   : > { %v4819_v0 = vpop.f32.mrf.mxu0  ;;  %v2347_v61 = vadd.f32 %v3677_v23, %v3451_v42 }
 0x1f4   : > { %v2338_v12 = vpop.f32.mrf.mxu1 }
 0x1f5   : > { %v2339_v22 = vadd.f32 %v4687_v21, %v2338_v12  ;;  %v4824_v27 = vpop.f32.mrf.mxu0  ;;  %v2467_v54 = vadd.f32 %v2347_v61, %v4611_v15  ;;  %v3463_v21 = vadd.f32 %v4735_v3, %v4729_v36  ;;  %v3466_v15 = vadd.f32 %v4743_v16, %v4737_v32 }
 0x1f6   : > { %v3678_v55 = vpop.f32.mrf.mxu1 }
 0x1f7   : > { %v2465_v13 = vadd.f32 %v2339_v22, %v4605_v24  ;;  %v2350_v50 = vadd.f32 %v3678_v55, %v3454_v59  ;;  %v4829_v30 = vpop.f32.mrf.mxu0 }
 0x1f8   : > { %v2341_v51 = vpop.f32.mrf.mxu1 }
 0x1f9   : > { %v2468_v43 = vadd.f32 %v2350_v50, %v4614_v38  ;;  %v2342_v60 = vadd.f32 %v3448_v26, %v2341_v51  ;;  %v4833_v23 = vpop.f32.mrf.mxu0  ;;  %v2695_v55 = vmul.f32 %v2465_v13, %v2465_v13  ;;  %v2697_v51 = vmul.f32 %v2467_v54, %v2467_v54 }
 0x1fa   : > { %v3681_v42 = vpop.f32.mrf.mxu1 }
 0x1fb   : > { %v3053_v12 = vpack.c.bf16 %v2468_v43, %v2467_v54  ;;  %v2466_v56 = vadd.f32 %v2342_v60, %v4608_v31  ;;  %v4838_v24 = vpop.f32.mrf.mxu0  ;;  %v2363_v38 = vadd.f32 %v3681_v42, %v3463_v21  ;;  %v3460_v31 = vadd.f32 %v4727_v28, %v4721_v14 }
 0x1fc   : > { %v2354_v50 = vpop.f32.mrf.mxu1  ;;  %v2698_v16 = vmul.f32 %v2468_v43, %v2468_v43 }
 0x1fd   : > { %3140 = vst [vmem:[%s3859_s27 + $0x8] sm:$0xff] %v3053_v12   ;;  %v3048_v26 = vpack.c.bf16 %v2466_v56, %v2465_v13  ;;  %v2658_v59 = vadd.f32 %v2466_v56, %v2465_v13  ;;  %v2696_v36 = vmul.f32 %v2466_v56, %v2466_v56  ;;  %v4845_v3 = vpop.f32.mrf.mxu0  ;;  %v2355_v61 = vadd.f32 %v3457_v20, %v2354_v50 }
 0x1fe   : > { %v3682_v22 = vpop.f32.mrf.mxu1  ;;  %v2471_v21 = vadd.f32 %v2363_v38, %v4629_v44 }
 0x1ff   : > { %3049 = vst [vmem:[%s3859_s27] sm:$0xff] %v3048_v26   ;;  %v2659_v10 = vadd.f32 %v2658_v59, %v2467_v54  ;;  %v2727_v37 = vadd.f32 %v2696_v36, %v2695_v55  ;;  %v2366_v60 = vadd.f32 %v3682_v22, %v3466_v15  ;;  %v4850_v32 = vpop.f32.mrf.mxu0  ;;  %v2469_v13 = vadd.f32 %v2355_v61, %v4619_v48 }
 0x200   : > { %v2357_v42 = vpop.f32.mrf.mxu1  ;;  %v3469_v54 = vadd.f32 %v4751_v52, %v4745_v7  ;;  %v3475_v15 = vadd.f32 %v4767_v4, %v4761_v45  ;;  %v3478_v59 = vadd.f32 %v4775_v53, %v4769_v6 }
 0x201   : > { %v2728_v12 = vadd.f32 %v2727_v37, %v2697_v51  ;;  %v2660_v56 = vadd.f32 %v2659_v10, %v2468_v43  ;;  %v2472_v14 = vadd.f32 %v2366_v60, %v4636_v5  ;;  %v2358_v28 = vadd.f32 %v3460_v31, %v2357_v42  ;;  %v4855_v20 = vpop.f32.mrf.mxu0 }
 0x202   : > { %v3685_v50 = vpop.f32.mrf.mxu1  ;;  %v2699_v44 = vmul.f32 %v2469_v13, %v2469_v13  ;;  %v3472_v51 = vadd.f32 %v4759_v63, %v4753_v8  ;;  %v2701_v37 = vmul.f32 %v2471_v21, %v2471_v21 }
 0x203   : > { %v2661_v55 = vadd.f32 %v2660_v56, %v2469_v13  ;;  %v2729_v38 = vadd.f32 %v2728_v12, %v2698_v16  ;;  %v3063_v48 = vpack.c.bf16 %v2472_v14, %v2471_v21  ;;  %v4861_v26 = vpop.f32.mrf.mxu0  ;;  %v2470_v43 = vadd.f32 %v2358_v28, %v4624_v41 }
 0x204   : > { %v2370_v5 = vpop.f32.mrf.mxu1  ;;  %v2379_v7 = vadd.f32 %v3685_v50, %v3475_v15  ;;  %v2702_v28 = vmul.f32 %v2472_v14, %v2472_v14  ;;  %v3481_v15 = vadd.f32 %v4783_v62, %v4777_v47 }
 0x205   : > { %v2730_v36 = vadd.f32 %v2729_v38, %v2699_v44  ;;  %3142 = vst [vmem:[%s3859_s27 + $0x18] sm:$0xff] %v3063_v48   ;;  %v2371_v52 = vadd.f32 %v3469_v54, %v2370_v5  ;;  %v4867_v31 = vpop.f32.mrf.mxu0  ;;  %v3058_v45 = vpack.c.bf16 %v2470_v43, %v2469_v13  ;;  %v2662_v4 = vadd.f32 %v2661_v55, %v2470_v43 }
 0x206   : > { %v2700_v61 = vmul.f32 %v2470_v43, %v2470_v43  ;;  %v3686_v22 = vpop.f32.mrf.mxu1  ;;  %v2475_v42 = vadd.f32 %v2379_v7, %v4657_v11 }
 0x207   : > { %v2382_v10 = vadd.f32 %v3686_v22, %v3478_v59  ;;  %v4871_v41 = vpop.f32.mrf.mxu0  ;;  %3141 = vst [vmem:[%s3859_s27 + $0x10] sm:$0xff] %v3058_v45   ;;  %v2663_v60 = vadd.f32 %v2662_v4, %v2471_v21  ;;  %v2473_v53 = vadd.f32 %v2371_v52, %v4643_v29  ;;  %v3487_v21 = vadd.f32 %v4799_v34, %v4793_v58 }
 0x208   : > { %v2731_v6 = vadd.f32 %v2730_v36, %v2700_v61  ;;  %v2373_v16 = vpop.f32.mrf.mxu1 }
 0x209   : > { %v2476_v13 = vadd.f32 %v2382_v10, %v4664_v35  ;;  %v2374_v12 = vadd.f32 %v3472_v51, %v2373_v16  ;;  %v4877_v56 = vpop.f32.mrf.mxu0  ;;  %v2664_v63 = vadd.f32 %v2663_v60, %v2472_v14  ;;  %v3490_v35 = vadd.f32 %v4811_v19, %v4801_v46 }
 0x20a   : > { %v2732_v8 = vadd.f32 %v2731_v6, %v2701_v37  ;;  %v3689_v54 = vpop.f32.mrf.mxu1  ;;  %v2703_v44 = vmul.f32 %v2473_v53, %v2473_v53  ;;  %v2705_v46 = vmul.f32 %v2475_v42, %v2475_v42  ;;  %v3493_v6 = vadd.f32 %v4819_v0, %v4815_v2 }
 0x20b   : > { %v3073_v29 = vpack.c.bf16 %v2476_v13, %v2475_v42  ;;  %v2474_v50 = vadd.f32 %v2374_v12, %v4650_v17  ;;  %v4884_v11 = vpop.f32.mrf.mxu0  ;;  %v2665_v55 = vadd.f32 %v2664_v63, %v2473_v53  ;;  %v2395_v47 = vadd.f32 %v3689_v54, %v3487_v21 }
 0x20c   : > { %v2733_v38 = vadd.f32 %v2732_v8, %v2702_v28  ;;  %v2386_v14 = vpop.f32.mrf.mxu1  ;;  %v3484_v17 = vadd.f32 %v4791_v39, %v4785_v25  ;;  %v2706_v37 = vmul.f32 %v2476_v13, %v2476_v13 }
 0x20d   : > { %3144 = vst [vmem:[%s3859_s27 + $0x28] sm:$0xff] %v3073_v29   ;;  %v3068_v48 = vpack.c.bf16 %v2474_v50, %v2473_v53  ;;  %v2704_v43 = vmul.f32 %v2474_v50, %v2474_v50  ;;  %v2387_v62 = vadd.f32 %v3481_v15, %v2386_v14  ;;  %v3512_v5 = vpop.f32.mrf.mxu0  ;;  %v2666_v34 = vadd.f32 %v2665_v55, %v2474_v50 }
 0x20e   : > { %v2734_v58 = vadd.f32 %v2733_v38, %v2703_v44  ;;  %v3690_v59 = vpop.f32.mrf.mxu1  ;;  %v2479_v61 = vadd.f32 %v2395_v47, %v4684_v18  ;;  %v3499_v53 = vadd.f32 %v4838_v24, %v4833_v23  ;;  %v3496_v15 = vadd.f32 %v4829_v30, %v4824_v27  ;;  %v4984_v38 = vld [vmem:[#allocation7_spill] sm:$0xff] }
 0x20f   : > { %3143 = vst [vmem:[%s3859_s27 + $0x20] sm:$0xff] %v3068_v48   ;;  %v2398_v36 = vadd.f32 %v3690_v59, %v3490_v35  ;;  %v3513_v7 = vpop.f32.mrf.mxu0  ;;  %v2667_v19 = vadd.f32 %v2666_v34, %v2475_v42  ;;  %v2477_v45 = vadd.f32 %v2387_v62, %v4671_v40  ;;  %v3511_v34 = vadd.f32 %v4884_v11, %v4877_v56 }
 0x210   : > { %v2735_v52 = vadd.f32 %v2734_v58, %v2704_v43  ;;  %v2389_v4 = vpop.f32.mrf.mxu1  ;;  %v3505_v58 = vadd.f32 %v4861_v26, %v4855_v20  ;;  %v3508_v56 = vadd.f32 %v4871_v41, %v4867_v31 }
 0x211   : > { %v2480_v22 = vadd.f32 %v2398_v36, %v4692_v49  ;;  %v2390_v51 = vadd.f32 %v3484_v17, %v2389_v4  ;;  %v4895_v10 = vpop.f32.mrf.mxu0  ;;  %v2668_v25 = vadd.f32 %v2667_v19, %v2476_v13  ;;  %v3502_v49 = vadd.f32 %v4850_v32, %v4845_v3 }
 0x212   : > { %v2736_v60 = vadd.f32 %v2735_v52, %v2705_v46  ;;  %v3693_v39 = vpop.f32.mrf.mxu1  ;;  %v2707_v12 = vmul.f32 %v2477_v45, %v2477_v45  ;;  %v2709_v32 = vmul.f32 %v2479_v61, %v2479_v61 }
 0x213   : > { %v3083_v40 = vpack.c.bf16 %v2480_v22, %v2479_v61  ;;  %v2478_v16 = vadd.f32 %v2390_v51, %v4678_v33  ;;  %v4902_v18 = vpop.f32.mrf.mxu0  ;;  %v2669_v42 = vadd.f32 %v2668_v25, %v2477_v45  ;;  %v2411_v2 = vadd.f32 %v3693_v39, %v3499_v53 }
 0x214   : > { %v2737_v28 = vadd.f32 %v2736_v60, %v2706_v37  ;;  %v2402_v13 = vpop.f32.mrf.mxu1  ;;  %v2710_v47 = vmul.f32 %v2480_v22, %v2480_v22  ;;  %v3517_v41 = vadd.f32 %v4902_v18, %v4895_v10 }
 0x215   : > { %3146 = vst [vmem:[%s3859_s27 + $0x38] sm:$0xff] %v3083_v40   ;;  %v3078_v8 = vpack.c.bf16 %v2478_v16, %v2477_v45  ;;  %v2708_v63 = vmul.f32 %v2478_v16, %v2478_v16  ;;  %v2403_v0 = vadd.f32 %v3493_v6, %v2402_v13  ;;  %v4907_v54 = vpop.f32.mrf.mxu0  ;;  %v2670_v24 = vadd.f32 %v2669_v42, %v2478_v16  ;;  %v4986_v6 = vld [vmem:[#allocation8_spill] sm:$0xff]  ;;  %v4987_v16 = vld [vmem:[#allocation10_spill] sm:$0xff]  ;;  %v4988_v42 = vld [vmem:[#allocation11_spill] sm:$0xff] }
 0x216   : > { %v2738_v23 = vadd.f32 %v2737_v28, %v2707_v12  ;;  %v3694_v33 = vpop.f32.mrf.mxu1  ;;  %v2483_v44 = vadd.f32 %v2411_v2, %v4716_v9  ;;  %v3514_v9 = vadd.f32 %v3513_v7, %v3512_v5 }
 0x217   : > { %3145 = vst [vmem:[%s3859_s27 + $0x30] sm:$0xff] %v3078_v8   ;;  %v2414_v21 = vadd.f32 %v3694_v33, %v3502_v49  ;;  %v4912_v3 = vpop.f32.mrf.mxu0  ;;  %v2671_v29 = vadd.f32 %v2670_v24, %v2479_v61  ;;  %v2481_v35 = vadd.f32 %v2403_v0, %v4700_v1  ;;  %v4985_v1 = vld [vmem:[#allocation6_spill] sm:$0xff]  ;;  %v4989_v24 = vld [vmem:[#allocation9_spill] sm:$0xff] }
 0x218   : > { %v2739_v50 = vadd.f32 %v2738_v23, %v2708_v63  ;;  %v2405_v55 = vpop.f32.mrf.mxu1  ;;  %v2713_v5 = vmul.f32 %v2483_v44, %v2483_v44  ;;  %v3520_v18 = vadd.f32 %v4912_v3, %v4907_v54 }
 0x219   : > { %v2484_v14 = vadd.f32 %v2414_v21, %v4984_v38  ;;  %v2406_v48 = vadd.f32 %v3496_v15, %v2405_v55  ;;  %v3521_v43 = vpop.f32.mrf.mxu0  ;;  %v2672_v30 = vadd.f32 %v2671_v29, %v2480_v22  ;;  %v2711_v19 = vmul.f32 %v2481_v35, %v2481_v35 }
 0x21a   : > { %v2740_v62 = vadd.f32 %v2739_v50, %v2709_v32  ;;  %v3697_v27 = vpop.f32.mrf.mxu1 }
 0x21b   : > { %v3093_v59 = vpack.c.bf16 %v2484_v14, %v2483_v44  ;;  %v2482_v17 = vadd.f32 %v2406_v48, %v4985_v1  ;;  %v3522_v36 = vpop.f32.mrf.mxu0  ;;  %v2673_v46 = vadd.f32 %v2672_v30, %v2481_v35  ;;  %v2427_v22 = vadd.f32 %v3697_v27, %v3511_v34 }
 0x21c   : > { %v2741_v52 = vadd.f32 %v2740_v62, %v2710_v47  ;;  %v2418_v45 = vpop.f32.mrf.mxu1  ;;  %v2714_v8 = vmul.f32 %v2484_v14, %v2484_v14  ;;  %v3523_v0 = vadd.f32 %v3522_v36, %v3521_v43  ;;  %v4991_v36 = vld [vmem:[#allocation19_spill] sm:$0xff] }
 0x21d   : > { %3148 = vst [vmem:[%s3859_s27 + $0x48] sm:$0xff] %v3093_v59   ;;  %v3088_v4 = vpack.c.bf16 %v2482_v17, %v2481_v35  ;;  %v2712_v61 = vmul.f32 %v2482_v17, %v2482_v17  ;;  %v2419_v51 = vadd.f32 %v3505_v58, %v2418_v45  ;;  %v3524_v37 = vpop.f32.mrf.mxu0  ;;  %v2674_v26 = vadd.f32 %v2673_v46, %v2482_v17  ;;  %v4990_v59 = vld [vmem:[#allocation12_spill] sm:$0xff]  ;;  %v4992_v46 = vld [vmem:[#allocation14_spill] sm:$0xff] }
 0x21e   : > { %v2742_v20 = vadd.f32 %v2741_v52, %v2711_v19  ;;  %v3698_v60 = vpop.f32.mrf.mxu1  ;;  %v2487_v49 = vadd.f32 %v2427_v22, %v4987_v16  ;;  %v4993_v52 = vld [vmem:[#allocation15_spill] sm:$0xff] }
 0x21f   : > { %3147 = vst [vmem:[%s3859_s27 + $0x40] sm:$0xff] %v3088_v4   ;;  %v2430_v11 = vadd.f32 %v3698_v60, %v3514_v9  ;;  %v3525_v25 = vpop.f32.mrf.mxu0  ;;  %v2675_v7 = vadd.f32 %v2674_v26, %v2483_v44  ;;  %v2485_v53 = vadd.f32 %v2419_v51, %v4986_v6  ;;  %v3402_v9 = vadd.f32 %v4991_v36, %v4806_v57  ;;  %v4994_v26 = vld [vmem:[#allocation13_spill] sm:$0xff] }
 0x220   : > { %v2743_v39 = vadd.f32 %v2742_v20, %v2712_v61  ;;  %v2421_v40 = vpop.f32.mrf.mxu1  ;;  %v3526_v50 = vadd.f32 %v3525_v25, %v3524_v37  ;;  %v2717_v27 = vmul.f32 %v2487_v49, %v2487_v49 }
 0x221   : > { %v2488_v12 = vadd.f32 %v2430_v11, %v4988_v42  ;;  %v2422_v28 = vadd.f32 %v3508_v56, %v2421_v40  ;;  %v3527_v13 = vpop.f32.mrf.mxu0  ;;  %v2676_v2 = vadd.f32 %v2675_v7, %v2484_v14  ;;  %v2715_v32 = vmul.f32 %v2485_v53, %v2485_v53 }
 0x222   : > { %v2744_v63 = vadd.f32 %v2743_v39, %v2713_v5  ;;  %v3701_v31 = vpop.f32.mrf.mxu1  ;;  %v4995_v39 = vld [vmem:[#allocation3_spill] sm:$0xff] }
 0x223   : > { %v3103_v23 = vpack.c.bf16 %v2488_v12, %v2487_v49  ;;  %v2486_v33 = vadd.f32 %v2422_v28, %v4989_v24  ;;  %v3528_v15 = vpop.f32.mrf.mxu0  ;;  %v2677_v21 = vadd.f32 %v2676_v2, %v2485_v53  ;;  %v2443_v38 = vadd.f32 %v3701_v31, %v3523_v0  ;;  %v4996_v0 = vld [vmem:[#allocation16_spill] sm:$0xff] }
 0x224   : > { %v2745_v29 = vadd.f32 %v2744_v63, %v2714_v8  ;;  %v2434_v35 = vpop.f32.mrf.mxu1  ;;  %v2718_v54 = vmul.f32 %v2488_v12, %v2488_v12  ;;  %v3529_v37 = vadd.f32 %v3528_v15, %v3527_v13  ;;  %v1642_v6 = vadd.f32 %v3402_v9, %v4995_v39  ;;  %v4997_v15 = vld [vmem:[#allocation18_spill] sm:$0xff] }
 0x225   : > { %3150 = vst [vmem:[%s3859_s27 + $0x58] sm:$0xff] %v3103_v23   ;;  %v3098_v55 = vpack.c.bf16 %v2486_v33, %v2485_v53  ;;  %v2716_v44 = vmul.f32 %v2486_v33, %v2486_v33  ;;  %v2435_v14 = vadd.f32 %v3517_v41, %v2434_v35  ;;  %v3530_v48 = vpop.f32.mrf.mxu0  ;;  %v2678_v62 = vadd.f32 %v2677_v21, %v2486_v33  ;;  %v4998_v21 = vld [vmem:[#allocation4_spill] sm:$0xff] }
 0x226   : > { %v2746_v47 = vadd.f32 %v2745_v29, %v2715_v32  ;;  %v3702_v10 = vpop.f32.mrf.mxu1  ;;  %v2491_v19 = vadd.f32 %v2443_v38, %v4992_v46  ;;  %v1800_v32 = vadd.f32 %v4998_v21, %v4997_v15  ;;  %v4999_v29 = vld [vmem:[#allocation5_spill] sm:$0xff] }
 0x227   : > { %3149 = vst [vmem:[%s3859_s27 + $0x50] sm:$0xff] %v3098_v55   ;;  %v2446_v43 = vadd.f32 %v3702_v10, %v3526_v50  ;;  %v3531_v30 = vpop.f32.mrf.mxu0  ;;  %v2679_v58 = vadd.f32 %v2678_v62, %v2487_v49  ;;  %v2489_v1 = vadd.f32 %v2435_v14, %v4990_v59  ;;  %v1803_v50 = vadd.f32 %v4999_v29, %v1642_v6 }
 0x228   : > { %v2747_v34 = vadd.f32 %v2746_v47, %v2716_v44  ;;  %v2437_v17 = vpop.f32.mrf.mxu1  ;;  %v2721_v13 = vmul.f32 %v2491_v19, %v2491_v19  ;;  %v3532_v8 = vadd.f32 %v3531_v30, %v3530_v48  ;;  %v5000_v47 = vld [vmem:[#allocation17_spill] sm:$0xff] }
 0x229   : > { %v2492_v45 = vadd.f32 %v2446_v43, %v4993_v52  ;;  %v2438_v4 = vadd.f32 %v3520_v18, %v2437_v17  ;;  %v3533_v61 = vpop.f32.mrf.mxu0  ;;  %v2680_v22 = vadd.f32 %v2679_v58, %v2488_v12  ;;  %v2719_v25 = vmul.f32 %v2489_v1, %v2489_v1 }
 0x22a   : > { %v2748_v3 = vadd.f32 %v2747_v34, %v2717_v27  ;;  %v3705_v51 = vpop.f32.mrf.mxu1 }
 0x22b   : > { %v3113_v20 = vpack.c.bf16 %v2492_v45, %v2491_v19  ;;  %v2490_v60 = vadd.f32 %v2438_v4, %v4994_v26  ;;  %v3534_v56 = vpop.f32.mrf.mxu0  ;;  %v2681_v11 = vadd.f32 %v2680_v22, %v2489_v1  ;;  %v2722_v55 = vmul.f32 %v2492_v45, %v2492_v45 }
 0x22c   : > { %v2749_v57 = vadd.f32 %v2748_v3, %v2718_v54  ;;  %v3535_v5 = vadd.f32 %v3534_v56, %v3533_v61  ;;  %v2450_v7 = vpop.f32.mrf.mxu1  ;;  %v2657_v56 = vld [vmem:[%s4966_s5] sm:$0x3] }
 0x22d   : > { %3152 = vst [vmem:[%s3859_s27 + $0x68] sm:$0xff] %v3113_v20   ;;  %v3108_v53 = vpack.c.bf16 %v2490_v60, %v2489_v1  ;;  %v2720_v40 = vmul.f32 %v2490_v60, %v2490_v60  ;;  %v2451_v16 = vadd.f32 %v3529_v37, %v2450_v7  ;;  %v3536_v49 = vpop.f32.mrf.mxu0  ;;  %v2682_v12 = vadd.f32 %v2681_v11, %v2490_v60 }
 0x22e   : > { %v2750_v42 = vadd.f32 %v2749_v57, %v2719_v25  ;;  %v3706_v28 = vpop.f32.mrf.mxu1  ;;  %v2459_v63 = vadd.f32 %v3705_v51, %v3535_v5 }
 0x22f   : > { %3151 = vst [vmem:[%s3859_s27 + $0x60] sm:$0xff] %v3108_v53   ;;  %v3537_v2 = vpop.f32.mrf.mxu0  ;;  %v2683_v31 = vadd.f32 %v2682_v12, %v2491_v19  ;;  %v2493_v23 = vadd.f32 %v2451_v16, %v4996_v0 }
 0x230   : > { %v2751_v41 = vadd.f32 %v2750_v42, %v2720_v40  ;;  %v3538_v24 = vadd.f32 %v3537_v2, %v3536_v49  ;;  %v2453_v33 = vpop.f32.mrf.mxu1  ;;  %v2495_v48 = vadd.f32 %v2459_v63, %v1800_v32 }
 0x231   : > { %v2454_v35 = vadd.f32 %v3532_v8, %v2453_v33  ;;  %v2684_v38 = vadd.f32 %v2683_v31, %v2492_v45  ;;  %v2723_v18 = vmul.f32 %v2493_v23, %v2493_v23 }
 0x232   : > { %v2752_v44 = vadd.f32 %v2751_v41, %v2721_v13  ;;  %v2462_v14 = vadd.f32 %v3706_v28, %v3538_v24  ;;  %v2725_v17 = vmul.f32 %v2495_v48, %v2495_v48 }
 0x233   : > { %v2494_v62 = vadd.f32 %v2454_v35, %v5000_v47  ;;  %v2685_v10 = vadd.f32 %v2684_v38, %v2493_v23 }
 0x234   : > { %v2753_v43 = vadd.f32 %v2752_v44, %v2722_v55  ;;  %v2496_v30 = vadd.f32 %v2462_v14, %v1803_v50 }
 0x235   : > { %v3118_v27 = vpack.c.bf16 %v2494_v62, %v2493_v23  ;;  %v2724_v58 = vmul.f32 %v2494_v62, %v2494_v62  ;;  %v2686_v1 = vadd.f32 %v2685_v10, %v2494_v62 }
 0x236   : > { %v2754_v34 = vadd.f32 %v2753_v43, %v2723_v18  ;;  %v3123_v59 = vpack.c.bf16 %v2496_v30, %v2495_v48  ;;  %v2726_v46 = vmul.f32 %v2496_v30, %v2496_v30 }
 0x237   : > { %3153 = vst [vmem:[%s3859_s27 + $0x70] sm:$0xff] %v3118_v27   ;;  %v2687_v36 = vadd.f32 %v2686_v1, %v2495_v48 }
 0x238   : > { %3154 = vst [vmem:[%s3859_s27 + $0x78] sm:$0xff] %v3123_v59   ;;  %v2755_v9 = vadd.f32 %v2754_v34, %v2724_v58 }
 0x239   : > { %v2688_v19 = vadd.f32 %v2687_v36, %v2496_v30 }
 0x23a   : > { %v2756_v52 = vadd.f32 %v2755_v9, %v2725_v17 }
 0x23b   : > { %v2689_v45 = vrot.slane %v2688_v19, 4 }
 0x23c   : > { %v2757_v4 = vadd.f32 %v2756_v52, %v2726_v46 }
 0x23d   : > { %v2690_v61 = vadd.f32 %v2689_v45, %v2688_v19 }
 0x23e   : > { %v2758_v54 = vrot.slane %v2757_v4, 4 }
 0x23f   : > { %v2691_v3 = vrot.slane %v2690_v61, 2 }
 0x240   : > { %v2759_v22 = vadd.f32 %v2758_v54, %v2757_v4 }
 0x241   : > { %v2692_v51 = vadd.f32 %v2691_v3, %v2690_v61 }
 0x242   : > { %v2760_v37 = vrot.slane %v2759_v22, 2 }
 0x243   : > { %v2693_v20 = vrot.slane %v2692_v51, 1 }
 0x244   : > { %v2761_v26 = vadd.f32 %v2760_v37, %v2759_v22 }
 0x245   : > { %v2694_v11 = vadd.f32 %v2693_v20, %v2692_v51 }
 0x246   : > { %v2762_v60 = vrot.slane %v2761_v26, 1 }
 0x248   : > { %v2763_v25 = vadd.f32 %v2762_v60, %v2761_v26 }
 0x24a   : > { %v2765_v57 = vsel %vm2764_vm0, %v2694_v11, %v2763_v25 }
 0x24b   : > { %v2766_v5 = vadd.f32 %v2765_v57, %v2657_v56 }
 0x24d   : > { %2767 = vst [vmem:[%s4966_s5] sm:$0x3] %v2766_v5 }
 0x24e PF: > { %s16_s18 = sadd.s32 1, %s3810_s18  }
 0x24f   : > { %p13_p5 = scmp.ge.s32.totalorder %s16_s18, 6  }
 0x251   :  { %15 = sbr.rel (!%p13_p5) target bundleno = 1 (0x1), region = 80 }

// kernel: bottleneck_forward.6
= control target key start
LH: loop header
LB: loop body
LE: loop exit
PB: predicated region body
PF: predicated region fallthrough
CT: control target
= control target key end

     0   :  { %vm1865_vm0 = vcmask 257024   ;;  %vm1995_vm1 = vcmask 261120   ;;  %vm24_vm2 = vcmask 254976   ;;  %vm2646_vm3 = vcmask 1040384   ;;  %s5287_s3 = inlined_call_operand.vmem [shape: bf16[128,32], index: 3, kind: input, shape index: {}]   ;;  %s5288_s0 = inlined_call_operand.vmem [shape: bf16[1024,128], index: 0, kind: input, shape index: {}]   ;;  %s5289_s1 = inlined_call_operand.vmem [shape: f32[1,128], index: 1, kind: input, shape index: {}]   ;;  %s5290_s2 = inlined_call_operand.vmem [shape: f32[1,128], index: 2, kind: input, shape index: {}]   ;;  %s5291_s4 = inlined_call_operand.vmem [shape: bf16[1024,32], index: 4, kind: output, shape index: {0}]   ;;  %s5292_s5 = inlined_call_operand.vmem [shape: f32[2,32], index: 5, kind: output, shape index: {1}]  }
   0x1   :  { %v3477_v0 = vld [vmem:[%s5287_s3 + $0x38] sm:$0xff]   ;;  %v3478_v1 = vld [vmem:[%s5287_s3 + $0x30] sm:$0xff]   ;;  %v3479_v2 = vld [vmem:[%s5287_s3 + $0x28] sm:$0xff]  }
   0x2   :  { %3316 = vmatprep.subr.bf16.mxu0 %v3477_v0  ;;  %3460 = vmatprep.subr.bf16.mxu1 %v3477_v0  ;;  %v3480_v3 = vld [vmem:[%s5287_s3 + $0x20] sm:$0xff]   ;;  %v3181_v11 = vld [vmem:[%s5288_s0 + $0x8] sm:$0xff]   ;;  %v3481_v12 = vld [vmem:[%s5287_s3 + $0x18] sm:$0xff]  }
   0x3   :  { %3317 = vmatpush3.bf16.msra.mxu0 %v3477_v0  ;;  %3468 = vmatpush3.bf16.msra.mxu1 %v3477_v0  ;;  %v2926_v4 = vld [vmem:[%s5288_s0] sm:$0xff]   ;;  %v3182_v13 = vld [vmem:[%s5288_s0 + $0x10] sm:$0xff]   ;;  %v2931_v16 = vunpack.c.l.bf16 %v3181_v11  ;;  %v2932_v17 = vunpack.c.h.bf16 %v3181_v11  ;;  %v3183_v26 = vld [vmem:[%s5288_s0 + $0x18] sm:$0xff]  }
   0x4   :  { %3318 = vmatprep.subr.bf16.mxu0 %v3478_v1  ;;  %3461 = vmatprep.subr.bf16.mxu1 %v3478_v1  ;;  %v3536_v5 = vld [vmem:[%s5289_s1] ss:$0 sm:$0xff]  ;;  %v2927_v6 = vunpack.c.l.bf16 %v2926_v4  ;;  %v2928_v7 = vunpack.c.h.bf16 %v2926_v4  ;;  %v2935_v20 = vunpack.c.l.bf16 %v3182_v13  ;;  %v2936_v21 = vunpack.c.h.bf16 %v3182_v13  ;;  %v3482_v22 = vld [vmem:[%s5287_s3 + $0x10] sm:$0xff]   ;;  %v3483_v29 = vld [vmem:[%s5287_s3 + $0x8] sm:$0xff]  }
   0x5   :  { %v3541_v8 = vld [vmem:[%s5290_s2] ss:$0 sm:$0xff]  ;;  %v291_v24 = vmul.f32 %v2931_v16, %v3536_v5  ;;  %v292_v25 = vmul.f32 %v2932_v17, %v3536_v5  ;;  %v2939_v31 = vunpack.c.l.bf16 %v3183_v26  ;;  %v2940_v32 = vunpack.c.h.bf16 %v3183_v26  ;;  %v3185_v48 = vld [vmem:[%s5288_s0 + $0x28] sm:$0xff]   ;;  %v3186_v49 = vld [vmem:[%s5288_s0 + $0x30] sm:$0xff]  }
   0x6   :  { %v289_v9 = vmul.f32 %v2927_v6, %v3536_v5  ;;  %v290_v10 = vmul.f32 %v2928_v7, %v3536_v5  ;;  %v293_v27 = vmul.f32 %v2935_v20, %v3536_v5  ;;  %v294_v28 = vmul.f32 %v2936_v21, %v3536_v5  ;;  %v3184_v30 = vld [vmem:[%s5288_s0 + $0x20] sm:$0xff]   ;;  %v3190_v21 = vld [vmem:[%s5288_s0 + $0x50] sm:$0xff]  }
   0x7   :  { %3319 = vmatpush3.bf16.msra.mxu0 %v3478_v1  ;;  %3469 = vmatpush3.bf16.msra.mxu1 %v3478_v1  ;;  %v426_v33 = vadd.f32 %v3541_v8, %v291_v24  ;;  %v427_v34 = vadd.f32 %v3541_v8, %v292_v25  ;;  %v2943_v37 = vunpack.c.l.bf16 %v3184_v30  ;;  %v2944_v38 = vunpack.c.h.bf16 %v3184_v30  ;;  %v3484_v39 = vld [vmem:[%s5287_s3] sm:$0xff]   ;;  %v3187_v1 = vld [vmem:[%s5288_s0 + $0x38] sm:$0xff]  }
   0x8   :  { %3320 = vmatprep.subr.bf16.mxu0 %v3479_v2  ;;  %3462 = vmatprep.subr.bf16.mxu1 %v3479_v2  ;;  %v424_v14 = vadd.f32 %v3541_v8, %v289_v9  ;;  %v425_v15 = vadd.f32 %v3541_v8, %v290_v10  ;;  %v428_v35 = vadd.f32 %v3541_v8, %v293_v27  ;;  %v2947_v53 = vunpack.c.l.bf16 %v3185_v48  ;;  %v3188_v6 = vld [vmem:[%s5288_s0 + $0x40] sm:$0xff]  }
   0x9   :  { %v429_v36 = vadd.f32 %v3541_v8, %v294_v28  ;;  %v295_v40 = vmul.f32 %v2939_v31, %v3536_v5  ;;  %v296_v41 = vmul.f32 %v2940_v32, %v3536_v5  ;;  %v554_v42 = vmax.f32 %v426_v33, 0.0 }
   0xa   :  { %v552_v18 = vmax.f32 %v424_v14, 0.0  ;;  %v553_v19 = vmax.f32 %v425_v15, 0.0  ;;  %v555_v43 = vmax.f32 %v427_v34, 0.0  ;;  %v556_v44 = vmax.f32 %v428_v35, 0.0 }
   0xb   :  { %3321 = vmatpush3.bf16.msra.mxu0 %v3479_v2  ;;  %3470 = vmatpush3.bf16.msra.mxu1 %v3479_v2  ;;  %v557_v45 = vmax.f32 %v429_v36, 0.0  ;;  %v297_v46 = vmul.f32 %v2943_v37, %v3536_v5  ;;  %v298_v47 = vmul.f32 %v2944_v38, %v3536_v5  ;;  %v430_v50 = vadd.f32 %v3541_v8, %v295_v40 }
   0xc   :  { %3322 = vmatprep.subr.bf16.mxu0 %v3480_v3  ;;  %3463 = vmatprep.subr.bf16.mxu1 %v3480_v3  ;;  %v680_v23 = vpack.c.bf16 %v553_v19, %v552_v18  ;;  %v431_v51 = vadd.f32 %v3541_v8, %v296_v41  ;;  %v681_v52 = vpack.c.bf16 %v555_v43, %v554_v42  ;;  %v2948_v54 = vunpack.c.h.bf16 %v3185_v48  ;;  %v3189_v18 = vld [vmem:[%s5288_s0 + $0x48] sm:$0xff]  }
   0xd   :  { %v2951_v55 = vunpack.c.l.bf16 %v3186_v49  ;;  %v682_v56 = vpack.c.bf16 %v557_v45, %v556_v44  ;;  %v432_v57 = vadd.f32 %v3541_v8, %v297_v46  ;;  %v433_v58 = vadd.f32 %v3541_v8, %v298_v47  ;;  %v3192_v47 = vld [vmem:[%s5288_s0 + $0x60] sm:$0xff]  }
   0xe   :  { %3332 = vmatprep.mubr.bf16.mxu0 %v680_v23  ;;  %v2952_v59 = vunpack.c.h.bf16 %v3186_v49  ;;  %v558_v60 = vmax.f32 %v430_v50, 0.0  ;;  %v559_v61 = vmax.f32 %v431_v51, 0.0  ;;  %v299_v62 = vmul.f32 %v2947_v53, %v3536_v5 }
   0xf   :  { %3323 = vmatpush3.bf16.msra.mxu0 %v3480_v3  ;;  %3471 = vmatpush3.bf16.msra.mxu1 %v3480_v3  ;;  %v300_v63 = vmul.f32 %v2948_v54, %v3536_v5  ;;  %v301_v0 = vmul.f32 %v2951_v55, %v3536_v5  ;;  %v560_v2 = vmax.f32 %v432_v57, 0.0  ;;  %v561_v3 = vmax.f32 %v433_v58, 0.0  ;;  %v3193_v55 = vld [vmem:[%s5288_s0 + $0x68] sm:$0xff]  }
  0x10   :  { %3324 = vmatprep.subr.bf16.mxu0 %v3481_v12  ;;  %3464 = vmatprep.subr.bf16.mxu1 %v3481_v12  ;;  %v302_v4 = vmul.f32 %v2952_v59, %v3536_v5  ;;  %v2955_v7 = vunpack.c.l.bf16 %v3187_v1  ;;  %v2956_v9 = vunpack.c.h.bf16 %v3187_v1  ;;  %v683_v10 = vpack.c.bf16 %v559_v61, %v558_v60 }
  0x11   :  { %v434_v11 = vadd.f32 %v3541_v8, %v299_v62  ;;  %v436_v13 = vadd.f32 %v3541_v8, %v301_v0  ;;  %v684_v14 = vpack.c.bf16 %v561_v3, %v560_v2  ;;  %v2959_v16 = vunpack.c.l.bf16 %v3188_v6 }
  0x12   :  { %v437_v15 = vadd.f32 %v3541_v8, %v302_v4  ;;  %v2960_v17 = vunpack.c.h.bf16 %v3188_v6  ;;  %v303_v19 = vmul.f32 %v2955_v7, %v3536_v5  ;;  %v304_v20 = vmul.f32 %v2956_v9, %v3536_v5 }
  0x13   :  { %3325 = vmatpush3.bf16.msra.mxu0 %v3481_v12  ;;  %3472 = vmatpush3.bf16.msra.mxu1 %v3481_v12  ;;  %v435_v12 = vadd.f32 %v3541_v8, %v300_v63  ;;  %v562_v23 = vmax.f32 %v434_v11, 0.0  ;;  %v564_v25 = vmax.f32 %v436_v13, 0.0  ;;  %v2963_v26 = vunpack.c.l.bf16 %v3189_v18  ;;  %v3194_v11 = vld [vmem:[%s5288_s0 + $0x70] sm:$0xff]   ;;  %v3195_v13 = vld [vmem:[%s5288_s0 + $0x78] sm:$0xff]  }
  0x14   :  { %3326 = vmatprep.subr.bf16.mxu0 %v3482_v22  ;;  %3465 = vmatprep.subr.bf16.mxu1 %v3482_v22  ;;  %v565_v27 = vmax.f32 %v437_v15, 0.0  ;;  %v305_v28 = vmul.f32 %v2959_v16, %v3536_v5  ;;  %v2964_v30 = vunpack.c.h.bf16 %v3189_v18  ;;  %v2967_v31 = vunpack.c.l.bf16 %v3190_v21  ;;  %v3197_v18 = vld [vmem:[%s5288_s0 + $0x88] sm:$0xff]  }
  0x15   :  { %v563_v24 = vmax.f32 %v435_v12, 0.0  ;;  %v2968_v32 = vunpack.c.h.bf16 %v3190_v21  ;;  %v438_v36 = vadd.f32 %v3541_v8, %v303_v19  ;;  %v439_v37 = vadd.f32 %v3541_v8, %v304_v20 }
  0x16   :  { %v307_v38 = vmul.f32 %v2963_v26, %v3536_v5  ;;  %v440_v40 = vadd.f32 %v3541_v8, %v305_v28  ;;  %v308_v42 = vmul.f32 %v2964_v30, %v3536_v5  ;;  %v309_v43 = vmul.f32 %v2967_v31, %v3536_v5  ;;  %v3199_v28 = vld [vmem:[%s5288_s0 + $0x98] sm:$0xff]  }
  0x17   :  { %3327 = vmatpush3.bf16.msra.mxu0 %v3482_v22  ;;  %3473 = vmatpush3.bf16.msra.mxu1 %v3482_v22  ;;  %v3191_v22 = vld [vmem:[%s5288_s0 + $0x58] sm:$0xff]   ;;  %v685_v35 = vpack.c.bf16 %v563_v24, %v562_v23  ;;  %v310_v44 = vmul.f32 %v2968_v32, %v3536_v5  ;;  %v566_v48 = vmax.f32 %v438_v36, 0.0  ;;  %v567_v49 = vmax.f32 %v439_v37, 0.0  ;;  %v3198_v23 = vld [vmem:[%s5288_s0 + $0x90] sm:$0xff]  }
  0x18   :  { %3328 = vmatprep.subr.bf16.mxu0 %v3483_v29  ;;  %3466 = vmatprep.subr.bf16.mxu1 %v3483_v29  ;;  %v2971_v33 = vunpack.c.l.bf16 %v3191_v22  ;;  %v2972_v34 = vunpack.c.h.bf16 %v3191_v22  ;;  %v442_v50 = vadd.f32 %v3541_v8, %v307_v38  ;;  %v568_v51 = vmax.f32 %v440_v40, 0.0 }
  0x19   :  { %v443_v53 = vadd.f32 %v3541_v8, %v308_v42  ;;  %v2975_v54 = vunpack.c.l.bf16 %v3192_v47  ;;  %v445_v57 = vadd.f32 %v3541_v8, %v310_v44  ;;  %v2976_v60 = vunpack.c.h.bf16 %v3192_v47 }
  0x1a   :  { %v311_v45 = vmul.f32 %v2971_v33, %v3536_v5  ;;  %v312_v46 = vmul.f32 %v2972_v34, %v3536_v5  ;;  %v687_v61 = vpack.c.bf16 %v567_v49, %v566_v48  ;;  %v570_v62 = vmax.f32 %v442_v50, 0.0 }
  0x1b   :  { %3329 = vmatpush3.bf16.msra.mxu0 %v3483_v29  ;;  %3474 = vmatpush3.bf16.msra.mxu1 %v3483_v29  ;;  %v306_v29 = vmul.f32 %v2960_v17, %v3536_v5  ;;  %v2979_v63 = vunpack.c.l.bf16 %v3193_v55  ;;  %v571_v1 = vmax.f32 %v443_v53, 0.0  ;;  %v313_v2 = vmul.f32 %v2975_v54, %v3536_v5 }
  0x1c   :  { %3330 = vmatprep.subr.bf16.mxu0 %v3484_v39  ;;  %3467 = vmatprep.subr.bf16.mxu1 %v3484_v39  ;;  %v446_v58 = vadd.f32 %v3541_v8, %v311_v45  ;;  %v447_v59 = vadd.f32 %v3541_v8, %v312_v46  ;;  %v2980_v3 = vunpack.c.h.bf16 %v3193_v55  ;;  %v573_v6 = vmax.f32 %v445_v57, 0.0 }
  0x1d   :  { %v441_v41 = vadd.f32 %v3541_v8, %v306_v29  ;;  %v315_v12 = vmul.f32 %v2979_v63, %v3536_v5  ;;  %v689_v15 = vpack.c.bf16 %v571_v1, %v570_v62  ;;  %v448_v16 = vadd.f32 %v3541_v8, %v313_v2 }
  0x1e   :  { %v574_v7 = vmax.f32 %v446_v58, 0.0  ;;  %v575_v9 = vmax.f32 %v447_v59, 0.0  ;;  %v316_v17 = vmul.f32 %v2980_v3, %v3536_v5  ;;  %v2983_v21 = vunpack.c.l.bf16 %v3194_v11  ;;  %v3201_v58 = vld [vmem:[%s5288_s0 + $0xa8] sm:$0xff]  }
  0x1f   :  { %3331 = vmatpush3.bf16.msra.mxu0 %v3484_v39  ;;  %3475 = vmatpush3.bf16.msra.mxu1 %v3484_v39  ;;  %v686_v39 = vpack.c.bf16 %v565_v27, %v564_v25  ;;  %v2984_v22 = vunpack.c.h.bf16 %v3194_v11  ;;  %v2987_v25 = vunpack.c.l.bf16 %v3195_v13  ;;  %v2988_v26 = vunpack.c.h.bf16 %v3195_v13 }
  0x20   :  { %v691_v20 = vpack.c.bf16 %v575_v9, %v574_v7  ;;  %v3667_v29 = vadd.f32 %v3541_v8, %v315_v12  ;;  %v2995_v31 = vunpack.c.l.bf16 %v3197_v18  ;;  %v2996_v32 = vunpack.c.h.bf16 %v3197_v18 }
  0x21   :  { %v576_v33 = vmax.f32 %v448_v16, 0.0  ;;  %v451_v34 = vadd.f32 %v3541_v8, %v316_v17  ;;  %v3000_v36 = vunpack.c.h.bf16 %v3198_v23  ;;  %v317_v37 = vmul.f32 %v2983_v21, %v3536_v5 }
  0x22   :  { %3333 = vmatmul.mubr.bf16.vlgmr.msra.gmra.mxu0 %v681_v52  ;;  %v569_v52 = vmax.f32 %v441_v41, 0.0  ;;  %v318_v38 = vmul.f32 %v2984_v22, %v3536_v5  ;;  %v3004_v40 = vunpack.c.h.bf16 %v3199_v28  ;;  %v3200_v41 = vld [vmem:[%s5288_s0 + $0xa0] sm:$0xff]   ;;  %v320_v44 = vmul.f32 %v2988_v26, %v3536_v5  ;;  %v3202_v22 = vld [vmem:[%s5288_s0 + $0xb0] sm:$0xff]  }
  0x23   :  { %3336 = vmatprep.mubr.bf16.mxu0 %v682_v56  ;;  %v444_v56 = vadd.f32 %v3541_v8, %v309_v43  ;;  %v319_v43 = vmul.f32 %v2987_v25, %v3536_v5  ;;  %v578_v46 = vmax.f32 %v3667_v29, 0.0  ;;  %v323_v48 = vmul.f32 %v2995_v31, %v3536_v5 }
  0x24   :  { %v688_v0 = vpack.c.bf16 %v569_v52, %v568_v51  ;;  %v324_v49 = vmul.f32 %v2996_v32, %v3536_v5  ;;  %v579_v50 = vmax.f32 %v451_v34, 0.0  ;;  %v326_v52 = vmul.f32 %v3000_v36, %v3536_v5 }
  0x25   :  { %v572_v4 = vmax.f32 %v444_v56, 0.0  ;;  %v3007_v53 = vunpack.c.l.bf16 %v3200_v41  ;;  %v452_v54 = vadd.f32 %v3541_v8, %v317_v37  ;;  %v453_v55 = vadd.f32 %v3541_v8, %v318_v38 }
  0x26   :  { %v328_v57 = vmul.f32 %v3004_v40, %v3536_v5  ;;  %v459_v1 = vadd.f32 %v3541_v8, %v324_v49  ;;  %v3008_v2 = vunpack.c.h.bf16 %v3200_v41  ;;  %v3011_v7 = vunpack.c.l.bf16 %v3201_v58  ;;  %v3213_v40 = vld [vmem:[%s5288_s0 + $0x108] sm:$0xff]  }
  0x27   :  { %v690_v19 = vpack.c.bf16 %v573_v6, %v572_v4  ;;  %v461_v4 = vadd.f32 %v3541_v8, %v326_v52  ;;  %v329_v6 = vmul.f32 %v3007_v53, %v3536_v5  ;;  %v580_v9 = vmax.f32 %v452_v54, 0.0  ;;  %v3215_v54 = vld [vmem:[%s5288_s0 + $0x118] sm:$0xff]  }
  0x28   :  { %v463_v11 = vadd.f32 %v3541_v8, %v328_v57  ;;  %v3012_v12 = vunpack.c.h.bf16 %v3201_v58  ;;  %v581_v13 = vmax.f32 %v453_v55, 0.0  ;;  %v330_v21 = vmul.f32 %v3008_v2, %v3536_v5 }
  0x29   :  { %v3707_v25 = vadd.f32 %v3541_v8, %v329_v6  ;;  %v331_v26 = vmul.f32 %v3011_v7, %v3536_v5  ;;  %v3016_v34 = vunpack.c.h.bf16 %v3202_v22  ;;  %v3059_v53 = vunpack.c.l.bf16 %v3213_v40 }
  0x2a   :  { %3337 = vmatmul.mubr.bf16.gmra.mxu0 %v683_v10  ;;  %v314_v10 = vmul.f32 %v2976_v60, %v3536_v5  ;;  %v454_v60 = vadd.f32 %v3541_v8, %v319_v43  ;;  %v591_v29 = vmax.f32 %v463_v11, 0.0  ;;  %v694_v31 = vpack.c.bf16 %v581_v13, %v580_v9 }
  0x2b   :  { %3340 = vmatprep.mubr.bf16.mxu0 %v684_v14  ;;  %v3196_v14 = vld [vmem:[%s5288_s0 + $0x80] sm:$0xff]   ;;  %v3722_v38 = vadd.f32 %v3541_v8, %v330_v21  ;;  %v3731_v43 = vadd.f32 %v3541_v8, %v331_v26  ;;  %v3060_v57 = vunpack.c.h.bf16 %v3213_v40  ;;  %v3067_v2 = vunpack.c.l.bf16 %v3215_v54 }
  0x2c   :  { %v449_v24 = vadd.f32 %v3541_v8, %v314_v10  ;;  %v2991_v27 = vunpack.c.l.bf16 %v3196_v14  ;;  %v2992_v30 = vunpack.c.h.bf16 %v3196_v14  ;;  %v582_v14 = vmax.f32 %v454_v60, 0.0 }
  0x2d   :  { %v593_v55 = vmax.f32 %v3722_v38, 0.0  ;;  %v359_v13 = vmul.f32 %v3067_v2, %v3536_v5  ;;  %v3205_v38 = vld [vmem:[%s5288_s0 + $0xc8] sm:$0xff]  }
  0x2e   :  { %v577_v42 = vmax.f32 %v449_v24, 0.0  ;;  %v321_v45 = vmul.f32 %v2991_v27, %v3536_v5  ;;  %v322_v47 = vmul.f32 %v2992_v30, %v3536_v5  ;;  %v589_v24 = vmax.f32 %v461_v4, 0.0 }
  0x2f   :  { %v693_v27 = vpack.c.bf16 %v579_v50, %v578_v46  ;;  %v332_v30 = vmul.f32 %v3012_v12, %v3536_v5  ;;  %v3068_v12 = vunpack.c.h.bf16 %v3215_v54 }
  0x30   :  { %v692_v59 = vpack.c.bf16 %v577_v42, %v576_v33  ;;  %v456_v62 = vadd.f32 %v3541_v8, %v321_v45  ;;  %v457_v63 = vadd.f32 %v3541_v8, %v322_v47  ;;  %v3015_v33 = vunpack.c.l.bf16 %v3202_v22  ;;  %v3214_v45 = vld [vmem:[%s5288_s0 + $0x110] sm:$0xff]  }
  0x31   :  { %v592_v42 = vmax.f32 %v3707_v25, 0.0  ;;  %v3739_v47 = vadd.f32 %v3541_v8, %v332_v30  ;;  %v3063_v58 = vunpack.c.l.bf16 %v3214_v45  ;;  %v360_v22 = vmul.f32 %v3068_v12, %v3536_v5 }
  0x32   :  { %3341 = vmatmul.mubr.bf16.gmra.mxu0 %v685_v35  ;;  %v2999_v35 = vunpack.c.l.bf16 %v3198_v23  ;;  %v584_v16 = vmax.f32 %v456_v62, 0.0  ;;  %v585_v17 = vmax.f32 %v457_v63, 0.0  ;;  %v3744_v50 = vmul.f32 %v3015_v33, %v3536_v5 }
  0x33   :  { %3344 = vmatprep.mubr.bf16.mxu0 %v686_v39  ;;  %v3003_v39 = vunpack.c.l.bf16 %v3199_v28  ;;  %v3064_v62 = vunpack.c.h.bf16 %v3214_v45  ;;  %v495_v30 = vadd.f32 %v3541_v8, %v360_v22  ;;  %v3204_v45 = vld [vmem:[%s5288_s0 + $0xc0] sm:$0xff]   ;;  %v595_v54 = vmax.f32 %v3739_v47, 0.0 }
  0x34   :  { %v325_v51 = vmul.f32 %v2999_v35, %v3536_v5  ;;  %v3717_v35 = vld [vmem:[%s5288_s0 + $0xb8] sm:$0xff]   ;;  %v696_v36 = vpack.c.bf16 %v585_v17, %v584_v16  ;;  %v3220_v47 = vld [vmem:[%s5288_s0 + $0x140] sm:$0xff]   ;;  %v700_v12 = vpack.c.bf16 %v593_v55, %v592_v42 }
  0x35   :  { %v327_v56 = vmul.f32 %v3003_v39, %v3536_v5  ;;  %v3020_v4 = vunpack.c.h.bf16 %v3717_v35  ;;  %v358_v9 = vmul.f32 %v3064_v62, %v3536_v5 }
  0x36   :  { %v460_v3 = vadd.f32 %v3541_v8, %v325_v51  ;;  %v3747_v51 = vmul.f32 %v3016_v34, %v3536_v5 }
  0x37   :  { %v462_v10 = vadd.f32 %v3541_v8, %v327_v56  ;;  %v493_v17 = vadd.f32 %v3541_v8, %v358_v9 }
  0x38   :  { %v588_v23 = vmax.f32 %v460_v3, 0.0  ;;  %v3216_v3 = vld [vmem:[%s5288_s0 + $0x120] sm:$0xff]  }
  0x39   :  { %v590_v28 = vmax.f32 %v462_v10, 0.0  ;;  %v3072_v26 = vunpack.c.h.bf16 %v3216_v3 }
  0x3a   :  { %3345 = vmatmul.mubr.bf16.gmra.mxu0 %v687_v61  ;;  %v455_v61 = vadd.f32 %v3541_v8, %v320_v44  ;;  %v3727_v41 = vpack.c.bf16 %v589_v24, %v588_v23  ;;  %v494_v23 = vadd.f32 %v3541_v8, %v359_v13  ;;  %v621_v24 = vmax.f32 %v493_v17, 0.0 }
  0x3b   :  { %3348 = vmatprep.mubr.bf16.mxu0 %v688_v0  ;;  %v458_v0 = vadd.f32 %v3541_v8, %v323_v48  ;;  %v3736_v46 = vpack.c.bf16 %v591_v29, %v590_v28  ;;  %v3019_v48 = vunpack.c.l.bf16 %v3717_v35  ;;  %v3218_v28 = vld [vmem:[%s5288_s0 + $0x130] sm:$0xff]   ;;  %v336_v13 = vmul.f32 %v3020_v4, %v3536_v5 }
  0x3d   :  { %v586_v18 = vmax.f32 %v458_v0, 0.0  ;;  %v356_v0 = vmul.f32 %v3060_v57, %v3536_v5  ;;  %v471_v22 = vadd.f32 %v3541_v8, %v336_v13 }
  0x3f   :  { %v491_v10 = vadd.f32 %v3541_v8, %v356_v0  ;;  %v3023_v0 = vunpack.c.l.bf16 %v3204_v45 }
  0x41   :  { %v337_v25 = vmul.f32 %v3023_v0, %v3536_v5 }
  0x42   :  { %3349 = vmatmul.mubr.bf16.gmra.mxu0 %v689_v15  ;;  %v583_v15 = vmax.f32 %v455_v61, 0.0  ;;  %v355_v61 = vmul.f32 %v3059_v53, %v3536_v5  ;;  %v3080_v53 = vunpack.c.h.bf16 %v3218_v28 }
  0x43   :  { %3352 = vmatprep.mubr.bf16.mxu0 %v690_v19  ;;  %v587_v19 = vmax.f32 %v459_v1, 0.0  ;;  %v357_v1 = vmul.f32 %v3063_v58, %v3536_v5 }
  0x44   :  { %v695_v32 = vpack.c.bf16 %v583_v15, %v582_v14  ;;  %v490_v7 = vadd.f32 %v3541_v8, %v355_v61  ;;  %v3217_v14 = vld [vmem:[%s5288_s0 + $0x128] sm:$0xff]   ;;  %v469_v61 = vadd.f32 %v3541_v8, %v3747_v51 }
  0x45   :  { %v3719_v37 = vpack.c.bf16 %v587_v19, %v586_v18  ;;  %v492_v11 = vadd.f32 %v3541_v8, %v357_v1  ;;  %v3071_v18 = vunpack.c.l.bf16 %v3216_v3  ;;  %v619_v19 = vmax.f32 %v491_v10, 0.0 }
  0x46   :  { %v618_v16 = vmax.f32 %v490_v7, 0.0  ;;  %v3076_v33 = vunpack.c.h.bf16 %v3217_v14  ;;  %v3087_v10 = vunpack.c.l.bf16 %v3220_v47 }
  0x47   :  { %v620_v21 = vmax.f32 %v492_v11, 0.0  ;;  %v3088_v11 = vunpack.c.h.bf16 %v3220_v47  ;;  %v3223_v47 = vld [vmem:[%s5288_s0 + $0x158] sm:$0xff]  }
  0x48   :  { %v713_v29 = vpack.c.bf16 %v619_v19, %v618_v16 }
  0x49   :  { %v714_v34 = vpack.c.bf16 %v621_v24, %v620_v21  ;;  %v370_v19 = vmul.f32 %v3088_v11, %v3536_v5  ;;  %v3222_v21 = vld [vmem:[%s5288_s0 + $0x150] sm:$0xff]  }
  0x4a   :  { %3353 = vmatmul.mubr.bf16.gmra.mxu0 %v691_v20  ;;  %v3212_v20 = vld [vmem:[%s5288_s0 + $0x100] sm:$0xff]  }
  0x4b   :  { %3356 = vmatprep.mubr.bf16.mxu0 %v692_v59  ;;  %v3055_v39 = vunpack.c.l.bf16 %v3212_v20  ;;  %v3056_v44 = vunpack.c.h.bf16 %v3212_v20  ;;  %v594_v59 = vmax.f32 %v3731_v43, 0.0  ;;  %v361_v20 = vmul.f32 %v3071_v18, %v3536_v5 }
  0x4c   :  { %v369_v18 = vmul.f32 %v3087_v10, %v3536_v5 }
  0x4d   :  { %v353_v49 = vmul.f32 %v3055_v39, %v3536_v5  ;;  %v354_v52 = vmul.f32 %v3056_v44, %v3536_v5  ;;  %v362_v39 = vmul.f32 %v3072_v26, %v3536_v5  ;;  %v496_v40 = vadd.f32 %v3541_v8, %v361_v20 }
  0x4e   :  { %v3820_v16 = vpack.c.bf16 %v595_v54, %v594_v59  ;;  %v3027_v26 = vunpack.c.l.bf16 %v3205_v38  ;;  %v472_v20 = vadd.f32 %v3541_v8, %v337_v25 }
  0x4f   :  { %v488_v56 = vadd.f32 %v3541_v8, %v353_v49  ;;  %v489_v60 = vadd.f32 %v3541_v8, %v354_v52  ;;  %v623_v49 = vmax.f32 %v495_v30, 0.0  ;;  %v3079_v52 = vunpack.c.l.bf16 %v3218_v28  ;;  %v3206_v28 = vld [vmem:[%s5288_s0 + $0xd0] sm:$0xff]  }
  0x50   :  { %v497_v57 = vadd.f32 %v3541_v8, %v362_v39  ;;  %v624_v58 = vmax.f32 %v496_v40, 0.0  ;;  %v3095_v39 = vunpack.c.l.bf16 %v3222_v21  ;;  %v339_v54 = vmul.f32 %v3027_v26, %v3536_v5  ;;  %v3225_v26 = vld [vmem:[%s5288_s0 + $0x168] sm:$0xff]  }
  0x51   :  { %v616_v63 = vmax.f32 %v488_v56, 0.0  ;;  %v617_v6 = vmax.f32 %v489_v60, 0.0  ;;  %v335_v56 = vmul.f32 %v3019_v48, %v3536_v5  ;;  %v468_v60 = vadd.f32 %v3541_v8, %v3744_v50 }
  0x52   :  { %3357 = vmatmul.mubr.bf16.gmra.mxu0 %v693_v27  ;;  %v3075_v27 = vunpack.c.l.bf16 %v3217_v14  ;;  %v365_v62 = vmul.f32 %v3079_v52, %v3536_v5  ;;  %v625_v48 = vmax.f32 %v497_v57, 0.0  ;;  %v599_v52 = vmax.f32 %v471_v22, 0.0  ;;  %v3207_v57 = vld [vmem:[%s5288_s0 + $0xd8] sm:$0xff]  }
  0x53   :  { %3360 = vmatprep.mubr.bf16.mxu0 %v694_v31  ;;  %v712_v15 = vpack.c.bf16 %v617_v6, %v616_v63  ;;  %v622_v31 = vmax.f32 %v494_v23, 0.0  ;;  %v366_v63 = vmul.f32 %v3080_v53, %v3536_v5  ;;  %v470_v14 = vadd.f32 %v3541_v8, %v335_v56 }
  0x54   :  { %v363_v44 = vmul.f32 %v3075_v27, %v3536_v5  ;;  %v500_v50 = vadd.f32 %v3541_v8, %v365_v62  ;;  %v716_v51 = vpack.c.bf16 %v625_v48, %v624_v58  ;;  %v596_v17 = vmax.f32 %v468_v60, 0.0 }
  0x55   :  { %3396 = vmatprep.mubr.bf16.mxu1 %v712_v15  ;;  %v715_v3 = vpack.c.bf16 %v623_v49, %v622_v31  ;;  %v501_v9 = vadd.f32 %v3541_v8, %v366_v63  ;;  %v3024_v15 = vunpack.c.h.bf16 %v3204_v45  ;;  %v598_v23 = vmax.f32 %v470_v14, 0.0 }
  0x56   :  { %3397 = vmatmul.mubr.bf16.vlgmr.msra.gmra.mxu1 %v713_v29  ;;  %v498_v1 = vadd.f32 %v3541_v8, %v363_v44  ;;  %v628_v43 = vmax.f32 %v500_v50, 0.0  ;;  %v3028_v27 = vunpack.c.h.bf16 %v3205_v38  ;;  %v504_v44 = vadd.f32 %v3541_v8, %v369_v18 }
  0x57   :  { %3400 = vmatprep.mubr.bf16.mxu1 %v714_v34  ;;  %v629_v59 = vmax.f32 %v501_v9, 0.0  ;;  %v338_v24 = vmul.f32 %v3024_v15, %v3536_v5  ;;  %v505_v45 = vadd.f32 %v3541_v8, %v370_v19  ;;  %v3096_v49 = vunpack.c.h.bf16 %v3222_v21 }
  0x58   :  { %v626_v35 = vmax.f32 %v498_v1, 0.0  ;;  %v3032_v56 = vunpack.c.h.bf16 %v3206_v28  ;;  %v373_v63 = vmul.f32 %v3095_v39, %v3536_v5  ;;  %v340_v0 = vmul.f32 %v3028_v27, %v3536_v5 }
  0x59   :  { %v718_v40 = vpack.c.bf16 %v629_v59, %v628_v43  ;;  %v473_v53 = vadd.f32 %v3541_v8, %v338_v24  ;;  %v632_v48 = vmax.f32 %v504_v44, 0.0  ;;  %v633_v1 = vmax.f32 %v505_v45, 0.0  ;;  %v3209_v44 = vld [vmem:[%s5288_s0 + $0xe8] sm:$0xff]  }
  0x5a   :  { %3361 = vmatmul.mubr.bf16.gmra.mxu0 %v695_v32  ;;  %v364_v32 = vmul.f32 %v3076_v33, %v3536_v5  ;;  %v474_v9 = vadd.f32 %v3541_v8, %v339_v54  ;;  %v342_v13 = vmul.f32 %v3032_v56, %v3536_v5  ;;  %v508_v15 = vadd.f32 %v3541_v8, %v373_v63 }
  0x5b   :  { %3364 = vmatprep.mubr.bf16.mxu0 %v696_v36  ;;  %v3219_v36 = vld [vmem:[%s5288_s0 + $0x138] sm:$0xff]   ;;  %v720_v25 = vpack.c.bf16 %v633_v1, %v632_v48  ;;  %v3043_v63 = vunpack.c.l.bf16 %v3209_v44  ;;  %v3210_v48 = vld [vmem:[%s5288_s0 + $0xf0] sm:$0xff]  }
  0x5c   :  { %v3083_v2 = vunpack.c.l.bf16 %v3219_v36  ;;  %v499_v6 = vadd.f32 %v3541_v8, %v364_v32  ;;  %v3084_v7 = vunpack.c.h.bf16 %v3219_v36  ;;  %v3031_v36 = vunpack.c.l.bf16 %v3206_v28 }
  0x5d   :  { %v602_v22 = vmax.f32 %v474_v9, 0.0 }
  0x5e   :  { %3401 = vmatmul.mubr.bf16.gmra.mxu1 %v715_v3  ;;  %v627_v42 = vmax.f32 %v499_v6, 0.0  ;;  %v367_v55 = vmul.f32 %v3083_v2, %v3536_v5  ;;  %v368_v4 = vmul.f32 %v3084_v7, %v3536_v5  ;;  %v374_v2 = vmul.f32 %v3096_v49, %v3536_v5 }
  0x5f   :  { %3404 = vmatprep.mubr.bf16.mxu1 %v716_v51  ;;  %v703_v3 = vpack.c.bf16 %v599_v52, %v598_v23  ;;  %v601_v6 = vmax.f32 %v473_v53, 0.0  ;;  %v341_v50 = vmul.f32 %v3031_v36, %v3536_v5  ;;  %v3035_v7 = vunpack.c.l.bf16 %v3207_v57  ;;  %v3224_v51 = vld [vmem:[%s5288_s0 + $0x160] sm:$0xff]  }
  0x60   :  { %v717_v31 = vpack.c.bf16 %v627_v42, %v626_v35  ;;  %v502_v33 = vadd.f32 %v3541_v8, %v367_v55  ;;  %v503_v34 = vadd.f32 %v3541_v8, %v368_v4  ;;  %v509_v38 = vadd.f32 %v3541_v8, %v374_v2 }
  0x61   :  { %v3103_v35 = vunpack.c.l.bf16 %v3224_v51  ;;  %v3104_v42 = vunpack.c.h.bf16 %v3224_v51  ;;  %v475_v55 = vadd.f32 %v3541_v8, %v340_v0  ;;  %v476_v4 = vadd.f32 %v3541_v8, %v341_v50  ;;  %v3227_v51 = vld [vmem:[%s5288_s0 + $0x178] sm:$0xff]  }
  0x62   :  { %3365 = vmatmul.mubr.bf16.gmra.mxu0 %v3719_v37  ;;  %v597_v37 = vmax.f32 %v469_v61, 0.0  ;;  %v600_v61 = vmax.f32 %v472_v20, 0.0  ;;  %v631_v62 = vmax.f32 %v503_v34, 0.0  ;;  %v343_v43 = vmul.f32 %v3035_v7, %v3536_v5 }
  0x63   :  { %3368 = vmatprep.mubr.bf16.mxu0 %v3727_v41  ;;  %v3221_v41 = vld [vmem:[%s5288_s0 + $0x148] sm:$0xff]   ;;  %v477_v23 = vadd.f32 %v3541_v8, %v342_v13  ;;  %v636_v20 = vmax.f32 %v508_v15, 0.0  ;;  %v637_v27 = vmax.f32 %v509_v38, 0.0  ;;  %v377_v28 = vmul.f32 %v3103_v35, %v3536_v5 }
  0x64   :  { %v3091_v29 = vunpack.c.l.bf16 %v3221_v41  ;;  %v3092_v30 = vunpack.c.h.bf16 %v3221_v41  ;;  %v702_v32 = vpack.c.bf16 %v597_v37, %v596_v17  ;;  %v3100_v17 = vunpack.c.h.bf16 %v3223_v47  ;;  %v3208_v37 = vld [vmem:[%s5288_s0 + $0xe0] sm:$0xff]  }
  0x65   :  { %v3036_v41 = vunpack.c.h.bf16 %v3207_v57  ;;  %v704_v59 = vpack.c.bf16 %v601_v6, %v600_v61  ;;  %v3039_v24 = vunpack.c.l.bf16 %v3208_v37  ;;  %v3890_v39 = vadd.f32 %v3541_v8, %v343_v43 }
  0x66   :  { %v371_v58 = vmul.f32 %v3091_v29, %v3536_v5  ;;  %v372_v60 = vmul.f32 %v3092_v30, %v3536_v5  ;;  %3405 = vmatmul.mubr.bf16.gmra.mxu1 %v717_v31  ;;  %v378_v29 = vmul.f32 %v3104_v42, %v3536_v5  ;;  %v3226_v30 = vld [vmem:[%s5288_s0 + $0x170] sm:$0xff]   ;;  %v603_v31 = vmax.f32 %v475_v55, 0.0 }
  0x67   :  { %3408 = vmatprep.mubr.bf16.mxu1 %v718_v40  ;;  %v344_v34 = vmul.f32 %v3036_v41, %v3536_v5  ;;  %v3040_v40 = vunpack.c.h.bf16 %v3208_v37  ;;  %v3108_v53 = vunpack.c.h.bf16 %v3225_v26  ;;  %v3111_v36 = vunpack.c.l.bf16 %v3226_v30  ;;  %v3228_v37 = vld [vmem:[%s5288_s0 + $0x180] sm:$0xff]  }
  0x68   :  { %v506_v10 = vadd.f32 %v3541_v8, %v371_v58  ;;  %v507_v11 = vadd.f32 %v3541_v8, %v372_v60  ;;  %v3112_v54 = vunpack.c.h.bf16 %v3226_v30  ;;  %v605_v56 = vmax.f32 %v477_v23, 0.0 }
  0x69   :  { %v722_v57 = vpack.c.bf16 %v637_v27, %v636_v20  ;;  %v512_v58 = vadd.f32 %v3541_v8, %v377_v28  ;;  %v513_v60 = vadd.f32 %v3541_v8, %v378_v29  ;;  %v705_v61 = vpack.c.bf16 %v603_v31, %v602_v22  ;;  %v3933_v28 = vld [vmem:[%s5289_s1] ss:$0 sm:$0xff] }
  0x6a   :  { %3369 = vmatmul.mubr.bf16.gmra.mxu0 %v3736_v46  ;;  %v630_v46 = vmax.f32 %v502_v33, 0.0  ;;  %v634_v18 = vmax.f32 %v506_v10, 0.0  ;;  %v635_v19 = vmax.f32 %v507_v11, 0.0  ;;  %v604_v33 = vmax.f32 %v476_v4, 0.0 }
  0x6b   :  { %3372 = vmatprep.mubr.bf16.mxu0 %v700_v12  ;;  %v3099_v12 = vunpack.c.l.bf16 %v3223_v47  ;;  %v606_v47 = vmax.f32 %v3890_v39, 0.0  ;;  %v346_v0 = vmul.f32 %v3040_v40, %v3536_v5  ;;  %v380_v6 = vmul.f32 %v3108_v53, %v3536_v5  ;;  %v3229_v39 = vld [vmem:[%s5288_s0 + $0x188] sm:$0xff]  }
  0x6c   :  { %v719_v14 = vpack.c.bf16 %v631_v62, %v630_v46  ;;  %v721_v45 = vpack.c.bf16 %v635_v19, %v634_v18  ;;  %v479_v46 = vadd.f32 %v3541_v8, %v344_v34  ;;  %v345_v62 = vmul.f32 %v3039_v24, %v3536_v5 }
  0x6d   :  { %v375_v21 = vmul.f32 %v3099_v12, %v3536_v5  ;;  %v381_v50 = vmul.f32 %v3111_v36, %v3536_v5  ;;  %v382_v7 = vmul.f32 %v3112_v54, %v3536_v5  ;;  %v706_v9 = vpack.c.bf16 %v605_v56, %v604_v33  ;;  %v3230_v54 = vld [vmem:[%s5288_s0 + $0x190] sm:$0xff]  }
  0x6e   :  { %3409 = vmatmul.mubr.bf16.gmra.mxu1 %v719_v14  ;;  %v3044_v10 = vunpack.c.h.bf16 %v3209_v44  ;;  %v640_v11 = vmax.f32 %v512_v58, 0.0  ;;  %v641_v12 = vmax.f32 %v513_v60, 0.0  ;;  %v480_v13 = vadd.f32 %v3541_v8, %v345_v62 }
  0x6f   :  { %3412 = vmatprep.mubr.bf16.mxu1 %v720_v25  ;;  %v510_v49 = vadd.f32 %v3541_v8, %v375_v21  ;;  %v347_v14 = vmul.f32 %v3043_v63, %v3536_v5  ;;  %v3047_v15 = vunpack.c.l.bf16 %v3210_v48  ;;  %v481_v25 = vadd.f32 %v3541_v8, %v346_v0 }
  0x70   :  { %v3115_v35 = vunpack.c.l.bf16 %v3227_v51  ;;  %v3116_v42 = vunpack.c.h.bf16 %v3227_v51  ;;  %v515_v4 = vadd.f32 %v3541_v8, %v380_v6  ;;  %v516_v41 = vadd.f32 %v3541_v8, %v381_v50 }
  0x71   :  { %v638_v1 = vmax.f32 %v510_v49, 0.0  ;;  %v517_v43 = vadd.f32 %v3541_v8, %v382_v7  ;;  %v724_v18 = vpack.c.bf16 %v641_v12, %v640_v11  ;;  %v3119_v19 = vunpack.c.l.bf16 %v3228_v37  ;;  %v3945_v49 = vld [vmem:[%s5290_s2] ss:$0 sm:$0xff] }
  0x72   :  { %3373 = vmatmul.mubr.bf16.gmra.mxu0 %v3820_v16  ;;  %v376_v16 = vmul.f32 %v3100_v17, %v3536_v5  ;;  %v3048_v17 = vunpack.c.h.bf16 %v3210_v48  ;;  %v3120_v21 = vunpack.c.h.bf16 %v3228_v37  ;;  %v608_v22 = vmax.f32 %v480_v13, 0.0  ;;  %v3232_v37 = vld [vmem:[%s5288_s0 + $0x1a0] sm:$0xff]  }
  0x73   :  { %3376 = vmatprep.mubr.bf16.mxu0 %v702_v32  ;;  %v3107_v32 = vunpack.c.l.bf16 %v3225_v26  ;;  %v348_v23 = vmul.f32 %v3044_v10, %v3536_v5  ;;  %v349_v24 = vmul.f32 %v3047_v15, %v3536_v5  ;;  %v3211_v26 = vld [vmem:[%s5288_s0 + $0xf8] sm:$0xff]   ;;  %v609_v20 = vmax.f32 %v481_v25, 0.0 }
  0x74   :  { %v511_v52 = vadd.f32 %v3541_v8, %v376_v16  ;;  %v350_v16 = vmul.f32 %v3048_v17, %v3536_v5  ;;  %v482_v27 = vadd.f32 %v3541_v8, %v347_v14  ;;  %v383_v29 = vmul.f32 %v3933_v28, %v3115_v35  ;;  %v3231_v17 = vld [vmem:[%s5288_s0 + $0x198] sm:$0xff]  }
  0x75   :  { %v379_v2 = vmul.f32 %v3107_v32, %v3536_v5  ;;  %v384_v30 = vmul.f32 %v3933_v28, %v3116_v42  ;;  %v643_v5 = vmax.f32 %v515_v4, 0.0  ;;  %v644_v33 = vmax.f32 %v516_v41, 0.0 }
  0x76   :  { %3413 = vmatmul.mubr.bf16.gmra.mxu1 %v721_v45  ;;  %v645_v34 = vmax.f32 %v517_v43, 0.0  ;;  %v385_v44 = vmul.f32 %v3933_v28, %v3119_v19  ;;  %v386_v45 = vmul.f32 %v3933_v28, %v3120_v21  ;;  %v483_v32 = vadd.f32 %v3945_v49, %v348_v23 }
  0x77   :  { %3416 = vmatprep.mubr.bf16.mxu1 %v722_v57  ;;  %v514_v38 = vadd.f32 %v3541_v8, %v379_v2  ;;  %v3051_v8 = vunpack.c.l.bf16 %v3211_v26  ;;  %v485_v53 = vadd.f32 %v3945_v49, %v350_v16  ;;  %v3052_v36 = vunpack.c.h.bf16 %v3211_v26 }
  0x78   :  { %v708_v56 = vpack.c.bf16 %v609_v20, %v608_v22  ;;  %v518_v57 = vadd.f32 %v3945_v49, %v383_v29  ;;  %v519_v58 = vadd.f32 %v3945_v49, %v384_v30  ;;  %v3123_v60 = vunpack.c.l.bf16 %v3229_v39 }
  0x79   :  { %v642_v31 = vmax.f32 %v514_v38, 0.0  ;;  %v726_v62 = vpack.c.bf16 %v645_v34, %v644_v33  ;;  %v3124_v63 = vunpack.c.h.bf16 %v3229_v39  ;;  %v521_v0 = vadd.f32 %v3945_v49, %v386_v45 }
  0x7a   :  { %3377 = vmatmul.mubr.bf16.gmra.mxu0 %v703_v3  ;;  %v639_v3 = vmax.f32 %v511_v52, 0.0  ;;  %v484_v52 = vadd.f32 %v3945_v49, %v349_v24  ;;  %v3127_v48 = vunpack.c.l.bf16 %v3230_v54  ;;  %v611_v2 = vmax.f32 %v483_v32, 0.0 }
  0x7b   :  { %3380 = vmatprep.mubr.bf16.mxu0 %v704_v59  ;;  %v607_v59 = vmax.f32 %v479_v46, 0.0  ;;  %v725_v46 = vpack.c.bf16 %v643_v5, %v642_v31  ;;  %v351_v6 = vmul.f32 %v3933_v28, %v3051_v8  ;;  %v352_v50 = vmul.f32 %v3933_v28, %v3052_v36  ;;  %v3233_v31 = vld [vmem:[%s5288_s0 + $0x1a8] sm:$0xff]  }
  0x7c   :  { %v723_v55 = vpack.c.bf16 %v639_v3, %v638_v1  ;;  %v3128_v1 = vunpack.c.h.bf16 %v3230_v54  ;;  %v612_v3 = vmax.f32 %v484_v52, 0.0  ;;  %v613_v7 = vmax.f32 %v485_v53, 0.0 }
  0x7d   :  { %v707_v40 = vpack.c.bf16 %v607_v59, %v606_v47  ;;  %v520_v47 = vadd.f32 %v3945_v49, %v385_v44  ;;  %v646_v51 = vmax.f32 %v518_v57, 0.0  ;;  %v387_v10 = vmul.f32 %v3933_v28, %v3123_v60 }
  0x7e   :  { %3417 = vmatmul.mubr.bf16.gmra.mxu1 %v723_v55  ;;  %v388_v11 = vmul.f32 %v3933_v28, %v3124_v63  ;;  %v649_v13 = vmax.f32 %v521_v0, 0.0  ;;  %v389_v14 = vmul.f32 %v3933_v28, %v3127_v48  ;;  %v390_v15 = vmul.f32 %v3933_v28, %v3128_v1  ;;  %v3236_v1 = vld [vmem:[%s5288_s0 + $0x1c0] sm:$0xff]  }
  0x7f   :  { %3420 = vmatprep.mubr.bf16.mxu1 %v724_v18  ;;  %v648_v12 = vmax.f32 %v520_v47, 0.0  ;;  %v486_v38 = vadd.f32 %v3945_v49, %v351_v6  ;;  %v487_v35 = vadd.f32 %v3945_v49, %v352_v50  ;;  %v710_v42 = vpack.c.bf16 %v613_v7, %v612_v3 }
  0x80   :  { %v522_v4 = vadd.f32 %v3945_v49, %v387_v10  ;;  %v523_v41 = vadd.f32 %v3945_v49, %v388_v11  ;;  %v3131_v43 = vunpack.c.l.bf16 %v3231_v17  ;;  %v3132_v59 = vunpack.c.h.bf16 %v3231_v17 }
  0x81   :  { %v3135_v18 = vunpack.c.l.bf16 %v3232_v37  ;;  %v728_v19 = vpack.c.bf16 %v649_v13, %v648_v12  ;;  %v524_v21 = vadd.f32 %v3945_v49, %v389_v14  ;;  %v525_v22 = vadd.f32 %v3945_v49, %v390_v15 }
  0x82   :  { %3381 = vmatmul.mubr.bf16.gmra.mxu0 %v705_v61  ;;  %v610_v61 = vmax.f32 %v482_v27, 0.0  ;;  %v3136_v23 = vunpack.c.h.bf16 %v3232_v37  ;;  %v614_v24 = vmax.f32 %v486_v38, 0.0  ;;  %v615_v16 = vmax.f32 %v487_v35, 0.0 }
  0x83   :  { %3384 = vmatprep.mubr.bf16.mxu0 %v706_v9  ;;  %v647_v9 = vmax.f32 %v519_v58, 0.0  ;;  %v650_v26 = vmax.f32 %v522_v4, 0.0  ;;  %v651_v20 = vmax.f32 %v523_v41, 0.0  ;;  %v391_v27 = vmul.f32 %v3933_v28, %v3131_v43 }
  0x84   :  { %v709_v25 = vpack.c.bf16 %v611_v2, %v610_v61  ;;  %v392_v29 = vmul.f32 %v3933_v28, %v3132_v59  ;;  %v393_v30 = vmul.f32 %v3933_v28, %v3135_v18  ;;  %v652_v5 = vmax.f32 %v524_v21, 0.0 }
  0x85   :  { %v727_v55 = vpack.c.bf16 %v647_v9, %v646_v51  ;;  %v653_v33 = vmax.f32 %v525_v22, 0.0  ;;  %v394_v34 = vmul.f32 %v3933_v28, %v3136_v23  ;;  %v711_v39 = vpack.c.bf16 %v615_v16, %v614_v24 }
  0x86   :  { %3421 = vmatmul.mubr.bf16.gmra.mxu1 %v725_v46  ;;  %v3139_v8 = vunpack.c.l.bf16 %v3233_v31  ;;  %v3140_v44 = vunpack.c.h.bf16 %v3233_v31  ;;  %v729_v45 = vpack.c.bf16 %v651_v20, %v650_v26  ;;  %v526_v32 = vadd.f32 %v3945_v49, %v391_v27 }
  0x87   :  { %3424 = vmatprep.mubr.bf16.mxu1 %v726_v62  ;;  %v527_v52 = vadd.f32 %v3945_v49, %v392_v29  ;;  %v528_v53 = vadd.f32 %v3945_v49, %v393_v30  ;;  %v730_v36 = vpack.c.bf16 %v653_v33, %v652_v5  ;;  %v529_v54 = vadd.f32 %v3945_v49, %v394_v34  ;;  %v3235_v62 = vld [vmem:[%s5288_s0 + $0x1b8] sm:$0xff]   ;;  %v3240_v34 = vld [vmem:[%s5288_s0 + $0x1e0] sm:$0xff]  }
  0x88   :  { %v395_v58 = vmul.f32 %v3933_v28, %v3139_v8  ;;  %v396_v60 = vmul.f32 %v3933_v28, %v3140_v44  ;;  %v654_v61 = vmax.f32 %v526_v32, 0.0  ;;  %v3147_v6 = vunpack.c.l.bf16 %v3235_v62  ;;  %v3239_v29 = vld [vmem:[%s5288_s0 + $0x1d8] sm:$0xff]  }
  0x89   :  { %v655_v46 = vmax.f32 %v527_v52, 0.0  ;;  %v656_v63 = vmax.f32 %v528_v53, 0.0  ;;  %v657_v47 = vmax.f32 %v529_v54, 0.0  ;;  %v3148_v7 = vunpack.c.h.bf16 %v3235_v62 }
  0x8a   :  { %3385 = vmatmul.mubr.bf16.gmra.mxu0 %v707_v40  ;;  %v3234_v40 = vld [vmem:[%s5288_s0 + $0x1b0] sm:$0xff]   ;;  %v530_v2 = vadd.f32 %v3945_v49, %v395_v58  ;;  %v531_v3 = vadd.f32 %v3945_v49, %v396_v60  ;;  %v3151_v51 = vunpack.c.l.bf16 %v3236_v1  ;;  %v3152_v12 = vunpack.c.h.bf16 %v3236_v1 }
  0x8b   :  { %3388 = vmatprep.mubr.bf16.mxu0 %v708_v56  ;;  %v3143_v56 = vunpack.c.l.bf16 %v3234_v40  ;;  %v3144_v57 = vunpack.c.h.bf16 %v3234_v40  ;;  %v731_v50 = vpack.c.bf16 %v655_v46, %v654_v61  ;;  %v732_v9 = vpack.c.bf16 %v657_v47, %v656_v63  ;;  %v3241_v47 = vld [vmem:[%s5288_s0 + $0x1e8] sm:$0xff]  }
  0x8c   :  { %v658_v13 = vmax.f32 %v530_v2, 0.0  ;;  %v659_v14 = vmax.f32 %v531_v3, 0.0  ;;  %v399_v15 = vmul.f32 %v3933_v28, %v3147_v6  ;;  %v400_v17 = vmul.f32 %v3933_v28, %v3148_v7 }
  0x8d   :  { %v397_v0 = vmul.f32 %v3933_v28, %v3143_v56  ;;  %v398_v48 = vmul.f32 %v3933_v28, %v3144_v57  ;;  %v401_v37 = vmul.f32 %v3933_v28, %v3151_v51  ;;  %v402_v35 = vmul.f32 %v3933_v28, %v3152_v12 }
  0x8e   :  { %3425 = vmatmul.mubr.bf16.gmra.mxu1 %v727_v55  ;;  %v3238_v55 = vld [vmem:[%s5288_s0 + $0x1d0] sm:$0xff]   ;;  %v733_v4 = vpack.c.bf16 %v659_v14, %v658_v13  ;;  %v534_v41 = vadd.f32 %v3945_v49, %v399_v15  ;;  %v535_v43 = vadd.f32 %v3945_v49, %v400_v17  ;;  %v3164_v40 = vunpack.c.h.bf16 %v3239_v29 }
  0x8f   :  { %3428 = vmatprep.mubr.bf16.mxu1 %v728_v19  ;;  %v532_v10 = vadd.f32 %v3945_v49, %v397_v0  ;;  %v533_v11 = vadd.f32 %v3945_v49, %v398_v48  ;;  %v536_v59 = vadd.f32 %v3945_v49, %v401_v37  ;;  %v537_v22 = vadd.f32 %v3945_v49, %v402_v35  ;;  %v3242_v0 = vld [vmem:[%s5288_s0 + $0x1f0] sm:$0xff]  }
  0x90   :  { %v3159_v23 = vunpack.c.l.bf16 %v3238_v55  ;;  %v3160_v24 = vunpack.c.h.bf16 %v3238_v55  ;;  %v662_v16 = vmax.f32 %v534_v41, 0.0  ;;  %v663_v26 = vmax.f32 %v535_v43, 0.0 }
  0x91   :  { %v661_v38 = vmax.f32 %v533_v11, 0.0  ;;  %v664_v30 = vmax.f32 %v536_v59, 0.0  ;;  %v665_v31 = vmax.f32 %v537_v22, 0.0  ;;  %v3167_v32 = vunpack.c.l.bf16 %v3240_v34 }
  0x92   :  { %3389 = vmatmul.mubr.bf16.gmra.mxu0 %v709_v25  ;;  %v660_v25 = vmax.f32 %v532_v10, 0.0  ;;  %v405_v5 = vmul.f32 %v3933_v28, %v3159_v23  ;;  %v406_v33 = vmul.f32 %v3933_v28, %v3160_v24  ;;  %v735_v8 = vpack.c.bf16 %v663_v26, %v662_v16 }
  0x93   :  { %3392 = vmatprep.mubr.bf16.mxu0 %v710_v42  ;;  %v3237_v42 = vld [vmem:[%s5288_s0 + $0x1c8] sm:$0xff]   ;;  %v736_v52 = vpack.c.bf16 %v665_v31, %v664_v30  ;;  %v3168_v54 = vunpack.c.h.bf16 %v3240_v34  ;;  %v408_v57 = vmul.f32 %v3933_v28, %v3164_v40  ;;  %v409_v61 = vmul.f32 %v3933_v28, %v3167_v32 }
  0x94   :  { %v3155_v18 = vunpack.c.l.bf16 %v3237_v42  ;;  %v3156_v19 = vunpack.c.h.bf16 %v3237_v42  ;;  %v734_v21 = vpack.c.bf16 %v661_v38, %v660_v25  ;;  %v540_v53 = vadd.f32 %v3945_v49, %v405_v5  ;;  %v3243_v38 = vld [vmem:[%s5288_s0 + $0x1f8] sm:$0xff]  }
  0x95   :  { %v410_v63 = vmul.f32 %v3933_v28, %v3168_v54  ;;  %v543_v1 = vadd.f32 %v3945_v49, %v408_v57  ;;  %v544_v3 = vadd.f32 %v3945_v49, %v409_v61  ;;  %v3171_v6 = vunpack.c.l.bf16 %v3241_v47 }
  0x96   :  { %3429 = vmatmul.mubr.bf16.gmra.mxu1 %v729_v45  ;;  %v403_v20 = vmul.f32 %v3933_v28, %v3155_v18  ;;  %v404_v27 = vmul.f32 %v3933_v28, %v3156_v19  ;;  %v668_v46 = vmax.f32 %v540_v53, 0.0  ;;  %v3176_v10 = vunpack.c.h.bf16 %v3242_v0 }
  0x97   :  { %3432 = vmatprep.mubr.bf16.mxu1 %v730_v36  ;;  %v541_v36 = vadd.f32 %v3945_v49, %v406_v33  ;;  %v545_v51 = vadd.f32 %v3945_v49, %v410_v63  ;;  %v671_v12 = vmax.f32 %v543_v1, 0.0  ;;  %v411_v13 = vmul.f32 %v3933_v28, %v3171_v6 }
  0x98   :  { %v538_v44 = vadd.f32 %v3945_v49, %v403_v20  ;;  %v539_v45 = vadd.f32 %v3945_v49, %v404_v27  ;;  %v672_v15 = vmax.f32 %v544_v3, 0.0  ;;  %v414_v25 = vmul.f32 %v3933_v28, %v3176_v10 }
  0x99   :  { %v669_v62 = vmax.f32 %v541_v36, 0.0  ;;  %v673_v17 = vmax.f32 %v545_v51, 0.0  ;;  %v546_v42 = vadd.f32 %v3945_v49, %v411_v13  ;;  %v3180_v41 = vunpack.c.h.bf16 %v3243_v38 }
  0x9a   :  { %3393 = vmatmul.mubr.bf16.gmra.mxu0 %v711_v39  ;;  %v3163_v39 = vunpack.c.l.bf16 %v3239_v29  ;;  %v666_v58 = vmax.f32 %v538_v44, 0.0  ;;  %v667_v60 = vmax.f32 %v539_v45, 0.0  ;;  %v549_v18 = vadd.f32 %v3945_v49, %v414_v25 }
  0x9b   :  { %v738_v7 = vpack.c.bf16 %v669_v62, %v668_v46  ;;  %v740_v43 = vpack.c.bf16 %v673_v17, %v672_v15  ;;  %v674_v19 = vmax.f32 %v546_v42, 0.0  ;;  %v416_v23 = vmul.f32 %v3933_v28, %v3180_v41 }
  0x9c   :  { %v407_v56 = vmul.f32 %v3933_v28, %v3163_v39  ;;  %v737_v2 = vpack.c.bf16 %v667_v60, %v666_v58  ;;  %v677_v16 = vmax.f32 %v549_v18, 0.0 }
  0x9d   :  { %v551_v27 = vadd.f32 %v3945_v49, %v416_v23 }
  0x9e   :  { %3433 = vmatmul.mubr.bf16.gmra.mxu1 %v731_v50  ;;  %v542_v48 = vadd.f32 %v3945_v49, %v407_v56  ;;  %v3172_v50 = vunpack.c.h.bf16 %v3241_v47 }
  0x9f   :  { %3436 = vmatprep.mubr.bf16.mxu1 %v732_v9  ;;  %v3175_v9 = vunpack.c.l.bf16 %v3242_v0  ;;  %v679_v31 = vmax.f32 %v551_v27, 0.0 }
  0xa0   :  { %v670_v11 = vmax.f32 %v542_v48, 0.0  ;;  %v412_v14 = vmul.f32 %v3933_v28, %v3172_v50 }
  0xa1   :  { %v413_v37 = vmul.f32 %v3933_v28, %v3175_v9 }
  0xa2   :  { %v739_v35 = vpack.c.bf16 %v671_v12, %v670_v11  ;;  %v547_v55 = vadd.f32 %v3945_v49, %v412_v14 }
  0xa3   :  { %v548_v59 = vadd.f32 %v3945_v49, %v413_v37 }
  0xa5   :  { %v676_v24 = vmax.f32 %v548_v59, 0.0 }
  0xa6   :  { %3437 = vmatmul.mubr.bf16.gmra.mxu1 %v733_v4  ;;  %v3179_v4 = vunpack.c.l.bf16 %v3243_v38 }
  0xa7   :  { %3440 = vmatprep.mubr.bf16.mxu1 %v734_v21  ;;  %v675_v21 = vmax.f32 %v547_v55, 0.0  ;;  %v742_v29 = vpack.c.bf16 %v677_v16, %v676_v24 }
  0xa8   :  { %v415_v22 = vmul.f32 %v3933_v28, %v3179_v4 }
  0xa9   :  { %v741_v26 = vpack.c.bf16 %v675_v21, %v674_v19 }
  0xaa   :  { %v550_v20 = vadd.f32 %v3945_v49, %v415_v22 }
  0xac   :  { %v678_v30 = vmax.f32 %v550_v20, 0.0 }
  0xae   :  { %3441 = vmatmul.mubr.bf16.gmra.mxu1 %v735_v8  ;;  %v743_v5 = vpack.c.bf16 %v679_v31, %v678_v30 }
  0xaf   :  { %3444 = vmatprep.mubr.bf16.mxu1 %v736_v52 }
  0xb6   :  { %3445 = vmatmul.mubr.bf16.gmra.mxu1 %v737_v2 }
  0xb7   :  { %3448 = vmatprep.mubr.bf16.mxu1 %v738_v7 }
  0xbe   :  { %3449 = vmatmul.mubr.bf16.gmra.mxu1 %v739_v35 }
  0xbf   :  { %3452 = vmatprep.mubr.bf16.mxu1 %v740_v43 }
  0xc6   :  { %3453 = vmatmul.mubr.bf16.gmra.mxu1 %v741_v26 }
  0xc7   :  { %3456 = vmatprep.mubr.bf16.mxu1 %v742_v29 }
  0xce   :  { %3457 = vmatmul.mubr.bf16.gmra.mxu1 %v743_v5 }
  0xe2   :  { %v3334_v33 = vpop.f32.mrf.mxu0 }
  0xe3   :  { %v2799_v34 = vpack.c.bf16 %v3334_v33, %v3334_v33  ;;  %v2259_v44 = vmul.f32 %v3334_v33, %v3334_v33  ;;  %v1999_v54 = vsel %vm1995_vm1, %v3334_v33, 0.0 }
  0xe4   :  { %v842_v39 = vpop.f32.mrf.mxu0 }
  0xe5   :  { %1868 = vst.msk [vmem:[%s5291_s4 + $0x8] sm:$0xf] %vm1865_vm0, %v2799_v34  ;;  %v2797_v28 = vpack.c.bf16 %v842_v39, %v842_v39  ;;  %v2257_v49 = vmul.f32 %v842_v39, %v842_v39  ;;  %v1996_v32 = vsel %vm1995_vm1, %v842_v39, 0.0  ;;  %v2388_v0 = vsel %vm1995_vm1, %v2259_v44, 0.0 }
  0xe6   :  { %v3335_v40 = vpop.f32.mrf.mxu0 }
  0xe7   :  { %1866 = vst.msk [vmem:[%s5291_s4] sm:$0xf] %vm1865_vm0, %v2797_v28  ;;  %v2800_v8 = vpack.c.bf16 %v3335_v40, %v3335_v40  ;;  %v2385_v58 = vsel %vm1995_vm1, %v2257_v49, 0.0  ;;  %v2260_v60 = vmul.f32 %v3335_v40, %v3335_v40  ;;  %v2001_v48 = vsel %vm1995_vm1, %v3335_v40, 0.0 }
  0xe8   :  { %v845_v45 = vpop.f32.mrf.mxu0 }
  0xe9   :  { %1869 = vst.msk [vmem:[%s5291_s4 + $0xc] sm:$0xf] %vm1865_vm0, %v2800_v8  ;;  %v2798_v52 = vpack.c.bf16 %v845_v45, %v845_v45  ;;  %v1997_v53 = vsel %vm1995_vm1, %v845_v45, 0.0  ;;  %v2258_v36 = vmul.f32 %v845_v45, %v845_v45  ;;  %v2390_v7 = vsel %vm1995_vm1, %v2260_v60, 0.0 }
  0xea   :  { %v1998_v56 = vadd.f32 %v1997_v53, %v1996_v32  ;;  %v3338_v57 = vpop.f32.mrf.mxu0 }
  0xeb   :  { %1867 = vst.msk [vmem:[%s5291_s4 + $0x4] sm:$0xf] %vm1865_vm0, %v2798_v52  ;;  %v2386_v61 = vsel %vm1995_vm1, %v2258_v36, 0.0  ;;  %v2803_v46 = vpack.c.bf16 %v3338_v57, %v3338_v57  ;;  %v2263_v10 = vmul.f32 %v3338_v57, %v3338_v57  ;;  %v2007_v42 = vsel %vm1995_vm1, %v3338_v57, 0.0 }
  0xec   :  { %v2000_v62 = vadd.f32 %v1999_v54, %v1998_v56  ;;  %v2387_v63 = vadd.f32 %v2386_v61, %v2385_v58  ;;  %v858_v47 = vpop.f32.mrf.mxu0 }
  0xed   :  { %1872 = vst.msk [vmem:[%s5291_s4 + $0x18] sm:$0xf] %vm1865_vm0, %v2803_v46  ;;  %v2801_v1 = vpack.c.bf16 %v858_v47, %v858_v47  ;;  %v2261_v2 = vmul.f32 %v858_v47, %v858_v47  ;;  %v2003_v51 = vsel %vm1995_vm1, %v858_v47, 0.0  ;;  %v2396_v19 = vsel %vm1995_vm1, %v2263_v10, 0.0 }
  0xee   :  { %v2389_v3 = vadd.f32 %v2388_v0, %v2387_v63  ;;  %v2002_v6 = vadd.f32 %v2001_v48, %v2000_v62  ;;  %v3339_v50 = vpop.f32.mrf.mxu0 }
  0xef   :  { %1870 = vst.msk [vmem:[%s5291_s4 + $0x10] sm:$0xf] %vm1865_vm0, %v2801_v1  ;;  %v2804_v9 = vpack.c.bf16 %v3339_v50, %v3339_v50  ;;  %v2392_v14 = vsel %vm1995_vm1, %v2261_v2, 0.0  ;;  %v2264_v55 = vmul.f32 %v3339_v50, %v3339_v50  ;;  %v2009_v21 = vsel %vm1995_vm1, %v3339_v50, 0.0 }
  0xf0   :  { %v2004_v11 = vadd.f32 %v2003_v51, %v2002_v6  ;;  %v2391_v12 = vadd.f32 %v2390_v7, %v2389_v3  ;;  %v861_v13 = vpop.f32.mrf.mxu0 }
  0xf1   :  { %1873 = vst.msk [vmem:[%s5291_s4 + $0x1c] sm:$0xf] %vm1865_vm0, %v2804_v9  ;;  %v2802_v15 = vpack.c.bf16 %v861_v13, %v861_v13  ;;  %v2005_v17 = vsel %vm1995_vm1, %v861_v13, 0.0  ;;  %v2262_v37 = vmul.f32 %v861_v13, %v861_v13  ;;  %v2398_v20 = vsel %vm1995_vm1, %v2264_v55, 0.0 }
  0xf2   :  { %v2393_v25 = vadd.f32 %v2392_v14, %v2391_v12  ;;  %v2006_v38 = vadd.f32 %v2005_v17, %v2004_v11  ;;  %v3342_v35 = vpop.f32.mrf.mxu0 }
  0xf3   :  { %1871 = vst.msk [vmem:[%s5291_s4 + $0x14] sm:$0xf] %vm1865_vm0, %v2802_v15  ;;  %v2394_v4 = vsel %vm1995_vm1, %v2262_v37, 0.0  ;;  %v2807_v41 = vpack.c.bf16 %v3342_v35, %v3342_v35  ;;  %v2267_v30 = vmul.f32 %v3342_v35, %v3342_v35  ;;  %v2015_v45 = vsel %vm1995_vm1, %v3342_v35, 0.0 }
  0xf4   :  { %v2008_v43 = vadd.f32 %v2007_v42, %v2006_v38  ;;  %v2395_v59 = vadd.f32 %v2394_v4, %v2393_v25  ;;  %v874_v18 = vpop.f32.mrf.mxu0 }
  0xf5   :  { %1876 = vst.msk [vmem:[%s5291_s4 + $0x28] sm:$0xf] %vm1865_vm0, %v2807_v41  ;;  %v2805_v22 = vpack.c.bf16 %v874_v18, %v874_v18  ;;  %v2265_v23 = vmul.f32 %v874_v18, %v874_v18  ;;  %v2011_v27 = vsel %vm1995_vm1, %v874_v18, 0.0  ;;  %v2404_v57 = vsel %vm1995_vm1, %v2267_v30, 0.0 }
  0xf6   :  { %v2397_v24 = vadd.f32 %v2396_v19, %v2395_v59  ;;  %v2010_v16 = vadd.f32 %v2009_v21, %v2008_v43  ;;  %v3343_v26 = vpop.f32.mrf.mxu0 }
  0xf7   :  { %1874 = vst.msk [vmem:[%s5291_s4 + $0x20] sm:$0xf] %vm1865_vm0, %v2805_v22  ;;  %v2808_v29 = vpack.c.bf16 %v3343_v26, %v3343_v26  ;;  %v2400_v34 = vsel %vm1995_vm1, %v2265_v23, 0.0  ;;  %v2268_v32 = vmul.f32 %v3343_v26, %v3343_v26  ;;  %v2017_v58 = vsel %vm1995_vm1, %v3343_v26, 0.0 }
  0xf8   :  { %v2012_v31 = vadd.f32 %v2011_v27, %v2010_v16  ;;  %v2399_v5 = vadd.f32 %v2398_v20, %v2397_v24  ;;  %v877_v33 = vpop.f32.mrf.mxu0 }
  0xf9   :  { %1877 = vst.msk [vmem:[%s5291_s4 + $0x2c] sm:$0xf] %vm1865_vm0, %v2808_v29  ;;  %v2806_v39 = vpack.c.bf16 %v877_v33, %v877_v33  ;;  %v2013_v28 = vsel %vm1995_vm1, %v877_v33, 0.0  ;;  %v2266_v40 = vmul.f32 %v877_v33, %v877_v33  ;;  %v2406_v47 = vsel %vm1995_vm1, %v2268_v32, 0.0 }
  0xfa   :  { %v2401_v49 = vadd.f32 %v2400_v34, %v2399_v5  ;;  %v2014_v8 = vadd.f32 %v2013_v28, %v2012_v31  ;;  %v3346_v44 = vpop.f32.mrf.mxu0 }
  0xfb   :  { %1875 = vst.msk [vmem:[%s5291_s4 + $0x24] sm:$0xf] %vm1865_vm0, %v2806_v39  ;;  %v2402_v52 = vsel %vm1995_vm1, %v2266_v40, 0.0  ;;  %v2811_v53 = vpack.c.bf16 %v3346_v44, %v3346_v44  ;;  %v2271_v1 = vmul.f32 %v3346_v44, %v3346_v44  ;;  %v2023_v13 = vsel %vm1995_vm1, %v3346_v44, 0.0 }
  0xfc   :  { %v2016_v36 = vadd.f32 %v2015_v45, %v2014_v8  ;;  %v2403_v54 = vadd.f32 %v2402_v52, %v2401_v49  ;;  %v890_v56 = vpop.f32.mrf.mxu0 }
  0xfd   :  { %1880 = vst.msk [vmem:[%s5291_s4 + $0x38] sm:$0xf] %vm1865_vm0, %v2811_v53  ;;  %v2809_v60 = vpack.c.bf16 %v890_v56, %v890_v56  ;;  %v2269_v61 = vmul.f32 %v890_v56, %v890_v56  ;;  %v2019_v0 = vsel %vm1995_vm1, %v890_v56, 0.0  ;;  %v2412_v35 = vsel %vm1995_vm1, %v2271_v1, 0.0 }
  0xfe   :  { %v2405_v46 = vadd.f32 %v2404_v57, %v2403_v54  ;;  %v2018_v62 = vadd.f32 %v2017_v58, %v2016_v36  ;;  %v3347_v63 = vpop.f32.mrf.mxu0 }
  0xff   :  { %1878 = vst.msk [vmem:[%s5291_s4 + $0x30] sm:$0xf] %vm1865_vm0, %v2809_v60  ;;  %v2812_v48 = vpack.c.bf16 %v3347_v63, %v3347_v63  ;;  %v2408_v50 = vsel %vm1995_vm1, %v2269_v61, 0.0  ;;  %v2272_v14 = vmul.f32 %v3347_v63, %v3347_v63  ;;  %v2025_v42 = vsel %vm1995_vm1, %v3347_v63, 0.0 }
 0x100   :  { %v2020_v2 = vadd.f32 %v2019_v0, %v2018_v62  ;;  %v2407_v3 = vadd.f32 %v2406_v47, %v2405_v46  ;;  %v893_v6 = vpop.f32.mrf.mxu0 }
 0x101   :  { %1881 = vst.msk [vmem:[%s5291_s4 + $0x3c] sm:$0xf] %vm1865_vm0, %v2812_v48  ;;  %v2810_v7 = vpack.c.bf16 %v893_v6, %v893_v6  ;;  %v2021_v51 = vsel %vm1995_vm1, %v893_v6, 0.0  ;;  %v2270_v9 = vmul.f32 %v893_v6, %v893_v6  ;;  %v2414_v18 = vsel %vm1995_vm1, %v2272_v14, 0.0 }
 0x102   :  { %v2409_v10 = vadd.f32 %v2408_v50, %v2407_v3  ;;  %v2022_v11 = vadd.f32 %v2021_v51, %v2020_v2  ;;  %v3350_v12 = vpop.f32.mrf.mxu0 }
 0x103   :  { %1879 = vst.msk [vmem:[%s5291_s4 + $0x34] sm:$0xf] %vm1865_vm0, %v2810_v7  ;;  %v2410_v15 = vsel %vm1995_vm1, %v2270_v9, 0.0  ;;  %v2815_v17 = vpack.c.bf16 %v3350_v12, %v3350_v12  ;;  %v2275_v22 = vmul.f32 %v3350_v12, %v3350_v12  ;;  %v2031_v33 = vsel %vm1995_vm1, %v3350_v12, 0.0 }
 0x104   :  { %v2024_v37 = vadd.f32 %v2023_v13, %v2022_v11  ;;  %v2411_v25 = vadd.f32 %v2410_v15, %v2409_v10  ;;  %v906_v38 = vpop.f32.mrf.mxu0 }
 0x105   :  { %1884 = vst.msk [vmem:[%s5291_s4 + $0x48] sm:$0xf] %vm1865_vm0, %v2815_v17  ;;  %v2813_v55 = vpack.c.bf16 %v906_v38, %v906_v38  ;;  %v2273_v4 = vmul.f32 %v906_v38, %v906_v38  ;;  %v2027_v19 = vsel %vm1995_vm1, %v906_v38, 0.0  ;;  %v2420_v44 = vsel %vm1995_vm1, %v2275_v22, 0.0 }
 0x106   :  { %v2413_v41 = vadd.f32 %v2412_v35, %v2411_v25  ;;  %v2026_v43 = vadd.f32 %v2025_v42, %v2024_v37  ;;  %v3351_v59 = vpop.f32.mrf.mxu0 }
 0x107   :  { %1882 = vst.msk [vmem:[%s5291_s4 + $0x40] sm:$0xf] %vm1865_vm0, %v2813_v55  ;;  %v2816_v21 = vpack.c.bf16 %v3351_v59, %v3351_v59  ;;  %v2416_v26 = vsel %vm1995_vm1, %v2273_v4, 0.0  ;;  %v2276_v34 = vmul.f32 %v3351_v59, %v3351_v59  ;;  %v2033_v45 = vsel %vm1995_vm1, %v3351_v59, 0.0 }
 0x108   :  { %v2028_v23 = vadd.f32 %v2027_v19, %v2026_v43  ;;  %v2415_v24 = vadd.f32 %v2414_v18, %v2413_v41  ;;  %v909_v16 = vpop.f32.mrf.mxu0 }
 0x109   :  { %1885 = vst.msk [vmem:[%s5291_s4 + $0x4c] sm:$0xf] %vm1865_vm0, %v2816_v21  ;;  %v2814_v20 = vpack.c.bf16 %v909_v16, %v909_v16  ;;  %v2029_v27 = vsel %vm1995_vm1, %v909_v16, 0.0  ;;  %v2274_v29 = vmul.f32 %v909_v16, %v909_v16  ;;  %v2422_v56 = vsel %vm1995_vm1, %v2276_v34, 0.0 }
 0x10a   :  { %v2417_v30 = vadd.f32 %v2416_v26, %v2415_v24  ;;  %v2030_v31 = vadd.f32 %v2029_v27, %v2028_v23  ;;  %v3354_v5 = vpop.f32.mrf.mxu0 }
 0x10b   :  { %1883 = vst.msk [vmem:[%s5291_s4 + $0x44] sm:$0xf] %vm1865_vm0, %v2814_v20  ;;  %v2418_v39 = vsel %vm1995_vm1, %v2274_v29, 0.0  ;;  %v2819_v28 = vpack.c.bf16 %v3354_v5, %v3354_v5  ;;  %v2279_v60 = vmul.f32 %v3354_v5, %v3354_v5  ;;  %v2039_v6 = vsel %vm1995_vm1, %v3354_v5, 0.0 }
 0x10c   :  { %v2032_v40 = vadd.f32 %v2031_v33, %v2030_v31  ;;  %v2419_v49 = vadd.f32 %v2418_v39, %v2417_v30  ;;  %v922_v8 = vpop.f32.mrf.mxu0 }
 0x10d   :  { %1888 = vst.msk [vmem:[%s5291_s4 + $0x58] sm:$0xf] %vm1865_vm0, %v2819_v28  ;;  %v2817_v32 = vpack.c.bf16 %v922_v8, %v922_v8  ;;  %v2277_v52 = vmul.f32 %v922_v8, %v922_v8  ;;  %v2035_v57 = vsel %vm1995_vm1, %v922_v8, 0.0  ;;  %v2428_v12 = vsel %vm1995_vm1, %v2279_v60, 0.0 }
 0x10e   :  { %v2421_v53 = vadd.f32 %v2420_v44, %v2419_v49  ;;  %v2034_v36 = vadd.f32 %v2033_v45, %v2032_v40  ;;  %v3355_v54 = vpop.f32.mrf.mxu0 }
 0x10f   :  { %1886 = vst.msk [vmem:[%s5291_s4 + $0x50] sm:$0xf] %vm1865_vm0, %v2817_v32  ;;  %v2820_v58 = vpack.c.bf16 %v3355_v54, %v3355_v54  ;;  %v2424_v63 = vsel %vm1995_vm1, %v2277_v52, 0.0  ;;  %v2280_v50 = vmul.f32 %v3355_v54, %v3355_v54  ;;  %v2041_v13 = vsel %vm1995_vm1, %v3355_v54, 0.0 }
 0x110   :  { %v2036_v61 = vadd.f32 %v2035_v57, %v2034_v36  ;;  %v2423_v46 = vadd.f32 %v2422_v56, %v2421_v53  ;;  %v925_v62 = vpop.f32.mrf.mxu0 }
 0x111   :  { %1889 = vst.msk [vmem:[%s5291_s4 + $0x5c] sm:$0xf] %vm1865_vm0, %v2820_v58  ;;  %v2818_v47 = vpack.c.bf16 %v925_v62, %v925_v62  ;;  %v2037_v0 = vsel %vm1995_vm1, %v925_v62, 0.0  ;;  %v2278_v48 = vmul.f32 %v925_v62, %v925_v62  ;;  %v2430_v38 = vsel %vm1995_vm1, %v2280_v50, 0.0 }
 0x112   :  { %v2425_v1 = vadd.f32 %v2424_v63, %v2423_v46  ;;  %v2038_v2 = vadd.f32 %v2037_v0, %v2036_v61  ;;  %v3358_v3 = vpop.f32.mrf.mxu0 }
 0x113   :  { %1887 = vst.msk [vmem:[%s5291_s4 + $0x54] sm:$0xf] %vm1865_vm0, %v2818_v47  ;;  %v2426_v7 = vsel %vm1995_vm1, %v2278_v48, 0.0  ;;  %v2823_v51 = vpack.c.bf16 %v3358_v3, %v3358_v3  ;;  %v2283_v55 = vmul.f32 %v3358_v3, %v3358_v3  ;;  %v2047_v16 = vsel %vm1995_vm1, %v3358_v3, 0.0 }
 0x114   :  { %v2040_v9 = vadd.f32 %v2039_v6, %v2038_v2  ;;  %v2427_v10 = vadd.f32 %v2426_v7, %v2425_v1  ;;  %v938_v11 = vpop.f32.mrf.mxu0 }
 0x115   :  { %1892 = vst.msk [vmem:[%s5291_s4 + $0x68] sm:$0xf] %vm1865_vm0, %v2823_v51  ;;  %v2821_v14 = vpack.c.bf16 %v938_v11, %v938_v11  ;;  %v2281_v15 = vmul.f32 %v938_v11, %v938_v11  ;;  %v2043_v35 = vsel %vm1995_vm1, %v938_v11, 0.0  ;;  %v2436_v33 = vsel %vm1995_vm1, %v2283_v55, 0.0 }
 0x116   :  { %v2429_v17 = vadd.f32 %v2428_v12, %v2427_v10  ;;  %v2042_v37 = vadd.f32 %v2041_v13, %v2040_v9  ;;  %v3359_v25 = vpop.f32.mrf.mxu0  ;;  %v4225_v5 = vpop.f32.mrf.mxu1 }
 0x117   :  { %1890 = vst.msk [vmem:[%s5291_s4 + $0x60] sm:$0xf] %vm1865_vm0, %v2821_v14  ;;  %v2824_v42 = vpack.c.bf16 %v3359_v25, %v3359_v25  ;;  %v2432_v59 = vsel %vm1995_vm1, %v2281_v15, 0.0  ;;  %v2284_v26 = vmul.f32 %v3359_v25, %v3359_v25  ;;  %v2049_v34 = vsel %vm1995_vm1, %v3359_v25, 0.0 }
 0x118   :  { %v2044_v4 = vadd.f32 %v2043_v35, %v2042_v37  ;;  %v2431_v41 = vadd.f32 %v2430_v38, %v2429_v17  ;;  %v941_v43 = vpop.f32.mrf.mxu0  ;;  %v2863_v44 = vpack.c.bf16 %v4225_v5, %v4225_v5  ;;  %v4235_v45 = vpop.f32.mrf.mxu1 }
 0x119   :  { %1893 = vst.msk [vmem:[%s5291_s4 + $0x6c] sm:$0xf] %vm1865_vm0, %v2824_v42  ;;  %v2822_v18 = vpack.c.bf16 %v941_v43, %v941_v43  ;;  %v2045_v19 = vsel %vm1995_vm1, %v941_v43, 0.0  ;;  %v2282_v21 = vmul.f32 %v941_v43, %v941_v43  ;;  %v2438_v32 = vsel %vm1995_vm1, %v2284_v26, 0.0 }
 0x11a   :  { %v2433_v22 = vadd.f32 %v2432_v59, %v2431_v41  ;;  %v2046_v23 = vadd.f32 %v2045_v19, %v2044_v4  ;;  %v3362_v24 = vpop.f32.mrf.mxu0  ;;  %1932 = vst.msk [vmem:[%s5291_s4 + $0x108] sm:$0xf] %vm1865_vm0, %v2863_v44  ;;  %v2861_v58 = vpack.c.bf16 %v4235_v45, %v4235_v45  ;;  %v4249_v60 = vpop.f32.mrf.mxu1 }
 0x11b   :  { %1891 = vst.msk [vmem:[%s5291_s4 + $0x64] sm:$0xf] %vm1865_vm0, %v2822_v18  ;;  %v2434_v20 = vsel %vm1995_vm1, %v2282_v21, 0.0  ;;  %v2827_v27 = vpack.c.bf16 %v3362_v24, %v3362_v24  ;;  %v2287_v36 = vmul.f32 %v3362_v24, %v3362_v24  ;;  %v2055_v2 = vsel %vm1995_vm1, %v3362_v24, 0.0 }
 0x11c   :  { %v2048_v29 = vadd.f32 %v2047_v16, %v2046_v23  ;;  %v2435_v30 = vadd.f32 %v2434_v20, %v2433_v22  ;;  %v954_v31 = vpop.f32.mrf.mxu0  ;;  %1930 = vst.msk [vmem:[%s5291_s4 + $0x100] sm:$0xf] %vm1865_vm0, %v2861_v58  ;;  %v4261_v1 = vpop.f32.mrf.mxu1  ;;  %v2864_v10 = vpack.c.bf16 %v4249_v60, %v4249_v60 }
 0x11d   :  { %1896 = vst.msk [vmem:[%s5291_s4 + $0x78] sm:$0xf] %vm1865_vm0, %v2827_v27  ;;  %v2825_v39 = vpack.c.bf16 %v954_v31, %v954_v31  ;;  %v2285_v28 = vmul.f32 %v954_v31, %v954_v31  ;;  %v2051_v52 = vsel %vm1995_vm1, %v954_v31, 0.0  ;;  %v2444_v12 = vsel %vm1995_vm1, %v2287_v36, 0.0 }
 0x11e   :  { %v2437_v40 = vadd.f32 %v2436_v33, %v2435_v30  ;;  %v2050_v49 = vadd.f32 %v2049_v34, %v2048_v29  ;;  %v3363_v8 = vpop.f32.mrf.mxu0  ;;  %v4271_v11 = vpop.f32.mrf.mxu1  ;;  %1933 = vst.msk [vmem:[%s5291_s4 + $0x10c] sm:$0xf] %vm1865_vm0, %v2864_v10  ;;  %v2862_v18 = vpack.c.bf16 %v4261_v1, %v4261_v1 }
 0x11f   :  { %1894 = vst.msk [vmem:[%s5291_s4 + $0x70] sm:$0xf] %vm1865_vm0, %v2825_v39  ;;  %v2828_v53 = vpack.c.bf16 %v3363_v8, %v3363_v8  ;;  %v2440_v61 = vsel %vm1995_vm1, %v2285_v28, 0.0  ;;  %v2288_v3 = vmul.f32 %v3363_v8, %v3363_v8  ;;  %v2057_v13 = vsel %vm1995_vm1, %v3363_v8, 0.0 }
 0x120   :  { %v2052_v54 = vadd.f32 %v2051_v52, %v2050_v49  ;;  %v2439_v56 = vadd.f32 %v2438_v32, %v2437_v40  ;;  %v957_v57 = vpop.f32.mrf.mxu0  ;;  %v4283_v38 = vpop.f32.mrf.mxu1  ;;  %1931 = vst.msk [vmem:[%s5291_s4 + $0x104] sm:$0xf] %vm1865_vm0, %v2862_v18  ;;  %v2867_v40 = vpack.c.bf16 %v4271_v11, %v4271_v11 }
 0x121   :  { %1897 = vst.msk [vmem:[%s5291_s4 + $0x7c] sm:$0xf] %vm1865_vm0, %v2828_v53  ;;  %v2826_v46 = vpack.c.bf16 %v957_v57, %v957_v57  ;;  %v2053_v62 = vsel %vm1995_vm1, %v957_v57, 0.0  ;;  %v2286_v63 = vmul.f32 %v957_v57, %v957_v57  ;;  %v2446_v35 = vsel %vm1995_vm1, %v2288_v3, 0.0 }
 0x122   :  { %v2441_v47 = vadd.f32 %v2440_v61, %v2439_v56  ;;  %v2054_v0 = vadd.f32 %v2053_v62, %v2052_v54  ;;  %v3366_v48 = vpop.f32.mrf.mxu0  ;;  %v4293_v19 = vpop.f32.mrf.mxu1  ;;  %1936 = vst.msk [vmem:[%s5291_s4 + $0x118] sm:$0xf] %vm1865_vm0, %v2867_v40 }
 0x123   :  { %1895 = vst.msk [vmem:[%s5291_s4 + $0x74] sm:$0xf] %vm1865_vm0, %v2826_v46  ;;  %v2442_v6 = vsel %vm1995_vm1, %v2286_v63, 0.0  ;;  %v2831_v50 = vpack.c.bf16 %v3366_v48, %v3366_v48  ;;  %v2291_v4 = vmul.f32 %v3366_v48, %v3366_v48  ;;  %v2063_v29 = vsel %vm1995_vm1, %v3366_v48, 0.0 }
 0x124   :  { %v2056_v7 = vadd.f32 %v2055_v2, %v2054_v0  ;;  %v2443_v51 = vadd.f32 %v2442_v6, %v2441_v47  ;;  %v970_v9 = vpop.f32.mrf.mxu0  ;;  %v4305_v27 = vpop.f32.mrf.mxu1  ;;  %v2865_v0 = vpack.c.bf16 %v4283_v38, %v4283_v38 }
 0x125   :  { %1900 = vst.msk [vmem:[%s5291_s4 + $0x88] sm:$0xf] %vm1865_vm0, %v2831_v50  ;;  %v2829_v14 = vpack.c.bf16 %v970_v9, %v970_v9  ;;  %v2289_v15 = vmul.f32 %v970_v9, %v970_v9  ;;  %v2059_v42 = vsel %vm1995_vm1, %v970_v9, 0.0  ;;  %v2452_v8 = vsel %vm1995_vm1, %v2291_v4, 0.0 }
 0x126   :  { %v2445_v17 = vadd.f32 %v2444_v12, %v2443_v51  ;;  %v2058_v37 = vadd.f32 %v2057_v13, %v2056_v7  ;;  %v3367_v25 = vpop.f32.mrf.mxu0  ;;  %v4315_v49 = vpop.f32.mrf.mxu1  ;;  %1934 = vst.msk [vmem:[%s5291_s4 + $0x110] sm:$0xf] %vm1865_vm0, %v2865_v0 }
 0x127   :  { %1898 = vst.msk [vmem:[%s5291_s4 + $0x80] sm:$0xf] %vm1865_vm0, %v2829_v14  ;;  %v2832_v55 = vpack.c.bf16 %v3367_v25, %v3367_v25  ;;  %v2448_v21 = vsel %vm1995_vm1, %v2289_v15, 0.0  ;;  %v2292_v30 = vmul.f32 %v3367_v25, %v3367_v25  ;;  %v2065_v44 = vsel %vm1995_vm1, %v3367_v25, 0.0 }
 0x128   :  { %v2060_v41 = vadd.f32 %v2059_v42, %v2058_v37  ;;  %v2447_v43 = vadd.f32 %v2446_v35, %v2445_v17  ;;  %v973_v59 = vpop.f32.mrf.mxu0  ;;  %v4327_v56 = vpop.f32.mrf.mxu1  ;;  %v2868_v35 = vpack.c.bf16 %v4293_v19, %v4293_v19 }
 0x129   :  { %1901 = vst.msk [vmem:[%s5291_s4 + $0x8c] sm:$0xf] %vm1865_vm0, %v2832_v55  ;;  %v2830_v22 = vpack.c.bf16 %v973_v59, %v973_v59  ;;  %v2061_v23 = vsel %vm1995_vm1, %v973_v59, 0.0  ;;  %v2290_v24 = vmul.f32 %v973_v59, %v973_v59  ;;  %v2454_v57 = vsel %vm1995_vm1, %v2292_v30, 0.0 }
 0x12a   :  { %v2449_v16 = vadd.f32 %v2448_v21, %v2447_v43  ;;  %v2062_v26 = vadd.f32 %v2061_v23, %v2060_v41  ;;  %v3370_v20 = vpop.f32.mrf.mxu0  ;;  %v4337_v48 = vpop.f32.mrf.mxu1  ;;  %1937 = vst.msk [vmem:[%s5291_s4 + $0x11c] sm:$0xf] %vm1865_vm0, %v2868_v35 }
 0x12b   :  { %1899 = vst.msk [vmem:[%s5291_s4 + $0x84] sm:$0xf] %vm1865_vm0, %v2830_v22  ;;  %v2450_v31 = vsel %vm1995_vm1, %v2290_v24, 0.0  ;;  %v2835_v33 = vpack.c.bf16 %v3370_v20, %v3370_v20  ;;  %v2295_v46 = vmul.f32 %v3370_v20, %v3370_v20  ;;  %v2071_v12 = vsel %vm1995_vm1, %v3370_v20, 0.0 }
 0x12c   :  { %v2064_v34 = vadd.f32 %v2063_v29, %v2062_v26  ;;  %v2451_v39 = vadd.f32 %v2450_v31, %v2449_v16  ;;  %v986_v28 = vpop.f32.mrf.mxu0  ;;  %v4349_v10 = vpop.f32.mrf.mxu1  ;;  %v2866_v31 = vpack.c.bf16 %v4305_v27, %v4305_v27 }
 0x12d   :  { %1904 = vst.msk [vmem:[%s5291_s4 + $0x98] sm:$0xf] %vm1865_vm0, %v2835_v33  ;;  %v2833_v32 = vpack.c.bf16 %v986_v28, %v986_v28  ;;  %v2293_v52 = vmul.f32 %v986_v28, %v986_v28  ;;  %v2067_v58 = vsel %vm1995_vm1, %v986_v28, 0.0  ;;  %v2460_v55 = vsel %vm1995_vm1, %v2295_v46, 0.0 }
 0x12e   :  { %v2453_v53 = vadd.f32 %v2452_v8, %v2451_v39  ;;  %v2066_v36 = vadd.f32 %v2065_v44, %v2064_v34  ;;  %v3371_v54 = vpop.f32.mrf.mxu0  ;;  %v4359_v42 = vpop.f32.mrf.mxu1  ;;  %1935 = vst.msk [vmem:[%s5291_s4 + $0x114] sm:$0xf] %vm1865_vm0, %v2866_v31 }
 0x12f   :  { %1902 = vst.msk [vmem:[%s5291_s4 + $0x90] sm:$0xf] %vm1865_vm0, %v2833_v32  ;;  %v2836_v61 = vpack.c.bf16 %v3371_v54, %v3371_v54  ;;  %v2456_v2 = vsel %vm1995_vm1, %v2293_v52, 0.0  ;;  %v2296_v13 = vmul.f32 %v3371_v54, %v3371_v54  ;;  %v2073_v4 = vsel %vm1995_vm1, %v3371_v54, 0.0 }
 0x130   :  { %v2068_v62 = vadd.f32 %v2067_v58, %v2066_v36  ;;  %v2455_v63 = vadd.f32 %v2454_v57, %v2453_v53  ;;  %v989_v47 = vpop.f32.mrf.mxu0  ;;  %v4371_v22 = vpop.f32.mrf.mxu1 }
 0x131   :  { %1905 = vst.msk [vmem:[%s5291_s4 + $0x9c] sm:$0xf] %vm1865_vm0, %v2836_v61  ;;  %v2834_v3 = vpack.c.bf16 %v989_v47, %v989_v47  ;;  %v2069_v6 = vsel %vm1995_vm1, %v989_v47, 0.0  ;;  %v2294_v50 = vmul.f32 %v989_v47, %v989_v47  ;;  %v2462_v23 = vsel %vm1995_vm1, %v2296_v13, 0.0 }
 0x132   :  { %v2457_v7 = vadd.f32 %v2456_v2, %v2455_v63  ;;  %v2070_v51 = vadd.f32 %v2069_v6, %v2068_v62  ;;  %v3374_v9 = vpop.f32.mrf.mxu0  ;;  %v4381_v33 = vpop.f32.mrf.mxu1  ;;  %v2871_v62 = vpack.c.bf16 %v4315_v49, %v4315_v49 }
 0x133   :  { %1903 = vst.msk [vmem:[%s5291_s4 + $0x94] sm:$0xf] %vm1865_vm0, %v2834_v3  ;;  %v2458_v14 = vsel %vm1995_vm1, %v2294_v50, 0.0  ;;  %v2839_v15 = vpack.c.bf16 %v3374_v9, %v3374_v9  ;;  %v2299_v26 = vmul.f32 %v3374_v9, %v3374_v9  ;;  %v2079_v53 = vsel %vm1995_vm1, %v3374_v9, 0.0 }
 0x134   :  { %v2072_v17 = vadd.f32 %v2071_v12, %v2070_v51  ;;  %v2459_v37 = vadd.f32 %v2458_v14, %v2457_v7  ;;  %v1002_v25 = vpop.f32.mrf.mxu0  ;;  %v4393_v52 = vpop.f32.mrf.mxu1  ;;  %1940 = vst.msk [vmem:[%s5291_s4 + $0x128] sm:$0xf] %vm1865_vm0, %v2871_v62 }
 0x135   :  { %1908 = vst.msk [vmem:[%s5291_s4 + $0xa8] sm:$0xf] %vm1865_vm0, %v2839_v15  ;;  %v2837_v41 = vpack.c.bf16 %v1002_v25, %v1002_v25  ;;  %v2297_v43 = vmul.f32 %v1002_v25, %v1002_v25  ;;  %v2075_v24 = vsel %vm1995_vm1, %v1002_v25, 0.0  ;;  %v2468_v47 = vsel %vm1995_vm1, %v2299_v26, 0.0 }
 0x136   :  { %v2461_v59 = vadd.f32 %v2460_v55, %v2459_v37  ;;  %v2074_v18 = vadd.f32 %v2073_v4, %v2072_v17  ;;  %v3375_v21 = vpop.f32.mrf.mxu0  ;;  %v4403_v63 = vpop.f32.mrf.mxu1  ;;  %v2869_v25 = vpack.c.bf16 %v4327_v56, %v4327_v56 }
 0x137   :  { %1906 = vst.msk [vmem:[%s5291_s4 + $0xa0] sm:$0xf] %vm1865_vm0, %v2837_v41  ;;  %v2840_v16 = vpack.c.bf16 %v3375_v21, %v3375_v21  ;;  %v2464_v34 = vsel %vm1995_vm1, %v2297_v43, 0.0  ;;  %v2300_v36 = vmul.f32 %v3375_v21, %v3375_v21  ;;  %v2081_v0 = vsel %vm1995_vm1, %v3375_v21, 0.0 }
 0x138   :  { %v2076_v20 = vadd.f32 %v2075_v24, %v2074_v18  ;;  %v2463_v29 = vadd.f32 %v2462_v23, %v2461_v59  ;;  %v1005_v30 = vpop.f32.mrf.mxu0  ;;  %v4415_v51 = vpop.f32.mrf.mxu1  ;;  %1938 = vst.msk [vmem:[%s5291_s4 + $0x120] sm:$0xf] %vm1865_vm0, %v2869_v25 }
 0x139   :  { %1909 = vst.msk [vmem:[%s5291_s4 + $0xac] sm:$0xf] %vm1865_vm0, %v2840_v16  ;;  %v2838_v39 = vpack.c.bf16 %v1005_v30, %v1005_v30  ;;  %v2077_v28 = vsel %vm1995_vm1, %v1005_v30, 0.0  ;;  %v2298_v40 = vmul.f32 %v1005_v30, %v1005_v30  ;;  %v2470_v9 = vsel %vm1995_vm1, %v2300_v36, 0.0 }
 0x13a   :  { %v2465_v8 = vadd.f32 %v2464_v34, %v2463_v29  ;;  %v2078_v44 = vadd.f32 %v2077_v28, %v2076_v20  ;;  %v3378_v32 = vpop.f32.mrf.mxu0  ;;  %v4425_v35 = vpop.f32.mrf.mxu1  ;;  %v2872_v34 = vpack.c.bf16 %v4337_v48, %v4337_v48 }
 0x13b   :  { %1907 = vst.msk [vmem:[%s5291_s4 + $0xa4] sm:$0xf] %vm1865_vm0, %v2838_v39  ;;  %v2466_v54 = vsel %vm1995_vm1, %v2298_v40, 0.0  ;;  %v2843_v57 = vpack.c.bf16 %v3378_v32, %v3378_v32  ;;  %v2303_v14 = vmul.f32 %v3378_v32, %v3378_v32  ;;  %v2087_v24 = vsel %vm1995_vm1, %v3378_v32, 0.0 }
 0x13c   :  { %v2080_v58 = vadd.f32 %v2079_v53, %v2078_v44  ;;  %v2467_v61 = vadd.f32 %v2466_v54, %v2465_v8  ;;  %v1018_v46 = vpop.f32.mrf.mxu0  ;;  %v4437_v23 = vpop.f32.mrf.mxu1  ;;  %1941 = vst.msk [vmem:[%s5291_s4 + $0x12c] sm:$0xf] %vm1865_vm0, %v2872_v34 }
 0x13d   :  { %1912 = vst.msk [vmem:[%s5291_s4 + $0xb8] sm:$0xf] %vm1865_vm0, %v2843_v57  ;;  %v2841_v2 = vpack.c.bf16 %v1018_v46, %v1018_v46  ;;  %v2301_v3 = vmul.f32 %v1018_v46, %v1018_v46  ;;  %v2083_v12 = vsel %vm1995_vm1, %v1018_v46, 0.0  ;;  %v2476_v28 = vsel %vm1995_vm1, %v2303_v14, 0.0 }
 0x13e   :  { %v2469_v6 = vadd.f32 %v2468_v47, %v2467_v61  ;;  %v2082_v50 = vadd.f32 %v2081_v0, %v2080_v58  ;;  %v3379_v7 = vpop.f32.mrf.mxu0  ;;  %v4447_v39 = vpop.f32.mrf.mxu1 }
 0x13f   :  { %1910 = vst.msk [vmem:[%s5291_s4 + $0xb0] sm:$0xf] %vm1865_vm0, %v2841_v2  ;;  %v2844_v13 = vpack.c.bf16 %v3379_v7, %v3379_v7  ;;  %v2472_v55 = vsel %vm1995_vm1, %v2301_v3, 0.0  ;;  %v2304_v16 = vmul.f32 %v3379_v7, %v3379_v7  ;;  %v2089_v40 = vsel %vm1995_vm1, %v3379_v7, 0.0 }
 0x140   :  { %v2084_v15 = vadd.f32 %v2083_v12, %v2082_v50  ;;  %v2471_v17 = vadd.f32 %v2470_v9, %v2469_v6  ;;  %v1021_v37 = vpop.f32.mrf.mxu0  ;;  %v4459_v54 = vpop.f32.mrf.mxu1  ;;  %v2870_v2 = vpack.c.bf16 %v4349_v10, %v4349_v10 }
 0x141   :  { %1913 = vst.msk [vmem:[%s5291_s4 + $0xbc] sm:$0xf] %vm1865_vm0, %v2844_v13  ;;  %v2842_v4 = vpack.c.bf16 %v1021_v37, %v1021_v37  ;;  %v2085_v41 = vsel %vm1995_vm1, %v1021_v37, 0.0  ;;  %v2302_v43 = vmul.f32 %v1021_v37, %v1021_v37  ;;  %v2478_v57 = vsel %vm1995_vm1, %v2304_v16, 0.0 }
 0x142   :  { %v2473_v59 = vadd.f32 %v2472_v55, %v2471_v17  ;;  %v2086_v18 = vadd.f32 %v2085_v41, %v2084_v15  ;;  %v3382_v21 = vpop.f32.mrf.mxu0  ;;  %v4469_v3 = vpop.f32.mrf.mxu1  ;;  %1939 = vst.msk [vmem:[%s5291_s4 + $0x124] sm:$0xf] %vm1865_vm0, %v2870_v2 }
 0x143   :  { %1911 = vst.msk [vmem:[%s5291_s4 + $0xb4] sm:$0xf] %vm1865_vm0, %v2842_v4  ;;  %v2474_v26 = vsel %vm1995_vm1, %v2302_v43, 0.0  ;;  %v2847_v20 = vpack.c.bf16 %v3382_v21, %v3382_v21  ;;  %v2307_v46 = vmul.f32 %v3382_v21, %v3382_v21  ;;  %v2095_v17 = vsel %vm1995_vm1, %v3382_v21, 0.0 }
 0x144   :  { %v2088_v29 = vadd.f32 %v2087_v24, %v2086_v18  ;;  %v2475_v30 = vadd.f32 %v2474_v26, %v2473_v59  ;;  %v1034_v31 = vpop.f32.mrf.mxu0  ;;  %v4481_v15 = vpop.f32.mrf.mxu1  ;;  %v2875_v59 = vpack.c.bf16 %v4359_v42, %v4359_v42 }
 0x145   :  { %1916 = vst.msk [vmem:[%s5291_s4 + $0xc8] sm:$0xf] %vm1865_vm0, %v2847_v20  ;;  %v2845_v8 = vpack.c.bf16 %v1034_v31, %v1034_v31  ;;  %v2305_v44 = vmul.f32 %v1034_v31, %v1034_v31  ;;  %v2091_v58 = vsel %vm1995_vm1, %v1034_v31, 0.0  ;;  %v2484_v24 = vsel %vm1995_vm1, %v2307_v46, 0.0 }
 0x146   :  { %v2477_v32 = vadd.f32 %v2476_v28, %v2475_v30  ;;  %v2090_v53 = vadd.f32 %v2089_v40, %v2088_v29  ;;  %v3383_v36 = vpop.f32.mrf.mxu0  ;;  %v4491_v18 = vpop.f32.mrf.mxu1  ;;  %1944 = vst.msk [vmem:[%s5291_s4 + $0x138] sm:$0xf] %vm1865_vm0, %v2875_v59 }
 0x147   :  { %1914 = vst.msk [vmem:[%s5291_s4 + $0xc0] sm:$0xf] %vm1865_vm0, %v2845_v8  ;;  %v2848_v61 = vpack.c.bf16 %v3383_v36, %v3383_v36  ;;  %v2480_v6 = vsel %vm1995_vm1, %v2305_v44, 0.0  ;;  %v2308_v37 = vmul.f32 %v3383_v36, %v3383_v36  ;;  %v2097_v21 = vsel %vm1995_vm1, %v3383_v36, 0.0 }
 0x148   :  { %v2092_v62 = vadd.f32 %v2091_v58, %v2090_v53  ;;  %v2479_v47 = vadd.f32 %v2478_v57, %v2477_v32  ;;  %v1037_v0 = vpop.f32.mrf.mxu0  ;;  %v4503_v31 = vpop.f32.mrf.mxu1  ;;  %v2873_v36 = vpack.c.bf16 %v4371_v22, %v4371_v22 }
 0x149   :  { %1917 = vst.msk [vmem:[%s5291_s4 + $0xcc] sm:$0xf] %vm1865_vm0, %v2848_v61  ;;  %v2846_v50 = vpack.c.bf16 %v1037_v0, %v1037_v0  ;;  %v2093_v7 = vsel %vm1995_vm1, %v1037_v0, 0.0  ;;  %v2306_v9 = vmul.f32 %v1037_v0, %v1037_v0  ;;  %v2486_v34 = vsel %vm1995_vm1, %v2308_v37, 0.0 }
 0x14a   :  { %v2481_v12 = vadd.f32 %v2480_v6, %v2479_v47  ;;  %v2094_v13 = vadd.f32 %v2093_v7, %v2092_v62  ;;  %v3386_v14 = vpop.f32.mrf.mxu0  ;;  %v4513_v57 = vpop.f32.mrf.mxu1  ;;  %1942 = vst.msk [vmem:[%s5291_s4 + $0x130] sm:$0xf] %vm1865_vm0, %v2873_v36 }
 0x14b   :  { %1915 = vst.msk [vmem:[%s5291_s4 + $0xc4] sm:$0xf] %vm1865_vm0, %v2846_v50  ;;  %v2482_v25 = vsel %vm1995_vm1, %v2306_v9, 0.0  ;;  %v2851_v55 = vpack.c.bf16 %v3386_v14, %v3386_v14  ;;  %v2311_v8 = vmul.f32 %v3386_v14, %v3386_v14  ;;  %v2103_v50 = vsel %vm1995_vm1, %v3386_v14, 0.0 }
 0x14c   :  { %v2096_v4 = vadd.f32 %v2095_v17, %v2094_v13  ;;  %v2483_v41 = vadd.f32 %v2482_v25, %v2481_v12  ;;  %v1050_v43 = vpop.f32.mrf.mxu0  ;;  %v4525_v6 = vpop.f32.mrf.mxu1  ;;  %v2876_v25 = vpack.c.bf16 %v4381_v33, %v4381_v33 }
 0x14d   :  { %1920 = vst.msk [vmem:[%s5291_s4 + $0xd8] sm:$0xf] %vm1865_vm0, %v2851_v55  ;;  %v2849_v16 = vpack.c.bf16 %v1050_v43, %v1050_v43  ;;  %v2309_v26 = vmul.f32 %v1050_v43, %v1050_v43  ;;  %v2099_v28 = vsel %vm1995_vm1, %v1050_v43, 0.0 }
 0x14e   :  { %v2485_v20 = vadd.f32 %v2484_v24, %v2483_v41  ;;  %v2098_v29 = vadd.f32 %v2097_v21, %v2096_v4  ;;  %v3387_v30 = vpop.f32.mrf.mxu0  ;;  %v4535_v55 = vpop.f32.mrf.mxu1  ;;  %v2492_v4 = vsel %vm1995_vm1, %v2311_v8, 0.0  ;;  %1945 = vst.msk [vmem:[%s5291_s4 + $0x13c] sm:$0xf] %vm1865_vm0, %v2876_v25  ;;  %v2874_v8 = vpack.c.bf16 %v4393_v52, %v4393_v52 }
 0x14f   :  { %1918 = vst.msk [vmem:[%s5291_s4 + $0xd0] sm:$0xf] %vm1865_vm0, %v2849_v16  ;;  %v2852_v40 = vpack.c.bf16 %v3387_v30, %v3387_v30  ;;  %v2488_v58 = vsel %vm1995_vm1, %v2309_v26, 0.0  ;;  %v2312_v7 = vmul.f32 %v3387_v30, %v3387_v30  ;;  %v2105_v14 = vsel %vm1995_vm1, %v3387_v30, 0.0 }
 0x150   :  { %v2100_v44 = vadd.f32 %v2099_v28, %v2098_v29  ;;  %v2487_v32 = vadd.f32 %v2486_v34, %v2485_v20  ;;  %v1053_v53 = vpop.f32.mrf.mxu0  ;;  %v4547_v16 = vpop.f32.mrf.mxu1  ;;  %1943 = vst.msk [vmem:[%s5291_s4 + $0x134] sm:$0xf] %vm1865_vm0, %v2874_v8  ;;  %v2877_v8 = vpack.c.bf16 %v4415_v51, %v4415_v51 }
 0x151   :  { %1921 = vst.msk [vmem:[%s5291_s4 + $0xdc] sm:$0xf] %vm1865_vm0, %v2852_v40  ;;  %v2850_v61 = vpack.c.bf16 %v1053_v53, %v1053_v53  ;;  %v2101_v46 = vsel %vm1995_vm1, %v1053_v53, 0.0  ;;  %v2310_v62 = vmul.f32 %v1053_v53, %v1053_v53  ;;  %v2494_v26 = vsel %vm1995_vm1, %v2312_v7, 0.0 }
 0x152   :  { %v2489_v47 = vadd.f32 %v2488_v58, %v2487_v32  ;;  %v2102_v0 = vadd.f32 %v2101_v46, %v2100_v44  ;;  %v3390_v2 = vpop.f32.mrf.mxu0  ;;  %v4557_v44 = vpop.f32.mrf.mxu1  ;;  %1946 = vst.msk [vmem:[%s5291_s4 + $0x140] sm:$0xf] %vm1865_vm0, %v2877_v8  ;;  %v2884_v8 = vpack.c.bf16 %v4469_v3, %v4469_v3 }
 0x153   :  { %1919 = vst.msk [vmem:[%s5291_s4 + $0xd4] sm:$0xf] %vm1865_vm0, %v2850_v61  ;;  %v2490_v9 = vsel %vm1995_vm1, %v2310_v62, 0.0  ;;  %v2855_v12 = vpack.c.bf16 %v3390_v2, %v3390_v2  ;;  %v2315_v30 = vmul.f32 %v3390_v2, %v3390_v2 }
 0x154   :  { %v2104_v13 = vadd.f32 %v2103_v50, %v2102_v0  ;;  %v2491_v17 = vadd.f32 %v2490_v9, %v2489_v47  ;;  %v1066_v37 = vpop.f32.mrf.mxu0  ;;  %v4569_v47 = vpop.f32.mrf.mxu1  ;;  %v2111_v0 = vsel %vm1995_vm1, %v3390_v2, 0.0  ;;  %1953 = vst.msk [vmem:[%s5291_s4 + $0x15c] sm:$0xf] %vm1865_vm0, %v2884_v8  ;;  %v2891_v8 = vpack.c.bf16 %v4535_v55, %v4535_v55 }
 0x155   :  { %1924 = vst.msk [vmem:[%s5291_s4 + $0xe8] sm:$0xf] %vm1865_vm0, %v2855_v12  ;;  %v2853_v41 = vpack.c.bf16 %v1066_v37, %v1066_v37  ;;  %v2313_v43 = vmul.f32 %v1066_v37, %v1066_v37  ;;  %v2107_v20 = vsel %vm1995_vm1, %v1066_v37, 0.0  ;;  %v2879_v37 = vpack.c.bf16 %v4403_v63, %v4403_v63 }
 0x156   :  { %v2493_v59 = vadd.f32 %v2492_v4, %v2491_v17  ;;  %v2106_v24 = vadd.f32 %v2105_v14, %v2104_v13  ;;  %v3391_v21 = vpop.f32.mrf.mxu0  ;;  %v4579_v25 = vpop.f32.mrf.mxu1  ;;  %v2500_v4 = vsel %vm1995_vm1, %v2315_v30, 0.0  ;;  %1960 = vst.msk [vmem:[%s5291_s4 + $0x178] sm:$0xf] %vm1865_vm0, %v2891_v8 }
 0x157   :  { %1922 = vst.msk [vmem:[%s5291_s4 + $0xe0] sm:$0xf] %vm1865_vm0, %v2853_v41  ;;  %v2856_v29 = vpack.c.bf16 %v3391_v21, %v3391_v21  ;;  %v2496_v32 = vsel %vm1995_vm1, %v2313_v43, 0.0  ;;  %v2316_v50 = vmul.f32 %v3391_v21, %v3391_v21  ;;  %v2113_v2 = vsel %vm1995_vm1, %v3391_v21, 0.0  ;;  %1948 = vst.msk [vmem:[%s5291_s4 + $0x148] sm:$0xf] %vm1865_vm0, %v2879_v37 }
 0x158   :  { %v2108_v34 = vadd.f32 %v2107_v20, %v2106_v24  ;;  %v2495_v28 = vadd.f32 %v2494_v26, %v2493_v59  ;;  %v1069_v40 = vpop.f32.mrf.mxu0  ;;  %v4591_v26 = vpop.f32.mrf.mxu1 }
 0x159   :  { %1925 = vst.msk [vmem:[%s5291_s4 + $0xec] sm:$0xf] %vm1865_vm0, %v2856_v29  ;;  %v2854_v53 = vpack.c.bf16 %v1069_v40, %v1069_v40  ;;  %v2109_v36 = vsel %vm1995_vm1, %v1069_v40, 0.0  ;;  %v2314_v58 = vmul.f32 %v1069_v40, %v1069_v40  ;;  %v2502_v20 = vsel %vm1995_vm1, %v2316_v50, 0.0 }
 0x15a   :  { %v2497_v61 = vadd.f32 %v2496_v32, %v2495_v28  ;;  %v2110_v46 = vadd.f32 %v2109_v36, %v2108_v34  ;;  %v3394_v62 = vpop.f32.mrf.mxu0  ;;  %v4601_v32 = vpop.f32.mrf.mxu1 }
 0x15b   :  { %1923 = vst.msk [vmem:[%s5291_s4 + $0xe4] sm:$0xf] %vm1865_vm0, %v2854_v53  ;;  %v2498_v7 = vsel %vm1995_vm1, %v2314_v58, 0.0  ;;  %v2859_v9 = vpack.c.bf16 %v3394_v62, %v3394_v62  ;;  %v2319_v30 = vmul.f32 %v3394_v62, %v3394_v62  ;;  %v2896_v8 = vpack.c.bf16 %v4601_v32, %v4601_v32 }
 0x15c   :  { %v2112_v12 = vadd.f32 %v2111_v0, %v2110_v46  ;;  %v2499_v13 = vadd.f32 %v2498_v7, %v2497_v61  ;;  %v1082_v17 = vpop.f32.mrf.mxu0  ;;  %v4613_v50 = vpop.f32.mrf.mxu1  ;;  %v2119_v7 = vsel %vm1995_vm1, %v3394_v62, 0.0 }
 0x15d   :  { %1928 = vst.msk [vmem:[%s5291_s4 + $0xf8] sm:$0xf] %vm1865_vm0, %v2859_v9  ;;  %v2857_v14 = vpack.c.bf16 %v1082_v17, %v1082_v17  ;;  %v2317_v41 = vmul.f32 %v1082_v17, %v1082_v17  ;;  %v2115_v21 = vsel %vm1995_vm1, %v1082_v17, 0.0  ;;  %v2508_v62 = vsel %vm1995_vm1, %v2319_v30, 0.0  ;;  %1965 = vst.msk [vmem:[%s5291_s4 + $0x18c] sm:$0xf] %vm1865_vm0, %v2896_v8 }
 0x15e   :  { %v2501_v43 = vadd.f32 %v2500_v4, %v2499_v13  ;;  %v2114_v59 = vadd.f32 %v2113_v2, %v2112_v12  ;;  %v3395_v24 = vpop.f32.mrf.mxu0  ;;  %v2880_v13 = vpack.c.bf16 %v4425_v35, %v4425_v35  ;;  %v2878_v4 = vpack.c.bf16 %v4437_v23, %v4437_v23  ;;  %v4625_v2 = vpop.f32.mrf.mxu1 }
 0x15f   :  { %1926 = vst.msk [vmem:[%s5291_s4 + $0xf0] sm:$0xf] %vm1865_vm0, %v2857_v14  ;;  %v2860_v29 = vpack.c.bf16 %v3395_v24, %v3395_v24  ;;  %v2504_v53 = vsel %vm1995_vm1, %v2317_v41, 0.0  ;;  %v2320_v9 = vmul.f32 %v3395_v24, %v3395_v24  ;;  %v2121_v14 = vsel %vm1995_vm1, %v3395_v24, 0.0 }
 0x160   :  { %v2116_v34 = vadd.f32 %v2115_v21, %v2114_v59  ;;  %v2503_v28 = vadd.f32 %v2502_v20, %v2501_v43  ;;  %v1085_v40 = vpop.f32.mrf.mxu0  ;;  %v2321_v41 = vmul.f32 %v4235_v45, %v4235_v45  ;;  %1949 = vst.msk [vmem:[%s5291_s4 + $0x14c] sm:$0xf] %vm1865_vm0, %v2880_v13  ;;  %v2883_v43 = vpack.c.bf16 %v4447_v39, %v4447_v39  ;;  %v4641_v21 = vpop.f32.mrf.mxu1 }
 0x161   :  { %1929 = vst.msk [vmem:[%s5291_s4 + $0xfc] sm:$0xf] %vm1865_vm0, %v2860_v29  ;;  %v2858_v36 = vpack.c.bf16 %v1085_v40, %v1085_v40  ;;  %v2117_v58 = vsel %vm1995_vm1, %v1085_v40, 0.0  ;;  %v2318_v61 = vmul.f32 %v1085_v40, %v1085_v40  ;;  %1947 = vst.msk [vmem:[%s5291_s4 + $0x144] sm:$0xf] %vm1865_vm0, %v2878_v4  ;;  %v2510_v24 = vsel %vm1995_vm1, %v2320_v9, 0.0 }
 0x162   :  { %v2505_v46 = vadd.f32 %v2504_v53, %v2503_v28  ;;  %v2118_v0 = vadd.f32 %v2117_v58, %v2116_v34  ;;  %v2123_v29 = vsel %vm1995_vm1, %v4235_v45, 0.0  ;;  %v2322_v30 = vmul.f32 %v4261_v1, %v4261_v1  ;;  %1952 = vst.msk [vmem:[%s5291_s4 + $0x158] sm:$0xf] %vm1865_vm0, %v2883_v43  ;;  %v4656_v53 = vpop.f32.mrf.mxu1 }
 0x163   :  { %1927 = vst.msk [vmem:[%s5291_s4 + $0xf4] sm:$0xf] %vm1865_vm0, %v2858_v36  ;;  %v2506_v12 = vsel %vm1995_vm1, %v2318_v61, 0.0  ;;  %v2881_v34 = vpack.c.bf16 %v4459_v54, %v4459_v54  ;;  %v2323_v45 = vmul.f32 %v4225_v5, %v4225_v5  ;;  %v2512_v36 = vsel %vm1995_vm1, %v2321_v41, 0.0 }
 0x164   :  { %v2120_v17 = vadd.f32 %v2119_v7, %v2118_v0  ;;  %v2507_v37 = vadd.f32 %v2506_v12, %v2505_v46  ;;  %v2125_v58 = vsel %vm1995_vm1, %v4261_v1, 0.0  ;;  %v2882_v61 = vpack.c.bf16 %v4481_v15, %v4481_v15  ;;  %v4673_v7 = vpop.f32.mrf.mxu1 }
 0x165   :  { %1950 = vst.msk [vmem:[%s5291_s4 + $0x150] sm:$0xf] %vm1865_vm0, %v2881_v34  ;;  %v2127_v1 = vsel %vm1995_vm1, %v4225_v5, 0.0  ;;  %v2324_v9 = vmul.f32 %v4249_v60, %v4249_v60  ;;  %v2514_v12 = vsel %vm1995_vm1, %v2322_v30, 0.0  ;;  %v2887_v13 = vpack.c.bf16 %v4491_v18, %v4491_v18 }
 0x166   :  { %v2122_v59 = vadd.f32 %v2121_v14, %v2120_v17  ;;  %v2509_v20 = vadd.f32 %v2508_v62, %v2507_v37  ;;  %1951 = vst.msk [vmem:[%s5291_s4 + $0x154] sm:$0xf] %vm1865_vm0, %v2882_v61  ;;  %v2885_v4 = vpack.c.bf16 %v4503_v31, %v4503_v31  ;;  %v4688_v62 = vpop.f32.mrf.mxu1  ;;  %v2516_v5 = vsel %vm1995_vm1, %v2323_v45, 0.0 }
 0x167   :  { %v2129_v14 = vsel %vm1995_vm1, %v4249_v60, 0.0  ;;  %v2325_v41 = vmul.f32 %v4283_v38, %v4283_v38  ;;  %1956 = vst.msk [vmem:[%s5291_s4 + $0x168] sm:$0xf] %vm1865_vm0, %v2887_v13  ;;  %v2888_v43 = vpack.c.bf16 %v4513_v57, %v4513_v57  ;;  %v2518_v60 = vsel %vm1995_vm1, %v2324_v9, 0.0 }
 0x168   :  { %v2124_v28 = vadd.f32 %v2123_v29, %v2122_v59  ;;  %v2511_v40 = vadd.f32 %v2510_v24, %v2509_v20  ;;  %1954 = vst.msk [vmem:[%s5291_s4 + $0x160] sm:$0xf] %vm1865_vm0, %v2885_v4  ;;  %v4705_v24 = vpop.f32.mrf.mxu1  ;;  %v2131_v29 = vsel %vm1995_vm1, %v4283_v38, 0.0  ;;  %v2326_v30 = vmul.f32 %v4305_v27, %v4305_v27 }
 0x169   :  { %1957 = vst.msk [vmem:[%s5291_s4 + $0x16c] sm:$0xf] %vm1865_vm0, %v2888_v43  ;;  %v2886_v34 = vpack.c.bf16 %v4525_v6, %v4525_v6  ;;  %v2327_v38 = vmul.f32 %v4271_v11, %v4271_v11  ;;  %v2889_v61 = vpack.c.bf16 %v4547_v16, %v4547_v16  ;;  %v2328_v9 = vmul.f32 %v4293_v19, %v4293_v19 }
 0x16a   :  { %v2513_v46 = vadd.f32 %v2512_v36, %v2511_v40  ;;  %v2126_v0 = vadd.f32 %v2125_v58, %v2124_v28  ;;  %v4720_v45 = vpop.f32.mrf.mxu1  ;;  %v2520_v36 = vsel %vm1995_vm1, %v2325_v41, 0.0  ;;  %v2133_v58 = vsel %vm1995_vm1, %v4305_v27, 0.0 }
 0x16b   :  { %1955 = vst.msk [vmem:[%s5291_s4 + $0x164] sm:$0xf] %vm1865_vm0, %v2886_v34  ;;  %v2135_v27 = vsel %vm1995_vm1, %v4271_v11, 0.0  ;;  %1958 = vst.msk [vmem:[%s5291_s4 + $0x170] sm:$0xf] %vm1865_vm0, %v2889_v61  ;;  %v2892_v13 = vpack.c.bf16 %v4557_v44, %v4557_v44  ;;  %v2890_v4 = vpack.c.bf16 %v4569_v47, %v4569_v47  ;;  %v2524_v11 = vsel %vm1995_vm1, %v2327_v38, 0.0 }
 0x16c   :  { %v2128_v17 = vadd.f32 %v2127_v1, %v2126_v0  ;;  %v2515_v37 = vadd.f32 %v2514_v12, %v2513_v46  ;;  %v4737_v1 = vpop.f32.mrf.mxu1  ;;  %v2522_v12 = vsel %vm1995_vm1, %v2326_v30, 0.0  ;;  %v2329_v41 = vmul.f32 %v4327_v56, %v4327_v56 }
 0x16d   :  { %1961 = vst.msk [vmem:[%s5291_s4 + $0x17c] sm:$0xf] %vm1865_vm0, %v2892_v13  ;;  %v2895_v43 = vpack.c.bf16 %v4579_v25, %v4579_v25  ;;  %1959 = vst.msk [vmem:[%s5291_s4 + $0x174] sm:$0xf] %vm1865_vm0, %v2890_v4  ;;  %v2330_v30 = vmul.f32 %v4349_v10, %v4349_v10  ;;  %v2893_v34 = vpack.c.bf16 %v4591_v26, %v4591_v26 }
 0x16e   :  { %v2517_v59 = vadd.f32 %v2516_v5, %v2515_v37  ;;  %v2130_v20 = vadd.f32 %v2129_v14, %v2128_v17  ;;  %v4752_v5 = vpop.f32.mrf.mxu1  ;;  %v2137_v14 = vsel %vm1995_vm1, %v4293_v19, 0.0  ;;  %v2526_v19 = vsel %vm1995_vm1, %v2328_v9, 0.0 }
 0x16f   :  { %1964 = vst.msk [vmem:[%s5291_s4 + $0x188] sm:$0xf] %vm1865_vm0, %v2895_v43  ;;  %1962 = vst.msk [vmem:[%s5291_s4 + $0x180] sm:$0xf] %vm1865_vm0, %v2893_v34  ;;  %v2894_v61 = vpack.c.bf16 %v4613_v50, %v4613_v50  ;;  %v2332_v9 = vmul.f32 %v4337_v48, %v4337_v48  ;;  %v2899_v13 = vpack.c.bf16 %v4625_v2, %v4625_v2 }
 0x170   :  { %v2132_v28 = vadd.f32 %v2131_v29, %v2130_v20  ;;  %v2519_v40 = vadd.f32 %v2518_v60, %v2517_v59  ;;  %v4769_v60 = vpop.f32.mrf.mxu1  ;;  %v2139_v29 = vsel %vm1995_vm1, %v4327_v56, 0.0  ;;  %v2331_v56 = vmul.f32 %v4315_v49, %v4315_v49 }
 0x171   :  { %1963 = vst.msk [vmem:[%s5291_s4 + $0x184] sm:$0xf] %vm1865_vm0, %v2894_v61  ;;  %v2897_v4 = vpack.c.bf16 %v4641_v21, %v4641_v21  ;;  %1968 = vst.msk [vmem:[%s5291_s4 + $0x198] sm:$0xf] %vm1865_vm0, %v2899_v13  ;;  %v2900_v43 = vpack.c.bf16 %v4656_v53, %v4656_v53  ;;  %v2898_v34 = vpack.c.bf16 %v4673_v7, %v4673_v7 }
 0x172   :  { %v2521_v46 = vadd.f32 %v2520_v36, %v2519_v40  ;;  %v2134_v0 = vadd.f32 %v2133_v58, %v2132_v28  ;;  %v4784_v38 = vpop.f32.mrf.mxu1  ;;  %v2528_v36 = vsel %vm1995_vm1, %v2329_v41, 0.0  ;;  %v2141_v58 = vsel %vm1995_vm1, %v4349_v10, 0.0 }
 0x173   :  { %v2143_v10 = vsel %vm1995_vm1, %v4315_v49, 0.0  ;;  %v2532_v49 = vsel %vm1995_vm1, %v2331_v56, 0.0  ;;  %v2333_v41 = vmul.f32 %v4371_v22, %v4371_v22  ;;  %1966 = vst.msk [vmem:[%s5291_s4 + $0x190] sm:$0xf] %vm1865_vm0, %v2897_v4  ;;  %1969 = vst.msk [vmem:[%s5291_s4 + $0x19c] sm:$0xf] %vm1865_vm0, %v2900_v43  ;;  %v2903_v8 = vpack.c.bf16 %v4688_v62, %v4688_v62 }
 0x174   :  { %v2136_v17 = vadd.f32 %v2135_v27, %v2134_v0  ;;  %v2523_v37 = vadd.f32 %v2522_v12, %v2521_v46  ;;  %v4801_v27 = vpop.f32.mrf.mxu1  ;;  %v2530_v12 = vsel %vm1995_vm1, %v2330_v30, 0.0  ;;  %v2334_v30 = vmul.f32 %v4393_v52, %v4393_v52  ;;  %1967 = vst.msk [vmem:[%s5291_s4 + $0x194] sm:$0xf] %vm1865_vm0, %v2898_v34 }
 0x175   :  { %v2901_v61 = vpack.c.bf16 %v4705_v24, %v4705_v24  ;;  %1972 = vst.msk [vmem:[%s5291_s4 + $0x1a8] sm:$0xf] %vm1865_vm0, %v2903_v8  ;;  %v2904_v13 = vpack.c.bf16 %v4720_v45, %v4720_v45  ;;  %v2902_v4 = vpack.c.bf16 %v4737_v1, %v4737_v1  ;;  %v2907_v43 = vpack.c.bf16 %v4752_v5, %v4752_v5 }
 0x176   :  { %v2525_v59 = vadd.f32 %v2524_v11, %v2523_v37  ;;  %v2138_v20 = vadd.f32 %v2137_v14, %v2136_v17  ;;  %v4816_v11 = vpop.f32.mrf.mxu1  ;;  %v2145_v14 = vsel %vm1995_vm1, %v4337_v48, 0.0  ;;  %v2534_v48 = vsel %vm1995_vm1, %v2332_v9, 0.0 }
 0x177   :  { %v2336_v9 = vmul.f32 %v4381_v33, %v4381_v33  ;;  %1970 = vst.msk [vmem:[%s5291_s4 + $0x1a0] sm:$0xf] %vm1865_vm0, %v2901_v61  ;;  %1973 = vst.msk [vmem:[%s5291_s4 + $0x1ac] sm:$0xf] %vm1865_vm0, %v2904_v13  ;;  %v2905_v34 = vpack.c.bf16 %v4769_v60, %v4769_v60  ;;  %v2908_v8 = vpack.c.bf16 %v4784_v38, %v4784_v38 }
 0x178   :  { %v2140_v28 = vadd.f32 %v2139_v29, %v2138_v20  ;;  %v2527_v40 = vadd.f32 %v2526_v19, %v2525_v59  ;;  %v4833_v19 = vpop.f32.mrf.mxu1  ;;  %v2147_v29 = vsel %vm1995_vm1, %v4371_v22, 0.0  ;;  %v2335_v22 = vmul.f32 %v4359_v42, %v4359_v42  ;;  %1971 = vst.msk [vmem:[%s5291_s4 + $0x1a4] sm:$0xf] %vm1865_vm0, %v2902_v4  ;;  %1976 = vst.msk [vmem:[%s5291_s4 + $0x1b8] sm:$0xf] %vm1865_vm0, %v2907_v43 }
 0x179   :  { %1974 = vst.msk [vmem:[%s5291_s4 + $0x1b0] sm:$0xf] %vm1865_vm0, %v2905_v34  ;;  %v2906_v61 = vpack.c.bf16 %v4801_v27, %v4801_v27  ;;  %1977 = vst.msk [vmem:[%s5291_s4 + $0x1bc] sm:$0xf] %vm1865_vm0, %v2908_v8  ;;  %v2911_v13 = vpack.c.bf16 %v4816_v11, %v4816_v11  ;;  %v2909_v4 = vpack.c.bf16 %v4833_v19, %v4833_v19 }
 0x17a   :  { %v2529_v46 = vadd.f32 %v2528_v36, %v2527_v40  ;;  %v2142_v0 = vadd.f32 %v2141_v58, %v2140_v28  ;;  %v4848_v56 = vpop.f32.mrf.mxu1  ;;  %v2536_v36 = vsel %vm1995_vm1, %v2333_v41, 0.0  ;;  %v2149_v58 = vsel %vm1995_vm1, %v4393_v52, 0.0 }
 0x17b   :  { %v2151_v52 = vsel %vm1995_vm1, %v4359_v42, 0.0  ;;  %v2540_v42 = vsel %vm1995_vm1, %v2335_v22, 0.0  ;;  %v2337_v41 = vmul.f32 %v4415_v51, %v4415_v51  ;;  %1975 = vst.msk [vmem:[%s5291_s4 + $0x1b4] sm:$0xf] %vm1865_vm0, %v2906_v61  ;;  %1980 = vst.msk [vmem:[%s5291_s4 + $0x1c8] sm:$0xf] %vm1865_vm0, %v2911_v13  ;;  %v2912_v43 = vpack.c.bf16 %v4848_v56, %v4848_v56 }
 0x17c   :  { %v2144_v17 = vadd.f32 %v2143_v10, %v2142_v0  ;;  %v2531_v37 = vadd.f32 %v2530_v12, %v2529_v46  ;;  %v4865_v10 = vpop.f32.mrf.mxu1  ;;  %v2538_v12 = vsel %vm1995_vm1, %v2334_v30, 0.0  ;;  %v2338_v30 = vmul.f32 %v4437_v23, %v4437_v23  ;;  %1978 = vst.msk [vmem:[%s5291_s4 + $0x1c0] sm:$0xf] %vm1865_vm0, %v2909_v4 }
 0x17d   :  { %1981 = vst.msk [vmem:[%s5291_s4 + $0x1cc] sm:$0xf] %vm1865_vm0, %v2912_v43  ;;  %v2910_v34 = vpack.c.bf16 %v4865_v10, %v4865_v10 }
 0x17e   :  { %v2533_v59 = vadd.f32 %v2532_v49, %v2531_v37  ;;  %v2146_v20 = vadd.f32 %v2145_v14, %v2144_v17  ;;  %v4880_v49 = vpop.f32.mrf.mxu1  ;;  %v2153_v14 = vsel %vm1995_vm1, %v4381_v33, 0.0  ;;  %v2542_v33 = vsel %vm1995_vm1, %v2336_v9, 0.0 }
 0x17f   :  { %v2340_v9 = vmul.f32 %v4425_v35, %v4425_v35  ;;  %v2915_v8 = vpack.c.bf16 %v4880_v49, %v4880_v49  ;;  %1979 = vst.msk [vmem:[%s5291_s4 + $0x1c4] sm:$0xf] %vm1865_vm0, %v2910_v34 }
 0x180   :  { %v2148_v28 = vadd.f32 %v2147_v29, %v2146_v20  ;;  %v2535_v40 = vadd.f32 %v2534_v48, %v2533_v59  ;;  %v4897_v48 = vpop.f32.mrf.mxu1  ;;  %v2155_v29 = vsel %vm1995_vm1, %v4415_v51, 0.0  ;;  %v2339_v51 = vmul.f32 %v4403_v63, %v4403_v63 }
 0x181   :  { %v2913_v61 = vpack.c.bf16 %v4897_v48, %v4897_v48  ;;  %1984 = vst.msk [vmem:[%s5291_s4 + $0x1d8] sm:$0xf] %vm1865_vm0, %v2915_v8 }
 0x182   :  { %v2537_v46 = vadd.f32 %v2536_v36, %v2535_v40  ;;  %v2150_v0 = vadd.f32 %v2149_v58, %v2148_v28  ;;  %v4912_v22 = vpop.f32.mrf.mxu1  ;;  %v2544_v36 = vsel %vm1995_vm1, %v2337_v41, 0.0  ;;  %v2157_v58 = vsel %vm1995_vm1, %v4437_v23, 0.0 }
 0x183   :  { %v2159_v23 = vsel %vm1995_vm1, %v4403_v63, 0.0  ;;  %v2548_v63 = vsel %vm1995_vm1, %v2339_v51, 0.0  ;;  %v2341_v41 = vmul.f32 %v4459_v54, %v4459_v54  ;;  %1982 = vst.msk [vmem:[%s5291_s4 + $0x1d0] sm:$0xf] %vm1865_vm0, %v2913_v61  ;;  %v2916_v13 = vpack.c.bf16 %v4912_v22, %v4912_v22 }
 0x184   :  { %v2152_v17 = vadd.f32 %v2151_v52, %v2150_v0  ;;  %v2539_v37 = vadd.f32 %v2538_v12, %v2537_v46  ;;  %v4929_v52 = vpop.f32.mrf.mxu1  ;;  %v2546_v12 = vsel %vm1995_vm1, %v2338_v30, 0.0  ;;  %v2342_v30 = vmul.f32 %v4481_v15, %v4481_v15 }
 0x185   :  { %v2914_v4 = vpack.c.bf16 %v4929_v52, %v4929_v52  ;;  %1985 = vst.msk [vmem:[%s5291_s4 + $0x1dc] sm:$0xf] %vm1865_vm0, %v2916_v13 }
 0x186   :  { %v2541_v59 = vadd.f32 %v2540_v42, %v2539_v37  ;;  %v2154_v20 = vadd.f32 %v2153_v14, %v2152_v17  ;;  %v4944_v42 = vpop.f32.mrf.mxu1  ;;  %v2161_v14 = vsel %vm1995_vm1, %v4425_v35, 0.0  ;;  %v2550_v35 = vsel %vm1995_vm1, %v2340_v9, 0.0 }
 0x187   :  { %v2344_v9 = vmul.f32 %v4469_v3, %v4469_v3  ;;  %v2919_v43 = vpack.c.bf16 %v4944_v42, %v4944_v42  ;;  %1983 = vst.msk [vmem:[%s5291_s4 + $0x1d4] sm:$0xf] %vm1865_vm0, %v2914_v4 }
 0x188   :  { %v2156_v28 = vadd.f32 %v2155_v29, %v2154_v20  ;;  %v2543_v40 = vadd.f32 %v2542_v33, %v2541_v59  ;;  %v4961_v33 = vpop.f32.mrf.mxu1  ;;  %v2163_v29 = vsel %vm1995_vm1, %v4459_v54, 0.0  ;;  %v2343_v54 = vmul.f32 %v4447_v39, %v4447_v39 }
 0x189   :  { %1988 = vst.msk [vmem:[%s5291_s4 + $0x1e8] sm:$0xf] %vm1865_vm0, %v2919_v43  ;;  %v2917_v34 = vpack.c.bf16 %v4961_v33, %v4961_v33 }
 0x18a   :  { %v2545_v46 = vadd.f32 %v2544_v36, %v2543_v40  ;;  %v2158_v0 = vadd.f32 %v2157_v58, %v2156_v28  ;;  %v4976_v51 = vpop.f32.mrf.mxu1  ;;  %v2552_v36 = vsel %vm1995_vm1, %v2341_v41, 0.0  ;;  %v2165_v58 = vsel %vm1995_vm1, %v4481_v15, 0.0 }
 0x18b   :  { %v2167_v15 = vsel %vm1995_vm1, %v4447_v39, 0.0  ;;  %v2556_v39 = vsel %vm1995_vm1, %v2343_v54, 0.0  ;;  %v2345_v41 = vmul.f32 %v4503_v31, %v4503_v31  ;;  %v2920_v8 = vpack.c.bf16 %v4976_v51, %v4976_v51  ;;  %1986 = vst.msk [vmem:[%s5291_s4 + $0x1e0] sm:$0xf] %vm1865_vm0, %v2917_v34 }
 0x18c   :  { %v2160_v17 = vadd.f32 %v2159_v23, %v2158_v0  ;;  %v2547_v37 = vadd.f32 %v2546_v12, %v2545_v46  ;;  %v4993_v23 = vpop.f32.mrf.mxu1  ;;  %v2554_v12 = vsel %vm1995_vm1, %v2342_v30, 0.0  ;;  %v2346_v30 = vmul.f32 %v4525_v6, %v4525_v6 }
 0x18d   :  { %v2347_v54 = vmul.f32 %v4491_v18, %v4491_v18  ;;  %1989 = vst.msk [vmem:[%s5291_s4 + $0x1ec] sm:$0xf] %vm1865_vm0, %v2920_v8  ;;  %v3487_v34 = vmov 0.0   ;;  %v2181_v8 = vsel %vm1995_vm1, %v4569_v47, 0.0 }
 0x18e   :  { %v2549_v59 = vadd.f32 %v2548_v63, %v2547_v37  ;;  %v2162_v20 = vadd.f32 %v2161_v14, %v2160_v17  ;;  %v5008_v63 = vpop.f32.mrf.mxu1  ;;  %v2169_v14 = vsel %vm1995_vm1, %v4469_v3, 0.0  ;;  %v2558_v3 = vsel %vm1995_vm1, %v2344_v9, 0.0  ;;  %25 = vst.msk [vmem:[%s5292_s5] sm:$0x3] %vm24_vm2, %v3487_v34 }
 0x18f   :  { %v2562_v9 = vsel %vm1995_vm1, %v2346_v30, 0.0  ;;  %v2564_v4 = vsel %vm1995_vm1, %v2347_v54, 0.0  ;;  %v2193_v34 = vsel %vm1995_vm1, %v4601_v32, 0.0 }
 0x190   :  { %v2164_v28 = vadd.f32 %v2163_v29, %v2162_v20  ;;  %v2551_v40 = vadd.f32 %v2550_v35, %v2549_v59  ;;  %v5025_v35 = vpop.f32.mrf.mxu1  ;;  %v2171_v29 = vsel %vm1995_vm1, %v4503_v31, 0.0  ;;  %v2560_v31 = vsel %vm1995_vm1, %v2345_v41, 0.0 }
 0x192   :  { %v2553_v46 = vadd.f32 %v2552_v36, %v2551_v40  ;;  %v2166_v0 = vadd.f32 %v2165_v58, %v2164_v28  ;;  %v2173_v36 = vsel %vm1995_vm1, %v4525_v6, 0.0  ;;  %v2918_v58 = vpack.c.bf16 %v4993_v23, %v4993_v23  ;;  %v5051_v61 = vpop.f32.mrf.mxu1 }
 0x193   :  { %v2175_v6 = vsel %vm1995_vm1, %v4491_v18, 0.0  ;;  %v2177_v18 = vsel %vm1995_vm1, %v4513_v57, 0.0 }
 0x194   :  { %v2168_v17 = vadd.f32 %v2167_v15, %v2166_v0  ;;  %v2555_v37 = vadd.f32 %v2554_v12, %v2553_v46  ;;  %v2348_v0 = vmul.f32 %v4513_v57, %v4513_v57  ;;  %1987 = vst.msk [vmem:[%s5291_s4 + $0x1e4] sm:$0xf] %vm1865_vm0, %v2918_v58  ;;  %v2923_v12 = vpack.c.bf16 %v5008_v63, %v5008_v63  ;;  %v5081_v41 = vpop.f32.mrf.mxu1 }
 0x195   :  { %v2179_v57 = vsel %vm1995_vm1, %v4547_v16, 0.0  ;;  %v2352_v58 = vmul.f32 %v4557_v44, %v4557_v44 }
 0x196   :  { %v2557_v59 = vadd.f32 %v2556_v39, %v2555_v37  ;;  %v2170_v20 = vadd.f32 %v2169_v14, %v2168_v17  ;;  %v2921_v37 = vpack.c.bf16 %v5025_v35, %v5025_v35  ;;  %v2349_v39 = vmul.f32 %v4547_v16, %v4547_v16  ;;  %1992 = vst.msk [vmem:[%s5291_s4 + $0x1f8] sm:$0xf] %vm1865_vm0, %v2923_v12 }
 0x197   :  { %v2924_v14 = vpack.c.bf16 %v5051_v61, %v5051_v61  ;;  %v2566_v43 = vsel %vm1995_vm1, %v2348_v0, 0.0  ;;  %v2922_v16 = vpack.c.bf16 %v5081_v41, %v5081_v41 }
 0x198   :  { %v2172_v28 = vadd.f32 %v2171_v29, %v2170_v20  ;;  %v2559_v40 = vadd.f32 %v2558_v3, %v2557_v59  ;;  %1990 = vst.msk [vmem:[%s5291_s4 + $0x1f0] sm:$0xf] %vm1865_vm0, %v2921_v37  ;;  %v2350_v3 = vmul.f32 %v4569_v47, %v4569_v47  ;;  %v2185_v47 = vsel %vm1995_vm1, %v4557_v44, 0.0 }
 0x199   :  { %1993 = vst.msk [vmem:[%s5291_s4 + $0x1fc] sm:$0xf] %vm1865_vm0, %v2924_v14  ;;  %1991 = vst.msk [vmem:[%s5291_s4 + $0x1f4] sm:$0xf] %vm1865_vm0, %v2922_v16  ;;  %v2354_v37 = vmul.f32 %v4613_v50, %v4613_v50  ;;  %v2189_v14 = vsel %vm1995_vm1, %v4613_v50, 0.0  ;;  %v2357_v50 = vmul.f32 %v4641_v21, %v4641_v21 }
 0x19a   :  { %v2561_v46 = vadd.f32 %v2560_v31, %v2559_v40  ;;  %v2174_v15 = vadd.f32 %v2173_v36, %v2172_v28  ;;  %v2351_v28 = vmul.f32 %v4535_v55, %v4535_v55  ;;  %v2568_v40 = vsel %vm1995_vm1, %v2349_v39, 0.0 }
 0x19b   :  { %v2183_v36 = vsel %vm1995_vm1, %v4535_v55, 0.0  ;;  %v2187_v55 = vsel %vm1995_vm1, %v4591_v26, 0.0  ;;  %v2355_v39 = vmul.f32 %v4579_v25, %v4579_v25 }
 0x19c   :  { %v2176_v13 = vadd.f32 %v2175_v6, %v2174_v15  ;;  %v2563_v17 = vadd.f32 %v2562_v9, %v2561_v46  ;;  %v2570_v46 = vsel %vm1995_vm1, %v2350_v3, 0.0  ;;  %v2572_v6 = vsel %vm1995_vm1, %v2351_v28, 0.0 }
 0x19d   :  { %v2353_v9 = vmul.f32 %v4591_v26, %v4591_v26  ;;  %v2356_v26 = vmul.f32 %v4601_v32, %v4601_v32  ;;  %v2584_v32 = vsel %vm1995_vm1, %v2357_v50, 0.0 }
 0x19e   :  { %v2565_v59 = vadd.f32 %v2564_v4, %v2563_v17  ;;  %v2178_v20 = vadd.f32 %v2177_v18, %v2176_v13  ;;  %v2574_v17 = vsel %vm1995_vm1, %v2352_v58, 0.0  ;;  %v2197_v58 = vsel %vm1995_vm1, %v4673_v7, 0.0 }
 0x19f   :  { %v2576_v44 = vsel %vm1995_vm1, %v2353_v9, 0.0 }
 0x1a0   :  { %v2180_v29 = vadd.f32 %v2179_v57, %v2178_v20  ;;  %v2567_v30 = vadd.f32 %v2566_v43, %v2565_v59  ;;  %v2191_v20 = vsel %vm1995_vm1, %v4579_v25, 0.0  ;;  %v2578_v57 = vsel %vm1995_vm1, %v2354_v37, 0.0 }
 0x1a1   :  { %v2195_v25 = vsel %vm1995_vm1, %v4641_v21, 0.0  ;;  %v2360_v21 = vmul.f32 %v4656_v53, %v4656_v53 }
 0x1a2   :  { %v2569_v54 = vadd.f32 %v2568_v40, %v2567_v30  ;;  %v2182_v31 = vadd.f32 %v2181_v8, %v2180_v29  ;;  %v2580_v30 = vsel %vm1995_vm1, %v2355_v39, 0.0  ;;  %v2582_v40 = vsel %vm1995_vm1, %v2356_v26, 0.0 }
 0x1a3   :  { %v2358_v8 = vmul.f32 %v4673_v7, %v4673_v7  ;;  %v2361_v7 = vmul.f32 %v4705_v24, %v4705_v24  ;;  %v2590_v37 = vsel %vm1995_vm1, %v2360_v21, 0.0  ;;  %v2217_v21 = vsel %vm1995_vm1, %v4784_v38, 0.0 }
 0x1a4   :  { %v2184_v0 = vadd.f32 %v2183_v36, %v2182_v31  ;;  %v2571_v15 = vadd.f32 %v2570_v46, %v2569_v54  ;;  %v2359_v36 = vmul.f32 %v4625_v2, %v4625_v2 }
 0x1a6   :  { %v2573_v12 = vadd.f32 %v2572_v6, %v2571_v15  ;;  %v2186_v13 = vadd.f32 %v2185_v47, %v2184_v0  ;;  %v2199_v15 = vsel %vm1995_vm1, %v4625_v2, 0.0  ;;  %v2586_v6 = vsel %vm1995_vm1, %v2358_v8, 0.0 }
 0x1a7   :  { %v2203_v2 = vsel %vm1995_vm1, %v4705_v24, 0.0  ;;  %v2364_v24 = vmul.f32 %v4720_v45, %v4720_v45  ;;  %v2367_v8 = vmul.f32 %v4752_v5, %v4752_v5 }
 0x1a8   :  { %v2188_v4 = vadd.f32 %v2187_v55, %v2186_v13  ;;  %v2575_v18 = vadd.f32 %v2574_v17, %v2573_v12  ;;  %v2588_v12 = vsel %vm1995_vm1, %v2359_v36, 0.0  ;;  %v2201_v13 = vsel %vm1995_vm1, %v4656_v53, 0.0 }
 0x1a9   :  { %v2592_v53 = vsel %vm1995_vm1, %v2361_v7, 0.0 }
 0x1aa   :  { %v2577_v43 = vadd.f32 %v2576_v44, %v2575_v18  ;;  %v2190_v59 = vadd.f32 %v2189_v14, %v2188_v4  ;;  %v2362_v4 = vmul.f32 %v4737_v1, %v4737_v1  ;;  %v2363_v44 = vmul.f32 %v4688_v62, %v4688_v62 }
 0x1ab   :  { %v2205_v14 = vsel %vm1995_vm1, %v4737_v1, 0.0  ;;  %v2365_v1 = vmul.f32 %v4769_v60, %v4769_v60 }
 0x1ac   :  { %v2192_v3 = vadd.f32 %v2191_v20, %v2190_v59  ;;  %v2579_v29 = vadd.f32 %v2578_v57, %v2577_v43  ;;  %v2207_v20 = vsel %vm1995_vm1, %v4688_v62, 0.0  ;;  %v2594_v26 = vsel %vm1995_vm1, %v2362_v4, 0.0 }
 0x1ad   :  { %v2211_v62 = vsel %vm1995_vm1, %v4769_v60, 0.0  ;;  %v2368_v60 = vmul.f32 %v4784_v38, %v4784_v38  ;;  %v2223_v4 = vsel %vm1995_vm1, %v4816_v11, 0.0 }
 0x1ae   :  { %v2581_v16 = vadd.f32 %v2580_v30, %v2579_v29  ;;  %v2194_v28 = vadd.f32 %v2193_v34, %v2192_v3  ;;  %v2596_v29 = vsel %vm1995_vm1, %v2363_v44, 0.0  ;;  %v2209_v30 = vsel %vm1995_vm1, %v4720_v45, 0.0 }
 0x1af   :  { %v2600_v45 = vsel %vm1995_vm1, %v2365_v1, 0.0 }
 0x1b0   :  { %v2196_v54 = vadd.f32 %v2195_v25, %v2194_v28  ;;  %v2583_v31 = vadd.f32 %v2582_v40, %v2581_v16  ;;  %v2598_v16 = vsel %vm1995_vm1, %v2364_v24, 0.0  ;;  %v2366_v28 = vmul.f32 %v4801_v27, %v4801_v27 }
 0x1b1   :  { %v2374_v24 = vmul.f32 %v4929_v52, %v4929_v52 }
 0x1b2   :  { %v2585_v46 = vadd.f32 %v2584_v32, %v2583_v31  ;;  %v2198_v0 = vadd.f32 %v2197_v58, %v2196_v54  ;;  %v2213_v54 = vsel %vm1995_vm1, %v4801_v27, 0.0  ;;  %v2215_v32 = vsel %vm1995_vm1, %v4752_v5, 0.0 }
 0x1b3   :  { %v2602_v58 = vsel %vm1995_vm1, %v2366_v28, 0.0  ;;  %v2369_v27 = vmul.f32 %v4833_v19, %v4833_v19  ;;  %v2219_v5 = vsel %vm1995_vm1, %v4833_v19, 0.0  ;;  %v2372_v19 = vmul.f32 %v4848_v56, %v4848_v56 }
 0x1b4   :  { %v2200_v47 = vadd.f32 %v2199_v15, %v2198_v0  ;;  %v2587_v9 = vadd.f32 %v2586_v6, %v2585_v46  ;;  %v2604_v15 = vsel %vm1995_vm1, %v2367_v8, 0.0 }
 0x1b5   :  { %v2608_v38 = vsel %vm1995_vm1, %v2369_v27, 0.0 }
 0x1b6   :  { %v2589_v17 = vadd.f32 %v2588_v12, %v2587_v9  ;;  %v2202_v55 = vadd.f32 %v2201_v13, %v2200_v47  ;;  %v2606_v9 = vsel %vm1995_vm1, %v2368_v60, 0.0  ;;  %v2370_v12 = vmul.f32 %v4865_v10, %v4865_v10 }
 0x1b7   :  { %v2237_v60 = vsel %vm1995_vm1, %v4993_v23, 0.0 }
 0x1b8   :  { %v2204_v18 = vadd.f32 %v2203_v2, %v2202_v55  ;;  %v2591_v39 = vadd.f32 %v2590_v37, %v2589_v17  ;;  %v2371_v17 = vmul.f32 %v4816_v11, %v4816_v11  ;;  %v2221_v55 = vsel %vm1995_vm1, %v4865_v10, 0.0 }
 0x1b9   :  { %v2373_v10 = vmul.f32 %v4897_v48, %v4897_v48  ;;  %v2227_v11 = vsel %vm1995_vm1, %v4897_v48, 0.0  ;;  %v2376_v48 = vmul.f32 %v4912_v22, %v4912_v22 }
 0x1ba   :  { %v2593_v43 = vadd.f32 %v2592_v53, %v2591_v39  ;;  %v2206_v59 = vadd.f32 %v2205_v14, %v2204_v18  ;;  %v2610_v18 = vsel %vm1995_vm1, %v2370_v12, 0.0  ;;  %v2612_v53 = vsel %vm1995_vm1, %v2371_v17, 0.0 }
 0x1bb   :  { %v2225_v14 = vsel %vm1995_vm1, %v4848_v56, 0.0  ;;  %v2616_v56 = vsel %vm1995_vm1, %v2373_v10, 0.0 }
 0x1bc   :  { %v2208_v57 = vadd.f32 %v2207_v20, %v2206_v59  ;;  %v2595_v3 = vadd.f32 %v2594_v26, %v2593_v43  ;;  %v2614_v20 = vsel %vm1995_vm1, %v2372_v19, 0.0 }
 0x1be   :  { %v2597_v34 = vadd.f32 %v2596_v29, %v2595_v3  ;;  %v2210_v50 = vadd.f32 %v2209_v30, %v2208_v57  ;;  %v2375_v3 = vmul.f32 %v4880_v49, %v4880_v49  ;;  %v2229_v29 = vsel %vm1995_vm1, %v4929_v52, 0.0 }
 0x1bf   :  { %v2377_v52 = vmul.f32 %v4961_v33, %v4961_v33 }
 0x1c0   :  { %v2212_v40 = vadd.f32 %v2211_v62, %v2210_v50  ;;  %v2599_v25 = vadd.f32 %v2598_v16, %v2597_v34  ;;  %v2231_v34 = vsel %vm1995_vm1, %v4880_v49, 0.0  ;;  %v2618_v50 = vsel %vm1995_vm1, %v2374_v24, 0.0 }
 0x1c1   :  { %v2620_v28 = vsel %vm1995_vm1, %v2375_v3, 0.0  ;;  %v2235_v49 = vsel %vm1995_vm1, %v4961_v33, 0.0  ;;  %v2380_v33 = vmul.f32 %v4976_v51, %v4976_v51 }
 0x1c2   :  { %v2601_v31 = vadd.f32 %v2600_v45, %v2599_v25  ;;  %v2214_v36 = vadd.f32 %v2213_v54, %v2212_v40  ;;  %v2233_v40 = vsel %vm1995_vm1, %v4912_v22, 0.0  ;;  %v2622_v45 = vsel %vm1995_vm1, %v2376_v48, 0.0 }
 0x1c3   :  { %v2378_v54 = vmul.f32 %v4993_v23, %v4993_v23  ;;  %v2624_v22 = vsel %vm1995_vm1, %v2377_v52, 0.0  ;;  %v2381_v23 = vmul.f32 %v5025_v35, %v5025_v35  ;;  %v2630_v12 = vsel %vm1995_vm1, %v2380_v33, 0.0 }
 0x1c4   :  { %v2216_v46 = vadd.f32 %v2215_v32, %v2214_v36  ;;  %v2603_v0 = vadd.f32 %v2602_v58, %v2601_v31  ;;  %v2379_v32 = vmul.f32 %v4944_v42, %v4944_v42 }
 0x1c6   :  { %v2605_v6 = vadd.f32 %v2604_v15, %v2603_v0  ;;  %v2218_v47 = vadd.f32 %v2217_v21, %v2216_v46  ;;  %v2239_v0 = vsel %vm1995_vm1, %v4944_v42, 0.0  ;;  %v2626_v15 = vsel %vm1995_vm1, %v2378_v54, 0.0 }
 0x1c7   :  { %v2243_v42 = vsel %vm1995_vm1, %v5025_v35, 0.0  ;;  %v2384_v35 = vmul.f32 %v5051_v61, %v5051_v61 }
 0x1c8   :  { %v2220_v13 = vadd.f32 %v2219_v5, %v2218_v47  ;;  %v2607_v7 = vadd.f32 %v2606_v9, %v2605_v6  ;;  %v2628_v6 = vsel %vm1995_vm1, %v2379_v32, 0.0  ;;  %v2241_v47 = vsel %vm1995_vm1, %v4976_v51, 0.0 }
 0x1c9   :  { %v2632_v51 = vsel %vm1995_vm1, %v2381_v23, 0.0 }
 0x1ca   :  { %v2609_v37 = vadd.f32 %v2608_v38, %v2607_v7  ;;  %v2222_v2 = vadd.f32 %v2221_v55, %v2220_v13  ;;  %v2382_v13 = vmul.f32 %v5081_v41, %v5081_v41  ;;  %v2383_v38 = vmul.f32 %v5008_v63, %v5008_v63 }
 0x1cb   :  { %v2245_v55 = vsel %vm1995_vm1, %v5081_v41, 0.0  ;;  %v2638_v41 = vsel %vm1995_vm1, %v2384_v35, 0.0 }
 0x1cc   :  { %v2224_v39 = vadd.f32 %v2223_v4, %v2222_v2  ;;  %v2611_v44 = vadd.f32 %v2610_v18, %v2609_v37  ;;  %v2247_v4 = vsel %vm1995_vm1, %v5008_v63, 0.0  ;;  %v2634_v19 = vsel %vm1995_vm1, %v2382_v13, 0.0 }
 0x1ce   :  { %v2613_v43 = vadd.f32 %v2612_v53, %v2611_v44  ;;  %v2226_v59 = vadd.f32 %v2225_v14, %v2224_v39  ;;  %v2636_v44 = vsel %vm1995_vm1, %v2383_v38, 0.0  ;;  %v2249_v53 = vsel %vm1995_vm1, %v5051_v61, 0.0  ;;  %v1994_v61 = vld [vmem:[%s5292_s5] sm:$0x3] }
 0x1d0   :  { %v2228_v26 = vadd.f32 %v2227_v11, %v2226_v59  ;;  %v2615_v57 = vadd.f32 %v2614_v20, %v2613_v43 }
 0x1d2   :  { %v2617_v30 = vadd.f32 %v2616_v56, %v2615_v57  ;;  %v2230_v1 = vadd.f32 %v2229_v29, %v2228_v26 }
 0x1d4   :  { %v2232_v16 = vadd.f32 %v2231_v34, %v2230_v1  ;;  %v2619_v62 = vadd.f32 %v2618_v50, %v2617_v30 }
 0x1d6   :  { %v2621_v25 = vadd.f32 %v2620_v28, %v2619_v62  ;;  %v2234_v8 = vadd.f32 %v2233_v40, %v2232_v16 }
 0x1d8   :  { %v2236_v31 = vadd.f32 %v2235_v49, %v2234_v8  ;;  %v2623_v36 = vadd.f32 %v2622_v45, %v2621_v25 }
 0x1da   :  { %v2625_v58 = vadd.f32 %v2624_v22, %v2623_v36  ;;  %v2238_v46 = vadd.f32 %v2237_v60, %v2236_v31 }
 0x1dc   :  { %v2240_v21 = vadd.f32 %v2239_v0, %v2238_v46  ;;  %v2627_v27 = vadd.f32 %v2626_v15, %v2625_v58 }
 0x1de   :  { %v2629_v9 = vadd.f32 %v2628_v6, %v2627_v27  ;;  %v2242_v5 = vadd.f32 %v2241_v47, %v2240_v21 }
 0x1e0   :  { %v2244_v7 = vadd.f32 %v2243_v42, %v2242_v5  ;;  %v2631_v17 = vadd.f32 %v2630_v12, %v2629_v9 }
 0x1e2   :  { %v2633_v37 = vadd.f32 %v2632_v51, %v2631_v17  ;;  %v2246_v2 = vadd.f32 %v2245_v55, %v2244_v7 }
 0x1e4   :  { %v2248_v18 = vadd.f32 %v2247_v4, %v2246_v2  ;;  %v2635_v39 = vadd.f32 %v2634_v19, %v2633_v37 }
 0x1e6   :  { %v2250_v14 = vadd.f32 %v2249_v53, %v2248_v18  ;;  %v2637_v10 = vadd.f32 %v2636_v44, %v2635_v39 }
 0x1e8   :  { %v2251_v43 = vrot.slane %v2250_v14, 4  ;;  %v2639_v59 = vadd.f32 %v2638_v41, %v2637_v10 }
 0x1ea   :  { %v2252_v20 = vadd.f32 %v2251_v43, %v2250_v14  ;;  %v2640_v63 = vrot.slane %v2639_v59, 4 }
 0x1ec   :  { %v2253_v11 = vrot.slane %v2252_v20, 2  ;;  %v2641_v24 = vadd.f32 %v2640_v63, %v2639_v59 }
 0x1ee   :  { %v2254_v26 = vadd.f32 %v2253_v11, %v2252_v20  ;;  %v2642_v57 = vrot.slane %v2641_v24, 2 }
 0x1f0   :  { %v2255_v3 = vrot.slane %v2254_v26, 1  ;;  %v2643_v56 = vadd.f32 %v2642_v57, %v2641_v24 }
 0x1f2   :  { %v2644_v29 = vrot.slane %v2643_v56, 1  ;;  %v2256_v30 = vadd.f32 %v2255_v3, %v2254_v26 }
 0x1f4   :  { %v2645_v1 = vadd.f32 %v2644_v29, %v2643_v56 }
 0x1f6   :  { %v2647_v34 = vsel %vm2646_vm3, %v2256_v30, %v2645_v1 }
 0x1f7   :  { %v2648_v48 = vadd.f32 %v2647_v34, %v1994_v61 }
 0x1f9   :  { %2650 = vst.msk [vmem:[%s5292_s5] sm:$0x3] %vm24_vm2, %v2648_v48 }

</bundles_post_ra>
